<compile_context>
chip_gen: v7x
topology: tpu7x:2x2x1
jax: 0.10.0
libtpu: 0.0.40
codegen_flags: <defaults>
</compile_context>

<pallas_src>
import functools

import jax
import jax.numpy as jnp
from jax.experimental import pallas as pl
from jax.experimental.pallas import tpu as pltpu


def _round_up(n, m):
    return (n + m - 1) // m * m


# ----------------------------------------------------------------------------
# Generic 1-D convolution: im2col slab in VMEM scratch + single MXU matmul
# ----------------------------------------------------------------------------

def _conv_mxu_kernel(x_ref, w_ref, o_ref, slab_ref, *, K, activation):
    # x_ref: (1, Cin, Lp)   w_ref: (Cout, K*Cin)   o_ref: (1, Cout, Lout)
    # slab_ref: (K*Cin, Lout) VMEM scratch (im2col slab)
    Cin = x_ref.shape[1]
    Lout = o_ref.shape[2]
    x = x_ref[0]                                    # (Cin, Lp)
    for k in range(K):                              # K shifted slices -> slab
        slab_ref[k * Cin:(k + 1) * Cin, :] = x[:, k:k + Lout]
    acc = jnp.dot(w_ref[...], slab_ref[...],
                  preferred_element_type=jnp.float32)          # MXU
    if activation == "relu":
        acc = jnp.maximum(acc, 0.0)
    elif activation == "softplus":
        acc = jnp.maximum(acc, 0.0) + jnp.log1p(jnp.exp(-jnp.abs(acc)))
    o_ref[0] = acc


def conv1d(x, w, *, padding=0, pad_mode="zeros", activation=None):
    """torch.nn.functional.conv1d(x, w, padding=padding) with torch's
    padding_mode semantics plus an optional fused activation."""
    x = x.astype(jnp.float32)
    w = w.astype(jnp.float32)
    B, Cin, _ = (int(d) for d in x.shape)
    Cout, _, K = (int(d) for d in w.shape)
    if padding > 0:
        mode = "constant" if pad_mode == "zeros" else "reflect"
        x = jnp.pad(x, ((0, 0), (0, 0), (padding, padding)), mode=mode)
    Lp = int(x.shape[2])
    Lout = Lp - K + 1
    # lane-dense weight layout: w2[co, k*Cin + c] = w[co, c, k]
    w2 = jnp.transpose(w, (0, 2, 1)).reshape(Cout, K * Cin)
    kernel = functools.partial(_conv_mxu_kernel, K=K, activation=activation)
    return pl.pallas_call(
        kernel,
        out_shape=jax.ShapeDtypeStruct((B, Cout, Lout), jnp.float32),
        grid=(B,),
        in_specs=[
            pl.BlockSpec((1, Cin, Lp), lambda b: (b, 0, 0)),
            pl.BlockSpec((Cout, K * Cin), lambda b: (0, 0)),
        ],
        out_specs=pl.BlockSpec((1, Cout, Lout), lambda b: (b, 0, 0)),
        scratch_shapes=[pltpu.VMEM((K * Cin, Lout), jnp.float32)],
        compiler_params=pltpu.CompilerParams(dimension_semantics=("parallel",)),
    )(x, w2)


# ----------------------------------------------------------------------------
# Fused stage-tail kernels (8 rows per grid step)
# ----------------------------------------------------------------------------

def _break_tail_kernel(f_ref, w_ref, o_ref, pad_ref, *, K):
    # softmax(last) -> Sum20 conv (shared K-tap weight, zero pad) -> max(last)
    L = f_ref.shape[1]
    P = (K - 1) // 2
    x = f_ref[...]                                   # (8, L)
    m = jnp.max(x, axis=-1, keepdims=True)
    e = jnp.exp(x - m)
    sm = e / jnp.sum(e, axis=-1, keepdims=True)
    pad_ref[...] = jnp.zeros_like(pad_ref)
    pad_ref[:, P:P + L] = sm
    padded = pad_ref[...]
    acc = jnp.zeros_like(x)
    for k in range(K):
        acc = acc + w_ref[0, k] * padded[:, k:k + L]
    o_ref[...] = jnp.max(acc, axis=-1, keepdims=True)


def break_tail(f2, w21):
    # f2: (N, 2, L), w21: (1, K)  ->  (N, 2)
    N, C, L = (int(d) for d in f2.shape)
    K = int(w21.shape[1])
    R = N * C
    Rp = _round_up(R, 8)
    x = f2.reshape(R, L)
    if Rp != R:
        x = jnp.pad(x, ((0, Rp - R), (0, 0)))
    out = pl.pallas_call(
        functools.partial(_break_tail_kernel, K=K),
        out_shape=jax.ShapeDtypeStruct((Rp, 1), jnp.float32),
        grid=(Rp // 8,),
        in_specs=[pl.BlockSpec((8, L), lambda i: (i, 0)),
                  pl.BlockSpec((1, K), lambda i: (0, 0))],
        out_specs=pl.BlockSpec((8, 1), lambda i: (i, 0)),
        scratch_shapes=[pltpu.VMEM((8, L + K - 1), jnp.float32)],
        compiler_params=pltpu.CompilerParams(dimension_semantics=("parallel",)),
    )(x, w21)
    return out[:R, 0].reshape(N, C)


def _spot_tail_kernel(x_ref, m_ref, o_ref):
    # amax -> normalize -> mask -> softmax(10000 * .)
    x = x_ref[...]
    msk = m_ref[...]
    amax = jnp.max(x, axis=-1, keepdims=True) + 1e-10
    z = 10000.0 * (x / amax * msk)
    zm = jnp.max(z, axis=-1, keepdims=True)
    e = jnp.exp(z - zm)
    o_ref[...] = e / jnp.sum(e, axis=-1, keepdims=True)


def spot_tail(out2d, mask):
    n, L = (int(d) for d in out2d.shape)
    npad = _round_up(n, 8)
    if npad != n:
        out2d = jnp.pad(out2d, ((0, npad - n), (0, 0)))
        mask = jnp.pad(mask, ((0, npad - n), (0, 0)))
    res = pl.pallas_call(
        _spot_tail_kernel,
        out_shape=jax.ShapeDtypeStruct((npad, L), jnp.float32),
        grid=(npad // 8,),
        in_specs=[pl.BlockSpec((8, L), lambda i: (i, 0)),
                  pl.BlockSpec((8, L), lambda i: (i, 0))],
        out_specs=pl.BlockSpec((8, L), lambda i: (i, 0)),
        compiler_params=pltpu.CompilerParams(dimension_semantics=("parallel",)),
    )(out2d, mask)
    return res[:n]


def _recon_tail_kernel(f_ref, wf_ref, spe_ref, ws_ref, o_ref):
    # c = softmax(5*f); a = sigmoid(sum(wf*c*w0 + SPE*c*w1)) + 0.1
    f = 5.0 * f_ref[...]
    m = jnp.max(f, axis=-1, keepdims=True)
    e = jnp.exp(f - m)
    c = e / jnp.sum(e, axis=-1, keepdims=True)
    wf = wf_ref[...]
    spe = spe_ref[...]                # (1, D)
    w0 = ws_ref[0:1, :]               # (1, D)
    w1 = ws_ref[1:2, :]
    s = jnp.sum(wf * c * w0 + spe * c * w1, axis=-1, keepdims=True)
    o_ref[...] = 1.0 / (1.0 + jnp.exp(-s)) + 0.1


def recon_tail(feats, wf, spe, wscale):
    m, D = (int(d) for d in feats.shape)
    mp = _round_up(m, 8)
    if mp != m:
        feats = jnp.pad(feats, ((0, mp - m), (0, 0)))
        wf = jnp.pad(wf, ((0, mp - m), (0, 0)))
    res = pl.pallas_call(
        _recon_tail_kernel,
        out_shape=jax.ShapeDtypeStruct((mp, 1), jnp.float32),
        grid=(mp // 8,),
        in_specs=[pl.BlockSpec((8, D), lambda i: (i, 0)),
                  pl.BlockSpec((8, D), lambda i: (i, 0)),
                  pl.BlockSpec((1, D), lambda i: (0, 0)),
                  pl.BlockSpec((2, D), lambda i: (0, 0))],
        out_specs=pl.BlockSpec((8, 1), lambda i: (i, 0)),
        compiler_params=pltpu.CompilerParams(dimension_semantics=("parallel",)),
    )(feats, wf, spe[None, :], wscale)
    return res[:m, 0]


# ----------------------------------------------------------------------------
# Sub-module forward passes (all traced inside the per-iteration jit)
# ----------------------------------------------------------------------------

def break_forward(p, wf):
    """wf: (N, 1, 1000) -> (N, 2)"""
    # Embed the 9-tap derivative filter into a 51-tap / pad-25 filter so the
    # wf / cum / div-tap convolutions share one im2col + one matmul.
    div51 = jnp.zeros((1, 1, 51), jnp.float32).at[0, 0, 21:30].set(p["div_x_w"][0, 0])
    w_first = jnp.concatenate([p["break_wf_w"], p["break_cum_w"], div51], axis=0)
    feat7 = conv1d(wf, w_first, padding=25)                         # (N,7,1000)
    wf_cum_feat = jnp.maximum(feat7[:, :6], 0.0)                    # relu(wf/cum)
    d1 = feat7[:, 6:7]                                              # conv(wf, div_x)
    d2 = conv1d(d1, p["run_mean_w"], padding=25)                    # running mean
    div_feat = conv1d(d2, p["break_div_w"], padding=25, activation="relu")
    # NOTE: the reference applies Cum_Area_Features to wf (not cum_area).
    features = jnp.concatenate([wf_cum_feat, div_feat], axis=1)     # (N,9,1000)
    features2 = conv1d(features, p["break_mix_w"].reshape(2, 9, 21),
                       padding=10, activation="relu")               # (N,2,1000)
    # fused softmax -> Sum20 -> MaxPool1d(1000)
    return break_tail(features2, p["break_sum20_w"].reshape(1, 21))


def spot_forward(p, wf, mask, SPE):
    """wf: (n,1,1000), mask: (n,1000) -> (n,1000)"""
    n, _, L = (int(d) for d in wf.shape)
    spe_max = jnp.max(SPE)
    hmax = jnp.max(wf[:, 0, :], axis=-1, keepdims=True)             # MaxPool1d(1000)
    h = jnp.tile(hmax, (1, int(p["spot_W"].shape[0]))) / spe_max
    W = jax.nn.softmax(-jnp.maximum(h - p["spot_W"][None, :], 0.0), axis=1)  # (n,3)

    cum_area = jnp.cumsum(wf, axis=-1)
    d1 = conv1d(wf, p["div_x_w"], padding=4)
    div_x_smd = conv1d(d1, p["run_mean_w"], padding=25)

    # Merge roll / fit_cum (input cum_area), fit_x (wf) and fit_div (div) into
    # ONE Cin=3, Cout=4, K=121 reflect conv (roll weight zero-padded 101->121,
    # which leaves the first 1000 output samples unchanged).
    roll121 = jnp.pad(p["spot_roll_w"], ((0, 0), (0, 0), (0, 20)))
    wm = jnp.zeros((4, 3, 121), jnp.float32)
    wm = wm.at[0, 0].set(roll121[0, 0])
    wm = wm.at[1, 0].set(p["spot_fit_cum_w"][0, 0])
    wm = wm.at[2, 1].set(p["spot_fit_x_w"][0, 0])
    wm = wm.at[3, 2].set(p["spot_fit_div_w"][0, 0])
    stacked = jnp.concatenate([cum_area, wf, div_x_smd], axis=1)    # (n,3,1000)
    big = conv1d(stacked, wm, padding=100, pad_mode="reflect")[:, :, :L]

    BL = big[:, 0:1] * jnp.sum(p["spot_fit_cum_w"])
    fit_cum = jnp.maximum(big[:, 1:2] - BL, 0.0)
    fit_x = jnp.maximum(big[:, 2:3], 0.0)
    fit_div = jnp.maximum(big[:, 3:4], 0.0)
    features1 = jnp.concatenate([fit_cum, fit_x, fit_div], axis=1)  # (n,3,1000)

    S = jnp.sum(features1, axis=2) + 1e-10
    features1_norm = features1 / S[:, :, None]
    features2 = conv1d(features1_norm, p["spot_sub_w"], padding=10,
                       pad_mode="reflect")                          # (n,15,1000)

    Wc = jnp.tile(W, (1, 5))                                        # channel c -> W[:, c%3]
    chosen = features2 * Wc[:, :, None]
    comb_w = jnp.transpose(p["spot_comb_w"][0, 0], (0, 2, 1)).reshape(1, 15, 101)
    out = conv1d(chosen, comb_w, padding=50, activation="softplus")[:, 0, :]
    # fused amax -> normalize -> mask -> softmax(10000 * .)
    return spot_tail(out, mask)


def recon_forward(p, sub_wf, SPE):
    """sub_wf: (m, 100) -> (m,)"""
    wf3 = sub_wf[:, None, :]
    c1 = conv1d(wf3, p["recon_c1"], padding=10, activation="relu")
    c2 = conv1d(c1, p["recon_c2"], padding=5, activation="relu")
    c3 = conv1d(c2, p["recon_c3"], padding=2, activation="relu")    # (m,15,100)
    feats = conv1d(c3, p["recon_combine"].reshape(1, 15, 99), padding=49)[:, 0, :]
    wscale = jnp.transpose(p["recon_scale"][0, 0], (1, 0))          # (2,100)
    # fused softmax(5f) -> weighted sum -> sigmoid -> +0.1
    return recon_tail(feats, sub_wf, SPE, wscale)


# ----------------------------------------------------------------------------
# One greedy iteration, fully batched over all rows (fixed shapes -> 1 compile)
# ----------------------------------------------------------------------------

def _init_active(p, Residual, thresh):
    go = jnp.argmax(break_forward(p, Residual[:, None, :]), axis=1)
    return jnp.logical_and(go == 1, 0.0 < thresh)


def _comb_step(p, Residual, Recon, Areas, Mask, BLW, thresh, active, niter):
    N, L = (int(d) for d in Residual.shape)
    SPE = p["SPE"]
    D = int(SPE.shape[0])
    spe_argmax = jnp.argmax(SPE)

    spots = jnp.argmax(spot_forward(p, Residual[:, None, :], Mask, SPE), axis=1)
    # batched roll(residual, -spot)[:D]
    idx = (spots[:, None] + jnp.arange(D, dtype=jnp.int32)[None, :]) % L
    sub = jnp.take_along_axis(Residual, idx, axis=1)                # (N, D)
    peak = jnp.take(sub, spe_argmax, axis=1)                        # (N,)

    # Rows with peak below the baseline threshold only touch the *local*
    # gathered mask copy in the reference (no effect on the outputs) -> no-op.
    hi = jnp.logical_and(active, peak >= BLW)
    any_hi = jnp.any(hi)
    max_hi_peak = jnp.max(jnp.where(hi, peak, -jnp.inf))
    norm = jnp.where(any_hi, max_hi_peak, 0.0) / jnp.max(SPE)

    areas = recon_forward(p, sub, SPE) * norm                       # (N,)
    spe_scaled = areas[:, None] * SPE[None, :]
    correct_spe = jnp.minimum(spe_scaled, sub)
    ln = jnp.sum(jnp.where(spe_scaled - correct_spe > 0, 1.0, 0.0), axis=1)
    correct_areas = (jnp.sum(correct_spe, axis=1) + p["bias"] * ln) / jnp.sum(SPE)

    padd = jnp.concatenate(
        [correct_spe, jnp.zeros((N, L - D), jnp.float32)], axis=1)
    # batched roll(padd, +spot)
    ridx = (jnp.arange(L, dtype=jnp.int32)[None, :] - spots[:, None]) % L
    roll_spe = jnp.take_along_axis(padd, ridx, axis=1)

    contrib = jnp.where(hi[:, None], roll_spe, 0.0)
    Recon = Recon + contrib
    Residual = Residual - contrib
    Areas = Areas.at[jnp.arange(N), spots].add(jnp.where(hi, correct_areas, 0.0))

    go = jnp.argmax(break_forward(p, Residual[:, None, :]), axis=1)
    new_active = jnp.logical_and(go == 1, niter < thresh)
    return Residual, Recon, Areas, new_active


_comb_step_jit = jax.jit(_comb_step)
_init_active_jit = jax.jit(_init_active)


def comb_forward(p, WF, Mask, BLW):
    WF = WF.astype(jnp.float32)
    Mask = Mask.astype(jnp.float32)
    BLW = BLW.astype(jnp.float32)
    SPE = p["SPE"]
    thresh = 2.0 * jnp.sum(WF, axis=1) / jnp.sum(SPE) + 1000.0

    Residual = WF
    Recon = jnp.zeros_like(WF)
    Areas = jnp.zeros_like(WF)

    active = _init_active_jit(p, Residual, thresh)
    Niter = 0
    # TODO(synk): the data-dependent greedy while-loop needs one host sync per
    # iteration for the termination test; the whole iteration body is a single
    # jitted, fixed-shape function (all rows processed, inactive rows masked).
    while bool(jnp.any(active)):
        Niter += 1
        Residual, Recon, Areas, active = _comb_step_jit(
            p, Residual, Recon, Areas, Mask, BLW, thresh, active,
            jnp.float32(Niter))
    return Recon, Areas


# ----------------------------------------------------------------------------
# Deterministic parameter initialisation (shapes from the module __init__)
# ----------------------------------------------------------------------------

def init_params(key):
    ks = jax.random.split(key, 16)
    normal = lambda k, shape, s: (s * jax.random.normal(k, shape)).astype(jnp.float32)
    p = {}
    # Break
    wf_w = normal(ks[0], (3, 1, 51), 0.1)
    wf_w = wf_w.at[0].set(0.0).at[0, 0, 25].set(-1.0)
    p["break_wf_w"] = wf_w
    p["break_cum_w"] = normal(ks[1], (3, 1, 51), 0.1)
    p["break_div_w"] = normal(ks[2], (3, 1, 51), 0.1)
    mix1 = jnp.abs(normal(ks[3], (1, 1, 9, 21), 0.2))
    p["break_mix_w"] = jnp.concatenate([jnp.zeros((1, 1, 9, 21), jnp.float32), mix1], 0)
    p["break_sum20_w"] = jnp.full((1, 1, 1, 21), 1.0 / 21.0, jnp.float32)
    # Spot
    p["spot_fit_cum_w"] = normal(ks[4], (1, 1, 121), 0.05)
    p["spot_fit_x_w"] = normal(ks[5], (1, 1, 121), 0.05)
    p["spot_fit_div_w"] = normal(ks[6], (1, 1, 121), 0.05)
    p["spot_roll_w"] = normal(ks[7], (1, 1, 101), 0.05)
    p["spot_sub_w"] = normal(ks[8], (15, 3, 21), 0.1)
    p["spot_comb_w"] = normal(ks[9], (1, 1, 5, 101, 3), 0.1)
    p["spot_W"] = jnp.array([0.0, 5.0, 10.0], jnp.float32)
    # Recon
    p["recon_c1"] = normal(ks[10], (5, 1, 21), 0.1)
    p["recon_c2"] = normal(ks[11], (10, 5, 11), 0.1)
    p["recon_c3"] = normal(ks[12], (15, 10, 5), 0.1)
    p["recon_combine"] = normal(ks[13], (1, 1, 15, 99), 0.05)
    p["recon_scale"] = normal(ks[14], (1, 1, 100, 2), 0.05)
    # Fixed filters from the reference
    p["div_x_w"] = jnp.array([1/280, -4/105, 1/5, -4/5, 0, 4/5, -1/5, 4/105, -1/280],
                             jnp.float32).reshape(1, 1, 9)
    p["run_mean_w"] = jnp.full((1, 1, 51), 1.0 / 51.0, jnp.float32)
    # Comb
    p["bias"] = jnp.float32(0.5)
    t = jnp.arange(100, dtype=jnp.float32)
    p["SPE"] = jnp.exp(-0.5 * ((t - 50.0) / 5.0) ** 2)
    return p


# ----------------------------------------------------------------------------

if __name__ == "__main__":
    key = jax.random.PRNGKey(0)
    p = init_params(key)
    SPE = p["SPE"]

    N, L = 2, 1000
    t = jnp.arange(L, dtype=jnp.float32)
    spikes = jnp.stack([
        5.0 * jnp.exp(-0.5 * ((t - 300.0) / 5.0) ** 2),
        4.0 * jnp.exp(-0.5 * ((t - 550.0) / 5.0) ** 2),
    ]).astype(jnp.float32)
    # Choose per-row baselines so 2*Narea + 1000 ~= 1.6, bounding the greedy
    # reconstruction loop to a couple of iterations at these shapes.
    target_sum = float((1.6 - 1000.0) / 2.0 * jnp.sum(SPE))
    base = (target_sum - jnp.sum(spikes, axis=1)) / L
    WF = (spikes + base[:, None]).astype(jnp.float32)
    Mask = jnp.ones((N, L), jnp.float32)
    BLW = jnp.full((N,), -1e3, jnp.float32)

    Recon_WF, Areas = comb_forward(p, WF, Mask, BLW)
    jax.block_until_ready((Recon_WF, Areas))
    assert Recon_WF.shape == (N, L) and Areas.shape == (N, L)
    print("KERNEL_OK")
</pallas_src>

<mosaic_0001>
module attributes {stable_mosaic.version = 11 : i64} {
  func.func @_conv_mxu_kernel(%arg0: i32, %arg1: memref<1x1x1050xf32, #tpu.memory_space<vmem>>, %arg2: memref<7x51xf32, #tpu.memory_space<vmem>>, %arg3: memref<1x7x1000xf32, #tpu.memory_space<vmem>>, %arg4: memref<51x1000xf32, #tpu.memory_space<vmem>>) attributes {dimension_semantics = [#tpu.dimension_semantics<parallel>], iteration_bounds = array<i64: 2>, scalar_prefetch = 0 : i64, scratch_operands = 1 : i64, tpu.core_type = #tpu.core_type<tc>, window_params = [{transform_indices = @transform_0, window_bounds = array<i64: 1, 1, 1050>}, {pipeline_mode = #tpu.pipeline_mode<synchronous>, transform_indices = @transform_1, window_bounds = array<i64: 7, 51>}, {transform_indices = @transform_2, window_bounds = array<i64: 1, 7, 1000>}]} {
    %c0 = arith.constant 0 : index
    %c0_0 = arith.constant 0 : index
    %c0_1 = arith.constant 0 : index
    %0 = vector.load %arg1[%c0, %c0_0, %c0_1] : memref<1x1x1050xf32, #tpu.memory_space<vmem>>, vector<1x1x1050xf32>
    %1 = vector.shape_cast %0 : vector<1x1x1050xf32> to vector<1x1050xf32>
    %2 = vector.extract_strided_slice %1 {offsets = [0, 0], sizes = [1, 1000], strides = [1, 1]} : vector<1x1050xf32> to vector<1x1000xf32>
    %c0_2 = arith.constant 0 : index
    %c0_3 = arith.constant 0 : index
    %3 = vector.load %arg4[%c0_2, %c0_3] : memref<51x1000xf32, #tpu.memory_space<vmem>>, vector<1x1000xf32>
    tpu.vector_store %arg4[%c0_2, %c0_3], %2 {strides = array<i32>} : memref<51x1000xf32, #tpu.memory_space<vmem>>, vector<1x1000xf32>,
    %4 = vector.extract_strided_slice %1 {offsets = [0, 1], sizes = [1, 1000], strides = [1, 1]} : vector<1x1050xf32> to vector<1x1000xf32>
    %c1 = arith.constant 1 : index
    %c0_4 = arith.constant 0 : index
    %5 = vector.load %arg4[%c1, %c0_4] : memref<51x1000xf32, #tpu.memory_space<vmem>>, vector<1x1000xf32>
    tpu.vector_store %arg4[%c1, %c0_4], %4 {strides = array<i32>} : memref<51x1000xf32, #tpu.memory_space<vmem>>, vector<1x1000xf32>,
    %6 = vector.extract_strided_slice %1 {offsets = [0, 2], sizes = [1, 1000], strides = [1, 1]} : vector<1x1050xf32> to vector<1x1000xf32>
    %c2 = arith.constant 2 : index
    %c0_5 = arith.constant 0 : index
    %7 = vector.load %arg4[%c2, %c0_5] : memref<51x1000xf32, #tpu.memory_space<vmem>>, vector<1x1000xf32>
    tpu.vector_store %arg4[%c2, %c0_5], %6 {strides = array<i32>} : memref<51x1000xf32, #tpu.memory_space<vmem>>, vector<1x1000xf32>,
    %8 = vector.extract_strided_slice %1 {offsets = [0, 3], sizes = [1, 1000], strides = [1, 1]} : vector<1x1050xf32> to vector<1x1000xf32>
    %c3 = arith.constant 3 : index
    %c0_6 = arith.constant 0 : index
    %9 = vector.load %arg4[%c3, %c0_6] : memref<51x1000xf32, #tpu.memory_space<vmem>>, vector<1x1000xf32>
    tpu.vector_store %arg4[%c3, %c0_6], %8 {strides = array<i32>} : memref<51x1000xf32, #tpu.memory_space<vmem>>, vector<1x1000xf32>,
    %10 = vector.extract_strided_slice %1 {offsets = [0, 4], sizes = [1, 1000], strides = [1, 1]} : vector<1x1050xf32> to vector<1x1000xf32>
    %c4 = arith.constant 4 : index
    %c0_7 = arith.constant 0 : index
    %11 = vector.load %arg4[%c4, %c0_7] : memref<51x1000xf32, #tpu.memory_space<vmem>>, vector<1x1000xf32>
    tpu.vector_store %arg4[%c4, %c0_7], %10 {strides = array<i32>} : memref<51x1000xf32, #tpu.memory_space<vmem>>, vector<1x1000xf32>,
    %12 = vector.extract_strided_slice %1 {offsets = [0, 5], sizes = [1, 1000], strides = [1, 1]} : vector<1x1050xf32> to vector<1x1000xf32>
    %c5 = arith.constant 5 : index
    %c0_8 = arith.constant 0 : index
    %13 = vector.load %arg4[%c5, %c0_8] : memref<51x1000xf32, #tpu.memory_space<vmem>>, vector<1x1000xf32>
    tpu.vector_store %arg4[%c5, %c0_8], %12 {strides = array<i32>} : memref<51x1000xf32, #tpu.memory_space<vmem>>, vector<1x1000xf32>,
    %14 = vector.extract_strided_slice %1 {offsets = [0, 6], sizes = [1, 1000], strides = [1, 1]} : vector<1x1050xf32> to vector<1x1000xf32>
    %c6 = arith.constant 6 : index
    %c0_9 = arith.constant 0 : index
    %15 = vector.load %arg4[%c6, %c0_9] : memref<51x1000xf32, #tpu.memory_space<vmem>>, vector<1x1000xf32>
    tpu.vector_store %arg4[%c6, %c0_9], %14 {strides = array<i32>} : memref<51x1000xf32, #tpu.memory_space<vmem>>, vector<1x1000xf32>,
    %16 = vector.extract_strided_slice %1 {offsets = [0, 7], sizes = [1, 1000], strides = [1, 1]} : vector<1x1050xf32> to vector<1x1000xf32>
    %c7 = arith.constant 7 : index
    %c0_10 = arith.constant 0 : index
    %17 = vector.load %arg4[%c7, %c0_10] : memref<51x1000xf32, #tpu.memory_space<vmem>>, vector<1x1000xf32>
    tpu.vector_store %arg4[%c7, %c0_10], %16 {strides = array<i32>} : memref<51x1000xf32, #tpu.memory_space<vmem>>, vector<1x1000xf32>,
    %18 = vector.extract_strided_slice %1 {offsets = [0, 8], sizes = [1, 1000], strides = [1, 1]} : vector<1x1050xf32> to vector<1x1000xf32>
    %c8 = arith.constant 8 : index
    %c0_11 = arith.constant 0 : index
    %19 = vector.load %arg4[%c8, %c0_11] : memref<51x1000xf32, #tpu.memory_space<vmem>>, vector<1x1000xf32>
    tpu.vector_store %arg4[%c8, %c0_11], %18 {strides = array<i32>} : memref<51x1000xf32, #tpu.memory_space<vmem>>, vector<1x1000xf32>,
    %20 = vector.extract_strided_slice %1 {offsets = [0, 9], sizes = [1, 1000], strides = [1, 1]} : vector<1x1050xf32> to vector<1x1000xf32>
    %c9 = arith.constant 9 : index
    %c0_12 = arith.constant 0 : index
    %21 = vector.load %arg4[%c9, %c0_12] : memref<51x1000xf32, #tpu.memory_space<vmem>>, vector<1x1000xf32>
    tpu.vector_store %arg4[%c9, %c0_12], %20 {strides = array<i32>} : memref<51x1000xf32, #tpu.memory_space<vmem>>, vector<1x1000xf32>,
    %22 = vector.extract_strided_slice %1 {offsets = [0, 10], sizes = [1, 1000], strides = [1, 1]} : vector<1x1050xf32> to vector<1x1000xf32>
    %c10 = arith.constant 10 : index
    %c0_13 = arith.constant 0 : index
    %23 = vector.load %arg4[%c10, %c0_13] : memref<51x1000xf32, #tpu.memory_space<vmem>>, vector<1x1000xf32>
    tpu.vector_store %arg4[%c10, %c0_13], %22 {strides = array<i32>} : memref<51x1000xf32, #tpu.memory_space<vmem>>, vector<1x1000xf32>,
    %24 = vector.extract_strided_slice %1 {offsets = [0, 11], sizes = [1, 1000], strides = [1, 1]} : vector<1x1050xf32> to vector<1x1000xf32>
    %c11 = arith.constant 11 : index
    %c0_14 = arith.constant 0 : index
    %25 = vector.load %arg4[%c11, %c0_14] : memref<51x1000xf32, #tpu.memory_space<vmem>>, vector<1x1000xf32>
    tpu.vector_store %arg4[%c11, %c0_14], %24 {strides = array<i32>} : memref<51x1000xf32, #tpu.memory_space<vmem>>, vector<1x1000xf32>,
    %26 = vector.extract_strided_slice %1 {offsets = [0, 12], sizes = [1, 1000], strides = [1, 1]} : vector<1x1050xf32> to vector<1x1000xf32>
    %c12 = arith.constant 12 : index
    %c0_15 = arith.constant 0 : index
    %27 = vector.load %arg4[%c12, %c0_15] : memref<51x1000xf32, #tpu.memory_space<vmem>>, vector<1x1000xf32>
    tpu.vector_store %arg4[%c12, %c0_15], %26 {strides = array<i32>} : memref<51x1000xf32, #tpu.memory_space<vmem>>, vector<1x1000xf32>,
    %28 = vector.extract_strided_slice %1 {offsets = [0, 13], sizes = [1, 1000], strides = [1, 1]} : vector<1x1050xf32> to vector<1x1000xf32>
    %c13 = arith.constant 13 : index
    %c0_16 = arith.constant 0 : index
    %29 = vector.load %arg4[%c13, %c0_16] : memref<51x1000xf32, #tpu.memory_space<vmem>>, vector<1x1000xf32>
    tpu.vector_store %arg4[%c13, %c0_16], %28 {strides = array<i32>} : memref<51x1000xf32, #tpu.memory_space<vmem>>, vector<1x1000xf32>,
    %30 = vector.extract_strided_slice %1 {offsets = [0, 14], sizes = [1, 1000], strides = [1, 1]} : vector<1x1050xf32> to vector<1x1000xf32>
    %c14 = arith.constant 14 : index
    %c0_17 = arith.constant 0 : index
    %31 = vector.load %arg4[%c14, %c0_17] : memref<51x1000xf32, #tpu.memory_space<vmem>>, vector<1x1000xf32>
    tpu.vector_store %arg4[%c14, %c0_17], %30 {strides = array<i32>} : memref<51x1000xf32, #tpu.memory_space<vmem>>, vector<1x1000xf32>,
    %32 = vector.extract_strided_slice %1 {offsets = [0, 15], sizes = [1, 1000], strides = [1, 1]} : vector<1x1050xf32> to vector<1x1000xf32>
    %c15 = arith.constant 15 : index
    %c0_18 = arith.constant 0 : index
    %33 = vector.load %arg4[%c15, %c0_18] : memref<51x1000xf32, #tpu.memory_space<vmem>>, vector<1x1000xf32>
    tpu.vector_store %arg4[%c15, %c0_18], %32 {strides = array<i32>} : memref<51x1000xf32, #tpu.memory_space<vmem>>, vector<1x1000xf32>,
    %34 = vector.extract_strided_slice %1 {offsets = [0, 16], sizes = [1, 1000], strides = [1, 1]} : vector<1x1050xf32> to vector<1x1000xf32>
    %c16 = arith.constant 16 : index
    %c0_19 = arith.constant 0 : index
    %35 = vector.load %arg4[%c16, %c0_19] : memref<51x1000xf32, #tpu.memory_space<vmem>>, vector<1x1000xf32>
    tpu.vector_store %arg4[%c16, %c0_19], %34 {strides = array<i32>} : memref<51x1000xf32, #tpu.memory_space<vmem>>, vector<1x1000xf32>,
    %36 = vector.extract_strided_slice %1 {offsets = [0, 17], sizes = [1, 1000], strides = [1, 1]} : vector<1x1050xf32> to vector<1x1000xf32>
    %c17 = arith.constant 17 : index
    %c0_20 = arith.constant 0 : index
    %37 = vector.load %arg4[%c17, %c0_20] : memref<51x1000xf32, #tpu.memory_space<vmem>>, vector<1x1000xf32>
    tpu.vector_store %arg4[%c17, %c0_20], %36 {strides = array<i32>} : memref<51x1000xf32, #tpu.memory_space<vmem>>, vector<1x1000xf32>,
    %38 = vector.extract_strided_slice %1 {offsets = [0, 18], sizes = [1, 1000], strides = [1, 1]} : vector<1x1050xf32> to vector<1x1000xf32>
    %c18 = arith.constant 18 : index
    %c0_21 = arith.constant 0 : index
    %39 = vector.load %arg4[%c18, %c0_21] : memref<51x1000xf32, #tpu.memory_space<vmem>>, vector<1x1000xf32>
    tpu.vector_store %arg4[%c18, %c0_21], %38 {strides = array<i32>} : memref<51x1000xf32, #tpu.memory_space<vmem>>, vector<1x1000xf32>,
    %40 = vector.extract_strided_slice %1 {offsets = [0, 19], sizes = [1, 1000], strides = [1, 1]} : vector<1x1050xf32> to vector<1x1000xf32>
    %c19 = arith.constant 19 : index
    %c0_22 = arith.constant 0 : index
    %41 = vector.load %arg4[%c19, %c0_22] : memref<51x1000xf32, #tpu.memory_space<vmem>>, vector<1x1000xf32>
    tpu.vector_store %arg4[%c19, %c0_22], %40 {strides = array<i32>} : memref<51x1000xf32, #tpu.memory_space<vmem>>, vector<1x1000xf32>,
    %42 = vector.extract_strided_slice %1 {offsets = [0, 20], sizes = [1, 1000], strides = [1, 1]} : vector<1x1050xf32> to vector<1x1000xf32>
    %c20 = arith.constant 20 : index
    %c0_23 = arith.constant 0 : index
    %43 = vector.load %arg4[%c20, %c0_23] : memref<51x1000xf32, #tpu.memory_space<vmem>>, vector<1x1000xf32>
    tpu.vector_store %arg4[%c20, %c0_23], %42 {strides = array<i32>} : memref<51x1000xf32, #tpu.memory_space<vmem>>, vector<1x1000xf32>,
    %44 = vector.extract_strided_slice %1 {offsets = [0, 21], sizes = [1, 1000], strides = [1, 1]} : vector<1x1050xf32> to vector<1x1000xf32>
    %c21 = arith.constant 21 : index
    %c0_24 = arith.constant 0 : index
    %45 = vector.load %arg4[%c21, %c0_24] : memref<51x1000xf32, #tpu.memory_space<vmem>>, vector<1x1000xf32>
    tpu.vector_store %arg4[%c21, %c0_24], %44 {strides = array<i32>} : memref<51x1000xf32, #tpu.memory_space<vmem>>, vector<1x1000xf32>,
    %46 = vector.extract_strided_slice %1 {offsets = [0, 22], sizes = [1, 1000], strides = [1, 1]} : vector<1x1050xf32> to vector<1x1000xf32>
    %c22 = arith.constant 22 : index
    %c0_25 = arith.constant 0 : index
    %47 = vector.load %arg4[%c22, %c0_25] : memref<51x1000xf32, #tpu.memory_space<vmem>>, vector<1x1000xf32>
    tpu.vector_store %arg4[%c22, %c0_25], %46 {strides = array<i32>} : memref<51x1000xf32, #tpu.memory_space<vmem>>, vector<1x1000xf32>,
    %48 = vector.extract_strided_slice %1 {offsets = [0, 23], sizes = [1, 1000], strides = [1, 1]} : vector<1x1050xf32> to vector<1x1000xf32>
    %c23 = arith.constant 23 : index
    %c0_26 = arith.constant 0 : index
    %49 = vector.load %arg4[%c23, %c0_26] : memref<51x1000xf32, #tpu.memory_space<vmem>>, vector<1x1000xf32>
    tpu.vector_store %arg4[%c23, %c0_26], %48 {strides = array<i32>} : memref<51x1000xf32, #tpu.memory_space<vmem>>, vector<1x1000xf32>,
    %50 = vector.extract_strided_slice %1 {offsets = [0, 24], sizes = [1, 1000], strides = [1, 1]} : vector<1x1050xf32> to vector<1x1000xf32>
    %c24 = arith.constant 24 : index
    %c0_27 = arith.constant 0 : index
    %51 = vector.load %arg4[%c24, %c0_27] : memref<51x1000xf32, #tpu.memory_space<vmem>>, vector<1x1000xf32>
    tpu.vector_store %arg4[%c24, %c0_27], %50 {strides = array<i32>} : memref<51x1000xf32, #tpu.memory_space<vmem>>, vector<1x1000xf32>,
    %52 = vector.extract_strided_slice %1 {offsets = [0, 25], sizes = [1, 1000], strides = [1, 1]} : vector<1x1050xf32> to vector<1x1000xf32>
    %c25 = arith.constant 25 : index
    %c0_28 = arith.constant 0 : index
    %53 = vector.load %arg4[%c25, %c0_28] : memref<51x1000xf32, #tpu.memory_space<vmem>>, vector<1x1000xf32>
    tpu.vector_store %arg4[%c25, %c0_28], %52 {strides = array<i32>} : memref<51x1000xf32, #tpu.memory_space<vmem>>, vector<1x1000xf32>,
    %54 = vector.extract_strided_slice %1 {offsets = [0, 26], sizes = [1, 1000], strides = [1, 1]} : vector<1x1050xf32> to vector<1x1000xf32>
    %c26 = arith.constant 26 : index
    %c0_29 = arith.constant 0 : index
    %55 = vector.load %arg4[%c26, %c0_29] : memref<51x1000xf32, #tpu.memory_space<vmem>>, vector<1x1000xf32>
    tpu.vector_store %arg4[%c26, %c0_29], %54 {strides = array<i32>} : memref<51x1000xf32, #tpu.memory_space<vmem>>, vector<1x1000xf32>,
    %56 = vector.extract_strided_slice %1 {offsets = [0, 27], sizes = [1, 1000], strides = [1, 1]} : vector<1x1050xf32> to vector<1x1000xf32>
    %c27 = arith.constant 27 : index
    %c0_30 = arith.constant 0 : index
    %57 = vector.load %arg4[%c27, %c0_30] : memref<51x1000xf32, #tpu.memory_space<vmem>>, vector<1x1000xf32>
    tpu.vector_store %arg4[%c27, %c0_30], %56 {strides = array<i32>} : memref<51x1000xf32, #tpu.memory_space<vmem>>, vector<1x1000xf32>,
    %58 = vector.extract_strided_slice %1 {offsets = [0, 28], sizes = [1, 1000], strides = [1, 1]} : vector<1x1050xf32> to vector<1x1000xf32>
    %c28 = arith.constant 28 : index
    %c0_31 = arith.constant 0 : index
    %59 = vector.load %arg4[%c28, %c0_31] : memref<51x1000xf32, #tpu.memory_space<vmem>>, vector<1x1000xf32>
    tpu.vector_store %arg4[%c28, %c0_31], %58 {strides = array<i32>} : memref<51x1000xf32, #tpu.memory_space<vmem>>, vector<1x1000xf32>,
    %60 = vector.extract_strided_slice %1 {offsets = [0, 29], sizes = [1, 1000], strides = [1, 1]} : vector<1x1050xf32> to vector<1x1000xf32>
    %c29 = arith.constant 29 : index
    %c0_32 = arith.constant 0 : index
    %61 = vector.load %arg4[%c29, %c0_32] : memref<51x1000xf32, #tpu.memory_space<vmem>>, vector<1x1000xf32>
    tpu.vector_store %arg4[%c29, %c0_32], %60 {strides = array<i32>} : memref<51x1000xf32, #tpu.memory_space<vmem>>, vector<1x1000xf32>,
    %62 = vector.extract_strided_slice %1 {offsets = [0, 30], sizes = [1, 1000], strides = [1, 1]} : vector<1x1050xf32> to vector<1x1000xf32>
    %c30 = arith.constant 30 : index
    %c0_33 = arith.constant 0 : index
    %63 = vector.load %arg4[%c30, %c0_33] : memref<51x1000xf32, #tpu.memory_space<vmem>>, vector<1x1000xf32>
    tpu.vector_store %arg4[%c30, %c0_33], %62 {strides = array<i32>} : memref<51x1000xf32, #tpu.memory_space<vmem>>, vector<1x1000xf32>,
    %64 = vector.extract_strided_slice %1 {offsets = [0, 31], sizes = [1, 1000], strides = [1, 1]} : vector<1x1050xf32> to vector<1x1000xf32>
    %c31 = arith.constant 31 : index
    %c0_34 = arith.constant 0 : index
    %65 = vector.load %arg4[%c31, %c0_34] : memref<51x1000xf32, #tpu.memory_space<vmem>>, vector<1x1000xf32>
    tpu.vector_store %arg4[%c31, %c0_34], %64 {strides = array<i32>} : memref<51x1000xf32, #tpu.memory_space<vmem>>, vector<1x1000xf32>,
    %66 = vector.extract_strided_slice %1 {offsets = [0, 32], sizes = [1, 1000], strides = [1, 1]} : vector<1x1050xf32> to vector<1x1000xf32>
    %c32 = arith.constant 32 : index
    %c0_35 = arith.constant 0 : index
    %67 = vector.load %arg4[%c32, %c0_35] : memref<51x1000xf32, #tpu.memory_space<vmem>>, vector<1x1000xf32>
    tpu.vector_store %arg4[%c32, %c0_35], %66 {strides = array<i32>} : memref<51x1000xf32, #tpu.memory_space<vmem>>, vector<1x1000xf32>,
    %68 = vector.extract_strided_slice %1 {offsets = [0, 33], sizes = [1, 1000], strides = [1, 1]} : vector<1x1050xf32> to vector<1x1000xf32>
    %c33 = arith.constant 33 : index
    %c0_36 = arith.constant 0 : index
    %69 = vector.load %arg4[%c33, %c0_36] : memref<51x1000xf32, #tpu.memory_space<vmem>>, vector<1x1000xf32>
    tpu.vector_store %arg4[%c33, %c0_36], %68 {strides = array<i32>} : memref<51x1000xf32, #tpu.memory_space<vmem>>, vector<1x1000xf32>,
    %70 = vector.extract_strided_slice %1 {offsets = [0, 34], sizes = [1, 1000], strides = [1, 1]} : vector<1x1050xf32> to vector<1x1000xf32>
    %c34 = arith.constant 34 : index
    %c0_37 = arith.constant 0 : index
    %71 = vector.load %arg4[%c34, %c0_37] : memref<51x1000xf32, #tpu.memory_space<vmem>>, vector<1x1000xf32>
    tpu.vector_store %arg4[%c34, %c0_37], %70 {strides = array<i32>} : memref<51x1000xf32, #tpu.memory_space<vmem>>, vector<1x1000xf32>,
    %72 = vector.extract_strided_slice %1 {offsets = [0, 35], sizes = [1, 1000], strides = [1, 1]} : vector<1x1050xf32> to vector<1x1000xf32>
    %c35 = arith.constant 35 : index
    %c0_38 = arith.constant 0 : index
    %73 = vector.load %arg4[%c35, %c0_38] : memref<51x1000xf32, #tpu.memory_space<vmem>>, vector<1x1000xf32>
    tpu.vector_store %arg4[%c35, %c0_38], %72 {strides = array<i32>} : memref<51x1000xf32, #tpu.memory_space<vmem>>, vector<1x1000xf32>,
    %74 = vector.extract_strided_slice %1 {offsets = [0, 36], sizes = [1, 1000], strides = [1, 1]} : vector<1x1050xf32> to vector<1x1000xf32>
    %c36 = arith.constant 36 : index
    %c0_39 = arith.constant 0 : index
    %75 = vector.load %arg4[%c36, %c0_39] : memref<51x1000xf32, #tpu.memory_space<vmem>>, vector<1x1000xf32>
    tpu.vector_store %arg4[%c36, %c0_39], %74 {strides = array<i32>} : memref<51x1000xf32, #tpu.memory_space<vmem>>, vector<1x1000xf32>,
    %76 = vector.extract_strided_slice %1 {offsets = [0, 37], sizes = [1, 1000], strides = [1, 1]} : vector<1x1050xf32> to vector<1x1000xf32>
    %c37 = arith.constant 37 : index
    %c0_40 = arith.constant 0 : index
    %77 = vector.load %arg4[%c37, %c0_40] : memref<51x1000xf32, #tpu.memory_space<vmem>>, vector<1x1000xf32>
    tpu.vector_store %arg4[%c37, %c0_40], %76 {strides = array<i32>} : memref<51x1000xf32, #tpu.memory_space<vmem>>, vector<1x1000xf32>,
    %78 = vector.extract_strided_slice %1 {offsets = [0, 38], sizes = [1, 1000], strides = [1, 1]} : vector<1x1050xf32> to vector<1x1000xf32>
    %c38 = arith.constant 38 : index
    %c0_41 = arith.constant 0 : index
    %79 = vector.load %arg4[%c38, %c0_41] : memref<51x1000xf32, #tpu.memory_space<vmem>>, vector<1x1000xf32>
    tpu.vector_store %arg4[%c38, %c0_41], %78 {strides = array<i32>} : memref<51x1000xf32, #tpu.memory_space<vmem>>, vector<1x1000xf32>,
    %80 = vector.extract_strided_slice %1 {offsets = [0, 39], sizes = [1, 1000], strides = [1, 1]} : vector<1x1050xf32> to vector<1x1000xf32>
    %c39 = arith.constant 39 : index
    %c0_42 = arith.constant 0 : index
    %81 = vector.load %arg4[%c39, %c0_42] : memref<51x1000xf32, #tpu.memory_space<vmem>>, vector<1x1000xf32>
    tpu.vector_store %arg4[%c39, %c0_42], %80 {strides = array<i32>} : memref<51x1000xf32, #tpu.memory_space<vmem>>, vector<1x1000xf32>,
    %82 = vector.extract_strided_slice %1 {offsets = [0, 40], sizes = [1, 1000], strides = [1, 1]} : vector<1x1050xf32> to vector<1x1000xf32>
    %c40 = arith.constant 40 : index
    %c0_43 = arith.constant 0 : index
    %83 = vector.load %arg4[%c40, %c0_43] : memref<51x1000xf32, #tpu.memory_space<vmem>>, vector<1x1000xf32>
    tpu.vector_store %arg4[%c40, %c0_43], %82 {strides = array<i32>} : memref<51x1000xf32, #tpu.memory_space<vmem>>, vector<1x1000xf32>,
    %84 = vector.extract_strided_slice %1 {offsets = [0, 41], sizes = [1, 1000], strides = [1, 1]} : vector<1x1050xf32> to vector<1x1000xf32>
    %c41 = arith.constant 41 : index
    %c0_44 = arith.constant 0 : index
    %85 = vector.load %arg4[%c41, %c0_44] : memref<51x1000xf32, #tpu.memory_space<vmem>>, vector<1x1000xf32>
    tpu.vector_store %arg4[%c41, %c0_44], %84 {strides = array<i32>} : memref<51x1000xf32, #tpu.memory_space<vmem>>, vector<1x1000xf32>,
    %86 = vector.extract_strided_slice %1 {offsets = [0, 42], sizes = [1, 1000], strides = [1, 1]} : vector<1x1050xf32> to vector<1x1000xf32>
    %c42 = arith.constant 42 : index
    %c0_45 = arith.constant 0 : index
    %87 = vector.load %arg4[%c42, %c0_45] : memref<51x1000xf32, #tpu.memory_space<vmem>>, vector<1x1000xf32>
    tpu.vector_store %arg4[%c42, %c0_45], %86 {strides = array<i32>} : memref<51x1000xf32, #tpu.memory_space<vmem>>, vector<1x1000xf32>,
    %88 = vector.extract_strided_slice %1 {offsets = [0, 43], sizes = [1, 1000], strides = [1, 1]} : vector<1x1050xf32> to vector<1x1000xf32>
    %c43 = arith.constant 43 : index
    %c0_46 = arith.constant 0 : index
    %89 = vector.load %arg4[%c43, %c0_46] : memref<51x1000xf32, #tpu.memory_space<vmem>>, vector<1x1000xf32>
    tpu.vector_store %arg4[%c43, %c0_46], %88 {strides = array<i32>} : memref<51x1000xf32, #tpu.memory_space<vmem>>, vector<1x1000xf32>,
    %90 = vector.extract_strided_slice %1 {offsets = [0, 44], sizes = [1, 1000], strides = [1, 1]} : vector<1x1050xf32> to vector<1x1000xf32>
    %c44 = arith.constant 44 : index
    %c0_47 = arith.constant 0 : index
    %91 = vector.load %arg4[%c44, %c0_47] : memref<51x1000xf32, #tpu.memory_space<vmem>>, vector<1x1000xf32>
    tpu.vector_store %arg4[%c44, %c0_47], %90 {strides = array<i32>} : memref<51x1000xf32, #tpu.memory_space<vmem>>, vector<1x1000xf32>,
    %92 = vector.extract_strided_slice %1 {offsets = [0, 45], sizes = [1, 1000], strides = [1, 1]} : vector<1x1050xf32> to vector<1x1000xf32>
    %c45 = arith.constant 45 : index
    %c0_48 = arith.constant 0 : index
    %93 = vector.load %arg4[%c45, %c0_48] : memref<51x1000xf32, #tpu.memory_space<vmem>>, vector<1x1000xf32>
    tpu.vector_store %arg4[%c45, %c0_48], %92 {strides = array<i32>} : memref<51x1000xf32, #tpu.memory_space<vmem>>, vector<1x1000xf32>,
    %94 = vector.extract_strided_slice %1 {offsets = [0, 46], sizes = [1, 1000], strides = [1, 1]} : vector<1x1050xf32> to vector<1x1000xf32>
    %c46 = arith.constant 46 : index
    %c0_49 = arith.constant 0 : index
    %95 = vector.load %arg4[%c46, %c0_49] : memref<51x1000xf32, #tpu.memory_space<vmem>>, vector<1x1000xf32>
    tpu.vector_store %arg4[%c46, %c0_49], %94 {strides = array<i32>} : memref<51x1000xf32, #tpu.memory_space<vmem>>, vector<1x1000xf32>,
    %96 = vector.extract_strided_slice %1 {offsets = [0, 47], sizes = [1, 1000], strides = [1, 1]} : vector<1x1050xf32> to vector<1x1000xf32>
    %c47 = arith.constant 47 : index
    %c0_50 = arith.constant 0 : index
    %97 = vector.load %arg4[%c47, %c0_50] : memref<51x1000xf32, #tpu.memory_space<vmem>>, vector<1x1000xf32>
    tpu.vector_store %arg4[%c47, %c0_50], %96 {strides = array<i32>} : memref<51x1000xf32, #tpu.memory_space<vmem>>, vector<1x1000xf32>,
    %98 = vector.extract_strided_slice %1 {offsets = [0, 48], sizes = [1, 1000], strides = [1, 1]} : vector<1x1050xf32> to vector<1x1000xf32>
    %c48 = arith.constant 48 : index
    %c0_51 = arith.constant 0 : index
    %99 = vector.load %arg4[%c48, %c0_51] : memref<51x1000xf32, #tpu.memory_space<vmem>>, vector<1x1000xf32>
    tpu.vector_store %arg4[%c48, %c0_51], %98 {strides = array<i32>} : memref<51x1000xf32, #tpu.memory_space<vmem>>, vector<1x1000xf32>,
    %100 = vector.extract_strided_slice %1 {offsets = [0, 49], sizes = [1, 1000], strides = [1, 1]} : vector<1x1050xf32> to vector<1x1000xf32>
    %c49 = arith.constant 49 : index
    %c0_52 = arith.constant 0 : index
    %101 = vector.load %arg4[%c49, %c0_52] : memref<51x1000xf32, #tpu.memory_space<vmem>>, vector<1x1000xf32>
    tpu.vector_store %arg4[%c49, %c0_52], %100 {strides = array<i32>} : memref<51x1000xf32, #tpu.memory_space<vmem>>, vector<1x1000xf32>,
    %102 = vector.extract_strided_slice %1 {offsets = [0, 50], sizes = [1, 1000], strides = [1, 1]} : vector<1x1050xf32> to vector<1x1000xf32>
    %c50 = arith.constant 50 : index
    %c0_53 = arith.constant 0 : index
    %103 = vector.load %arg4[%c50, %c0_53] : memref<51x1000xf32, #tpu.memory_space<vmem>>, vector<1x1000xf32>
    tpu.vector_store %arg4[%c50, %c0_53], %102 {strides = array<i32>} : memref<51x1000xf32, #tpu.memory_space<vmem>>, vector<1x1000xf32>,
    %c0_54 = arith.constant 0 : index
    %c0_55 = arith.constant 0 : index
    %104 = vector.load %arg2[%c0_54, %c0_55] : memref<7x51xf32, #tpu.memory_space<vmem>>, vector<7x51xf32>
    %c0_56 = arith.constant 0 : index
    %c0_57 = arith.constant 0 : index
    %105 = vector.load %arg4[%c0_56, %c0_57] : memref<51x1000xf32, #tpu.memory_space<vmem>>, vector<51x1000xf32>
    %cst = arith.constant dense<0.000000e+00> : vector<7x1000xf32>
    %106 = tpu.matmul %104, %105, %cst {dimension_numbers = #tpu.dot_dimension_numbers<[1], [0], [0], [1], [0, 0, 1, 1], [], []>} : vector<7x51xf32>, vector<51x1000xf32>, vector<7x1000xf32> -> vector<7x1000xf32>
    %c0_58 = arith.constant 0 : index
    %c0_59 = arith.constant 0 : index
    %c0_60 = arith.constant 0 : index
    %107 = vector.load %arg3[%c0_58, %c0_59, %c0_60] : memref<1x7x1000xf32, #tpu.memory_space<vmem>>, vector<1x7x1000xf32>
    %108 = vector.shape_cast %107 : vector<1x7x1000xf32> to vector<7x1000xf32>
    %109 = vector.shape_cast %106 : vector<7x1000xf32> to vector<1x7x1000xf32>
    tpu.vector_store %arg3[%c0_58, %c0_59, %c0_60], %109 {strides = array<i32>} : memref<1x7x1000xf32, #tpu.memory_space<vmem>>, vector<1x7x1000xf32>,
    return
  }
  func.func @transform_0(%arg0: i32) -> (i32, i32, i32) {
    %c0_i32 = arith.constant 0 : i32
    %c0_i32_0 = arith.constant 0 : i32
    %c0_i32_1 = arith.constant 0 : i32
    return %arg0, %c0_i32, %c0_i32_0 : i32, i32, i32
  }
  func.func @transform_1(%arg0: i32) -> (i32, i32) {
    %c0_i32 = arith.constant 0 : i32
    %c0_i32_0 = arith.constant 0 : i32
    %c0_i32_1 = arith.constant 0 : i32
    return %c0_i32, %c0_i32_0 : i32, i32
  }
  func.func @transform_2(%arg0: i32) -> (i32, i32, i32) {
    %c0_i32 = arith.constant 0 : i32
    %c0_i32_0 = arith.constant 0 : i32
    %c0_i32_1 = arith.constant 0 : i32
    return %arg0, %c0_i32, %c0_i32_0 : i32, i32, i32
  }
}

module attributes {stable_mosaic.version = 11 : i64} {
  func.func @_conv_mxu_kernel(%arg0: i32, %arg1: memref<1x1x1050xf32, #tpu.memory_space<vmem>>, %arg2: memref<1x51xf32, #tpu.memory_space<vmem>>, %arg3: memref<1x1x1000xf32, #tpu.memory_space<vmem>>, %arg4: memref<51x1000xf32, #tpu.memory_space<vmem>>) attributes {dimension_semantics = [#tpu.dimension_semantics<parallel>], iteration_bounds = array<i64: 2>, scalar_prefetch = 0 : i64, scratch_operands = 1 : i64, tpu.core_type = #tpu.core_type<tc>, window_params = [{transform_indices = @transform_0, window_bounds = array<i64: 1, 1, 1050>}, {pipeline_mode = #tpu.pipeline_mode<synchronous>, transform_indices = @transform_1, window_bounds = array<i64: 1, 51>}, {transform_indices = @transform_2, window_bounds = array<i64: 1, 1, 1000>}]} {
    %c0 = arith.constant 0 : index
    %c0_0 = arith.constant 0 : index
    %c0_1 = arith.constant 0 : index
    %0 = vector.load %arg1[%c0, %c0_0, %c0_1] : memref<1x1x1050xf32, #tpu.memory_space<vmem>>, vector<1x1x1050xf32>
    %1 = vector.shape_cast %0 : vector<1x1x1050xf32> to vector<1x1050xf32>
    %2 = vector.extract_strided_slice %1 {offsets = [0, 0], sizes = [1, 1000], strides = [1, 1]} : vector<1x1050xf32> to vector<1x1000xf32>
    %c0_2 = arith.constant 0 : index
    %c0_3 = arith.constant 0 : index
    %3 = vector.load %arg4[%c0_2, %c0_3] : memref<51x1000xf32, #tpu.memory_space<vmem>>, vector<1x1000xf32>
    tpu.vector_store %arg4[%c0_2, %c0_3], %2 {strides = array<i32>} : memref<51x1000xf32, #tpu.memory_space<vmem>>, vector<1x1000xf32>,
    %4 = vector.extract_strided_slice %1 {offsets = [0, 1], sizes = [1, 1000], strides = [1, 1]} : vector<1x1050xf32> to vector<1x1000xf32>
    %c1 = arith.constant 1 : index
    %c0_4 = arith.constant 0 : index
    %5 = vector.load %arg4[%c1, %c0_4] : memref<51x1000xf32, #tpu.memory_space<vmem>>, vector<1x1000xf32>
    tpu.vector_store %arg4[%c1, %c0_4], %4 {strides = array<i32>} : memref<51x1000xf32, #tpu.memory_space<vmem>>, vector<1x1000xf32>,
    %6 = vector.extract_strided_slice %1 {offsets = [0, 2], sizes = [1, 1000], strides = [1, 1]} : vector<1x1050xf32> to vector<1x1000xf32>
    %c2 = arith.constant 2 : index
    %c0_5 = arith.constant 0 : index
    %7 = vector.load %arg4[%c2, %c0_5] : memref<51x1000xf32, #tpu.memory_space<vmem>>, vector<1x1000xf32>
    tpu.vector_store %arg4[%c2, %c0_5], %6 {strides = array<i32>} : memref<51x1000xf32, #tpu.memory_space<vmem>>, vector<1x1000xf32>,
    %8 = vector.extract_strided_slice %1 {offsets = [0, 3], sizes = [1, 1000], strides = [1, 1]} : vector<1x1050xf32> to vector<1x1000xf32>
    %c3 = arith.constant 3 : index
    %c0_6 = arith.constant 0 : index
    %9 = vector.load %arg4[%c3, %c0_6] : memref<51x1000xf32, #tpu.memory_space<vmem>>, vector<1x1000xf32>
    tpu.vector_store %arg4[%c3, %c0_6], %8 {strides = array<i32>} : memref<51x1000xf32, #tpu.memory_space<vmem>>, vector<1x1000xf32>,
    %10 = vector.extract_strided_slice %1 {offsets = [0, 4], sizes = [1, 1000], strides = [1, 1]} : vector<1x1050xf32> to vector<1x1000xf32>
    %c4 = arith.constant 4 : index
    %c0_7 = arith.constant 0 : index
    %11 = vector.load %arg4[%c4, %c0_7] : memref<51x1000xf32, #tpu.memory_space<vmem>>, vector<1x1000xf32>
    tpu.vector_store %arg4[%c4, %c0_7], %10 {strides = array<i32>} : memref<51x1000xf32, #tpu.memory_space<vmem>>, vector<1x1000xf32>,
    %12 = vector.extract_strided_slice %1 {offsets = [0, 5], sizes = [1, 1000], strides = [1, 1]} : vector<1x1050xf32> to vector<1x1000xf32>
    %c5 = arith.constant 5 : index
    %c0_8 = arith.constant 0 : index
    %13 = vector.load %arg4[%c5, %c0_8] : memref<51x1000xf32, #tpu.memory_space<vmem>>, vector<1x1000xf32>
    tpu.vector_store %arg4[%c5, %c0_8], %12 {strides = array<i32>} : memref<51x1000xf32, #tpu.memory_space<vmem>>, vector<1x1000xf32>,
    %14 = vector.extract_strided_slice %1 {offsets = [0, 6], sizes = [1, 1000], strides = [1, 1]} : vector<1x1050xf32> to vector<1x1000xf32>
    %c6 = arith.constant 6 : index
    %c0_9 = arith.constant 0 : index
    %15 = vector.load %arg4[%c6, %c0_9] : memref<51x1000xf32, #tpu.memory_space<vmem>>, vector<1x1000xf32>
    tpu.vector_store %arg4[%c6, %c0_9], %14 {strides = array<i32>} : memref<51x1000xf32, #tpu.memory_space<vmem>>, vector<1x1000xf32>,
    %16 = vector.extract_strided_slice %1 {offsets = [0, 7], sizes = [1, 1000], strides = [1, 1]} : vector<1x1050xf32> to vector<1x1000xf32>
    %c7 = arith.constant 7 : index
    %c0_10 = arith.constant 0 : index
    %17 = vector.load %arg4[%c7, %c0_10] : memref<51x1000xf32, #tpu.memory_space<vmem>>, vector<1x1000xf32>
    tpu.vector_store %arg4[%c7, %c0_10], %16 {strides = array<i32>} : memref<51x1000xf32, #tpu.memory_space<vmem>>, vector<1x1000xf32>,
    %18 = vector.extract_strided_slice %1 {offsets = [0, 8], sizes = [1, 1000], strides = [1, 1]} : vector<1x1050xf32> to vector<1x1000xf32>
    %c8 = arith.constant 8 : index
    %c0_11 = arith.constant 0 : index
    %19 = vector.load %arg4[%c8, %c0_11] : memref<51x1000xf32, #tpu.memory_space<vmem>>, vector<1x1000xf32>
    tpu.vector_store %arg4[%c8, %c0_11], %18 {strides = array<i32>} : memref<51x1000xf32, #tpu.memory_space<vmem>>, vector<1x1000xf32>,
    %20 = vector.extract_strided_slice %1 {offsets = [0, 9], sizes = [1, 1000], strides = [1, 1]} : vector<1x1050xf32> to vector<1x1000xf32>
    %c9 = arith.constant 9 : index
    %c0_12 = arith.constant 0 : index
    %21 = vector.load %arg4[%c9, %c0_12] : memref<51x1000xf32, #tpu.memory_space<vmem>>, vector<1x1000xf32>
    tpu.vector_store %arg4[%c9, %c0_12], %20 {strides = array<i32>} : memref<51x1000xf32, #tpu.memory_space<vmem>>, vector<1x1000xf32>,
    %22 = vector.extract_strided_slice %1 {offsets = [0, 10], sizes = [1, 1000], strides = [1, 1]} : vector<1x1050xf32> to vector<1x1000xf32>
    %c10 = arith.constant 10 : index
    %c0_13 = arith.constant 0 : index
    %23 = vector.load %arg4[%c10, %c0_13] : memref<51x1000xf32, #tpu.memory_space<vmem>>, vector<1x1000xf32>
    tpu.vector_store %arg4[%c10, %c0_13], %22 {strides = array<i32>} : memref<51x1000xf32, #tpu.memory_space<vmem>>, vector<1x1000xf32>,
    %24 = vector.extract_strided_slice %1 {offsets = [0, 11], sizes = [1, 1000], strides = [1, 1]} : vector<1x1050xf32> to vector<1x1000xf32>
    %c11 = arith.constant 11 : index
    %c0_14 = arith.constant 0 : index
    %25 = vector.load %arg4[%c11, %c0_14] : memref<51x1000xf32, #tpu.memory_space<vmem>>, vector<1x1000xf32>
    tpu.vector_store %arg4[%c11, %c0_14], %24 {strides = array<i32>} : memref<51x1000xf32, #tpu.memory_space<vmem>>, vector<1x1000xf32>,
    %26 = vector.extract_strided_slice %1 {offsets = [0, 12], sizes = [1, 1000], strides = [1, 1]} : vector<1x1050xf32> to vector<1x1000xf32>
    %c12 = arith.constant 12 : index
    %c0_15 = arith.constant 0 : index
    %27 = vector.load %arg4[%c12, %c0_15] : memref<51x1000xf32, #tpu.memory_space<vmem>>, vector<1x1000xf32>
    tpu.vector_store %arg4[%c12, %c0_15], %26 {strides = array<i32>} : memref<51x1000xf32, #tpu.memory_space<vmem>>, vector<1x1000xf32>,
    %28 = vector.extract_strided_slice %1 {offsets = [0, 13], sizes = [1, 1000], strides = [1, 1]} : vector<1x1050xf32> to vector<1x1000xf32>
    %c13 = arith.constant 13 : index
    %c0_16 = arith.constant 0 : index
    %29 = vector.load %arg4[%c13, %c0_16] : memref<51x1000xf32, #tpu.memory_space<vmem>>, vector<1x1000xf32>
    tpu.vector_store %arg4[%c13, %c0_16], %28 {strides = array<i32>} : memref<51x1000xf32, #tpu.memory_space<vmem>>, vector<1x1000xf32>,
    %30 = vector.extract_strided_slice %1 {offsets = [0, 14], sizes = [1, 1000], strides = [1, 1]} : vector<1x1050xf32> to vector<1x1000xf32>
    %c14 = arith.constant 14 : index
    %c0_17 = arith.constant 0 : index
    %31 = vector.load %arg4[%c14, %c0_17] : memref<51x1000xf32, #tpu.memory_space<vmem>>, vector<1x1000xf32>
    tpu.vector_store %arg4[%c14, %c0_17], %30 {strides = array<i32>} : memref<51x1000xf32, #tpu.memory_space<vmem>>, vector<1x1000xf32>,
    %32 = vector.extract_strided_slice %1 {offsets = [0, 15], sizes = [1, 1000], strides = [1, 1]} : vector<1x1050xf32> to vector<1x1000xf32>
    %c15 = arith.constant 15 : index
    %c0_18 = arith.constant 0 : index
    %33 = vector.load %arg4[%c15, %c0_18] : memref<51x1000xf32, #tpu.memory_space<vmem>>, vector<1x1000xf32>
    tpu.vector_store %arg4[%c15, %c0_18], %32 {strides = array<i32>} : memref<51x1000xf32, #tpu.memory_space<vmem>>, vector<1x1000xf32>,
    %34 = vector.extract_strided_slice %1 {offsets = [0, 16], sizes = [1, 1000], strides = [1, 1]} : vector<1x1050xf32> to vector<1x1000xf32>
    %c16 = arith.constant 16 : index
    %c0_19 = arith.constant 0 : index
    %35 = vector.load %arg4[%c16, %c0_19] : memref<51x1000xf32, #tpu.memory_space<vmem>>, vector<1x1000xf32>
    tpu.vector_store %arg4[%c16, %c0_19], %34 {strides = array<i32>} : memref<51x1000xf32, #tpu.memory_space<vmem>>, vector<1x1000xf32>,
    %36 = vector.extract_strided_slice %1 {offsets = [0, 17], sizes = [1, 1000], strides = [1, 1]} : vector<1x1050xf32> to vector<1x1000xf32>
    %c17 = arith.constant 17 : index
    %c0_20 = arith.constant 0 : index
    %37 = vector.load %arg4[%c17, %c0_20] : memref<51x1000xf32, #tpu.memory_space<vmem>>, vector<1x1000xf32>
    tpu.vector_store %arg4[%c17, %c0_20], %36 {strides = array<i32>} : memref<51x1000xf32, #tpu.memory_space<vmem>>, vector<1x1000xf32>,
    %38 = vector.extract_strided_slice %1 {offsets = [0, 18], sizes = [1, 1000], strides = [1, 1]} : vector<1x1050xf32> to vector<1x1000xf32>
    %c18 = arith.constant 18 : index
    %c0_21 = arith.constant 0 : index
    %39 = vector.load %arg4[%c18, %c0_21] : memref<51x1000xf32, #tpu.memory_space<vmem>>, vector<1x1000xf32>
    tpu.vector_store %arg4[%c18, %c0_21], %38 {strides = array<i32>} : memref<51x1000xf32, #tpu.memory_space<vmem>>, vector<1x1000xf32>,
    %40 = vector.extract_strided_slice %1 {offsets = [0, 19], sizes = [1, 1000], strides = [1, 1]} : vector<1x1050xf32> to vector<1x1000xf32>
    %c19 = arith.constant 19 : index
    %c0_22 = arith.constant 0 : index
    %41 = vector.load %arg4[%c19, %c0_22] : memref<51x1000xf32, #tpu.memory_space<vmem>>, vector<1x1000xf32>
    tpu.vector_store %arg4[%c19, %c0_22], %40 {strides = array<i32>} : memref<51x1000xf32, #tpu.memory_space<vmem>>, vector<1x1000xf32>,
    %42 = vector.extract_strided_slice %1 {offsets = [0, 20], sizes = [1, 1000], strides = [1, 1]} : vector<1x1050xf32> to vector<1x1000xf32>
    %c20 = arith.constant 20 : index
    %c0_23 = arith.constant 0 : index
    %43 = vector.load %arg4[%c20, %c0_23] : memref<51x1000xf32, #tpu.memory_space<vmem>>, vector<1x1000xf32>
    tpu.vector_store %arg4[%c20, %c0_23], %42 {strides = array<i32>} : memref<51x1000xf32, #tpu.memory_space<vmem>>, vector<1x1000xf32>,
    %44 = vector.extract_strided_slice %1 {offsets = [0, 21], sizes = [1, 1000], strides = [1, 1]} : vector<1x1050xf32> to vector<1x1000xf32>
    %c21 = arith.constant 21 : index
    %c0_24 = arith.constant 0 : index
    %45 = vector.load %arg4[%c21, %c0_24] : memref<51x1000xf32, #tpu.memory_space<vmem>>, vector<1x1000xf32>
    tpu.vector_store %arg4[%c21, %c0_24], %44 {strides = array<i32>} : memref<51x1000xf32, #tpu.memory_space<vmem>>, vector<1x1000xf32>,
    %46 = vector.extract_strided_slice %1 {offsets = [0, 22], sizes = [1, 1000], strides = [1, 1]} : vector<1x1050xf32> to vector<1x1000xf32>
    %c22 = arith.constant 22 : index
    %c0_25 = arith.constant 0 : index
    %47 = vector.load %arg4[%c22, %c0_25] : memref<51x1000xf32, #tpu.memory_space<vmem>>, vector<1x1000xf32>
    tpu.vector_store %arg4[%c22, %c0_25], %46 {strides = array<i32>} : memref<51x1000xf32, #tpu.memory_space<vmem>>, vector<1x1000xf32>,
    %48 = vector.extract_strided_slice %1 {offsets = [0, 23], sizes = [1, 1000], strides = [1, 1]} : vector<1x1050xf32> to vector<1x1000xf32>
    %c23 = arith.constant 23 : index
    %c0_26 = arith.constant 0 : index
    %49 = vector.load %arg4[%c23, %c0_26] : memref<51x1000xf32, #tpu.memory_space<vmem>>, vector<1x1000xf32>
    tpu.vector_store %arg4[%c23, %c0_26], %48 {strides = array<i32>} : memref<51x1000xf32, #tpu.memory_space<vmem>>, vector<1x1000xf32>,
    %50 = vector.extract_strided_slice %1 {offsets = [0, 24], sizes = [1, 1000], strides = [1, 1]} : vector<1x1050xf32> to vector<1x1000xf32>
    %c24 = arith.constant 24 : index
    %c0_27 = arith.constant 0 : index
    %51 = vector.load %arg4[%c24, %c0_27] : memref<51x1000xf32, #tpu.memory_space<vmem>>, vector<1x1000xf32>
    tpu.vector_store %arg4[%c24, %c0_27], %50 {strides = array<i32>} : memref<51x1000xf32, #tpu.memory_space<vmem>>, vector<1x1000xf32>,
    %52 = vector.extract_strided_slice %1 {offsets = [0, 25], sizes = [1, 1000], strides = [1, 1]} : vector<1x1050xf32> to vector<1x1000xf32>
    %c25 = arith.constant 25 : index
    %c0_28 = arith.constant 0 : index
    %53 = vector.load %arg4[%c25, %c0_28] : memref<51x1000xf32, #tpu.memory_space<vmem>>, vector<1x1000xf32>
    tpu.vector_store %arg4[%c25, %c0_28], %52 {strides = array<i32>} : memref<51x1000xf32, #tpu.memory_space<vmem>>, vector<1x1000xf32>,
    %54 = vector.extract_strided_slice %1 {offsets = [0, 26], sizes = [1, 1000], strides = [1, 1]} : vector<1x1050xf32> to vector<1x1000xf32>
    %c26 = arith.constant 26 : index
    %c0_29 = arith.constant 0 : index
    %55 = vector.load %arg4[%c26, %c0_29] : memref<51x1000xf32, #tpu.memory_space<vmem>>, vector<1x1000xf32>
    tpu.vector_store %arg4[%c26, %c0_29], %54 {strides = array<i32>} : memref<51x1000xf32, #tpu.memory_space<vmem>>, vector<1x1000xf32>,
    %56 = vector.extract_strided_slice %1 {offsets = [0, 27], sizes = [1, 1000], strides = [1, 1]} : vector<1x1050xf32> to vector<1x1000xf32>
    %c27 = arith.constant 27 : index
    %c0_30 = arith.constant 0 : index
    %57 = vector.load %arg4[%c27, %c0_30] : memref<51x1000xf32, #tpu.memory_space<vmem>>, vector<1x1000xf32>
    tpu.vector_store %arg4[%c27, %c0_30], %56 {strides = array<i32>} : memref<51x1000xf32, #tpu.memory_space<vmem>>, vector<1x1000xf32>,
    %58 = vector.extract_strided_slice %1 {offsets = [0, 28], sizes = [1, 1000], strides = [1, 1]} : vector<1x1050xf32> to vector<1x1000xf32>
    %c28 = arith.constant 28 : index
    %c0_31 = arith.constant 0 : index
    %59 = vector.load %arg4[%c28, %c0_31] : memref<51x1000xf32, #tpu.memory_space<vmem>>, vector<1x1000xf32>
    tpu.vector_store %arg4[%c28, %c0_31], %58 {strides = array<i32>} : memref<51x1000xf32, #tpu.memory_space<vmem>>, vector<1x1000xf32>,
    %60 = vector.extract_strided_slice %1 {offsets = [0, 29], sizes = [1, 1000], strides = [1, 1]} : vector<1x1050xf32> to vector<1x1000xf32>
    %c29 = arith.constant 29 : index
    %c0_32 = arith.constant 0 : index
    %61 = vector.load %arg4[%c29, %c0_32] : memref<51x1000xf32, #tpu.memory_space<vmem>>, vector<1x1000xf32>
    tpu.vector_store %arg4[%c29, %c0_32], %60 {strides = array<i32>} : memref<51x1000xf32, #tpu.memory_space<vmem>>, vector<1x1000xf32>,
    %62 = vector.extract_strided_slice %1 {offsets = [0, 30], sizes = [1, 1000], strides = [1, 1]} : vector<1x1050xf32> to vector<1x1000xf32>
    %c30 = arith.constant 30 : index
    %c0_33 = arith.constant 0 : index
    %63 = vector.load %arg4[%c30, %c0_33] : memref<51x1000xf32, #tpu.memory_space<vmem>>, vector<1x1000xf32>
    tpu.vector_store %arg4[%c30, %c0_33], %62 {strides = array<i32>} : memref<51x1000xf32, #tpu.memory_space<vmem>>, vector<1x1000xf32>,
    %64 = vector.extract_strided_slice %1 {offsets = [0, 31], sizes = [1, 1000], strides = [1, 1]} : vector<1x1050xf32> to vector<1x1000xf32>
    %c31 = arith.constant 31 : index
    %c0_34 = arith.constant 0 : index
    %65 = vector.load %arg4[%c31, %c0_34] : memref<51x1000xf32, #tpu.memory_space<vmem>>, vector<1x1000xf32>
    tpu.vector_store %arg4[%c31, %c0_34], %64 {strides = array<i32>} : memref<51x1000xf32, #tpu.memory_space<vmem>>, vector<1x1000xf32>,
    %66 = vector.extract_strided_slice %1 {offsets = [0, 32], sizes = [1, 1000], strides = [1, 1]} : vector<1x1050xf32> to vector<1x1000xf32>
    %c32 = arith.constant 32 : index
    %c0_35 = arith.constant 0 : index
    %67 = vector.load %arg4[%c32, %c0_35] : memref<51x1000xf32, #tpu.memory_space<vmem>>, vector<1x1000xf32>
    tpu.vector_store %arg4[%c32, %c0_35], %66 {strides = array<i32>} : memref<51x1000xf32, #tpu.memory_space<vmem>>, vector<1x1000xf32>,
    %68 = vector.extract_strided_slice %1 {offsets = [0, 33], sizes = [1, 1000], strides = [1, 1]} : vector<1x1050xf32> to vector<1x1000xf32>
    %c33 = arith.constant 33 : index
    %c0_36 = arith.constant 0 : index
    %69 = vector.load %arg4[%c33, %c0_36] : memref<51x1000xf32, #tpu.memory_space<vmem>>, vector<1x1000xf32>
    tpu.vector_store %arg4[%c33, %c0_36], %68 {strides = array<i32>} : memref<51x1000xf32, #tpu.memory_space<vmem>>, vector<1x1000xf32>,
    %70 = vector.extract_strided_slice %1 {offsets = [0, 34], sizes = [1, 1000], strides = [1, 1]} : vector<1x1050xf32> to vector<1x1000xf32>
    %c34 = arith.constant 34 : index
    %c0_37 = arith.constant 0 : index
    %71 = vector.load %arg4[%c34, %c0_37] : memref<51x1000xf32, #tpu.memory_space<vmem>>, vector<1x1000xf32>
    tpu.vector_store %arg4[%c34, %c0_37], %70 {strides = array<i32>} : memref<51x1000xf32, #tpu.memory_space<vmem>>, vector<1x1000xf32>,
    %72 = vector.extract_strided_slice %1 {offsets = [0, 35], sizes = [1, 1000], strides = [1, 1]} : vector<1x1050xf32> to vector<1x1000xf32>
    %c35 = arith.constant 35 : index
    %c0_38 = arith.constant 0 : index
    %73 = vector.load %arg4[%c35, %c0_38] : memref<51x1000xf32, #tpu.memory_space<vmem>>, vector<1x1000xf32>
    tpu.vector_store %arg4[%c35, %c0_38], %72 {strides = array<i32>} : memref<51x1000xf32, #tpu.memory_space<vmem>>, vector<1x1000xf32>,
    %74 = vector.extract_strided_slice %1 {offsets = [0, 36], sizes = [1, 1000], strides = [1, 1]} : vector<1x1050xf32> to vector<1x1000xf32>
    %c36 = arith.constant 36 : index
    %c0_39 = arith.constant 0 : index
    %75 = vector.load %arg4[%c36, %c0_39] : memref<51x1000xf32, #tpu.memory_space<vmem>>, vector<1x1000xf32>
    tpu.vector_store %arg4[%c36, %c0_39], %74 {strides = array<i32>} : memref<51x1000xf32, #tpu.memory_space<vmem>>, vector<1x1000xf32>,
    %76 = vector.extract_strided_slice %1 {offsets = [0, 37], sizes = [1, 1000], strides = [1, 1]} : vector<1x1050xf32> to vector<1x1000xf32>
    %c37 = arith.constant 37 : index
    %c0_40 = arith.constant 0 : index
    %77 = vector.load %arg4[%c37, %c0_40] : memref<51x1000xf32, #tpu.memory_space<vmem>>, vector<1x1000xf32>
    tpu.vector_store %arg4[%c37, %c0_40], %76 {strides = array<i32>} : memref<51x1000xf32, #tpu.memory_space<vmem>>, vector<1x1000xf32>,
    %78 = vector.extract_strided_slice %1 {offsets = [0, 38], sizes = [1, 1000], strides = [1, 1]} : vector<1x1050xf32> to vector<1x1000xf32>
    %c38 = arith.constant 38 : index
    %c0_41 = arith.constant 0 : index
    %79 = vector.load %arg4[%c38, %c0_41] : memref<51x1000xf32, #tpu.memory_space<vmem>>, vector<1x1000xf32>
    tpu.vector_store %arg4[%c38, %c0_41], %78 {strides = array<i32>} : memref<51x1000xf32, #tpu.memory_space<vmem>>, vector<1x1000xf32>,
    %80 = vector.extract_strided_slice %1 {offsets = [0, 39], sizes = [1, 1000], strides = [1, 1]} : vector<1x1050xf32> to vector<1x1000xf32>
    %c39 = arith.constant 39 : index
    %c0_42 = arith.constant 0 : index
    %81 = vector.load %arg4[%c39, %c0_42] : memref<51x1000xf32, #tpu.memory_space<vmem>>, vector<1x1000xf32>
    tpu.vector_store %arg4[%c39, %c0_42], %80 {strides = array<i32>} : memref<51x1000xf32, #tpu.memory_space<vmem>>, vector<1x1000xf32>,
    %82 = vector.extract_strided_slice %1 {offsets = [0, 40], sizes = [1, 1000], strides = [1, 1]} : vector<1x1050xf32> to vector<1x1000xf32>
    %c40 = arith.constant 40 : index
    %c0_43 = arith.constant 0 : index
    %83 = vector.load %arg4[%c40, %c0_43] : memref<51x1000xf32, #tpu.memory_space<vmem>>, vector<1x1000xf32>
    tpu.vector_store %arg4[%c40, %c0_43], %82 {strides = array<i32>} : memref<51x1000xf32, #tpu.memory_space<vmem>>, vector<1x1000xf32>,
    %84 = vector.extract_strided_slice %1 {offsets = [0, 41], sizes = [1, 1000], strides = [1, 1]} : vector<1x1050xf32> to vector<1x1000xf32>
    %c41 = arith.constant 41 : index
    %c0_44 = arith.constant 0 : index
    %85 = vector.load %arg4[%c41, %c0_44] : memref<51x1000xf32, #tpu.memory_space<vmem>>, vector<1x1000xf32>
    tpu.vector_store %arg4[%c41, %c0_44], %84 {strides = array<i32>} : memref<51x1000xf32, #tpu.memory_space<vmem>>, vector<1x1000xf32>,
    %86 = vector.extract_strided_slice %1 {offsets = [0, 42], sizes = [1, 1000], strides = [1, 1]} : vector<1x1050xf32> to vector<1x1000xf32>
    %c42 = arith.constant 42 : index
    %c0_45 = arith.constant 0 : index
    %87 = vector.load %arg4[%c42, %c0_45] : memref<51x1000xf32, #tpu.memory_space<vmem>>, vector<1x1000xf32>
    tpu.vector_store %arg4[%c42, %c0_45], %86 {strides = array<i32>} : memref<51x1000xf32, #tpu.memory_space<vmem>>, vector<1x1000xf32>,
    %88 = vector.extract_strided_slice %1 {offsets = [0, 43], sizes = [1, 1000], strides = [1, 1]} : vector<1x1050xf32> to vector<1x1000xf32>
    %c43 = arith.constant 43 : index
    %c0_46 = arith.constant 0 : index
    %89 = vector.load %arg4[%c43, %c0_46] : memref<51x1000xf32, #tpu.memory_space<vmem>>, vector<1x1000xf32>
    tpu.vector_store %arg4[%c43, %c0_46], %88 {strides = array<i32>} : memref<51x1000xf32, #tpu.memory_space<vmem>>, vector<1x1000xf32>,
    %90 = vector.extract_strided_slice %1 {offsets = [0, 44], sizes = [1, 1000], strides = [1, 1]} : vector<1x1050xf32> to vector<1x1000xf32>
    %c44 = arith.constant 44 : index
    %c0_47 = arith.constant 0 : index
    %91 = vector.load %arg4[%c44, %c0_47] : memref<51x1000xf32, #tpu.memory_space<vmem>>, vector<1x1000xf32>
    tpu.vector_store %arg4[%c44, %c0_47], %90 {strides = array<i32>} : memref<51x1000xf32, #tpu.memory_space<vmem>>, vector<1x1000xf32>,
    %92 = vector.extract_strided_slice %1 {offsets = [0, 45], sizes = [1, 1000], strides = [1, 1]} : vector<1x1050xf32> to vector<1x1000xf32>
    %c45 = arith.constant 45 : index
    %c0_48 = arith.constant 0 : index
    %93 = vector.load %arg4[%c45, %c0_48] : memref<51x1000xf32, #tpu.memory_space<vmem>>, vector<1x1000xf32>
    tpu.vector_store %arg4[%c45, %c0_48], %92 {strides = array<i32>} : memref<51x1000xf32, #tpu.memory_space<vmem>>, vector<1x1000xf32>,
    %94 = vector.extract_strided_slice %1 {offsets = [0, 46], sizes = [1, 1000], strides = [1, 1]} : vector<1x1050xf32> to vector<1x1000xf32>
    %c46 = arith.constant 46 : index
    %c0_49 = arith.constant 0 : index
    %95 = vector.load %arg4[%c46, %c0_49] : memref<51x1000xf32, #tpu.memory_space<vmem>>, vector<1x1000xf32>
    tpu.vector_store %arg4[%c46, %c0_49], %94 {strides = array<i32>} : memref<51x1000xf32, #tpu.memory_space<vmem>>, vector<1x1000xf32>,
    %96 = vector.extract_strided_slice %1 {offsets = [0, 47], sizes = [1, 1000], strides = [1, 1]} : vector<1x1050xf32> to vector<1x1000xf32>
    %c47 = arith.constant 47 : index
    %c0_50 = arith.constant 0 : index
    %97 = vector.load %arg4[%c47, %c0_50] : memref<51x1000xf32, #tpu.memory_space<vmem>>, vector<1x1000xf32>
    tpu.vector_store %arg4[%c47, %c0_50], %96 {strides = array<i32>} : memref<51x1000xf32, #tpu.memory_space<vmem>>, vector<1x1000xf32>,
    %98 = vector.extract_strided_slice %1 {offsets = [0, 48], sizes = [1, 1000], strides = [1, 1]} : vector<1x1050xf32> to vector<1x1000xf32>
    %c48 = arith.constant 48 : index
    %c0_51 = arith.constant 0 : index
    %99 = vector.load %arg4[%c48, %c0_51] : memref<51x1000xf32, #tpu.memory_space<vmem>>, vector<1x1000xf32>
    tpu.vector_store %arg4[%c48, %c0_51], %98 {strides = array<i32>} : memref<51x1000xf32, #tpu.memory_space<vmem>>, vector<1x1000xf32>,
    %100 = vector.extract_strided_slice %1 {offsets = [0, 49], sizes = [1, 1000], strides = [1, 1]} : vector<1x1050xf32> to vector<1x1000xf32>
    %c49 = arith.constant 49 : index
    %c0_52 = arith.constant 0 : index
    %101 = vector.load %arg4[%c49, %c0_52] : memref<51x1000xf32, #tpu.memory_space<vmem>>, vector<1x1000xf32>
    tpu.vector_store %arg4[%c49, %c0_52], %100 {strides = array<i32>} : memref<51x1000xf32, #tpu.memory_space<vmem>>, vector<1x1000xf32>,
    %102 = vector.extract_strided_slice %1 {offsets = [0, 50], sizes = [1, 1000], strides = [1, 1]} : vector<1x1050xf32> to vector<1x1000xf32>
    %c50 = arith.constant 50 : index
    %c0_53 = arith.constant 0 : index
    %103 = vector.load %arg4[%c50, %c0_53] : memref<51x1000xf32, #tpu.memory_space<vmem>>, vector<1x1000xf32>
    tpu.vector_store %arg4[%c50, %c0_53], %102 {strides = array<i32>} : memref<51x1000xf32, #tpu.memory_space<vmem>>, vector<1x1000xf32>,
    %c0_54 = arith.constant 0 : index
    %c0_55 = arith.constant 0 : index
    %104 = vector.load %arg2[%c0_54, %c0_55] : memref<1x51xf32, #tpu.memory_space<vmem>>, vector<1x51xf32>
    %c0_56 = arith.constant 0 : index
    %c0_57 = arith.constant 0 : index
    %105 = vector.load %arg4[%c0_56, %c0_57] : memref<51x1000xf32, #tpu.memory_space<vmem>>, vector<51x1000xf32>
    %cst = arith.constant dense<0.000000e+00> : vector<1x1000xf32>
    %106 = tpu.matmul %104, %105, %cst {dimension_numbers = #tpu.dot_dimension_numbers<[1], [0], [0], [1], [0, 0, 1, 1], [], []>} : vector<1x51xf32>, vector<51x1000xf32>, vector<1x1000xf32> -> vector<1x1000xf32>
    %c0_58 = arith.constant 0 : index
    %c0_59 = arith.constant 0 : index
    %c0_60 = arith.constant 0 : index
    %107 = vector.load %arg3[%c0_58, %c0_59, %c0_60] : memref<1x1x1000xf32, #tpu.memory_space<vmem>>, vector<1x1x1000xf32>
    %108 = vector.shape_cast %107 : vector<1x1x1000xf32> to vector<1x1000xf32>
    %109 = vector.shape_cast %106 : vector<1x1000xf32> to vector<1x1x1000xf32>
    tpu.vector_store %arg3[%c0_58, %c0_59, %c0_60], %109 {strides = array<i32>} : memref<1x1x1000xf32, #tpu.memory_space<vmem>>, vector<1x1x1000xf32>,
    return
  }
  func.func @transform_0(%arg0: i32) -> (i32, i32, i32) {
    %c0_i32 = arith.constant 0 : i32
    %c0_i32_0 = arith.constant 0 : i32
    %c0_i32_1 = arith.constant 0 : i32
    return %arg0, %c0_i32, %c0_i32_0 : i32, i32, i32
  }
  func.func @transform_1(%arg0: i32) -> (i32, i32) {
    %c0_i32 = arith.constant 0 : i32
    %c0_i32_0 = arith.constant 0 : i32
    %c0_i32_1 = arith.constant 0 : i32
    return %c0_i32, %c0_i32_0 : i32, i32
  }
  func.func @transform_2(%arg0: i32) -> (i32, i32, i32) {
    %c0_i32 = arith.constant 0 : i32
    %c0_i32_0 = arith.constant 0 : i32
    %c0_i32_1 = arith.constant 0 : i32
    return %arg0, %c0_i32, %c0_i32_0 : i32, i32, i32
  }
}

module attributes {stable_mosaic.version = 11 : i64} {
  func.func @_conv_mxu_kernel(%arg0: i32, %arg1: memref<1x1x1050xf32, #tpu.memory_space<vmem>>, %arg2: memref<3x51xf32, #tpu.memory_space<vmem>>, %arg3: memref<1x3x1000xf32, #tpu.memory_space<vmem>>, %arg4: memref<51x1000xf32, #tpu.memory_space<vmem>>) attributes {dimension_semantics = [#tpu.dimension_semantics<parallel>], iteration_bounds = array<i64: 2>, scalar_prefetch = 0 : i64, scratch_operands = 1 : i64, tpu.core_type = #tpu.core_type<tc>, window_params = [{transform_indices = @transform_0, window_bounds = array<i64: 1, 1, 1050>}, {pipeline_mode = #tpu.pipeline_mode<synchronous>, transform_indices = @transform_1, window_bounds = array<i64: 3, 51>}, {transform_indices = @transform_2, window_bounds = array<i64: 1, 3, 1000>}]} {
    %c0 = arith.constant 0 : index
    %c0_0 = arith.constant 0 : index
    %c0_1 = arith.constant 0 : index
    %0 = vector.load %arg1[%c0, %c0_0, %c0_1] : memref<1x1x1050xf32, #tpu.memory_space<vmem>>, vector<1x1x1050xf32>
    %1 = vector.shape_cast %0 : vector<1x1x1050xf32> to vector<1x1050xf32>
    %2 = vector.extract_strided_slice %1 {offsets = [0, 0], sizes = [1, 1000], strides = [1, 1]} : vector<1x1050xf32> to vector<1x1000xf32>
    %c0_2 = arith.constant 0 : index
    %c0_3 = arith.constant 0 : index
    %3 = vector.load %arg4[%c0_2, %c0_3] : memref<51x1000xf32, #tpu.memory_space<vmem>>, vector<1x1000xf32>
    tpu.vector_store %arg4[%c0_2, %c0_3], %2 {strides = array<i32>} : memref<51x1000xf32, #tpu.memory_space<vmem>>, vector<1x1000xf32>,
    %4 = vector.extract_strided_slice %1 {offsets = [0, 1], sizes = [1, 1000], strides = [1, 1]} : vector<1x1050xf32> to vector<1x1000xf32>
    %c1 = arith.constant 1 : index
    %c0_4 = arith.constant 0 : index
    %5 = vector.load %arg4[%c1, %c0_4] : memref<51x1000xf32, #tpu.memory_space<vmem>>, vector<1x1000xf32>
    tpu.vector_store %arg4[%c1, %c0_4], %4 {strides = array<i32>} : memref<51x1000xf32, #tpu.memory_space<vmem>>, vector<1x1000xf32>,
    %6 = vector.extract_strided_slice %1 {offsets = [0, 2], sizes = [1, 1000], strides = [1, 1]} : vector<1x1050xf32> to vector<1x1000xf32>
    %c2 = arith.constant 2 : index
    %c0_5 = arith.constant 0 : index
    %7 = vector.load %arg4[%c2, %c0_5] : memref<51x1000xf32, #tpu.memory_space<vmem>>, vector<1x1000xf32>
    tpu.vector_store %arg4[%c2, %c0_5], %6 {strides = array<i32>} : memref<51x1000xf32, #tpu.memory_space<vmem>>, vector<1x1000xf32>,
    %8 = vector.extract_strided_slice %1 {offsets = [0, 3], sizes = [1, 1000], strides = [1, 1]} : vector<1x1050xf32> to vector<1x1000xf32>
    %c3 = arith.constant 3 : index
    %c0_6 = arith.constant 0 : index
    %9 = vector.load %arg4[%c3, %c0_6] : memref<51x1000xf32, #tpu.memory_space<vmem>>, vector<1x1000xf32>
    tpu.vector_store %arg4[%c3, %c0_6], %8 {strides = array<i32>} : memref<51x1000xf32, #tpu.memory_space<vmem>>, vector<1x1000xf32>,
    %10 = vector.extract_strided_slice %1 {offsets = [0, 4], sizes = [1, 1000], strides = [1, 1]} : vector<1x1050xf32> to vector<1x1000xf32>
    %c4 = arith.constant 4 : index
    %c0_7 = arith.constant 0 : index
    %11 = vector.load %arg4[%c4, %c0_7] : memref<51x1000xf32, #tpu.memory_space<vmem>>, vector<1x1000xf32>
    tpu.vector_store %arg4[%c4, %c0_7], %10 {strides = array<i32>} : memref<51x1000xf32, #tpu.memory_space<vmem>>, vector<1x1000xf32>,
    %12 = vector.extract_strided_slice %1 {offsets = [0, 5], sizes = [1, 1000], strides = [1, 1]} : vector<1x1050xf32> to vector<1x1000xf32>
    %c5 = arith.constant 5 : index
    %c0_8 = arith.constant 0 : index
    %13 = vector.load %arg4[%c5, %c0_8] : memref<51x1000xf32, #tpu.memory_space<vmem>>, vector<1x1000xf32>
    tpu.vector_store %arg4[%c5, %c0_8], %12 {strides = array<i32>} : memref<51x1000xf32, #tpu.memory_space<vmem>>, vector<1x1000xf32>,
    %14 = vector.extract_strided_slice %1 {offsets = [0, 6], sizes = [1, 1000], strides = [1, 1]} : vector<1x1050xf32> to vector<1x1000xf32>
    %c6 = arith.constant 6 : index
    %c0_9 = arith.constant 0 : index
    %15 = vector.load %arg4[%c6, %c0_9] : memref<51x1000xf32, #tpu.memory_space<vmem>>, vector<1x1000xf32>
    tpu.vector_store %arg4[%c6, %c0_9], %14 {strides = array<i32>} : memref<51x1000xf32, #tpu.memory_space<vmem>>, vector<1x1000xf32>,
    %16 = vector.extract_strided_slice %1 {offsets = [0, 7], sizes = [1, 1000], strides = [1, 1]} : vector<1x1050xf32> to vector<1x1000xf32>
    %c7 = arith.constant 7 : index
    %c0_10 = arith.constant 0 : index
    %17 = vector.load %arg4[%c7, %c0_10] : memref<51x1000xf32, #tpu.memory_space<vmem>>, vector<1x1000xf32>
    tpu.vector_store %arg4[%c7, %c0_10], %16 {strides = array<i32>} : memref<51x1000xf32, #tpu.memory_space<vmem>>, vector<1x1000xf32>,
    %18 = vector.extract_strided_slice %1 {offsets = [0, 8], sizes = [1, 1000], strides = [1, 1]} : vector<1x1050xf32> to vector<1x1000xf32>
    %c8 = arith.constant 8 : index
    %c0_11 = arith.constant 0 : index
    %19 = vector.load %arg4[%c8, %c0_11] : memref<51x1000xf32, #tpu.memory_space<vmem>>, vector<1x1000xf32>
    tpu.vector_store %arg4[%c8, %c0_11], %18 {strides = array<i32>} : memref<51x1000xf32, #tpu.memory_space<vmem>>, vector<1x1000xf32>,
    %20 = vector.extract_strided_slice %1 {offsets = [0, 9], sizes = [1, 1000], strides = [1, 1]} : vector<1x1050xf32> to vector<1x1000xf32>
    %c9 = arith.constant 9 : index
    %c0_12 = arith.constant 0 : index
    %21 = vector.load %arg4[%c9, %c0_12] : memref<51x1000xf32, #tpu.memory_space<vmem>>, vector<1x1000xf32>
    tpu.vector_store %arg4[%c9, %c0_12], %20 {strides = array<i32>} : memref<51x1000xf32, #tpu.memory_space<vmem>>, vector<1x1000xf32>,
    %22 = vector.extract_strided_slice %1 {offsets = [0, 10], sizes = [1, 1000], strides = [1, 1]} : vector<1x1050xf32> to vector<1x1000xf32>
    %c10 = arith.constant 10 : index
    %c0_13 = arith.constant 0 : index
    %23 = vector.load %arg4[%c10, %c0_13] : memref<51x1000xf32, #tpu.memory_space<vmem>>, vector<1x1000xf32>
    tpu.vector_store %arg4[%c10, %c0_13], %22 {strides = array<i32>} : memref<51x1000xf32, #tpu.memory_space<vmem>>, vector<1x1000xf32>,
    %24 = vector.extract_strided_slice %1 {offsets = [0, 11], sizes = [1, 1000], strides = [1, 1]} : vector<1x1050xf32> to vector<1x1000xf32>
    %c11 = arith.constant 11 : index
    %c0_14 = arith.constant 0 : index
    %25 = vector.load %arg4[%c11, %c0_14] : memref<51x1000xf32, #tpu.memory_space<vmem>>, vector<1x1000xf32>
    tpu.vector_store %arg4[%c11, %c0_14], %24 {strides = array<i32>} : memref<51x1000xf32, #tpu.memory_space<vmem>>, vector<1x1000xf32>,
    %26 = vector.extract_strided_slice %1 {offsets = [0, 12], sizes = [1, 1000], strides = [1, 1]} : vector<1x1050xf32> to vector<1x1000xf32>
    %c12 = arith.constant 12 : index
    %c0_15 = arith.constant 0 : index
    %27 = vector.load %arg4[%c12, %c0_15] : memref<51x1000xf32, #tpu.memory_space<vmem>>, vector<1x1000xf32>
    tpu.vector_store %arg4[%c12, %c0_15], %26 {strides = array<i32>} : memref<51x1000xf32, #tpu.memory_space<vmem>>, vector<1x1000xf32>,
    %28 = vector.extract_strided_slice %1 {offsets = [0, 13], sizes = [1, 1000], strides = [1, 1]} : vector<1x1050xf32> to vector<1x1000xf32>
    %c13 = arith.constant 13 : index
    %c0_16 = arith.constant 0 : index
    %29 = vector.load %arg4[%c13, %c0_16] : memref<51x1000xf32, #tpu.memory_space<vmem>>, vector<1x1000xf32>
    tpu.vector_store %arg4[%c13, %c0_16], %28 {strides = array<i32>} : memref<51x1000xf32, #tpu.memory_space<vmem>>, vector<1x1000xf32>,
    %30 = vector.extract_strided_slice %1 {offsets = [0, 14], sizes = [1, 1000], strides = [1, 1]} : vector<1x1050xf32> to vector<1x1000xf32>
    %c14 = arith.constant 14 : index
    %c0_17 = arith.constant 0 : index
    %31 = vector.load %arg4[%c14, %c0_17] : memref<51x1000xf32, #tpu.memory_space<vmem>>, vector<1x1000xf32>
    tpu.vector_store %arg4[%c14, %c0_17], %30 {strides = array<i32>} : memref<51x1000xf32, #tpu.memory_space<vmem>>, vector<1x1000xf32>,
    %32 = vector.extract_strided_slice %1 {offsets = [0, 15], sizes = [1, 1000], strides = [1, 1]} : vector<1x1050xf32> to vector<1x1000xf32>
    %c15 = arith.constant 15 : index
    %c0_18 = arith.constant 0 : index
    %33 = vector.load %arg4[%c15, %c0_18] : memref<51x1000xf32, #tpu.memory_space<vmem>>, vector<1x1000xf32>
    tpu.vector_store %arg4[%c15, %c0_18], %32 {strides = array<i32>} : memref<51x1000xf32, #tpu.memory_space<vmem>>, vector<1x1000xf32>,
    %34 = vector.extract_strided_slice %1 {offsets = [0, 16], sizes = [1, 1000], strides = [1, 1]} : vector<1x1050xf32> to vector<1x1000xf32>
    %c16 = arith.constant 16 : index
    %c0_19 = arith.constant 0 : index
    %35 = vector.load %arg4[%c16, %c0_19] : memref<51x1000xf32, #tpu.memory_space<vmem>>, vector<1x1000xf32>
    tpu.vector_store %arg4[%c16, %c0_19], %34 {strides = array<i32>} : memref<51x1000xf32, #tpu.memory_space<vmem>>, vector<1x1000xf32>,
    %36 = vector.extract_strided_slice %1 {offsets = [0, 17], sizes = [1, 1000], strides = [1, 1]} : vector<1x1050xf32> to vector<1x1000xf32>
    %c17 = arith.constant 17 : index
    %c0_20 = arith.constant 0 : index
    %37 = vector.load %arg4[%c17, %c0_20] : memref<51x1000xf32, #tpu.memory_space<vmem>>, vector<1x1000xf32>
    tpu.vector_store %arg4[%c17, %c0_20], %36 {strides = array<i32>} : memref<51x1000xf32, #tpu.memory_space<vmem>>, vector<1x1000xf32>,
    %38 = vector.extract_strided_slice %1 {offsets = [0, 18], sizes = [1, 1000], strides = [1, 1]} : vector<1x1050xf32> to vector<1x1000xf32>
    %c18 = arith.constant 18 : index
    %c0_21 = arith.constant 0 : index
    %39 = vector.load %arg4[%c18, %c0_21] : memref<51x1000xf32, #tpu.memory_space<vmem>>, vector<1x1000xf32>
    tpu.vector_store %arg4[%c18, %c0_21], %38 {strides = array<i32>} : memref<51x1000xf32, #tpu.memory_space<vmem>>, vector<1x1000xf32>,
    %40 = vector.extract_strided_slice %1 {offsets = [0, 19], sizes = [1, 1000], strides = [1, 1]} : vector<1x1050xf32> to vector<1x1000xf32>
    %c19 = arith.constant 19 : index
    %c0_22 = arith.constant 0 : index
    %41 = vector.load %arg4[%c19, %c0_22] : memref<51x1000xf32, #tpu.memory_space<vmem>>, vector<1x1000xf32>
    tpu.vector_store %arg4[%c19, %c0_22], %40 {strides = array<i32>} : memref<51x1000xf32, #tpu.memory_space<vmem>>, vector<1x1000xf32>,
    %42 = vector.extract_strided_slice %1 {offsets = [0, 20], sizes = [1, 1000], strides = [1, 1]} : vector<1x1050xf32> to vector<1x1000xf32>
    %c20 = arith.constant 20 : index
    %c0_23 = arith.constant 0 : index
    %43 = vector.load %arg4[%c20, %c0_23] : memref<51x1000xf32, #tpu.memory_space<vmem>>, vector<1x1000xf32>
    tpu.vector_store %arg4[%c20, %c0_23], %42 {strides = array<i32>} : memref<51x1000xf32, #tpu.memory_space<vmem>>, vector<1x1000xf32>,
    %44 = vector.extract_strided_slice %1 {offsets = [0, 21], sizes = [1, 1000], strides = [1, 1]} : vector<1x1050xf32> to vector<1x1000xf32>
    %c21 = arith.constant 21 : index
    %c0_24 = arith.constant 0 : index
    %45 = vector.load %arg4[%c21, %c0_24] : memref<51x1000xf32, #tpu.memory_space<vmem>>, vector<1x1000xf32>
    tpu.vector_store %arg4[%c21, %c0_24], %44 {strides = array<i32>} : memref<51x1000xf32, #tpu.memory_space<vmem>>, vector<1x1000xf32>,
    %46 = vector.extract_strided_slice %1 {offsets = [0, 22], sizes = [1, 1000], strides = [1, 1]} : vector<1x1050xf32> to vector<1x1000xf32>
    %c22 = arith.constant 22 : index
    %c0_25 = arith.constant 0 : index
    %47 = vector.load %arg4[%c22, %c0_25] : memref<51x1000xf32, #tpu.memory_space<vmem>>, vector<1x1000xf32>
    tpu.vector_store %arg4[%c22, %c0_25], %46 {strides = array<i32>} : memref<51x1000xf32, #tpu.memory_space<vmem>>, vector<1x1000xf32>,
    %48 = vector.extract_strided_slice %1 {offsets = [0, 23], sizes = [1, 1000], strides = [1, 1]} : vector<1x1050xf32> to vector<1x1000xf32>
    %c23 = arith.constant 23 : index
    %c0_26 = arith.constant 0 : index
    %49 = vector.load %arg4[%c23, %c0_26] : memref<51x1000xf32, #tpu.memory_space<vmem>>, vector<1x1000xf32>
    tpu.vector_store %arg4[%c23, %c0_26], %48 {strides = array<i32>} : memref<51x1000xf32, #tpu.memory_space<vmem>>, vector<1x1000xf32>,
    %50 = vector.extract_strided_slice %1 {offsets = [0, 24], sizes = [1, 1000], strides = [1, 1]} : vector<1x1050xf32> to vector<1x1000xf32>
    %c24 = arith.constant 24 : index
    %c0_27 = arith.constant 0 : index
    %51 = vector.load %arg4[%c24, %c0_27] : memref<51x1000xf32, #tpu.memory_space<vmem>>, vector<1x1000xf32>
    tpu.vector_store %arg4[%c24, %c0_27], %50 {strides = array<i32>} : memref<51x1000xf32, #tpu.memory_space<vmem>>, vector<1x1000xf32>,
    %52 = vector.extract_strided_slice %1 {offsets = [0, 25], sizes = [1, 1000], strides = [1, 1]} : vector<1x1050xf32> to vector<1x1000xf32>
    %c25 = arith.constant 25 : index
    %c0_28 = arith.constant 0 : index
    %53 = vector.load %arg4[%c25, %c0_28] : memref<51x1000xf32, #tpu.memory_space<vmem>>, vector<1x1000xf32>
    tpu.vector_store %arg4[%c25, %c0_28], %52 {strides = array<i32>} : memref<51x1000xf32, #tpu.memory_space<vmem>>, vector<1x1000xf32>,
    %54 = vector.extract_strided_slice %1 {offsets = [0, 26], sizes = [1, 1000], strides = [1, 1]} : vector<1x1050xf32> to vector<1x1000xf32>
    %c26 = arith.constant 26 : index
    %c0_29 = arith.constant 0 : index
    %55 = vector.load %arg4[%c26, %c0_29] : memref<51x1000xf32, #tpu.memory_space<vmem>>, vector<1x1000xf32>
    tpu.vector_store %arg4[%c26, %c0_29], %54 {strides = array<i32>} : memref<51x1000xf32, #tpu.memory_space<vmem>>, vector<1x1000xf32>,
    %56 = vector.extract_strided_slice %1 {offsets = [0, 27], sizes = [1, 1000], strides = [1, 1]} : vector<1x1050xf32> to vector<1x1000xf32>
    %c27 = arith.constant 27 : index
    %c0_30 = arith.constant 0 : index
    %57 = vector.load %arg4[%c27, %c0_30] : memref<51x1000xf32, #tpu.memory_space<vmem>>, vector<1x1000xf32>
    tpu.vector_store %arg4[%c27, %c0_30], %56 {strides = array<i32>} : memref<51x1000xf32, #tpu.memory_space<vmem>>, vector<1x1000xf32>,
    %58 = vector.extract_strided_slice %1 {offsets = [0, 28], sizes = [1, 1000], strides = [1, 1]} : vector<1x1050xf32> to vector<1x1000xf32>
    %c28 = arith.constant 28 : index
    %c0_31 = arith.constant 0 : index
    %59 = vector.load %arg4[%c28, %c0_31] : memref<51x1000xf32, #tpu.memory_space<vmem>>, vector<1x1000xf32>
    tpu.vector_store %arg4[%c28, %c0_31], %58 {strides = array<i32>} : memref<51x1000xf32, #tpu.memory_space<vmem>>, vector<1x1000xf32>,
    %60 = vector.extract_strided_slice %1 {offsets = [0, 29], sizes = [1, 1000], strides = [1, 1]} : vector<1x1050xf32> to vector<1x1000xf32>
    %c29 = arith.constant 29 : index
    %c0_32 = arith.constant 0 : index
    %61 = vector.load %arg4[%c29, %c0_32] : memref<51x1000xf32, #tpu.memory_space<vmem>>, vector<1x1000xf32>
    tpu.vector_store %arg4[%c29, %c0_32], %60 {strides = array<i32>} : memref<51x1000xf32, #tpu.memory_space<vmem>>, vector<1x1000xf32>,
    %62 = vector.extract_strided_slice %1 {offsets = [0, 30], sizes = [1, 1000], strides = [1, 1]} : vector<1x1050xf32> to vector<1x1000xf32>
    %c30 = arith.constant 30 : index
    %c0_33 = arith.constant 0 : index
    %63 = vector.load %arg4[%c30, %c0_33] : memref<51x1000xf32, #tpu.memory_space<vmem>>, vector<1x1000xf32>
    tpu.vector_store %arg4[%c30, %c0_33], %62 {strides = array<i32>} : memref<51x1000xf32, #tpu.memory_space<vmem>>, vector<1x1000xf32>,
    %64 = vector.extract_strided_slice %1 {offsets = [0, 31], sizes = [1, 1000], strides = [1, 1]} : vector<1x1050xf32> to vector<1x1000xf32>
    %c31 = arith.constant 31 : index
    %c0_34 = arith.constant 0 : index
    %65 = vector.load %arg4[%c31, %c0_34] : memref<51x1000xf32, #tpu.memory_space<vmem>>, vector<1x1000xf32>
    tpu.vector_store %arg4[%c31, %c0_34], %64 {strides = array<i32>} : memref<51x1000xf32, #tpu.memory_space<vmem>>, vector<1x1000xf32>,
    %66 = vector.extract_strided_slice %1 {offsets = [0, 32], sizes = [1, 1000], strides = [1, 1]} : vector<1x1050xf32> to vector<1x1000xf32>
    %c32 = arith.constant 32 : index
    %c0_35 = arith.constant 0 : index
    %67 = vector.load %arg4[%c32, %c0_35] : memref<51x1000xf32, #tpu.memory_space<vmem>>, vector<1x1000xf32>
    tpu.vector_store %arg4[%c32, %c0_35], %66 {strides = array<i32>} : memref<51x1000xf32, #tpu.memory_space<vmem>>, vector<1x1000xf32>,
    %68 = vector.extract_strided_slice %1 {offsets = [0, 33], sizes = [1, 1000], strides = [1, 1]} : vector<1x1050xf32> to vector<1x1000xf32>
    %c33 = arith.constant 33 : index
    %c0_36 = arith.constant 0 : index
    %69 = vector.load %arg4[%c33, %c0_36] : memref<51x1000xf32, #tpu.memory_space<vmem>>, vector<1x1000xf32>
    tpu.vector_store %arg4[%c33, %c0_36], %68 {strides = array<i32>} : memref<51x1000xf32, #tpu.memory_space<vmem>>, vector<1x1000xf32>,
    %70 = vector.extract_strided_slice %1 {offsets = [0, 34], sizes = [1, 1000], strides = [1, 1]} : vector<1x1050xf32> to vector<1x1000xf32>
    %c34 = arith.constant 34 : index
    %c0_37 = arith.constant 0 : index
    %71 = vector.load %arg4[%c34, %c0_37] : memref<51x1000xf32, #tpu.memory_space<vmem>>, vector<1x1000xf32>
    tpu.vector_store %arg4[%c34, %c0_37], %70 {strides = array<i32>} : memref<51x1000xf32, #tpu.memory_space<vmem>>, vector<1x1000xf32>,
    %72 = vector.extract_strided_slice %1 {offsets = [0, 35], sizes = [1, 1000], strides = [1, 1]} : vector<1x1050xf32> to vector<1x1000xf32>
    %c35 = arith.constant 35 : index
    %c0_38 = arith.constant 0 : index
    %73 = vector.load %arg4[%c35, %c0_38] : memref<51x1000xf32, #tpu.memory_space<vmem>>, vector<1x1000xf32>
    tpu.vector_store %arg4[%c35, %c0_38], %72 {strides = array<i32>} : memref<51x1000xf32, #tpu.memory_space<vmem>>, vector<1x1000xf32>,
    %74 = vector.extract_strided_slice %1 {offsets = [0, 36], sizes = [1, 1000], strides = [1, 1]} : vector<1x1050xf32> to vector<1x1000xf32>
    %c36 = arith.constant 36 : index
    %c0_39 = arith.constant 0 : index
    %75 = vector.load %arg4[%c36, %c0_39] : memref<51x1000xf32, #tpu.memory_space<vmem>>, vector<1x1000xf32>
    tpu.vector_store %arg4[%c36, %c0_39], %74 {strides = array<i32>} : memref<51x1000xf32, #tpu.memory_space<vmem>>, vector<1x1000xf32>,
    %76 = vector.extract_strided_slice %1 {offsets = [0, 37], sizes = [1, 1000], strides = [1, 1]} : vector<1x1050xf32> to vector<1x1000xf32>
    %c37 = arith.constant 37 : index
    %c0_40 = arith.constant 0 : index
    %77 = vector.load %arg4[%c37, %c0_40] : memref<51x1000xf32, #tpu.memory_space<vmem>>, vector<1x1000xf32>
    tpu.vector_store %arg4[%c37, %c0_40], %76 {strides = array<i32>} : memref<51x1000xf32, #tpu.memory_space<vmem>>, vector<1x1000xf32>,
    %78 = vector.extract_strided_slice %1 {offsets = [0, 38], sizes = [1, 1000], strides = [1, 1]} : vector<1x1050xf32> to vector<1x1000xf32>
    %c38 = arith.constant 38 : index
    %c0_41 = arith.constant 0 : index
    %79 = vector.load %arg4[%c38, %c0_41] : memref<51x1000xf32, #tpu.memory_space<vmem>>, vector<1x1000xf32>
    tpu.vector_store %arg4[%c38, %c0_41], %78 {strides = array<i32>} : memref<51x1000xf32, #tpu.memory_space<vmem>>, vector<1x1000xf32>,
    %80 = vector.extract_strided_slice %1 {offsets = [0, 39], sizes = [1, 1000], strides = [1, 1]} : vector<1x1050xf32> to vector<1x1000xf32>
    %c39 = arith.constant 39 : index
    %c0_42 = arith.constant 0 : index
    %81 = vector.load %arg4[%c39, %c0_42] : memref<51x1000xf32, #tpu.memory_space<vmem>>, vector<1x1000xf32>
    tpu.vector_store %arg4[%c39, %c0_42], %80 {strides = array<i32>} : memref<51x1000xf32, #tpu.memory_space<vmem>>, vector<1x1000xf32>,
    %82 = vector.extract_strided_slice %1 {offsets = [0, 40], sizes = [1, 1000], strides = [1, 1]} : vector<1x1050xf32> to vector<1x1000xf32>
    %c40 = arith.constant 40 : index
    %c0_43 = arith.constant 0 : index
    %83 = vector.load %arg4[%c40, %c0_43] : memref<51x1000xf32, #tpu.memory_space<vmem>>, vector<1x1000xf32>
    tpu.vector_store %arg4[%c40, %c0_43], %82 {strides = array<i32>} : memref<51x1000xf32, #tpu.memory_space<vmem>>, vector<1x1000xf32>,
    %84 = vector.extract_strided_slice %1 {offsets = [0, 41], sizes = [1, 1000], strides = [1, 1]} : vector<1x1050xf32> to vector<1x1000xf32>
    %c41 = arith.constant 41 : index
    %c0_44 = arith.constant 0 : index
    %85 = vector.load %arg4[%c41, %c0_44] : memref<51x1000xf32, #tpu.memory_space<vmem>>, vector<1x1000xf32>
    tpu.vector_store %arg4[%c41, %c0_44], %84 {strides = array<i32>} : memref<51x1000xf32, #tpu.memory_space<vmem>>, vector<1x1000xf32>,
    %86 = vector.extract_strided_slice %1 {offsets = [0, 42], sizes = [1, 1000], strides = [1, 1]} : vector<1x1050xf32> to vector<1x1000xf32>
    %c42 = arith.constant 42 : index
    %c0_45 = arith.constant 0 : index
    %87 = vector.load %arg4[%c42, %c0_45] : memref<51x1000xf32, #tpu.memory_space<vmem>>, vector<1x1000xf32>
    tpu.vector_store %arg4[%c42, %c0_45], %86 {strides = array<i32>} : memref<51x1000xf32, #tpu.memory_space<vmem>>, vector<1x1000xf32>,
    %88 = vector.extract_strided_slice %1 {offsets = [0, 43], sizes = [1, 1000], strides = [1, 1]} : vector<1x1050xf32> to vector<1x1000xf32>
    %c43 = arith.constant 43 : index
    %c0_46 = arith.constant 0 : index
    %89 = vector.load %arg4[%c43, %c0_46] : memref<51x1000xf32, #tpu.memory_space<vmem>>, vector<1x1000xf32>
    tpu.vector_store %arg4[%c43, %c0_46], %88 {strides = array<i32>} : memref<51x1000xf32, #tpu.memory_space<vmem>>, vector<1x1000xf32>,
    %90 = vector.extract_strided_slice %1 {offsets = [0, 44], sizes = [1, 1000], strides = [1, 1]} : vector<1x1050xf32> to vector<1x1000xf32>
    %c44 = arith.constant 44 : index
    %c0_47 = arith.constant 0 : index
    %91 = vector.load %arg4[%c44, %c0_47] : memref<51x1000xf32, #tpu.memory_space<vmem>>, vector<1x1000xf32>
    tpu.vector_store %arg4[%c44, %c0_47], %90 {strides = array<i32>} : memref<51x1000xf32, #tpu.memory_space<vmem>>, vector<1x1000xf32>,
    %92 = vector.extract_strided_slice %1 {offsets = [0, 45], sizes = [1, 1000], strides = [1, 1]} : vector<1x1050xf32> to vector<1x1000xf32>
    %c45 = arith.constant 45 : index
    %c0_48 = arith.constant 0 : index
    %93 = vector.load %arg4[%c45, %c0_48] : memref<51x1000xf32, #tpu.memory_space<vmem>>, vector<1x1000xf32>
    tpu.vector_store %arg4[%c45, %c0_48], %92 {strides = array<i32>} : memref<51x1000xf32, #tpu.memory_space<vmem>>, vector<1x1000xf32>,
    %94 = vector.extract_strided_slice %1 {offsets = [0, 46], sizes = [1, 1000], strides = [1, 1]} : vector<1x1050xf32> to vector<1x1000xf32>
    %c46 = arith.constant 46 : index
    %c0_49 = arith.constant 0 : index
    %95 = vector.load %arg4[%c46, %c0_49] : memref<51x1000xf32, #tpu.memory_space<vmem>>, vector<1x1000xf32>
    tpu.vector_store %arg4[%c46, %c0_49], %94 {strides = array<i32>} : memref<51x1000xf32, #tpu.memory_space<vmem>>, vector<1x1000xf32>,
    %96 = vector.extract_strided_slice %1 {offsets = [0, 47], sizes = [1, 1000], strides = [1, 1]} : vector<1x1050xf32> to vector<1x1000xf32>
    %c47 = arith.constant 47 : index
    %c0_50 = arith.constant 0 : index
    %97 = vector.load %arg4[%c47, %c0_50] : memref<51x1000xf32, #tpu.memory_space<vmem>>, vector<1x1000xf32>
    tpu.vector_store %arg4[%c47, %c0_50], %96 {strides = array<i32>} : memref<51x1000xf32, #tpu.memory_space<vmem>>, vector<1x1000xf32>,
    %98 = vector.extract_strided_slice %1 {offsets = [0, 48], sizes = [1, 1000], strides = [1, 1]} : vector<1x1050xf32> to vector<1x1000xf32>
    %c48 = arith.constant 48 : index
    %c0_51 = arith.constant 0 : index
    %99 = vector.load %arg4[%c48, %c0_51] : memref<51x1000xf32, #tpu.memory_space<vmem>>, vector<1x1000xf32>
    tpu.vector_store %arg4[%c48, %c0_51], %98 {strides = array<i32>} : memref<51x1000xf32, #tpu.memory_space<vmem>>, vector<1x1000xf32>,
    %100 = vector.extract_strided_slice %1 {offsets = [0, 49], sizes = [1, 1000], strides = [1, 1]} : vector<1x1050xf32> to vector<1x1000xf32>
    %c49 = arith.constant 49 : index
    %c0_52 = arith.constant 0 : index
    %101 = vector.load %arg4[%c49, %c0_52] : memref<51x1000xf32, #tpu.memory_space<vmem>>, vector<1x1000xf32>
    tpu.vector_store %arg4[%c49, %c0_52], %100 {strides = array<i32>} : memref<51x1000xf32, #tpu.memory_space<vmem>>, vector<1x1000xf32>,
    %102 = vector.extract_strided_slice %1 {offsets = [0, 50], sizes = [1, 1000], strides = [1, 1]} : vector<1x1050xf32> to vector<1x1000xf32>
    %c50 = arith.constant 50 : index
    %c0_53 = arith.constant 0 : index
    %103 = vector.load %arg4[%c50, %c0_53] : memref<51x1000xf32, #tpu.memory_space<vmem>>, vector<1x1000xf32>
    tpu.vector_store %arg4[%c50, %c0_53], %102 {strides = array<i32>} : memref<51x1000xf32, #tpu.memory_space<vmem>>, vector<1x1000xf32>,
    %c0_54 = arith.constant 0 : index
    %c0_55 = arith.constant 0 : index
    %104 = vector.load %arg2[%c0_54, %c0_55] : memref<3x51xf32, #tpu.memory_space<vmem>>, vector<3x51xf32>
    %c0_56 = arith.constant 0 : index
    %c0_57 = arith.constant 0 : index
    %105 = vector.load %arg4[%c0_56, %c0_57] : memref<51x1000xf32, #tpu.memory_space<vmem>>, vector<51x1000xf32>
    %cst = arith.constant dense<0.000000e+00> : vector<3x1000xf32>
    %106 = tpu.matmul %104, %105, %cst {dimension_numbers = #tpu.dot_dimension_numbers<[1], [0], [0], [1], [0, 0, 1, 1], [], []>} : vector<3x51xf32>, vector<51x1000xf32>, vector<3x1000xf32> -> vector<3x1000xf32>
    %cst_58 = arith.constant 0.000000e+00 : f32
    %107 = vector.broadcast %cst_58 : f32 to vector<3x1000xf32>
    %108 = arith.maximumf %106, %107 : vector<3x1000xf32>
    %c0_59 = arith.constant 0 : index
    %c0_60 = arith.constant 0 : index
    %c0_61 = arith.constant 0 : index
    %109 = vector.load %arg3[%c0_59, %c0_60, %c0_61] : memref<1x3x1000xf32, #tpu.memory_space<vmem>>, vector<1x3x1000xf32>
    %110 = vector.shape_cast %109 : vector<1x3x1000xf32> to vector<3x1000xf32>
    %111 = vector.shape_cast %108 : vector<3x1000xf32> to vector<1x3x1000xf32>
    tpu.vector_store %arg3[%c0_59, %c0_60, %c0_61], %111 {strides = array<i32>} : memref<1x3x1000xf32, #tpu.memory_space<vmem>>, vector<1x3x1000xf32>,
    return
  }
  func.func @transform_0(%arg0: i32) -> (i32, i32, i32) {
    %c0_i32 = arith.constant 0 : i32
    %c0_i32_0 = arith.constant 0 : i32
    %c0_i32_1 = arith.constant 0 : i32
    return %arg0, %c0_i32, %c0_i32_0 : i32, i32, i32
  }
  func.func @transform_1(%arg0: i32) -> (i32, i32) {
    %c0_i32 = arith.constant 0 : i32
    %c0_i32_0 = arith.constant 0 : i32
    %c0_i32_1 = arith.constant 0 : i32
    return %c0_i32, %c0_i32_0 : i32, i32
  }
  func.func @transform_2(%arg0: i32) -> (i32, i32, i32) {
    %c0_i32 = arith.constant 0 : i32
    %c0_i32_0 = arith.constant 0 : i32
    %c0_i32_1 = arith.constant 0 : i32
    return %arg0, %c0_i32, %c0_i32_0 : i32, i32, i32
  }
}

module attributes {stable_mosaic.version = 11 : i64} {
  func.func @_conv_mxu_kernel(%arg0: i32, %arg1: memref<1x9x1020xf32, #tpu.memory_space<vmem>>, %arg2: memref<2x189xf32, #tpu.memory_space<vmem>>, %arg3: memref<1x2x1000xf32, #tpu.memory_space<vmem>>, %arg4: memref<189x1000xf32, #tpu.memory_space<vmem>>) attributes {dimension_semantics = [#tpu.dimension_semantics<parallel>], iteration_bounds = array<i64: 2>, scalar_prefetch = 0 : i64, scratch_operands = 1 : i64, tpu.core_type = #tpu.core_type<tc>, window_params = [{transform_indices = @transform_0, window_bounds = array<i64: 1, 9, 1020>}, {pipeline_mode = #tpu.pipeline_mode<synchronous>, transform_indices = @transform_1, window_bounds = array<i64: 2, 189>}, {transform_indices = @transform_2, window_bounds = array<i64: 1, 2, 1000>}]} {
    %c0 = arith.constant 0 : index
    %c0_0 = arith.constant 0 : index
    %c0_1 = arith.constant 0 : index
    %0 = vector.load %arg1[%c0, %c0_0, %c0_1] : memref<1x9x1020xf32, #tpu.memory_space<vmem>>, vector<1x9x1020xf32>
    %1 = vector.shape_cast %0 : vector<1x9x1020xf32> to vector<9x1020xf32>
    %2 = vector.extract_strided_slice %1 {offsets = [0, 0], sizes = [9, 1000], strides = [1, 1]} : vector<9x1020xf32> to vector<9x1000xf32>
    %c0_2 = arith.constant 0 : index
    %c0_3 = arith.constant 0 : index
    %3 = vector.load %arg4[%c0_2, %c0_3] : memref<189x1000xf32, #tpu.memory_space<vmem>>, vector<9x1000xf32>
    tpu.vector_store %arg4[%c0_2, %c0_3], %2 {strides = array<i32>} : memref<189x1000xf32, #tpu.memory_space<vmem>>, vector<9x1000xf32>,
    %4 = vector.extract_strided_slice %1 {offsets = [0, 1], sizes = [9, 1000], strides = [1, 1]} : vector<9x1020xf32> to vector<9x1000xf32>
    %c9 = arith.constant 9 : index
    %c0_4 = arith.constant 0 : index
    %5 = vector.load %arg4[%c9, %c0_4] : memref<189x1000xf32, #tpu.memory_space<vmem>>, vector<9x1000xf32>
    tpu.vector_store %arg4[%c9, %c0_4], %4 {strides = array<i32>} : memref<189x1000xf32, #tpu.memory_space<vmem>>, vector<9x1000xf32>,
    %6 = vector.extract_strided_slice %1 {offsets = [0, 2], sizes = [9, 1000], strides = [1, 1]} : vector<9x1020xf32> to vector<9x1000xf32>
    %c18 = arith.constant 18 : index
    %c0_5 = arith.constant 0 : index
    %7 = vector.load %arg4[%c18, %c0_5] : memref<189x1000xf32, #tpu.memory_space<vmem>>, vector<9x1000xf32>
    tpu.vector_store %arg4[%c18, %c0_5], %6 {strides = array<i32>} : memref<189x1000xf32, #tpu.memory_space<vmem>>, vector<9x1000xf32>,
    %8 = vector.extract_strided_slice %1 {offsets = [0, 3], sizes = [9, 1000], strides = [1, 1]} : vector<9x1020xf32> to vector<9x1000xf32>
    %c27 = arith.constant 27 : index
    %c0_6 = arith.constant 0 : index
    %9 = vector.load %arg4[%c27, %c0_6] : memref<189x1000xf32, #tpu.memory_space<vmem>>, vector<9x1000xf32>
    tpu.vector_store %arg4[%c27, %c0_6], %8 {strides = array<i32>} : memref<189x1000xf32, #tpu.memory_space<vmem>>, vector<9x1000xf32>,
    %10 = vector.extract_strided_slice %1 {offsets = [0, 4], sizes = [9, 1000], strides = [1, 1]} : vector<9x1020xf32> to vector<9x1000xf32>
    %c36 = arith.constant 36 : index
    %c0_7 = arith.constant 0 : index
    %11 = vector.load %arg4[%c36, %c0_7] : memref<189x1000xf32, #tpu.memory_space<vmem>>, vector<9x1000xf32>
    tpu.vector_store %arg4[%c36, %c0_7], %10 {strides = array<i32>} : memref<189x1000xf32, #tpu.memory_space<vmem>>, vector<9x1000xf32>,
    %12 = vector.extract_strided_slice %1 {offsets = [0, 5], sizes = [9, 1000], strides = [1, 1]} : vector<9x1020xf32> to vector<9x1000xf32>
    %c45 = arith.constant 45 : index
    %c0_8 = arith.constant 0 : index
    %13 = vector.load %arg4[%c45, %c0_8] : memref<189x1000xf32, #tpu.memory_space<vmem>>, vector<9x1000xf32>
    tpu.vector_store %arg4[%c45, %c0_8], %12 {strides = array<i32>} : memref<189x1000xf32, #tpu.memory_space<vmem>>, vector<9x1000xf32>,
    %14 = vector.extract_strided_slice %1 {offsets = [0, 6], sizes = [9, 1000], strides = [1, 1]} : vector<9x1020xf32> to vector<9x1000xf32>
    %c54 = arith.constant 54 : index
    %c0_9 = arith.constant 0 : index
    %15 = vector.load %arg4[%c54, %c0_9] : memref<189x1000xf32, #tpu.memory_space<vmem>>, vector<9x1000xf32>
    tpu.vector_store %arg4[%c54, %c0_9], %14 {strides = array<i32>} : memref<189x1000xf32, #tpu.memory_space<vmem>>, vector<9x1000xf32>,
    %16 = vector.extract_strided_slice %1 {offsets = [0, 7], sizes = [9, 1000], strides = [1, 1]} : vector<9x1020xf32> to vector<9x1000xf32>
    %c63 = arith.constant 63 : index
    %c0_10 = arith.constant 0 : index
    %17 = vector.load %arg4[%c63, %c0_10] : memref<189x1000xf32, #tpu.memory_space<vmem>>, vector<9x1000xf32>
    tpu.vector_store %arg4[%c63, %c0_10], %16 {strides = array<i32>} : memref<189x1000xf32, #tpu.memory_space<vmem>>, vector<9x1000xf32>,
    %18 = vector.extract_strided_slice %1 {offsets = [0, 8], sizes = [9, 1000], strides = [1, 1]} : vector<9x1020xf32> to vector<9x1000xf32>
    %c72 = arith.constant 72 : index
    %c0_11 = arith.constant 0 : index
    %19 = vector.load %arg4[%c72, %c0_11] : memref<189x1000xf32, #tpu.memory_space<vmem>>, vector<9x1000xf32>
    tpu.vector_store %arg4[%c72, %c0_11], %18 {strides = array<i32>} : memref<189x1000xf32, #tpu.memory_space<vmem>>, vector<9x1000xf32>,
    %20 = vector.extract_strided_slice %1 {offsets = [0, 9], sizes = [9, 1000], strides = [1, 1]} : vector<9x1020xf32> to vector<9x1000xf32>
    %c81 = arith.constant 81 : index
    %c0_12 = arith.constant 0 : index
    %21 = vector.load %arg4[%c81, %c0_12] : memref<189x1000xf32, #tpu.memory_space<vmem>>, vector<9x1000xf32>
    tpu.vector_store %arg4[%c81, %c0_12], %20 {strides = array<i32>} : memref<189x1000xf32, #tpu.memory_space<vmem>>, vector<9x1000xf32>,
    %22 = vector.extract_strided_slice %1 {offsets = [0, 10], sizes = [9, 1000], strides = [1, 1]} : vector<9x1020xf32> to vector<9x1000xf32>
    %c90 = arith.constant 90 : index
    %c0_13 = arith.constant 0 : index
    %23 = vector.load %arg4[%c90, %c0_13] : memref<189x1000xf32, #tpu.memory_space<vmem>>, vector<9x1000xf32>
    tpu.vector_store %arg4[%c90, %c0_13], %22 {strides = array<i32>} : memref<189x1000xf32, #tpu.memory_space<vmem>>, vector<9x1000xf32>,
    %24 = vector.extract_strided_slice %1 {offsets = [0, 11], sizes = [9, 1000], strides = [1, 1]} : vector<9x1020xf32> to vector<9x1000xf32>
    %c99 = arith.constant 99 : index
    %c0_14 = arith.constant 0 : index
    %25 = vector.load %arg4[%c99, %c0_14] : memref<189x1000xf32, #tpu.memory_space<vmem>>, vector<9x1000xf32>
    tpu.vector_store %arg4[%c99, %c0_14], %24 {strides = array<i32>} : memref<189x1000xf32, #tpu.memory_space<vmem>>, vector<9x1000xf32>,
    %26 = vector.extract_strided_slice %1 {offsets = [0, 12], sizes = [9, 1000], strides = [1, 1]} : vector<9x1020xf32> to vector<9x1000xf32>
    %c108 = arith.constant 108 : index
    %c0_15 = arith.constant 0 : index
    %27 = vector.load %arg4[%c108, %c0_15] : memref<189x1000xf32, #tpu.memory_space<vmem>>, vector<9x1000xf32>
    tpu.vector_store %arg4[%c108, %c0_15], %26 {strides = array<i32>} : memref<189x1000xf32, #tpu.memory_space<vmem>>, vector<9x1000xf32>,
    %28 = vector.extract_strided_slice %1 {offsets = [0, 13], sizes = [9, 1000], strides = [1, 1]} : vector<9x1020xf32> to vector<9x1000xf32>
    %c117 = arith.constant 117 : index
    %c0_16 = arith.constant 0 : index
    %29 = vector.load %arg4[%c117, %c0_16] : memref<189x1000xf32, #tpu.memory_space<vmem>>, vector<9x1000xf32>
    tpu.vector_store %arg4[%c117, %c0_16], %28 {strides = array<i32>} : memref<189x1000xf32, #tpu.memory_space<vmem>>, vector<9x1000xf32>,
    %30 = vector.extract_strided_slice %1 {offsets = [0, 14], sizes = [9, 1000], strides = [1, 1]} : vector<9x1020xf32> to vector<9x1000xf32>
    %c126 = arith.constant 126 : index
    %c0_17 = arith.constant 0 : index
    %31 = vector.load %arg4[%c126, %c0_17] : memref<189x1000xf32, #tpu.memory_space<vmem>>, vector<9x1000xf32>
    tpu.vector_store %arg4[%c126, %c0_17], %30 {strides = array<i32>} : memref<189x1000xf32, #tpu.memory_space<vmem>>, vector<9x1000xf32>,
    %32 = vector.extract_strided_slice %1 {offsets = [0, 15], sizes = [9, 1000], strides = [1, 1]} : vector<9x1020xf32> to vector<9x1000xf32>
    %c135 = arith.constant 135 : index
    %c0_18 = arith.constant 0 : index
    %33 = vector.load %arg4[%c135, %c0_18] : memref<189x1000xf32, #tpu.memory_space<vmem>>, vector<9x1000xf32>
    tpu.vector_store %arg4[%c135, %c0_18], %32 {strides = array<i32>} : memref<189x1000xf32, #tpu.memory_space<vmem>>, vector<9x1000xf32>,
    %34 = vector.extract_strided_slice %1 {offsets = [0, 16], sizes = [9, 1000], strides = [1, 1]} : vector<9x1020xf32> to vector<9x1000xf32>
    %c144 = arith.constant 144 : index
    %c0_19 = arith.constant 0 : index
    %35 = vector.load %arg4[%c144, %c0_19] : memref<189x1000xf32, #tpu.memory_space<vmem>>, vector<9x1000xf32>
    tpu.vector_store %arg4[%c144, %c0_19], %34 {strides = array<i32>} : memref<189x1000xf32, #tpu.memory_space<vmem>>, vector<9x1000xf32>,
    %36 = vector.extract_strided_slice %1 {offsets = [0, 17], sizes = [9, 1000], strides = [1, 1]} : vector<9x1020xf32> to vector<9x1000xf32>
    %c153 = arith.constant 153 : index
    %c0_20 = arith.constant 0 : index
    %37 = vector.load %arg4[%c153, %c0_20] : memref<189x1000xf32, #tpu.memory_space<vmem>>, vector<9x1000xf32>
    tpu.vector_store %arg4[%c153, %c0_20], %36 {strides = array<i32>} : memref<189x1000xf32, #tpu.memory_space<vmem>>, vector<9x1000xf32>,
    %38 = vector.extract_strided_slice %1 {offsets = [0, 18], sizes = [9, 1000], strides = [1, 1]} : vector<9x1020xf32> to vector<9x1000xf32>
    %c162 = arith.constant 162 : index
    %c0_21 = arith.constant 0 : index
    %39 = vector.load %arg4[%c162, %c0_21] : memref<189x1000xf32, #tpu.memory_space<vmem>>, vector<9x1000xf32>
    tpu.vector_store %arg4[%c162, %c0_21], %38 {strides = array<i32>} : memref<189x1000xf32, #tpu.memory_space<vmem>>, vector<9x1000xf32>,
    %40 = vector.extract_strided_slice %1 {offsets = [0, 19], sizes = [9, 1000], strides = [1, 1]} : vector<9x1020xf32> to vector<9x1000xf32>
    %c171 = arith.constant 171 : index
    %c0_22 = arith.constant 0 : index
    %41 = vector.load %arg4[%c171, %c0_22] : memref<189x1000xf32, #tpu.memory_space<vmem>>, vector<9x1000xf32>
    tpu.vector_store %arg4[%c171, %c0_22], %40 {strides = array<i32>} : memref<189x1000xf32, #tpu.memory_space<vmem>>, vector<9x1000xf32>,
    %42 = vector.extract_strided_slice %1 {offsets = [0, 20], sizes = [9, 1000], strides = [1, 1]} : vector<9x1020xf32> to vector<9x1000xf32>
    %c180 = arith.constant 180 : index
    %c0_23 = arith.constant 0 : index
    %43 = vector.load %arg4[%c180, %c0_23] : memref<189x1000xf32, #tpu.memory_space<vmem>>, vector<9x1000xf32>
    tpu.vector_store %arg4[%c180, %c0_23], %42 {strides = array<i32>} : memref<189x1000xf32, #tpu.memory_space<vmem>>, vector<9x1000xf32>,
    %c0_24 = arith.constant 0 : index
    %c0_25 = arith.constant 0 : index
    %44 = vector.load %arg2[%c0_24, %c0_25] : memref<2x189xf32, #tpu.memory_space<vmem>>, vector<2x189xf32>
    %c0_26 = arith.constant 0 : index
    %c0_27 = arith.constant 0 : index
    %45 = vector.load %arg4[%c0_26, %c0_27] : memref<189x1000xf32, #tpu.memory_space<vmem>>, vector<189x1000xf32>
    %cst = arith.constant dense<0.000000e+00> : vector<2x1000xf32>
    %46 = tpu.matmul %44, %45, %cst {dimension_numbers = #tpu.dot_dimension_numbers<[1], [0], [0], [1], [0, 0, 1, 1], [], []>} : vector<2x189xf32>, vector<189x1000xf32>, vector<2x1000xf32> -> vector<2x1000xf32>
    %cst_28 = arith.constant 0.000000e+00 : f32
    %47 = vector.broadcast %cst_28 : f32 to vector<2x1000xf32>
    %48 = arith.maximumf %46, %47 : vector<2x1000xf32>
    %c0_29 = arith.constant 0 : index
    %c0_30 = arith.constant 0 : index
    %c0_31 = arith.constant 0 : index
    %49 = vector.load %arg3[%c0_29, %c0_30, %c0_31] : memref<1x2x1000xf32, #tpu.memory_space<vmem>>, vector<1x2x1000xf32>
    %50 = vector.shape_cast %49 : vector<1x2x1000xf32> to vector<2x1000xf32>
    %51 = vector.shape_cast %48 : vector<2x1000xf32> to vector<1x2x1000xf32>
    tpu.vector_store %arg3[%c0_29, %c0_30, %c0_31], %51 {strides = array<i32>} : memref<1x2x1000xf32, #tpu.memory_space<vmem>>, vector<1x2x1000xf32>,
    return
  }
  func.func @transform_0(%arg0: i32) -> (i32, i32, i32) {
    %c0_i32 = arith.constant 0 : i32
    %c0_i32_0 = arith.constant 0 : i32
    %c0_i32_1 = arith.constant 0 : i32
    return %arg0, %c0_i32, %c0_i32_0 : i32, i32, i32
  }
  func.func @transform_1(%arg0: i32) -> (i32, i32) {
    %c0_i32 = arith.constant 0 : i32
    %c0_i32_0 = arith.constant 0 : i32
    %c0_i32_1 = arith.constant 0 : i32
    return %c0_i32, %c0_i32_0 : i32, i32
  }
  func.func @transform_2(%arg0: i32) -> (i32, i32, i32) {
    %c0_i32 = arith.constant 0 : i32
    %c0_i32_0 = arith.constant 0 : i32
    %c0_i32_1 = arith.constant 0 : i32
    return %arg0, %c0_i32, %c0_i32_0 : i32, i32, i32
  }
}

module attributes {stable_mosaic.version = 11 : i64} {
  func.func @_break_tail_kernel(%arg0: i32, %arg1: memref<8x1000xf32, #tpu.memory_space<vmem>>, %arg2: memref<1x21xf32, #tpu.memory_space<vmem>>, %arg3: memref<8x1xf32, #tpu.memory_space<vmem>>, %arg4: memref<8x1020xf32, #tpu.memory_space<vmem>>) attributes {dimension_semantics = [#tpu.dimension_semantics<parallel>], iteration_bounds = array<i64: 1>, scalar_prefetch = 0 : i64, scratch_operands = 1 : i64, tpu.core_type = #tpu.core_type<tc>, window_params = [{transform_indices = @transform_0, window_bounds = array<i64: 8, 1000>}, {pipeline_mode = #tpu.pipeline_mode<synchronous>, transform_indices = @transform_1, window_bounds = array<i64: 1, 21>}, {transform_indices = @transform_2, window_bounds = array<i64: 8, 1>}]} {
    %c0 = arith.constant 0 : index
    %c0_0 = arith.constant 0 : index
    %0 = vector.load %arg1[%c0, %c0_0] : memref<8x1000xf32, #tpu.memory_space<vmem>>, vector<8x1000xf32>
    %cst = arith.constant dense<0xFF800000> : vector<8xf32>
    %1 = vector.multi_reduction <maximumf>, %0, %cst [1] : vector<8x1000xf32> to vector<8xf32>
    %2 = vector.shape_cast %1 : vector<8xf32> to vector<8x1xf32>
    %3 = vector.broadcast %2 : vector<8x1xf32> to vector<8x1000xf32>
    %4 = arith.subf %0, %3 : vector<8x1000xf32>
    %5 = math.exp %4 : vector<8x1000xf32>
    %cst_1 = arith.constant dense<0.000000e+00> : vector<8xf32>
    %6 = vector.multi_reduction <add>, %5, %cst_1 [1] : vector<8x1000xf32> to vector<8xf32>
    %7 = vector.shape_cast %6 : vector<8xf32> to vector<8x1xf32>
    %8 = vector.broadcast %7 : vector<8x1xf32> to vector<8x1000xf32>
    %9 = arith.divf %5, %8 : vector<8x1000xf32>
    %cst_2 = arith.constant 0.000000e+00 : f32
    %10 = vector.broadcast %cst_2 : f32 to vector<8x1020xf32>
    %c0_3 = arith.constant 0 : index
    %c0_4 = arith.constant 0 : index
    %11 = vector.load %arg4[%c0_3, %c0_4] : memref<8x1020xf32, #tpu.memory_space<vmem>>, vector<8x1020xf32>
    tpu.vector_store %arg4[%c0_3, %c0_4], %10 {strides = array<i32>} : memref<8x1020xf32, #tpu.memory_space<vmem>>, vector<8x1020xf32>,
    %c0_5 = arith.constant 0 : index
    %c10 = arith.constant 10 : index
    %12 = vector.load %arg4[%c0_5, %c10] : memref<8x1020xf32, #tpu.memory_space<vmem>>, vector<8x1000xf32>
    tpu.vector_store %arg4[%c0_5, %c10], %9 {strides = array<i32>} : memref<8x1020xf32, #tpu.memory_space<vmem>>, vector<8x1000xf32>,
    %c0_6 = arith.constant 0 : index
    %c0_7 = arith.constant 0 : index
    %13 = vector.load %arg4[%c0_6, %c0_7] : memref<8x1020xf32, #tpu.memory_space<vmem>>, vector<8x1020xf32>
    %cst_8 = arith.constant 0.000000e+00 : f32
    %14 = vector.broadcast %cst_8 : f32 to vector<8x1000xf32>
    %c0_9 = arith.constant 0 : index
    %c0_10 = arith.constant 0 : index
    %15 = vector.load %arg2[%c0_9, %c0_10] : memref<1x21xf32, #tpu.memory_space<vmem>>, vector<1x1xf32>
    %16 = vector.extract %15[0, 0] : f32 from vector<1x1xf32>
    %17 = vector.extract_strided_slice %13 {offsets = [0, 0], sizes = [8, 1000], strides = [1, 1]} : vector<8x1020xf32> to vector<8x1000xf32>
    %18 = vector.broadcast %16 : f32 to vector<8x1000xf32>
    %19 = arith.mulf %18, %17 : vector<8x1000xf32>
    %20 = arith.addf %14, %19 : vector<8x1000xf32>
    %c0_11 = arith.constant 0 : index
    %c1 = arith.constant 1 : index
    %21 = vector.load %arg2[%c0_11, %c1] : memref<1x21xf32, #tpu.memory_space<vmem>>, vector<1x1xf32>
    %22 = vector.extract %21[0, 0] : f32 from vector<1x1xf32>
    %23 = vector.extract_strided_slice %13 {offsets = [0, 1], sizes = [8, 1000], strides = [1, 1]} : vector<8x1020xf32> to vector<8x1000xf32>
    %24 = vector.broadcast %22 : f32 to vector<8x1000xf32>
    %25 = arith.mulf %24, %23 : vector<8x1000xf32>
    %26 = arith.addf %20, %25 : vector<8x1000xf32>
    %c0_12 = arith.constant 0 : index
    %c2 = arith.constant 2 : index
    %27 = vector.load %arg2[%c0_12, %c2] : memref<1x21xf32, #tpu.memory_space<vmem>>, vector<1x1xf32>
    %28 = vector.extract %27[0, 0] : f32 from vector<1x1xf32>
    %29 = vector.extract_strided_slice %13 {offsets = [0, 2], sizes = [8, 1000], strides = [1, 1]} : vector<8x1020xf32> to vector<8x1000xf32>
    %30 = vector.broadcast %28 : f32 to vector<8x1000xf32>
    %31 = arith.mulf %30, %29 : vector<8x1000xf32>
    %32 = arith.addf %26, %31 : vector<8x1000xf32>
    %c0_13 = arith.constant 0 : index
    %c3 = arith.constant 3 : index
    %33 = vector.load %arg2[%c0_13, %c3] : memref<1x21xf32, #tpu.memory_space<vmem>>, vector<1x1xf32>
    %34 = vector.extract %33[0, 0] : f32 from vector<1x1xf32>
    %35 = vector.extract_strided_slice %13 {offsets = [0, 3], sizes = [8, 1000], strides = [1, 1]} : vector<8x1020xf32> to vector<8x1000xf32>
    %36 = vector.broadcast %34 : f32 to vector<8x1000xf32>
    %37 = arith.mulf %36, %35 : vector<8x1000xf32>
    %38 = arith.addf %32, %37 : vector<8x1000xf32>
    %c0_14 = arith.constant 0 : index
    %c4 = arith.constant 4 : index
    %39 = vector.load %arg2[%c0_14, %c4] : memref<1x21xf32, #tpu.memory_space<vmem>>, vector<1x1xf32>
    %40 = vector.extract %39[0, 0] : f32 from vector<1x1xf32>
    %41 = vector.extract_strided_slice %13 {offsets = [0, 4], sizes = [8, 1000], strides = [1, 1]} : vector<8x1020xf32> to vector<8x1000xf32>
    %42 = vector.broadcast %40 : f32 to vector<8x1000xf32>
    %43 = arith.mulf %42, %41 : vector<8x1000xf32>
    %44 = arith.addf %38, %43 : vector<8x1000xf32>
    %c0_15 = arith.constant 0 : index
    %c5 = arith.constant 5 : index
    %45 = vector.load %arg2[%c0_15, %c5] : memref<1x21xf32, #tpu.memory_space<vmem>>, vector<1x1xf32>
    %46 = vector.extract %45[0, 0] : f32 from vector<1x1xf32>
    %47 = vector.extract_strided_slice %13 {offsets = [0, 5], sizes = [8, 1000], strides = [1, 1]} : vector<8x1020xf32> to vector<8x1000xf32>
    %48 = vector.broadcast %46 : f32 to vector<8x1000xf32>
    %49 = arith.mulf %48, %47 : vector<8x1000xf32>
    %50 = arith.addf %44, %49 : vector<8x1000xf32>
    %c0_16 = arith.constant 0 : index
    %c6 = arith.constant 6 : index
    %51 = vector.load %arg2[%c0_16, %c6] : memref<1x21xf32, #tpu.memory_space<vmem>>, vector<1x1xf32>
    %52 = vector.extract %51[0, 0] : f32 from vector<1x1xf32>
    %53 = vector.extract_strided_slice %13 {offsets = [0, 6], sizes = [8, 1000], strides = [1, 1]} : vector<8x1020xf32> to vector<8x1000xf32>
    %54 = vector.broadcast %52 : f32 to vector<8x1000xf32>
    %55 = arith.mulf %54, %53 : vector<8x1000xf32>
    %56 = arith.addf %50, %55 : vector<8x1000xf32>
    %c0_17 = arith.constant 0 : index
    %c7 = arith.constant 7 : index
    %57 = vector.load %arg2[%c0_17, %c7] : memref<1x21xf32, #tpu.memory_space<vmem>>, vector<1x1xf32>
    %58 = vector.extract %57[0, 0] : f32 from vector<1x1xf32>
    %59 = vector.extract_strided_slice %13 {offsets = [0, 7], sizes = [8, 1000], strides = [1, 1]} : vector<8x1020xf32> to vector<8x1000xf32>
    %60 = vector.broadcast %58 : f32 to vector<8x1000xf32>
    %61 = arith.mulf %60, %59 : vector<8x1000xf32>
    %62 = arith.addf %56, %61 : vector<8x1000xf32>
    %c0_18 = arith.constant 0 : index
    %c8 = arith.constant 8 : index
    %63 = vector.load %arg2[%c0_18, %c8] : memref<1x21xf32, #tpu.memory_space<vmem>>, vector<1x1xf32>
    %64 = vector.extract %63[0, 0] : f32 from vector<1x1xf32>
    %65 = vector.extract_strided_slice %13 {offsets = [0, 8], sizes = [8, 1000], strides = [1, 1]} : vector<8x1020xf32> to vector<8x1000xf32>
    %66 = vector.broadcast %64 : f32 to vector<8x1000xf32>
    %67 = arith.mulf %66, %65 : vector<8x1000xf32>
    %68 = arith.addf %62, %67 : vector<8x1000xf32>
    %c0_19 = arith.constant 0 : index
    %c9 = arith.constant 9 : index
    %69 = vector.load %arg2[%c0_19, %c9] : memref<1x21xf32, #tpu.memory_space<vmem>>, vector<1x1xf32>
    %70 = vector.extract %69[0, 0] : f32 from vector<1x1xf32>
    %71 = vector.extract_strided_slice %13 {offsets = [0, 9], sizes = [8, 1000], strides = [1, 1]} : vector<8x1020xf32> to vector<8x1000xf32>
    %72 = vector.broadcast %70 : f32 to vector<8x1000xf32>
    %73 = arith.mulf %72, %71 : vector<8x1000xf32>
    %74 = arith.addf %68, %73 : vector<8x1000xf32>
    %c0_20 = arith.constant 0 : index
    %c10_21 = arith.constant 10 : index
    %75 = vector.load %arg2[%c0_20, %c10_21] : memref<1x21xf32, #tpu.memory_space<vmem>>, vector<1x1xf32>
    %76 = vector.extract %75[0, 0] : f32 from vector<1x1xf32>
    %77 = vector.extract_strided_slice %13 {offsets = [0, 10], sizes = [8, 1000], strides = [1, 1]} : vector<8x1020xf32> to vector<8x1000xf32>
    %78 = vector.broadcast %76 : f32 to vector<8x1000xf32>
    %79 = arith.mulf %78, %77 : vector<8x1000xf32>
    %80 = arith.addf %74, %79 : vector<8x1000xf32>
    %c0_22 = arith.constant 0 : index
    %c11 = arith.constant 11 : index
    %81 = vector.load %arg2[%c0_22, %c11] : memref<1x21xf32, #tpu.memory_space<vmem>>, vector<1x1xf32>
    %82 = vector.extract %81[0, 0] : f32 from vector<1x1xf32>
    %83 = vector.extract_strided_slice %13 {offsets = [0, 11], sizes = [8, 1000], strides = [1, 1]} : vector<8x1020xf32> to vector<8x1000xf32>
    %84 = vector.broadcast %82 : f32 to vector<8x1000xf32>
    %85 = arith.mulf %84, %83 : vector<8x1000xf32>
    %86 = arith.addf %80, %85 : vector<8x1000xf32>
    %c0_23 = arith.constant 0 : index
    %c12 = arith.constant 12 : index
    %87 = vector.load %arg2[%c0_23, %c12] : memref<1x21xf32, #tpu.memory_space<vmem>>, vector<1x1xf32>
    %88 = vector.extract %87[0, 0] : f32 from vector<1x1xf32>
    %89 = vector.extract_strided_slice %13 {offsets = [0, 12], sizes = [8, 1000], strides = [1, 1]} : vector<8x1020xf32> to vector<8x1000xf32>
    %90 = vector.broadcast %88 : f32 to vector<8x1000xf32>
    %91 = arith.mulf %90, %89 : vector<8x1000xf32>
    %92 = arith.addf %86, %91 : vector<8x1000xf32>
    %c0_24 = arith.constant 0 : index
    %c13 = arith.constant 13 : index
    %93 = vector.load %arg2[%c0_24, %c13] : memref<1x21xf32, #tpu.memory_space<vmem>>, vector<1x1xf32>
    %94 = vector.extract %93[0, 0] : f32 from vector<1x1xf32>
    %95 = vector.extract_strided_slice %13 {offsets = [0, 13], sizes = [8, 1000], strides = [1, 1]} : vector<8x1020xf32> to vector<8x1000xf32>
    %96 = vector.broadcast %94 : f32 to vector<8x1000xf32>
    %97 = arith.mulf %96, %95 : vector<8x1000xf32>
    %98 = arith.addf %92, %97 : vector<8x1000xf32>
    %c0_25 = arith.constant 0 : index
    %c14 = arith.constant 14 : index
    %99 = vector.load %arg2[%c0_25, %c14] : memref<1x21xf32, #tpu.memory_space<vmem>>, vector<1x1xf32>
    %100 = vector.extract %99[0, 0] : f32 from vector<1x1xf32>
    %101 = vector.extract_strided_slice %13 {offsets = [0, 14], sizes = [8, 1000], strides = [1, 1]} : vector<8x1020xf32> to vector<8x1000xf32>
    %102 = vector.broadcast %100 : f32 to vector<8x1000xf32>
    %103 = arith.mulf %102, %101 : vector<8x1000xf32>
    %104 = arith.addf %98, %103 : vector<8x1000xf32>
    %c0_26 = arith.constant 0 : index
    %c15 = arith.constant 15 : index
    %105 = vector.load %arg2[%c0_26, %c15] : memref<1x21xf32, #tpu.memory_space<vmem>>, vector<1x1xf32>
    %106 = vector.extract %105[0, 0] : f32 from vector<1x1xf32>
    %107 = vector.extract_strided_slice %13 {offsets = [0, 15], sizes = [8, 1000], strides = [1, 1]} : vector<8x1020xf32> to vector<8x1000xf32>
    %108 = vector.broadcast %106 : f32 to vector<8x1000xf32>
    %109 = arith.mulf %108, %107 : vector<8x1000xf32>
    %110 = arith.addf %104, %109 : vector<8x1000xf32>
    %c0_27 = arith.constant 0 : index
    %c16 = arith.constant 16 : index
    %111 = vector.load %arg2[%c0_27, %c16] : memref<1x21xf32, #tpu.memory_space<vmem>>, vector<1x1xf32>
    %112 = vector.extract %111[0, 0] : f32 from vector<1x1xf32>
    %113 = vector.extract_strided_slice %13 {offsets = [0, 16], sizes = [8, 1000], strides = [1, 1]} : vector<8x1020xf32> to vector<8x1000xf32>
    %114 = vector.broadcast %112 : f32 to vector<8x1000xf32>
    %115 = arith.mulf %114, %113 : vector<8x1000xf32>
    %116 = arith.addf %110, %115 : vector<8x1000xf32>
    %c0_28 = arith.constant 0 : index
    %c17 = arith.constant 17 : index
    %117 = vector.load %arg2[%c0_28, %c17] : memref<1x21xf32, #tpu.memory_space<vmem>>, vector<1x1xf32>
    %118 = vector.extract %117[0, 0] : f32 from vector<1x1xf32>
    %119 = vector.extract_strided_slice %13 {offsets = [0, 17], sizes = [8, 1000], strides = [1, 1]} : vector<8x1020xf32> to vector<8x1000xf32>
    %120 = vector.broadcast %118 : f32 to vector<8x1000xf32>
    %121 = arith.mulf %120, %119 : vector<8x1000xf32>
    %122 = arith.addf %116, %121 : vector<8x1000xf32>
    %c0_29 = arith.constant 0 : index
    %c18 = arith.constant 18 : index
    %123 = vector.load %arg2[%c0_29, %c18] : memref<1x21xf32, #tpu.memory_space<vmem>>, vector<1x1xf32>
    %124 = vector.extract %123[0, 0] : f32 from vector<1x1xf32>
    %125 = vector.extract_strided_slice %13 {offsets = [0, 18], sizes = [8, 1000], strides = [1, 1]} : vector<8x1020xf32> to vector<8x1000xf32>
    %126 = vector.broadcast %124 : f32 to vector<8x1000xf32>
    %127 = arith.mulf %126, %125 : vector<8x1000xf32>
    %128 = arith.addf %122, %127 : vector<8x1000xf32>
    %c0_30 = arith.constant 0 : index
    %c19 = arith.constant 19 : index
    %129 = vector.load %arg2[%c0_30, %c19] : memref<1x21xf32, #tpu.memory_space<vmem>>, vector<1x1xf32>
    %130 = vector.extract %129[0, 0] : f32 from vector<1x1xf32>
    %131 = vector.extract_strided_slice %13 {offsets = [0, 19], sizes = [8, 1000], strides = [1, 1]} : vector<8x1020xf32> to vector<8x1000xf32>
    %132 = vector.broadcast %130 : f32 to vector<8x1000xf32>
    %133 = arith.mulf %132, %131 : vector<8x1000xf32>
    %134 = arith.addf %128, %133 : vector<8x1000xf32>
    %c0_31 = arith.constant 0 : index
    %c20 = arith.constant 20 : index
    %135 = vector.load %arg2[%c0_31, %c20] : memref<1x21xf32, #tpu.memory_space<vmem>>, vector<1x1xf32>
    %136 = vector.extract %135[0, 0] : f32 from vector<1x1xf32>
    %137 = vector.extract_strided_slice %13 {offsets = [0, 20], sizes = [8, 1000], strides = [1, 1]} : vector<8x1020xf32> to vector<8x1000xf32>
    %138 = vector.broadcast %136 : f32 to vector<8x1000xf32>
    %139 = arith.mulf %138, %137 : vector<8x1000xf32>
    %140 = arith.addf %134, %139 : vector<8x1000xf32>
    %cst_32 = arith.constant dense<0xFF800000> : vector<8xf32>
    %141 = vector.multi_reduction <maximumf>, %140, %cst_32 [1] : vector<8x1000xf32> to vector<8xf32>
    %142 = vector.shape_cast %141 : vector<8xf32> to vector<8x1xf32>
    %c0_33 = arith.constant 0 : index
    %c0_34 = arith.constant 0 : index
    %143 = vector.load %arg3[%c0_33, %c0_34] : memref<8x1xf32, #tpu.memory_space<vmem>>, vector<8x1xf32>
    tpu.vector_store %arg3[%c0_33, %c0_34], %142 {strides = array<i32>} : memref<8x1xf32, #tpu.memory_space<vmem>>, vector<8x1xf32>,
    return
  }
  func.func @transform_0(%arg0: i32) -> (i32, i32) {
    %c0_i32 = arith.constant 0 : i32
    %c0_i32_0 = arith.constant 0 : i32
    return %arg0, %c0_i32 : i32, i32
  }
  func.func @transform_1(%arg0: i32) -> (i32, i32) {
    %c0_i32 = arith.constant 0 : i32
    %c0_i32_0 = arith.constant 0 : i32
    %c0_i32_1 = arith.constant 0 : i32
    return %c0_i32, %c0_i32_0 : i32, i32
  }
  func.func @transform_2(%arg0: i32) -> (i32, i32) {
    %c0_i32 = arith.constant 0 : i32
    %c0_i32_0 = arith.constant 0 : i32
    return %arg0, %c0_i32 : i32, i32
  }
}

</mosaic_0001>

<bundles_post_ra>
// kernel: _init_active.6
= control target key start
LH: loop header
LB: loop body
LE: loop exit
PB: predicated region body
PF: predicated region fallthrough
CT: control target
= control target key end

     0   :  { %s1390_s9 = smov 0   ;;  %s1762_s0 = inlined_call_operand.vmem [shape: f32[2,1,1050], index: 0, kind: input, shape index: {}]   ;;  %s1763_s1 = inlined_call_operand.vmem [shape: f32[1,51], index: 1, kind: input, shape index: {}]   ;;  %s1764_s2 = inlined_call_operand.vmem [shape: f32[2,1,1000], index: 2, kind: output, shape index: {}]  }
   0x1 LB: > { %s1186_s10 = sadd.s32 4294967295, %s1321_s9   ;;  %p1190_p0 = scmp.ge.s32.totalorder %s1321_s9, 1  ;;  %s1321_s9 = sphi %s1390_s9, %s12_s9  }
   0x2   : > { %p111_p1 = scmp.lt.s32.totalorder %s1321_s9, 3 }
   0x4   : > { %p112_p2 = pnand %p1190_p0, %p111_p1 }
   0x5   : > { %p131_p3 = scmp.lt.s32.totalorder (!%p112_p2), %s1186_s10, 1  ;;  %v141_v0 = vlaneseq (!%p112_p2)  ;;  %s1323_s15 = smov (!%p112_p2), 125   ;;  %vm169_vm1 = vcmask (!%p112_p2), 1022976   ;;  %vm151_vm2 = vcmask (!%p112_p2), 1039360   ;;  %vm178_vm3 = vcmask (!%p112_p2), 1014784  }
   0x6   : > { %115 = sbr.rel (%p112_p2) target bundleno = 535 (0x217), region = 28  ;;  %s1324_s16 = smov (!%p112_p2), 127   ;;  %vm160_vm4 = vcmask (!%p112_p2), 1031168   ;;  %vm196_vm5 = vcmask (!%p112_p2), 998400   ;;  %vm187_vm6 = vcmask (!%p112_p2), 1006592   ;;  %vm214_vm7 = vcmask (!%p112_p2), 982016  }
   0x7   : > { %vm1410_vm0 = vcmp.lt.s32.totalorder (!%p112_p2), %v141_v0, 1000  ;;  %s1325_s17 = smov (!%p112_p2), 124   ;;  %s1326_s18 = smov (!%p112_p2), 126   ;;  %vm205_vm8 = vcmask (!%p112_p2), 990208   ;;  %vm232_vm9 = vcmask (!%p112_p2), 965632   ;;  %vm223_vm10 = vcmask (!%p112_p2), 973824  }
   0x8   : > { %s1327_s19 = smov (!%p112_p2), 122   ;;  %s1328_s20 = smov (!%p112_p2), 123   ;;  %vm250_vm11 = vcmask (!%p112_p2), 949248   ;;  %vm241_vm12 = vcmask (!%p112_p2), 957440   ;;  %vm268_vm13 = vcmask (!%p112_p2), 932864   ;;  %vm259_vm14 = vcmask (!%p112_p2), 941056  }
   0x9   : > { %s1329_s21 = smov (!%p112_p2), 120   ;;  %s1330_s22 = smov (!%p112_p2), 121   ;;  %vm277_vm15 = vcmask (!%p112_p2), 924672   ;;  %v1373_v55 = vmov (!%p112_p2), 0.0  }
   0xa   : > { %s1331_s23 = smov (!%p112_p2), 118   ;;  %s1332_s24 = smov (!%p112_p2), 119   ;;  %854 = vmatprep.mubr.f32.mxu0 (!%p112_p2), %v1373_v55  ;;  %925 = vmatprep.mubr.f32.mxu1 (!%p112_p2), %v1373_v55 }
   0xb   : > { %s1333_s25 = smov (!%p112_p2), 116   ;;  %s1334_s26 = smov (!%p112_p2), 117  }
   0xc   : > { %s1335_s27 = smov (!%p112_p2), 114   ;;  %s1336_s28 = smov (!%p112_p2), 115  }
   0xd   : > { %s1768_s10 = smov (!%p131_p3, %s1186_s10), 1  ;;  %s1337_s29 = smov 103  }
   0xe   : > { %s1254_s11 = smul.u32 9, %s1768_s10  ;;  %s1338_s30 = smov 113  }
   0xf   : > { %s1339_s3 = smov 102   ;;  %s1340_s4 = smov 101  }
  0x10   : > { %s1404_s14 = scalar_lea.vmem %s1762_s0, %s1254_s11  ;;  %s1341_s5 = smov 100  }
  0x11   : > { %v1407_v1 = vld [vmem:[%s1404_s14] sm:$0xff]  ;;  %v1437_v3 = vld [vmem:[%s1404_s14 + $0x8] sm:$0x1]  ;;  %s1342_s6 = smov 99   ;;  %s1343_s7 = smov 98  }
  0x12   : > { %166 = vrot.lane.b32.xlu1 %v1407_v1, %s1323_s15  ;;  %148 = vrot.lane.b32.xlu0 %v1407_v1, %s1324_s16  ;;  %145 = vst.msk [vmem:[#allocation2] ss:$8 sm:$0xf] %vm1410_vm0, %v1407_v1  ;;  %146 = vst.msk [vmem:[#allocation2] ss:$8 sm:$0xf0] %vm1410_vm0, %v1407_v1 }
  0x13   : > { %s1344_s8 = smov 97   ;;  %s1345_s11 = smov 112  }
  0x14   : > { %s1346_s12 = smov 110   ;;  %s1347_s13 = smov 111  }
  0x15   : > { %s1348_s14 = smov 108   ;;  %s1349_s15 = smov 109  }
  0x16   : > { %175 = vrot.lane.b32.xlu1 %v1407_v1, %s1325_s17  ;;  %157 = vrot.lane.b32.xlu0 %v1407_v1, %s1326_s18  ;;  %s1350_s16 = smov 106   ;;  %s1351_s17 = smov 107  }
  0x17   : > { %s1352_s18 = smov 104  }
  0x1a   : > { %193 = vrot.lane.b32.xlu1 %v1407_v1, %s1327_s19  ;;  %184 = vrot.lane.b32.xlu0 %v1407_v1, %s1328_s20  ;;  %s1353_s19 = smov 105   ;;  %s1354_s20 = smov 96  }
  0x1e   : > { %211 = vrot.lane.b32.xlu1 %v1407_v1, %s1329_s21  ;;  %202 = vrot.lane.b32.xlu0 %v1407_v1, %s1330_s22  ;;  %s1355_s21 = smov 95   ;;  %s1356_s22 = smov 94  }
  0x22   : > { %229 = vrot.lane.b32.xlu1 %v1407_v1, %s1331_s23  ;;  %220 = vrot.lane.b32.xlu0 %v1407_v1, %s1332_s24  ;;  %s1357_s23 = smov 93   ;;  %s1358_s24 = smov 92  }
  0x26   : > { %247 = vrot.lane.b32.xlu1 %v1407_v1, %s1333_s25  ;;  %238 = vrot.lane.b32.xlu0 %v1407_v1, %s1334_s26  ;;  %s1359_s25 = smov 91   ;;  %s1360_s26 = smov 90  }
  0x2a   : > { %265 = vrot.lane.b32.xlu1 %v1407_v1, %s1335_s27  ;;  %256 = vrot.lane.b32.xlu0 %v1407_v1, %s1336_s28  ;;  %s1361_s27 = smov 89   ;;  %s1362_s28 = smov 88  }
  0x2e   : > { %365 = vrot.lane.b32.xlu1 %v1407_v1, %s1337_s29  ;;  %274 = vrot.lane.b32.xlu0 %v1407_v1, %s1338_s30  ;;  %s1364_s30 = smov 86  }
  0x32   : > { %379 = vrot.lane.b32.xlu1 %v1407_v1, %s1339_s3  ;;  %367 = vrot.lane.b32.xlu0 %v1437_v3, %s1337_s29  ;;  %s1363_s29 = smov 87  }
  0x36   : > { %392 = vrot.lane.b32.xlu1 %v1407_v1, %s1340_s4  ;;  %381 = vrot.lane.b32.xlu0 %v1437_v3, %s1339_s3  ;;  %s1365_s3 = smov 85  }
  0x3a   : > { %405 = vrot.lane.b32.xlu1 %v1407_v1, %s1341_s5  ;;  %394 = vrot.lane.b32.xlu0 %v1437_v3, %s1340_s4  ;;  %s1366_s4 = smov 84  }
  0x3e   : > { %418 = vrot.lane.b32.xlu1 %v1407_v1, %s1342_s6  ;;  %407 = vrot.lane.b32.xlu0 %v1437_v3, %s1341_s5  ;;  %s1367_s5 = smov 83  }
  0x42   : > { %431 = vrot.lane.b32.xlu1 %v1407_v1, %s1343_s7  ;;  %420 = vrot.lane.b32.xlu0 %v1437_v3, %s1342_s6  ;;  %s1368_s6 = smov 82  }
  0x46   : > { %444 = vrot.lane.b32.xlu1 %v1407_v1, %s1344_s8  ;;  %433 = vrot.lane.b32.xlu0 %v1437_v3, %s1343_s7  ;;  %s1369_s7 = smov 81  }
  0x4a   : > { %283 = vrot.lane.b32.xlu1 %v1407_v1, %s1345_s11  ;;  %446 = vrot.lane.b32.xlu0 %v1437_v3, %s1344_s8  ;;  %s1370_s8 = smov 80   ;;  %s1371_s11 = smov 79  }
  0x4e   : > { %301 = vrot.lane.b32.xlu1 %v1407_v1, %s1346_s12  ;;  %292 = vrot.lane.b32.xlu0 %v1407_v1, %s1347_s13  ;;  %s1372_s12 = smov 78  }
  0x52   : > { %319 = vrot.lane.b32.xlu1 %v1407_v1, %s1348_s14  ;;  %310 = vrot.lane.b32.xlu0 %v1407_v1, %s1349_s15  ;;  %s1191_s15 = sshll.u32 %s1768_s10, 3 }
  0x56   : > { %337 = vrot.lane.b32.xlu1 %v1407_v1, %s1350_s16  ;;  %328 = vrot.lane.b32.xlu0 %v1407_v1, %s1351_s17 }
  0x5a   : > { %355 = vrot.lane.b32.xlu1 %v1407_v1, %s1352_s18  ;;  %346 = vrot.lane.b32.xlu0 %v1407_v1, %s1353_s19  ;;  %s138_s18 = scalar_lea.vmem %s1764_s2, %s1191_s15 }
  0x5e   : > { %459 = vrot.lane.b32.xlu1 %v1437_v3, %s1354_s20  ;;  %457 = vrot.lane.b32.xlu0 %v1407_v1, %s1354_s20 }
  0x62   : > { %472 = vrot.lane.b32.xlu1 %v1437_v3, %s1355_s21  ;;  %470 = vrot.lane.b32.xlu0 %v1407_v1, %s1355_s21 }
  0x66   : > { %485 = vrot.lane.b32.xlu1 %v1437_v3, %s1356_s22  ;;  %483 = vrot.lane.b32.xlu0 %v1407_v1, %s1356_s22 }
  0x6a   : > { %498 = vrot.lane.b32.xlu1 %v1437_v3, %s1357_s23  ;;  %496 = vrot.lane.b32.xlu0 %v1407_v1, %s1357_s23 }
  0x6e   : > { %511 = vrot.lane.b32.xlu1 %v1437_v3, %s1358_s24  ;;  %509 = vrot.lane.b32.xlu0 %v1407_v1, %s1358_s24 }
  0x72   : > { %524 = vrot.lane.b32.xlu1 %v1437_v3, %s1359_s25  ;;  %522 = vrot.lane.b32.xlu0 %v1407_v1, %s1359_s25 }
  0x76   : > { %537 = vrot.lane.b32.xlu1 %v1437_v3, %s1360_s26  ;;  %535 = vrot.lane.b32.xlu0 %v1407_v1, %s1360_s26 }
  0x7a   : > { %550 = vrot.lane.b32.xlu1 %v1437_v3, %s1361_s27  ;;  %548 = vrot.lane.b32.xlu0 %v1407_v1, %s1361_s27 }
  0x7e   : > { %563 = vrot.lane.b32.xlu1 %v1437_v3, %s1362_s28  ;;  %561 = vrot.lane.b32.xlu0 %v1407_v1, %s1362_s28 }
  0x82   : > { %576 = vrot.lane.b32.xlu1 %v1437_v3, %s1363_s29  ;;  %574 = vrot.lane.b32.xlu0 %v1407_v1, %s1363_s29 }
  0x84   : > { %v167_v4 = vpop.permute.xlu1 %166  ;;  %v149_v5 = vpop.permute.xlu0 %148 }
  0x85   : > { %v168_v6 = vrot.slane %v167_v4, 1  ;;  %v150_v7 = vrot.slane %v149_v5, 1 }
  0x86   : > { %589 = vrot.lane.b32.xlu1 %v1437_v3, %s1364_s30  ;;  %587 = vrot.lane.b32.xlu0 %v1407_v1, %s1364_s30 }
  0x87   : > { %v170_v8 = vsel %vm169_vm1, %v167_v4, %v168_v6  ;;  %v152_v9 = vsel %vm151_vm2, %v149_v5, %v150_v7  ;;  %vm371_vm1 = vcmask 1046528   ;;  %vm373_vm2 = vcmask 842752  }
  0x88   : > { %173 = vst.msk [vmem:[#allocation2 + $0x3] ss:$8 sm:$0xf] %vm1410_vm0, %v170_v8  ;;  %174 = vst.msk [vmem:[#allocation2 + $0x3] ss:$8 sm:$0xf0] %vm1410_vm0, %v170_v8  ;;  %v176_v10 = vpop.permute.xlu1 %175  ;;  %v158_v11 = vpop.permute.xlu0 %157 }
  0x89   : > { %155 = vst.msk [vmem:[#allocation2 + $0x1] ss:$8 sm:$0xf] %vm1410_vm0, %v152_v9  ;;  %156 = vst.msk [vmem:[#allocation2 + $0x1] ss:$8 sm:$0xf0] %vm1410_vm0, %v152_v9 }
  0x8a   : > { %v177_v12 = vrot.slane %v176_v10, 1  ;;  %v159_v13 = vrot.slane %v158_v11, 1  ;;  %602 = vrot.lane.b32.xlu1 %v1437_v3, %s1365_s3  ;;  %600 = vrot.lane.b32.xlu0 %v1407_v1, %s1365_s3 }
  0x8c   : > { %v179_v14 = vsel %vm178_vm3, %v176_v10, %v177_v12  ;;  %v161_v15 = vsel %vm160_vm4, %v158_v11, %v159_v13  ;;  %v194_v16 = vpop.permute.xlu1 %193  ;;  %v185_v17 = vpop.permute.xlu0 %184  ;;  %vm386_vm3 = vcmask 834560   ;;  %vm399_vm4 = vcmask 826368  }
  0x8d   : > { %182 = vst.msk [vmem:[#allocation2 + $0x4] ss:$8 sm:$0xf] %vm1410_vm0, %v179_v14  ;;  %183 = vst.msk [vmem:[#allocation2 + $0x4] ss:$8 sm:$0xf0] %vm1410_vm0, %v179_v14 }
  0x8e   : > { %164 = vst.msk [vmem:[#allocation2 + $0x2] ss:$8 sm:$0xf] %vm1410_vm0, %v161_v15  ;;  %165 = vst.msk [vmem:[#allocation2 + $0x2] ss:$8 sm:$0xf0] %vm1410_vm0, %v161_v15  ;;  %615 = vrot.lane.b32.xlu1 %v1437_v3, %s1366_s4  ;;  %613 = vrot.lane.b32.xlu0 %v1407_v1, %s1366_s4 }
  0x8f   : > { %v195_v18 = vrot.slane %v194_v16, 1  ;;  %v186_v19 = vrot.slane %v185_v17, 1 }
  0x90   : > { %v212_v22 = vpop.permute.xlu1 %211  ;;  %v203_v23 = vpop.permute.xlu0 %202 }
  0x91   : > { %v197_v20 = vsel %vm196_vm5, %v194_v16, %v195_v18  ;;  %v188_v21 = vsel %vm187_vm6, %v185_v17, %v186_v19  ;;  %v213_v24 = vrot.slane %v212_v22, 1  ;;  %v204_v25 = vrot.slane %v203_v23, 1 }
  0x92   : > { %200 = vst.msk [vmem:[#allocation2 + $0x6] ss:$8 sm:$0xf] %vm1410_vm0, %v197_v20  ;;  %201 = vst.msk [vmem:[#allocation2 + $0x6] ss:$8 sm:$0xf0] %vm1410_vm0, %v197_v20  ;;  %628 = vrot.lane.b32.xlu1 %v1437_v3, %s1367_s5  ;;  %626 = vrot.lane.b32.xlu0 %v1407_v1, %s1367_s5 }
  0x93   : > { %191 = vst.msk [vmem:[#allocation2 + $0x5] ss:$8 sm:$0xf] %vm1410_vm0, %v188_v21  ;;  %192 = vst.msk [vmem:[#allocation2 + $0x5] ss:$8 sm:$0xf0] %vm1410_vm0, %v188_v21  ;;  %v215_v26 = vsel %vm214_vm7, %v212_v22, %v213_v24  ;;  %v206_v27 = vsel %vm205_vm8, %v203_v23, %v204_v25 }
  0x94   : > { %218 = vst.msk [vmem:[#allocation2 + $0x40] ss:$8 sm:$0xf] %vm1410_vm0, %v215_v26  ;;  %219 = vst.msk [vmem:[#allocation2 + $0x40] ss:$8 sm:$0xf0] %vm1410_vm0, %v215_v26  ;;  %v230_v28 = vpop.permute.xlu1 %229  ;;  %v221_v29 = vpop.permute.xlu0 %220 }
  0x95   : > { %209 = vst.msk [vmem:[#allocation2 + $0x7] ss:$8 sm:$0xf] %vm1410_vm0, %v206_v27  ;;  %210 = vst.msk [vmem:[#allocation2 + $0x7] ss:$8 sm:$0xf0] %vm1410_vm0, %v206_v27 }
  0x96   : > { %v231_v30 = vrot.slane %v230_v28, 1  ;;  %v222_v31 = vrot.slane %v221_v29, 1  ;;  %641 = vrot.lane.b32.xlu1 %v1437_v3, %s1368_s6  ;;  %639 = vrot.lane.b32.xlu0 %v1407_v1, %s1368_s6  ;;  %vm412_vm5 = vcmask 818176   ;;  %vm425_vm6 = vcmask 809984  }
  0x97   : > { %vm438_vm7 = vcmask 801792   ;;  %vm286_vm8 = vcmask 916480  }
  0x98   : > { %v233_v32 = vsel %vm232_vm9, %v230_v28, %v231_v30  ;;  %v224_v33 = vsel %vm223_vm10, %v221_v29, %v222_v31  ;;  %v248_v34 = vpop.permute.xlu1 %247  ;;  %v239_v35 = vpop.permute.xlu0 %238  ;;  %vm451_vm9 = vcmask 793600   ;;  %vm304_vm10 = vcmask 900096  }
  0x99   : > { %236 = vst.msk [vmem:[#allocation2 + $0x42] ss:$8 sm:$0xf] %vm1410_vm0, %v233_v32  ;;  %237 = vst.msk [vmem:[#allocation2 + $0x42] ss:$8 sm:$0xf0] %vm1410_vm0, %v233_v32 }
  0x9a   : > { %227 = vst.msk [vmem:[#allocation2 + $0x41] ss:$8 sm:$0xf] %vm1410_vm0, %v224_v33  ;;  %228 = vst.msk [vmem:[#allocation2 + $0x41] ss:$8 sm:$0xf0] %vm1410_vm0, %v224_v33  ;;  %654 = vrot.lane.b32.xlu1 %v1437_v3, %s1369_s7  ;;  %652 = vrot.lane.b32.xlu0 %v1407_v1, %s1369_s7 }
  0x9b   : > { %v249_v36 = vrot.slane %v248_v34, 1  ;;  %v240_v37 = vrot.slane %v239_v35, 1 }
  0x9c   : > { %v266_v40 = vpop.permute.xlu1 %265  ;;  %v257_v41 = vpop.permute.xlu0 %256  ;;  %v706_v61 = vld [vmem:[#allocation2 + $0x8] sm:$0xff]  ;;  %v708_v62 = vld [vmem:[#allocation2 + $0x18] sm:$0xff]  ;;  %v705_v63 = vld [vmem:[#allocation2] sm:$0xff] }
  0x9d   : > { %v251_v38 = vsel %vm250_vm11, %v248_v34, %v249_v36  ;;  %v242_v39 = vsel %vm241_vm12, %v239_v35, %v240_v37  ;;  %v267_v42 = vrot.slane %v266_v40, 1  ;;  %v258_v43 = vrot.slane %v257_v41, 1  ;;  %v707_v12 = vld [vmem:[#allocation2 + $0x10] sm:$0xff] }
  0x9e   : > { %254 = vst.msk [vmem:[#allocation2 + $0x44] ss:$8 sm:$0xf] %vm1410_vm0, %v251_v38  ;;  %255 = vst.msk [vmem:[#allocation2 + $0x44] ss:$8 sm:$0xf0] %vm1410_vm0, %v251_v38  ;;  %667 = vrot.lane.b32.xlu1 %v1437_v3, %s1370_s8  ;;  %665 = vrot.lane.b32.xlu0 %v1407_v1, %s1370_s8 }
  0x9f   : > { %245 = vst.msk [vmem:[#allocation2 + $0x43] ss:$8 sm:$0xf] %vm1410_vm0, %v242_v39  ;;  %246 = vst.msk [vmem:[#allocation2 + $0x43] ss:$8 sm:$0xf0] %vm1410_vm0, %v242_v39  ;;  %v269_v44 = vsel %vm268_vm13, %v266_v40, %v267_v42  ;;  %v260_v45 = vsel %vm259_vm14, %v257_v41, %v258_v43 }
  0xa0   : > { %272 = vst.msk [vmem:[#allocation2 + $0x46] ss:$8 sm:$0xf] %vm1410_vm0, %v269_v44  ;;  %273 = vst.msk [vmem:[#allocation2 + $0x46] ss:$8 sm:$0xf0] %vm1410_vm0, %v269_v44  ;;  %v366_v46 = vpop.permute.xlu1 %365  ;;  %v275_v47 = vpop.permute.xlu0 %274 }
  0xa1   : > { %263 = vst.msk [vmem:[#allocation2 + $0x45] ss:$8 sm:$0xf] %vm1410_vm0, %v260_v45  ;;  %264 = vst.msk [vmem:[#allocation2 + $0x45] ss:$8 sm:$0xf0] %vm1410_vm0, %v260_v45 }
  0xa2   : > { %v276_v48 = vrot.slane %v275_v47, 1  ;;  %680 = vrot.lane.b32.xlu1 %v1437_v3, %s1371_s11  ;;  %678 = vrot.lane.b32.xlu0 %v1407_v1, %s1371_s11  ;;  %v369_v52 = vrot.slane %v366_v46, 1  ;;  %vm295_vm11 = vcmask 908288   ;;  %vm322_vm12 = vcmask 883712  }
  0xa3   : > { %vm313_vm13 = vcmask 891904   ;;  %vm340_vm14 = vcmask 867328  }
  0xa4   : > { %v278_v49 = vsel %vm277_vm15, %v275_v47, %v276_v48  ;;  %v380_v50 = vpop.permute.xlu1 %379  ;;  %v368_v51 = vpop.permute.xlu0 %367  ;;  %vm331_vm15 = vcmask 875520  }
  0xa5   : > { %281 = vst.msk [vmem:[#allocation2 + $0x47] ss:$8 sm:$0xf] %vm1410_vm0, %v278_v49  ;;  %282 = vst.msk [vmem:[#allocation2 + $0x47] ss:$8 sm:$0xf0] %vm1410_vm0, %v278_v49 }
  0xa6   : > { %v370_v53 = vrot.slane %v368_v51, 1  ;;  %693 = vrot.lane.b32.xlu1 %v1437_v3, %s1372_s12  ;;  %691 = vrot.lane.b32.xlu0 %v1407_v1, %s1372_s12  ;;  %v383_v59 = vrot.slane %v380_v50, 1 }
  0xa8   : > { %v372_v54 = vsel %vm371_vm1, %v369_v52, %v370_v53  ;;  %v393_v57 = vpop.permute.xlu1 %392  ;;  %v382_v58 = vpop.permute.xlu0 %381 }
  0xa9   : > { %v374_v56 = vsel %vm373_vm2, %v366_v46, %v372_v54  ;;  %v384_v60 = vrot.slane %v382_v58, 1  ;;  %v396_v14 = vrot.slane %v393_v57, 1  ;;  %vm358_vm2 = vcmask 850944  }
  0xaa   : > { %377 = vst.msk [vmem:[#allocation2 + $0xc1] ss:$8 sm:$0xf] %vm1410_vm0, %v374_v56  ;;  %378 = vst.msk [vmem:[#allocation2 + $0xc1] ss:$8 sm:$0xf0] %vm1410_vm0, %v374_v56 }
  0xab   : > { %v385_v1 = vsel %vm371_vm1, %v383_v59, %v384_v60 }
  0xac   : > { %v714_v3 = vld [vmem:[#allocation2 + $0x48] sm:$0xff]  ;;  %v716_v4 = vld [vmem:[#allocation2 + $0x58] sm:$0xff]  ;;  %v713_v5 = vld [vmem:[#allocation2 + $0x40] sm:$0xff]  ;;  %v387_v6 = vsel %vm386_vm3, %v380_v50, %v385_v1  ;;  %v406_v7 = vpop.permute.xlu1 %405  ;;  %v395_v8 = vpop.permute.xlu0 %394  ;;  %vm349_vm3 = vcmask 859136  }
  0xad   : > { %v1206_v9 = vpack.c.bf16 %v714_v3, %v706_v61  ;;  %v1218_v10 = vpack.c.bf16 %v716_v4, %v708_v62  ;;  %v1208_v11 = vpack.c.bf16 %v713_v5, %v705_v63  ;;  %v715_v13 = vld [vmem:[#allocation2 + $0x50] sm:$0xff]  ;;  %390 = vst.msk [vmem:[#allocation2 + $0xc2] ss:$8 sm:$0xf] %vm1410_vm0, %v387_v6  ;;  %v397_v15 = vrot.slane %v395_v8, 1 }
  0xae   : > { %391 = vst.msk [vmem:[#allocation2 + $0xc2] ss:$8 sm:$0xf0] %vm1410_vm0, %v387_v6  ;;  %v1220_v16 = vpack.c.bf16 %v715_v13, %v707_v12  ;;  %v409_v21 = vrot.slane %v406_v7, 1 }
  0xaf   : > { %1207 = vmatprep.subr.bf16.mxu0 %v1206_v9  ;;  %1219 = vmatprep.subr.bf16.mxu1 %v1218_v10  ;;  %v398_v17 = vsel %vm371_vm1, %v396_v14, %v397_v15 }
  0xb0   : > { %1209 = vmatpush1.bf16.msra.mxu0 %v1208_v11  ;;  %1221 = vmatpush1.bf16.msra.mxu1 %v1220_v16  ;;  %v400_v18 = vsel %vm399_vm4, %v393_v57, %v398_v17  ;;  %v419_v19 = vpop.permute.xlu1 %418  ;;  %v408_v20 = vpop.permute.xlu0 %407  ;;  %vm464_vm4 = vcmask 785408  }
  0xb1   : > { %403 = vst.msk [vmem:[#allocation2 + $0xc3] ss:$8 sm:$0xf] %vm1410_vm0, %v400_v18  ;;  %404 = vst.msk [vmem:[#allocation2 + $0xc3] ss:$8 sm:$0xf0] %vm1410_vm0, %v400_v18 }
  0xb2   : > { %v410_v22 = vrot.slane %v408_v20, 1  ;;  %v422_v27 = vrot.slane %v419_v19, 1 }
  0xb4   : > { %v411_v23 = vsel %vm371_vm1, %v409_v21, %v410_v22  ;;  %v432_v25 = vpop.permute.xlu1 %431  ;;  %v421_v26 = vpop.permute.xlu0 %420 }
  0xb5   : > { %v413_v24 = vsel %vm412_vm5, %v406_v7, %v411_v23  ;;  %v423_v28 = vrot.slane %v421_v26, 1  ;;  %v435_v33 = vrot.slane %v432_v25, 1  ;;  %vm477_vm5 = vcmask 777216  }
  0xb6   : > { %416 = vst.msk [vmem:[#allocation2 + $0xc4] ss:$8 sm:$0xf] %vm1410_vm0, %v413_v24  ;;  %417 = vst.msk [vmem:[#allocation2 + $0xc4] ss:$8 sm:$0xf0] %vm1410_vm0, %v413_v24 }
  0xb7   : > { %v424_v29 = vsel %vm371_vm1, %v422_v27, %v423_v28 }
  0xb8   : > { %v426_v30 = vsel %vm425_vm6, %v419_v19, %v424_v29  ;;  %v445_v31 = vpop.permute.xlu1 %444  ;;  %v434_v32 = vpop.permute.xlu0 %433  ;;  %vm490_vm6 = vcmask 769024  }
  0xb9   : > { %429 = vst.msk [vmem:[#allocation2 + $0xc5] ss:$8 sm:$0xf] %vm1410_vm0, %v426_v30  ;;  %430 = vst.msk [vmem:[#allocation2 + $0xc5] ss:$8 sm:$0xf0] %vm1410_vm0, %v426_v30 }
  0xba   : > { %v436_v34 = vrot.slane %v434_v32, 1  ;;  %v448_v39 = vrot.slane %v445_v31, 1 }
  0xbc   : > { %v437_v35 = vsel %vm371_vm1, %v435_v33, %v436_v34  ;;  %v284_v37 = vpop.permute.xlu1 %283  ;;  %v447_v38 = vpop.permute.xlu0 %446 }
  0xbd   : > { %v439_v36 = vsel %vm438_vm7, %v432_v25, %v437_v35  ;;  %v285_v40 = vrot.slane %v284_v37, 1  ;;  %v449_v41 = vrot.slane %v447_v38, 1  ;;  %vm503_vm7 = vcmask 760832  }
  0xbe   : > { %442 = vst.msk [vmem:[#allocation2 + $0xc6] ss:$8 sm:$0xf] %vm1410_vm0, %v439_v36  ;;  %443 = vst.msk [vmem:[#allocation2 + $0xc6] ss:$8 sm:$0xf0] %vm1410_vm0, %v439_v36 }
  0xbf   : > { %v287_v42 = vsel %vm286_vm8, %v284_v37, %v285_v40  ;;  %v450_v43 = vsel %vm371_vm1, %v448_v39, %v449_v41  ;;  %vm516_vm8 = vcmask 752640  }
  0xc0   : > { %290 = vst.msk [vmem:[#allocation2 + $0x80] ss:$8 sm:$0xf] %vm1410_vm0, %v287_v42  ;;  %291 = vst.msk [vmem:[#allocation2 + $0x80] ss:$8 sm:$0xf0] %vm1410_vm0, %v287_v42  ;;  %v452_v44 = vsel %vm451_vm9, %v445_v31, %v450_v43  ;;  %v302_v45 = vpop.permute.xlu1 %301  ;;  %v293_v46 = vpop.permute.xlu0 %292 }
  0xc1   : > { %455 = vst.msk [vmem:[#allocation2 + $0xc7] ss:$8 sm:$0xf] %vm1410_vm0, %v452_v44  ;;  %456 = vst.msk [vmem:[#allocation2 + $0xc7] ss:$8 sm:$0xf0] %vm1410_vm0, %v452_v44 }
  0xc2   : > { %v303_v47 = vrot.slane %v302_v45, 1  ;;  %v294_v48 = vrot.slane %v293_v46, 1  ;;  %vm529_vm9 = vcmask 744448  }
  0xc4   : > { %v305_v49 = vsel %vm304_vm10, %v302_v45, %v303_v47  ;;  %v296_v50 = vsel %vm295_vm11, %v293_v46, %v294_v48  ;;  %v320_v51 = vpop.permute.xlu1 %319  ;;  %v311_v52 = vpop.permute.xlu0 %310  ;;  %vm542_vm10 = vcmask 736256   ;;  %vm555_vm11 = vcmask 728064  }
  0xc5   : > { %308 = vst.msk [vmem:[#allocation2 + $0x82] ss:$8 sm:$0xf] %vm1410_vm0, %v305_v49  ;;  %309 = vst.msk [vmem:[#allocation2 + $0x82] ss:$8 sm:$0xf0] %vm1410_vm0, %v305_v49 }
  0xc6   : > { %299 = vst.msk [vmem:[#allocation2 + $0x81] ss:$8 sm:$0xf] %vm1410_vm0, %v296_v50  ;;  %300 = vst.msk [vmem:[#allocation2 + $0x81] ss:$8 sm:$0xf0] %vm1410_vm0, %v296_v50 }
  0xc7   : > { %v321_v53 = vrot.slane %v320_v51, 1  ;;  %v312_v54 = vrot.slane %v311_v52, 1 }
  0xc8   : > { %v338_v58 = vpop.permute.xlu1 %337  ;;  %v329_v59 = vpop.permute.xlu0 %328 }
  0xc9   : > { %v323_v56 = vsel %vm322_vm12, %v320_v51, %v321_v53  ;;  %v314_v57 = vsel %vm313_vm13, %v311_v52, %v312_v54  ;;  %v339_v60 = vrot.slane %v338_v58, 1  ;;  %v330_v61 = vrot.slane %v329_v59, 1 }
  0xca   : > { %326 = vst.msk [vmem:[#allocation2 + $0x84] ss:$8 sm:$0xf] %vm1410_vm0, %v323_v56  ;;  %327 = vst.msk [vmem:[#allocation2 + $0x84] ss:$8 sm:$0xf0] %vm1410_vm0, %v323_v56 }
  0xcb   : > { %317 = vst.msk [vmem:[#allocation2 + $0x83] ss:$8 sm:$0xf] %vm1410_vm0, %v314_v57  ;;  %318 = vst.msk [vmem:[#allocation2 + $0x83] ss:$8 sm:$0xf0] %vm1410_vm0, %v314_v57  ;;  %v341_v62 = vsel %vm340_vm14, %v338_v58, %v339_v60  ;;  %v332_v63 = vsel %vm331_vm15, %v329_v59, %v330_v61 }
  0xcc   : > { %344 = vst.msk [vmem:[#allocation2 + $0x86] ss:$8 sm:$0xf] %vm1410_vm0, %v341_v62  ;;  %345 = vst.msk [vmem:[#allocation2 + $0x86] ss:$8 sm:$0xf0] %vm1410_vm0, %v341_v62  ;;  %v356_v1 = vpop.permute.xlu1 %355  ;;  %v347_v3 = vpop.permute.xlu0 %346 }
  0xcd   : > { %335 = vst.msk [vmem:[#allocation2 + $0x85] ss:$8 sm:$0xf] %vm1410_vm0, %v332_v63  ;;  %336 = vst.msk [vmem:[#allocation2 + $0x85] ss:$8 sm:$0xf0] %vm1410_vm0, %v332_v63 }
  0xce   : > { %v357_v4 = vrot.slane %v356_v1, 1  ;;  %v348_v5 = vrot.slane %v347_v3, 1  ;;  %vm568_vm12 = vcmask 719872   ;;  %vm581_vm13 = vcmask 711680  }
  0xcf   : > { %vm594_vm14 = vcmask 703488   ;;  %vm607_vm15 = vcmask 695296  }
  0xd0   : > { %v359_v6 = vsel %vm358_vm2, %v356_v1, %v357_v4  ;;  %v350_v7 = vsel %vm349_vm3, %v347_v3, %v348_v5  ;;  %v460_v8 = vpop.permute.xlu1 %459  ;;  %v458_v9 = vpop.permute.xlu0 %457  ;;  %vm620_vm2 = vcmask 687104   ;;  %vm633_vm3 = vcmask 678912  }
  0xd1   : > { %362 = vst.msk [vmem:[#allocation2 + $0xc0] ss:$8 sm:$0xf] %vm1410_vm0, %v359_v6  ;;  %363 = vst.msk [vmem:[#allocation2 + $0xc0] ss:$8 sm:$0xf0] %vm1410_vm0, %v359_v6 }
  0xd2   : > { %353 = vst.msk [vmem:[#allocation2 + $0x87] ss:$8 sm:$0xf] %vm1410_vm0, %v350_v7  ;;  %354 = vst.msk [vmem:[#allocation2 + $0x87] ss:$8 sm:$0xf0] %vm1410_vm0, %v350_v7 }
  0xd3   : > { %v462_v10 = vrot.slane %v460_v8, 1  ;;  %v461_v11 = vrot.slane %v458_v9, 1 }
  0xd4   : > { %v473_v14 = vpop.permute.xlu1 %472  ;;  %v471_v15 = vpop.permute.xlu0 %470 }
  0xd5   : > { %v463_v12 = vsel %vm371_vm1, %v461_v11, %v462_v10  ;;  %v475_v16 = vrot.slane %v473_v14, 1  ;;  %v474_v17 = vrot.slane %v471_v15, 1 }
  0xd6   : > { %v465_v13 = vsel %vm464_vm4, %v458_v9, %v463_v12  ;;  %vm646_vm4 = vcmask 670720  }
  0xd7   : > { %468 = vst.msk [vmem:[#allocation2 + $0x100] ss:$8 sm:$0xf] %vm1410_vm0, %v465_v13  ;;  %469 = vst.msk [vmem:[#allocation2 + $0x100] ss:$8 sm:$0xf0] %vm1410_vm0, %v465_v13  ;;  %v476_v18 = vsel %vm371_vm1, %v474_v17, %v475_v16 }
  0xd8   : > { %v730_v20 = vld [vmem:[#allocation2 + $0xc8] sm:$0xff]  ;;  %v478_v22 = vsel %vm477_vm5, %v471_v15, %v476_v18  ;;  %v486_v23 = vpop.permute.xlu1 %485  ;;  %v484_v24 = vpop.permute.xlu0 %483  ;;  %v732_v26 = vld [vmem:[#allocation2 + $0xd8] sm:$0xff]  ;;  %v729_v28 = vld [vmem:[#allocation2 + $0xc0] sm:$0xff]  ;;  %vm659_vm5 = vcmask 662528  }
  0xd9   : > { %v722_v19 = vld [vmem:[#allocation2 + $0x88] sm:$0xff]  ;;  %v724_v21 = vld [vmem:[#allocation2 + $0x98] sm:$0xff]  ;;  %v721_v27 = vld [vmem:[#allocation2 + $0x80] sm:$0xff]  ;;  %481 = vst.msk [vmem:[#allocation2 + $0x101] ss:$8 sm:$0xf] %vm1410_vm0, %v478_v22 }
  0xda   : > { %v1210_v25 = vpack.c.bf16 %v730_v20, %v722_v19  ;;  %482 = vst.msk [vmem:[#allocation2 + $0x101] ss:$8 sm:$0xf0] %vm1410_vm0, %v478_v22  ;;  %v488_v29 = vrot.slane %v486_v23, 1  ;;  %v487_v30 = vrot.slane %v484_v24, 1  ;;  %v1222_v31 = vpack.c.bf16 %v732_v26, %v724_v21  ;;  %v723_v33 = vld [vmem:[#allocation2 + $0x90] sm:$0xff] }
  0xdb   : > { %v1212_v32 = vpack.c.bf16 %v729_v28, %v721_v27  ;;  %v731_v34 = vld [vmem:[#allocation2 + $0xd0] sm:$0xff] }
  0xdc   : > { %1211 = vmatprep.subr.bf16.mxu0 %v1210_v25  ;;  %v1224_v35 = vpack.c.bf16 %v731_v34, %v723_v33  ;;  %v489_v36 = vsel %vm371_vm1, %v487_v30, %v488_v29  ;;  %1223 = vmatprep.subr.bf16.mxu1 %v1222_v31  ;;  %v499_v38 = vpop.permute.xlu1 %498  ;;  %v497_v39 = vpop.permute.xlu0 %496 }
  0xdd   : > { %1213 = vmatpush1.bf16.msra.mxu0 %v1212_v32  ;;  %v491_v37 = vsel %vm490_vm6, %v484_v24, %v489_v36  ;;  %v501_v40 = vrot.slane %v499_v38, 1  ;;  %v500_v41 = vrot.slane %v497_v39, 1  ;;  %vm672_vm6 = vcmask 654336  }
  0xde   : > { %1225 = vmatpush1.bf16.msra.mxu1 %v1224_v35  ;;  %494 = vst.msk [vmem:[#allocation2 + $0x102] ss:$8 sm:$0xf] %vm1410_vm0, %v491_v37  ;;  %495 = vst.msk [vmem:[#allocation2 + $0x102] ss:$8 sm:$0xf0] %vm1410_vm0, %v491_v37 }
  0xdf   : > { %v502_v42 = vsel %vm371_vm1, %v500_v41, %v501_v40 }
  0xe0   : > { %v504_v43 = vsel %vm503_vm7, %v497_v39, %v502_v42  ;;  %v512_v44 = vpop.permute.xlu1 %511  ;;  %v510_v45 = vpop.permute.xlu0 %509  ;;  %vm685_vm7 = vcmask 646144  }
  0xe1   : > { %507 = vst.msk [vmem:[#allocation2 + $0x103] ss:$8 sm:$0xf] %vm1410_vm0, %v504_v43  ;;  %508 = vst.msk [vmem:[#allocation2 + $0x103] ss:$8 sm:$0xf0] %vm1410_vm0, %v504_v43 }
  0xe2   : > { %v514_v46 = vrot.slane %v512_v44, 1  ;;  %v513_v47 = vrot.slane %v510_v45, 1 }
  0xe4   : > { %v515_v48 = vsel %vm371_vm1, %v513_v47, %v514_v46  ;;  %v525_v50 = vpop.permute.xlu1 %524  ;;  %v523_v51 = vpop.permute.xlu0 %522 }
  0xe5   : > { %v517_v49 = vsel %vm516_vm8, %v510_v45, %v515_v48  ;;  %v527_v52 = vrot.slane %v525_v50, 1  ;;  %v526_v53 = vrot.slane %v523_v51, 1  ;;  %vm698_vm8 = vcmask 637952  }
  0xe6   : > { %520 = vst.msk [vmem:[#allocation2 + $0x104] ss:$8 sm:$0xf] %vm1410_vm0, %v517_v49  ;;  %521 = vst.msk [vmem:[#allocation2 + $0x104] ss:$8 sm:$0xf0] %vm1410_vm0, %v517_v49 }
  0xe7   : > { %v528_v54 = vsel %vm371_vm1, %v526_v53, %v527_v52 }
  0xe8   : > { %v530_v56 = vsel %vm529_vm9, %v523_v51, %v528_v54  ;;  %v538_v57 = vpop.permute.xlu1 %537  ;;  %v536_v58 = vpop.permute.xlu0 %535  ;;  %vm765_vm9 = vcmask 1042432  }
  0xe9   : > { %533 = vst.msk [vmem:[#allocation2 + $0x105] ss:$8 sm:$0xf] %vm1410_vm0, %v530_v56  ;;  %534 = vst.msk [vmem:[#allocation2 + $0x105] ss:$8 sm:$0xf0] %vm1410_vm0, %v530_v56 }
  0xea   : > { %v540_v59 = vrot.slane %v538_v57, 1  ;;  %v539_v60 = vrot.slane %v536_v58, 1 }
  0xec   : > { %v541_v61 = vsel %vm371_vm1, %v539_v60, %v540_v59  ;;  %v551_v63 = vpop.permute.xlu1 %550  ;;  %v549_v1 = vpop.permute.xlu0 %548 }
  0xed   : > { %v543_v62 = vsel %vm542_vm10, %v536_v58, %v541_v61  ;;  %v553_v3 = vrot.slane %v551_v63, 1  ;;  %v552_v4 = vrot.slane %v549_v1, 1 }
  0xee   : > { %546 = vst.msk [vmem:[#allocation2 + $0x106] ss:$8 sm:$0xf] %vm1410_vm0, %v543_v62  ;;  %547 = vst.msk [vmem:[#allocation2 + $0x106] ss:$8 sm:$0xf0] %vm1410_vm0, %v543_v62 }
  0xef   : > { %v554_v5 = vsel %vm371_vm1, %v552_v4, %v553_v3 }
  0xf0   : > { %v556_v6 = vsel %vm555_vm11, %v549_v1, %v554_v5  ;;  %v564_v7 = vpop.permute.xlu1 %563  ;;  %v562_v8 = vpop.permute.xlu0 %561 }
  0xf1   : > { %559 = vst.msk [vmem:[#allocation2 + $0x107] ss:$8 sm:$0xf] %vm1410_vm0, %v556_v6  ;;  %560 = vst.msk [vmem:[#allocation2 + $0x107] ss:$8 sm:$0xf0] %vm1410_vm0, %v556_v6 }
  0xf2   : > { %v566_v9 = vrot.slane %v564_v7, 1  ;;  %v565_v10 = vrot.slane %v562_v8, 1 }
  0xf4   : > { %v567_v11 = vsel %vm371_vm1, %v565_v10, %v566_v9  ;;  %v577_v13 = vpop.permute.xlu1 %576  ;;  %v575_v14 = vpop.permute.xlu0 %574 }
  0xf5   : > { %v569_v12 = vsel %vm568_vm12, %v562_v8, %v567_v11  ;;  %v579_v15 = vrot.slane %v577_v13, 1  ;;  %v578_v16 = vrot.slane %v575_v14, 1 }
  0xf6   : > { %572 = vst.msk [vmem:[#allocation2 + $0x140] ss:$8 sm:$0xf] %vm1410_vm0, %v569_v12  ;;  %573 = vst.msk [vmem:[#allocation2 + $0x140] ss:$8 sm:$0xf0] %vm1410_vm0, %v569_v12 }
  0xf7   : > { %v580_v17 = vsel %vm371_vm1, %v578_v16, %v579_v15 }
  0xf8   : > { %v582_v18 = vsel %vm581_vm13, %v575_v14, %v580_v17  ;;  %v590_v19 = vpop.permute.xlu1 %589  ;;  %v588_v20 = vpop.permute.xlu0 %587  ;;  %v738_v5 = vld [vmem:[#allocation2 + $0x108] sm:$0xff]  ;;  %v740_v6 = vld [vmem:[#allocation2 + $0x118] sm:$0xff]  ;;  %v737_v17 = vld [vmem:[#allocation2 + $0x100] sm:$0xff] }
  0xf9   : > { %585 = vst.msk [vmem:[#allocation2 + $0x141] ss:$8 sm:$0xf] %vm1410_vm0, %v582_v18  ;;  %586 = vst.msk [vmem:[#allocation2 + $0x141] ss:$8 sm:$0xf0] %vm1410_vm0, %v582_v18 }
  0xfa   : > { %v592_v21 = vrot.slane %v590_v19, 1  ;;  %v591_v22 = vrot.slane %v588_v20, 1  ;;  %v739_v18 = vld [vmem:[#allocation2 + $0x110] sm:$0xff] }
  0xfc   : > { %v593_v23 = vsel %vm371_vm1, %v591_v22, %v592_v21  ;;  %v603_v25 = vpop.permute.xlu1 %602  ;;  %v601_v26 = vpop.permute.xlu0 %600 }
  0xfd   : > { %v595_v24 = vsel %vm594_vm14, %v588_v20, %v593_v23  ;;  %v605_v27 = vrot.slane %v603_v25, 1  ;;  %v604_v28 = vrot.slane %v601_v26, 1  ;;  %v718_v25 = vld [vmem:[#allocation2 + $0x68] sm:$0xff] }
  0xfe   : > { %598 = vst.msk [vmem:[#allocation2 + $0x142] ss:$8 sm:$0xf] %vm1410_vm0, %v595_v24  ;;  %599 = vst.msk [vmem:[#allocation2 + $0x142] ss:$8 sm:$0xf0] %vm1410_vm0, %v595_v24 }
  0xff   : > { %v606_v29 = vsel %vm371_vm1, %v604_v28, %v605_v27  ;;  %v1732_v24 = vld [vmem:[%s1763_s1] sm:$0x1]  ;;  %v710_v28 = vld [vmem:[#allocation2 + $0x28] sm:$0xff] }
 0x100   : > { %v608_v30 = vsel %vm607_vm15, %v601_v26, %v606_v29  ;;  %v616_v31 = vpop.permute.xlu1 %615  ;;  %v614_v32 = vpop.permute.xlu0 %613  ;;  %v720_v26 = vld [vmem:[#allocation2 + $0x78] sm:$0xff]  ;;  %v717_v27 = vld [vmem:[#allocation2 + $0x60] sm:$0xff] }
 0x101   : > { %611 = vst.msk [vmem:[#allocation2 + $0x143] ss:$8 sm:$0xf] %vm1410_vm0, %v608_v30  ;;  %612 = vst.msk [vmem:[#allocation2 + $0x143] ss:$8 sm:$0xf0] %vm1410_vm0, %v608_v30 }
 0x102   : > { %v618_v33 = vrot.slane %v616_v31, 1  ;;  %v617_v34 = vrot.slane %v614_v32, 1  ;;  %v712_v29 = vld [vmem:[#allocation2 + $0x38] sm:$0xff]  ;;  %v719_v30 = vld [vmem:[#allocation2 + $0x70] sm:$0xff]  ;;  %v726_v31 = vld [vmem:[#allocation2 + $0xa8] sm:$0xff] }
 0x104   : > { %v619_v35 = vsel %vm371_vm1, %v617_v34, %v618_v33  ;;  %v629_v37 = vpop.permute.xlu1 %628  ;;  %v627_v38 = vpop.permute.xlu0 %626 }
 0x105   : > { %v621_v36 = vsel %vm620_vm2, %v614_v32, %v619_v35  ;;  %v631_v39 = vrot.slane %v629_v37, 1  ;;  %v630_v40 = vrot.slane %v627_v38, 1  ;;  %v734_v32 = vld [vmem:[#allocation2 + $0xe8] sm:$0xff]  ;;  %v728_v37 = vld [vmem:[#allocation2 + $0xb8] sm:$0xff] }
 0x106   : > { %624 = vst.msk [vmem:[#allocation2 + $0x144] ss:$8 sm:$0xf] %vm1410_vm0, %v621_v36  ;;  %625 = vst.msk [vmem:[#allocation2 + $0x144] ss:$8 sm:$0xf0] %vm1410_vm0, %v621_v36 }
 0x107   : > { %v632_v41 = vsel %vm371_vm1, %v630_v40, %v631_v39  ;;  %v1230_v39 = vpack.c.bf16 %v718_v25, %v710_v28  ;;  %v1242_v40 = vpack.c.bf16 %v720_v26, %v712_v29 }
 0x108   : > { %v634_v42 = vsel %vm633_vm3, %v627_v38, %v632_v41  ;;  %v642_v43 = vpop.permute.xlu1 %641  ;;  %v640_v44 = vpop.permute.xlu0 %639  ;;  %v736_v38 = vld [vmem:[#allocation2 + $0xf8] sm:$0xff]  ;;  %v709_v41 = vld [vmem:[#allocation2 + $0x20] sm:$0xff] }
 0x109   : > { %637 = vst.msk [vmem:[#allocation2 + $0x145] ss:$8 sm:$0xf] %vm1410_vm0, %v634_v42  ;;  %638 = vst.msk [vmem:[#allocation2 + $0x145] ss:$8 sm:$0xf0] %vm1410_vm0, %v634_v42 }
 0x10a   : > { %v644_v45 = vrot.slane %v642_v43, 1  ;;  %v643_v46 = vrot.slane %v640_v44, 1  ;;  %v711_v42 = vld [vmem:[#allocation2 + $0x30] sm:$0xff]  ;;  %v1232_v43 = vpack.c.bf16 %v717_v27, %v709_v41 }
 0x10c   : > { %v645_v47 = vsel %vm371_vm1, %v643_v46, %v644_v45  ;;  %v655_v49 = vpop.permute.xlu1 %654  ;;  %v653_v50 = vpop.permute.xlu0 %652  ;;  %v725_v45 = vld [vmem:[#allocation2 + $0xa0] sm:$0xff]  ;;  %v1234_v46 = vpack.c.bf16 %v734_v32, %v726_v31 }
 0x10d   : > { %v647_v48 = vsel %vm646_vm4, %v640_v44, %v645_v47  ;;  %v657_v51 = vrot.slane %v655_v49, 1  ;;  %v656_v52 = vrot.slane %v653_v50, 1  ;;  %v1244_v44 = vpack.c.bf16 %v719_v30, %v711_v42  ;;  %v727_v49 = vld [vmem:[#allocation2 + $0xb0] sm:$0xff] }
 0x10e   : > { %650 = vst.msk [vmem:[#allocation2 + $0x146] ss:$8 sm:$0xf] %vm1410_vm0, %v647_v48  ;;  %651 = vst.msk [vmem:[#allocation2 + $0x146] ss:$8 sm:$0xf0] %vm1410_vm0, %v647_v48  ;;  %v1246_v47 = vpack.c.bf16 %v736_v38, %v728_v37 }
 0x10f   : > { %v658_v53 = vsel %vm371_vm1, %v656_v52, %v657_v51  ;;  %v733_v48 = vld [vmem:[#allocation2 + $0xe0] sm:$0xff] }
 0x110   : > { %v660_v54 = vsel %vm659_vm5, %v653_v50, %v658_v53  ;;  %v668_v56 = vpop.permute.xlu1 %667  ;;  %v666_v57 = vpop.permute.xlu0 %665  ;;  %v735_v50 = vld [vmem:[#allocation2 + $0xf0] sm:$0xff]  ;;  %v1236_v53 = vpack.c.bf16 %v733_v48, %v725_v45 }
 0x111   : > { %663 = vst.msk [vmem:[#allocation2 + $0x147] ss:$8 sm:$0xf] %vm1410_vm0, %v660_v54  ;;  %664 = vst.msk [vmem:[#allocation2 + $0x147] ss:$8 sm:$0xf0] %vm1410_vm0, %v660_v54  ;;  %v1248_v54 = vpack.c.bf16 %v735_v50, %v727_v49 }
 0x112   : > { %v670_v58 = vrot.slane %v668_v56, 1  ;;  %v669_v59 = vrot.slane %v666_v57, 1  ;;  %v742_v56 = vld [vmem:[#allocation2 + $0x128] sm:$0xff] }
 0x114   : > { %v671_v60 = vsel %vm371_vm1, %v669_v59, %v670_v58  ;;  %v681_v62 = vpop.permute.xlu1 %680  ;;  %v679_v63 = vpop.permute.xlu0 %678 }
 0x115   : > { %v673_v61 = vsel %vm672_vm6, %v666_v57, %v671_v60  ;;  %v683_v1 = vrot.slane %v681_v62, 1  ;;  %v682_v3 = vrot.slane %v679_v63, 1  ;;  %v744_v57 = vld [vmem:[#allocation2 + $0x138] sm:$0xff]  ;;  %v741_v62 = vld [vmem:[#allocation2 + $0x120] sm:$0xff] }
 0x116   : > { %676 = vst.msk [vmem:[#allocation2 + $0x180] ss:$8 sm:$0xf] %vm1410_vm0, %v673_v61  ;;  %677 = vst.msk [vmem:[#allocation2 + $0x180] ss:$8 sm:$0xf0] %vm1410_vm0, %v673_v61 }
 0x117   : > { %v684_v4 = vsel %vm371_vm1, %v682_v3, %v683_v1 }
 0x118   : > { %v686_v7 = vsel %vm685_vm7, %v679_v63, %v684_v4  ;;  %v694_v8 = vpop.permute.xlu1 %693  ;;  %v692_v9 = vpop.permute.xlu0 %691  ;;  %v746_v10 = vld [vmem:[#allocation2 + $0x148] sm:$0xff]  ;;  %v748_v11 = vld [vmem:[#allocation2 + $0x158] sm:$0xff]  ;;  %v745_v12 = vld [vmem:[#allocation2 + $0x140] sm:$0xff] }
 0x119   : > { %689 = vst.msk [vmem:[#allocation2 + $0x181] ss:$8 sm:$0xf] %vm1410_vm0, %v686_v7  ;;  %690 = vst.msk [vmem:[#allocation2 + $0x181] ss:$8 sm:$0xf0] %vm1410_vm0, %v686_v7  ;;  %v1214_v15 = vpack.c.bf16 %v746_v10, %v738_v5  ;;  %v1226_v16 = vpack.c.bf16 %v748_v11, %v740_v6  ;;  %v1216_v20 = vpack.c.bf16 %v745_v12, %v737_v17 }
 0x11a   : > { %v696_v13 = vrot.slane %v694_v8, 1  ;;  %v695_v14 = vrot.slane %v692_v9, 1  ;;  %v747_v19 = vld [vmem:[#allocation2 + $0x150] sm:$0xff]  ;;  %v750_v51 = vld [vmem:[#allocation2 + $0x168] sm:$0xff]  ;;  %v752_v52 = vld [vmem:[#allocation2 + $0x178] sm:$0xff]  ;;  %v1090_v10 = vshrl.u32 %v141_v0, 7 }
 0x11b   : > { %v1228_v21 = vpack.c.bf16 %v747_v19, %v739_v18  ;;  %1215 = vmatprep.subr.bf16.mxu0 %v1214_v15  ;;  %1227 = vmatprep.subr.bf16.mxu1 %v1226_v16  ;;  %v1238_v58 = vpack.c.bf16 %v750_v51, %v742_v56  ;;  %v1250_v59 = vpack.c.bf16 %v752_v52, %v744_v57  ;;  %v749_v60 = vld [vmem:[#allocation2 + $0x160] sm:$0xff]  ;;  %v751_v61 = vld [vmem:[#allocation2 + $0x170] sm:$0xff]  ;;  %v1374_v7 = vmov 1966171168  }
 0x11c   : > { %v697_v22 = vsel %vm371_vm1, %v695_v14, %v696_v13  ;;  %1217 = vmatpush1.bf16.msra.mxu0 %v1216_v20  ;;  %vm761_vm1 = vcmask 416768   ;;  %v743_v63 = vld [vmem:[#allocation2 + $0x130] sm:$0xff]  ;;  %v1240_v1 = vpack.c.bf16 %v749_v60, %v741_v62  ;;  %v1087_v8 = vunpack.c.l.s4 %v1374_v7 }
 0x11d   : > { %v699_v23 = vsel %vm698_vm8, %v692_v9, %v697_v22  ;;  %1229 = vmatpush1.bf16.msra.mxu1 %v1228_v21  ;;  %v1252_v3 = vpack.c.bf16 %v751_v61, %v743_v63 }
 0x11e   : > { %702 = vst.msk [vmem:[#allocation2 + $0x182] ss:$8 sm:$0xf] %vm1410_vm0, %v699_v23  ;;  %703 = vst.msk [vmem:[#allocation2 + $0x182] ss:$8 sm:$0xf0] %vm1410_vm0, %v699_v23  ;;  %v1088_v9 = vunpack.c.0.s8 %v1087_v8 }
 0x120   : > { %v1091_v13 = vsub.s32 %v1088_v9, %v1090_v10 }
 0x125   : > { %v754_v33 = vld [vmem:[#allocation2 + $0x188] sm:$0x7]  ;;  %v756_v34 = vld [vmem:[#allocation2 + $0x198] sm:$0x7]  ;;  %v753_v35 = vld [vmem:[#allocation2 + $0x180] sm:$0x7] }
 0x126   : > { %1192 = vmatprep.subr.msk.mxu0 %vm765_vm9, %v754_v33  ;;  %1195 = vmatprep.subr.msk.mxu1 %vm765_vm9, %v756_v34  ;;  %v755_v36 = vld [vmem:[#allocation2 + $0x190] sm:$0x7]  ;;  %v758_v4 = vld [vmem:[#allocation2 + $0x1a8] sm:$0x7]  ;;  %v760_v5 = vld [vmem:[#allocation2 + $0x1b8] sm:$0x7] }
 0x127   : > { %1193 = vmatpush1.msk.msra.mxu0 %vm765_vm9, %v753_v35  ;;  %1196 = vmatpush1.msk.msra.mxu1 %vm765_vm9, %v755_v36  ;;  %v759_v6 = vld [vmem:[#allocation2 + $0x1b0] sm:$0x7] }
 0x128   : > { %1194 = vmatmul.mubr.msk.f32.vlgmr.msra.gmra.mrb[0].mxu0 %vm761_vm1, %v1732_v24  ;;  %1197 = vmatmul.mubr.msk.f32.vlgmr.msra.gmra.mrb[0].mxu1 %vm761_vm1, %v1732_v24 }
 0x129   : > { %1231 = vmatprep.subr.bf16.mxu0 %v1230_v39  ;;  %1243 = vmatprep.subr.bf16.mxu1 %v1242_v40 }
 0x12a   : > { %1233 = vmatpush1.bf16.msra.mxu0 %v1232_v43  ;;  %1245 = vmatpush1.bf16.msra.mxu1 %v1244_v44 }
 0x12b   : > { %1235 = vmatprep.subr.bf16.mxu0 %v1234_v46  ;;  %1247 = vmatprep.subr.bf16.mxu1 %v1246_v47 }
 0x12c   : > { %996 = vmatprep.mubr.f32.mxu0 %v1373_v55  ;;  %1067 = vmatprep.mubr.f32.mxu1 %v1373_v55  ;;  %v757_v55 = vld [vmem:[#allocation2 + $0x1a0] sm:$0x7] }
 0x12e   : > { %1237 = vmatpush1.bf16.msra.mxu0 %v1236_v53  ;;  %1249 = vmatpush1.bf16.msra.mxu1 %v1248_v54 }
 0x12f   : > { %1239 = vmatprep.subr.bf16.mxu0 %v1238_v58  ;;  %1251 = vmatprep.subr.bf16.mxu1 %v1250_v59 }
 0x132   : > { %1241 = vmatpush1.bf16.msra.mxu0 %v1240_v1  ;;  %1253 = vmatpush1.bf16.msra.mxu1 %v1252_v3 }
 0x133   : > { %1198 = vmatprep.subr.msk.mxu0 %vm765_vm9, %v758_v4  ;;  %1201 = vmatprep.subr.msk.mxu1 %vm765_vm9, %v760_v5 }
 0x136   : > { %1199 = vmatpush1.msk.msra.mxu0 %vm765_vm9, %v757_v55  ;;  %1202 = vmatpush1.msk.msra.mxu1 %vm765_vm9, %v759_v6 }
 0x137   : > { %1200 = vmatmul.mubr.msk.f32.vlgmr.msra.gmra.mrb[2].mxu0 %vm761_vm1, %v1732_v24  ;;  %1203 = vmatmul.mubr.msk.f32.vlgmr.msra.gmra.mrb[2].mxu1 %vm761_vm1, %v1732_v24 }
 0x1fb   : > { %v856_v11 = vpop.f32.mrb[0].mxu0  ;;  %v927_v12 = vpop.f32.mrb[0].mxu1 }
 0x1fc   : > { %v858_v14 = vpop.f32.mrb[1].mxu0  ;;  %v929_v15 = vpop.f32.mrb[1].mxu1 }
 0x1fd   : > { %v1082_v16 = vcombine.low %v856_v11, %v858_v14  ;;  %v1083_v17 = vcombine.low %v927_v12, %v929_v15 }
 0x1ff   : > { %v1092_v18 = vrot.slane %v1082_v16, %v1091_v13  ;;  %v1099_v19 = vrot.slane %v1083_v17, %v1091_v13 }
 0x201   : > { %v1114_v20 = vcombine.low %v1092_v18, %v1099_v19 }
 0x203   : > { %v1122_v29 = vrot.slane %v1114_v20, %v1091_v13 }
 0x20a   : > { %v998_v21 = vpop.f32.mrb[2].mxu0  ;;  %v1069_v22 = vpop.f32.mrb[2].mxu1 }
 0x20b   : > { %v1000_v23 = vpop.f32.mrb[3].mxu0  ;;  %v1071_v24 = vpop.f32.mrb[3].mxu1 }
 0x20c   : > { %v1084_v25 = vcombine.low %v998_v21, %v1000_v23  ;;  %v1085_v26 = vcombine.low %v1069_v22, %v1071_v24 }
 0x20e   : > { %v1106_v27 = vrot.slane %v1084_v25, %v1091_v13  ;;  %v1113_v28 = vrot.slane %v1085_v26, %v1091_v13 }
 0x210   : > { %v1115_v0 = vcombine.low %v1106_v27, %v1113_v28 }
 0x212   : > { %v1129_v30 = vrot.slane %v1115_v0, %v1091_v13 }
 0x214   : > { %v1130_v31 = vcombine.low %v1122_v29, %v1129_v30 }
 0x216   : > { %1132 = vst.msk [vmem:[%s138_s18] sm:$0xff] %vm1410_vm0, %v1130_v31 }
 0x217 PF: > { %s12_s9 = sadd.s32 1, %s1321_s9  }
 0x218   : > { %p9_p4 = scmp.ge.s32.totalorder %s12_s9, 4  }
 0x21a   :  { %11 = sbr.rel (!%p9_p4) target bundleno = 1 (0x1), region = 108 }

// kernel: _init_active.7
= control target key start
LH: loop header
LB: loop body
LE: loop exit
PB: predicated region body
PF: predicated region fallthrough
CT: control target
= control target key end

     0   :  { %s1365_s9 = smov 0   ;;  %s1734_s0 = inlined_call_operand.vmem [shape: f32[2,1,1050], index: 0, kind: input, shape index: {}]   ;;  %s1735_s1 = inlined_call_operand.vmem [shape: f32[3,51], index: 1, kind: input, shape index: {}]   ;;  %s1736_s2 = inlined_call_operand.vmem [shape: f32[2,3,1000], index: 2, kind: output, shape index: {}]  }
   0x1 LB: > { %s1161_s10 = sadd.s32 4294967295, %s1297_s9   ;;  %p1165_p0 = scmp.ge.s32.totalorder %s1297_s9, 1  ;;  %s1297_s9 = sphi %s1365_s9, %s12_s9  }
   0x2   : > { %p111_p1 = scmp.lt.s32.totalorder %s1297_s9, 3 }
   0x4   : > { %p112_p2 = pnand %p1165_p0, %p111_p1 }
   0x5   : > { %p132_p3 = scmp.lt.s32.totalorder (!%p112_p2), %s1161_s10, 1  ;;  %v143_v0 = vlaneseq (!%p112_p2)  ;;  %s1299_s15 = smov (!%p112_p2), 125   ;;  %vm171_vm1 = vcmask (!%p112_p2), 1022976   ;;  %vm153_vm2 = vcmask (!%p112_p2), 1039360   ;;  %vm180_vm3 = vcmask (!%p112_p2), 1014784  }
   0x6   : > { %115 = sbr.rel (%p112_p2) target bundleno = 529 (0x211), region = 28  ;;  %s1300_s16 = smov (!%p112_p2), 127   ;;  %vm162_vm4 = vcmask (!%p112_p2), 1031168   ;;  %vm198_vm5 = vcmask (!%p112_p2), 998400   ;;  %vm189_vm6 = vcmask (!%p112_p2), 1006592   ;;  %vm216_vm7 = vcmask (!%p112_p2), 982016  }
   0x7   : > { %vm1384_vm0 = vcmp.lt.s32.totalorder (!%p112_p2), %v143_v0, 1000  ;;  %s1301_s17 = smov (!%p112_p2), 124   ;;  %s1302_s18 = smov (!%p112_p2), 126   ;;  %vm207_vm8 = vcmask (!%p112_p2), 990208   ;;  %vm234_vm9 = vcmask (!%p112_p2), 965632   ;;  %vm225_vm10 = vcmask (!%p112_p2), 973824  }
   0x8   : > { %s1303_s19 = smov (!%p112_p2), 122   ;;  %s1304_s20 = smov (!%p112_p2), 123   ;;  %vm252_vm11 = vcmask (!%p112_p2), 949248   ;;  %vm243_vm12 = vcmask (!%p112_p2), 957440   ;;  %vm270_vm13 = vcmask (!%p112_p2), 932864   ;;  %vm261_vm14 = vcmask (!%p112_p2), 941056  }
   0x9   : > { %s1305_s21 = smov (!%p112_p2), 120   ;;  %s1306_s22 = smov (!%p112_p2), 121   ;;  %vm279_vm15 = vcmask (!%p112_p2), 924672   ;;  %v1349_v55 = vmov (!%p112_p2), 0.0  }
   0xa   : > { %s1307_s23 = smov (!%p112_p2), 118   ;;  %s1308_s24 = smov (!%p112_p2), 119   ;;  %856 = vmatprep.mubr.f32.mxu0 (!%p112_p2), %v1349_v55  ;;  %927 = vmatprep.mubr.f32.mxu1 (!%p112_p2), %v1349_v55 }
   0xb   : > { %s1309_s25 = smov (!%p112_p2), 116   ;;  %s1310_s26 = smov (!%p112_p2), 117  }
   0xc   : > { %s1311_s27 = smov (!%p112_p2), 114   ;;  %s1312_s28 = smov (!%p112_p2), 115  }
   0xd   : > { %s1740_s10 = smov (!%p132_p3, %s1161_s10), 1  ;;  %s1313_s29 = smov 103  }
   0xe   : > { %s1231_s11 = smul.u32 9, %s1740_s10  ;;  %s1314_s30 = smov 113  }
   0xf   : > { %s1315_s3 = smov 102   ;;  %s1316_s4 = smov 101  }
  0x10   : > { %s1379_s14 = scalar_lea.vmem %s1734_s0, %s1231_s11  ;;  %s1317_s5 = smov 100  }
  0x11   : > { %v1382_v1 = vld [vmem:[%s1379_s14] sm:$0xff]  ;;  %v1411_v3 = vld [vmem:[%s1379_s14 + $0x8] sm:$0x1]  ;;  %s1318_s6 = smov 99   ;;  %s1319_s7 = smov 98  }
  0x12   : > { %168 = vrot.lane.b32.xlu1 %v1382_v1, %s1299_s15  ;;  %150 = vrot.lane.b32.xlu0 %v1382_v1, %s1300_s16  ;;  %147 = vst.msk [vmem:[#allocation2] ss:$8 sm:$0xf] %vm1384_vm0, %v1382_v1  ;;  %148 = vst.msk [vmem:[#allocation2] ss:$8 sm:$0xf0] %vm1384_vm0, %v1382_v1 }
  0x13   : > { %s1320_s8 = smov 97   ;;  %s1321_s11 = smov 112  }
  0x14   : > { %s1322_s12 = smov 110   ;;  %s1323_s13 = smov 111  }
  0x15   : > { %s1324_s14 = smov 108   ;;  %s1325_s15 = smov 109  }
  0x16   : > { %177 = vrot.lane.b32.xlu1 %v1382_v1, %s1301_s17  ;;  %159 = vrot.lane.b32.xlu0 %v1382_v1, %s1302_s18  ;;  %s1326_s16 = smov 106   ;;  %s1327_s17 = smov 107  }
  0x17   : > { %s1328_s18 = smov 104  }
  0x1a   : > { %195 = vrot.lane.b32.xlu1 %v1382_v1, %s1303_s19  ;;  %186 = vrot.lane.b32.xlu0 %v1382_v1, %s1304_s20  ;;  %s1329_s19 = smov 105   ;;  %s1330_s20 = smov 96  }
  0x1e   : > { %213 = vrot.lane.b32.xlu1 %v1382_v1, %s1305_s21  ;;  %204 = vrot.lane.b32.xlu0 %v1382_v1, %s1306_s22  ;;  %s1331_s21 = smov 95   ;;  %s1332_s22 = smov 94  }
  0x22   : > { %231 = vrot.lane.b32.xlu1 %v1382_v1, %s1307_s23  ;;  %222 = vrot.lane.b32.xlu0 %v1382_v1, %s1308_s24  ;;  %s1333_s23 = smov 93   ;;  %s1334_s24 = smov 92  }
  0x26   : > { %249 = vrot.lane.b32.xlu1 %v1382_v1, %s1309_s25  ;;  %240 = vrot.lane.b32.xlu0 %v1382_v1, %s1310_s26  ;;  %s1335_s25 = smov 91   ;;  %s1336_s26 = smov 90  }
  0x2a   : > { %267 = vrot.lane.b32.xlu1 %v1382_v1, %s1311_s27  ;;  %258 = vrot.lane.b32.xlu0 %v1382_v1, %s1312_s28  ;;  %s1337_s27 = smov 89   ;;  %s1338_s28 = smov 88  }
  0x2e   : > { %367 = vrot.lane.b32.xlu1 %v1382_v1, %s1313_s29  ;;  %276 = vrot.lane.b32.xlu0 %v1382_v1, %s1314_s30  ;;  %s1340_s30 = smov 86  }
  0x32   : > { %381 = vrot.lane.b32.xlu1 %v1382_v1, %s1315_s3  ;;  %369 = vrot.lane.b32.xlu0 %v1411_v3, %s1313_s29  ;;  %s1339_s29 = smov 87  }
  0x36   : > { %394 = vrot.lane.b32.xlu1 %v1382_v1, %s1316_s4  ;;  %383 = vrot.lane.b32.xlu0 %v1411_v3, %s1315_s3  ;;  %s1341_s3 = smov 85  }
  0x3a   : > { %407 = vrot.lane.b32.xlu1 %v1382_v1, %s1317_s5  ;;  %396 = vrot.lane.b32.xlu0 %v1411_v3, %s1316_s4  ;;  %s1342_s4 = smov 84  }
  0x3e   : > { %420 = vrot.lane.b32.xlu1 %v1382_v1, %s1318_s6  ;;  %409 = vrot.lane.b32.xlu0 %v1411_v3, %s1317_s5  ;;  %s1343_s5 = smov 83  }
  0x42   : > { %433 = vrot.lane.b32.xlu1 %v1382_v1, %s1319_s7  ;;  %422 = vrot.lane.b32.xlu0 %v1411_v3, %s1318_s6  ;;  %s1344_s6 = smov 82  }
  0x46   : > { %446 = vrot.lane.b32.xlu1 %v1382_v1, %s1320_s8  ;;  %435 = vrot.lane.b32.xlu0 %v1411_v3, %s1319_s7  ;;  %s1345_s7 = smov 81  }
  0x4a   : > { %285 = vrot.lane.b32.xlu1 %v1382_v1, %s1321_s11  ;;  %448 = vrot.lane.b32.xlu0 %v1411_v3, %s1320_s8  ;;  %s1346_s8 = smov 80   ;;  %s1347_s11 = smov 79  }
  0x4e   : > { %303 = vrot.lane.b32.xlu1 %v1382_v1, %s1322_s12  ;;  %294 = vrot.lane.b32.xlu0 %v1382_v1, %s1323_s13  ;;  %s1348_s12 = smov 78  }
  0x52   : > { %321 = vrot.lane.b32.xlu1 %v1382_v1, %s1324_s14  ;;  %312 = vrot.lane.b32.xlu0 %v1382_v1, %s1325_s15  ;;  %s1182_s15 = sshll.u32 %s1740_s10, 5 }
  0x56   : > { %339 = vrot.lane.b32.xlu1 %v1382_v1, %s1326_s16  ;;  %330 = vrot.lane.b32.xlu0 %v1382_v1, %s1327_s17 }
  0x5a   : > { %357 = vrot.lane.b32.xlu1 %v1382_v1, %s1328_s18  ;;  %348 = vrot.lane.b32.xlu0 %v1382_v1, %s1329_s19  ;;  %s140_s18 = scalar_lea.vmem %s1736_s2, %s1182_s15 }
  0x5e   : > { %461 = vrot.lane.b32.xlu1 %v1411_v3, %s1330_s20  ;;  %459 = vrot.lane.b32.xlu0 %v1382_v1, %s1330_s20 }
  0x62   : > { %474 = vrot.lane.b32.xlu1 %v1411_v3, %s1331_s21  ;;  %472 = vrot.lane.b32.xlu0 %v1382_v1, %s1331_s21 }
  0x66   : > { %487 = vrot.lane.b32.xlu1 %v1411_v3, %s1332_s22  ;;  %485 = vrot.lane.b32.xlu0 %v1382_v1, %s1332_s22 }
  0x6a   : > { %500 = vrot.lane.b32.xlu1 %v1411_v3, %s1333_s23  ;;  %498 = vrot.lane.b32.xlu0 %v1382_v1, %s1333_s23 }
  0x6e   : > { %513 = vrot.lane.b32.xlu1 %v1411_v3, %s1334_s24  ;;  %511 = vrot.lane.b32.xlu0 %v1382_v1, %s1334_s24 }
  0x72   : > { %526 = vrot.lane.b32.xlu1 %v1411_v3, %s1335_s25  ;;  %524 = vrot.lane.b32.xlu0 %v1382_v1, %s1335_s25 }
  0x76   : > { %539 = vrot.lane.b32.xlu1 %v1411_v3, %s1336_s26  ;;  %537 = vrot.lane.b32.xlu0 %v1382_v1, %s1336_s26 }
  0x7a   : > { %552 = vrot.lane.b32.xlu1 %v1411_v3, %s1337_s27  ;;  %550 = vrot.lane.b32.xlu0 %v1382_v1, %s1337_s27 }
  0x7e   : > { %565 = vrot.lane.b32.xlu1 %v1411_v3, %s1338_s28  ;;  %563 = vrot.lane.b32.xlu0 %v1382_v1, %s1338_s28 }
  0x82   : > { %578 = vrot.lane.b32.xlu1 %v1411_v3, %s1339_s29  ;;  %576 = vrot.lane.b32.xlu0 %v1382_v1, %s1339_s29 }
  0x84   : > { %v169_v4 = vpop.permute.xlu1 %168  ;;  %v151_v5 = vpop.permute.xlu0 %150 }
  0x85   : > { %v170_v6 = vrot.slane %v169_v4, 1  ;;  %v152_v7 = vrot.slane %v151_v5, 1 }
  0x86   : > { %591 = vrot.lane.b32.xlu1 %v1411_v3, %s1340_s30  ;;  %589 = vrot.lane.b32.xlu0 %v1382_v1, %s1340_s30 }
  0x87   : > { %v172_v8 = vsel %vm171_vm1, %v169_v4, %v170_v6  ;;  %v154_v9 = vsel %vm153_vm2, %v151_v5, %v152_v7  ;;  %vm373_vm1 = vcmask 1046528   ;;  %vm375_vm2 = vcmask 842752  }
  0x88   : > { %175 = vst.msk [vmem:[#allocation2 + $0x3] ss:$8 sm:$0xf] %vm1384_vm0, %v172_v8  ;;  %176 = vst.msk [vmem:[#allocation2 + $0x3] ss:$8 sm:$0xf0] %vm1384_vm0, %v172_v8  ;;  %v178_v10 = vpop.permute.xlu1 %177  ;;  %v160_v11 = vpop.permute.xlu0 %159 }
  0x89   : > { %157 = vst.msk [vmem:[#allocation2 + $0x1] ss:$8 sm:$0xf] %vm1384_vm0, %v154_v9  ;;  %158 = vst.msk [vmem:[#allocation2 + $0x1] ss:$8 sm:$0xf0] %vm1384_vm0, %v154_v9 }
  0x8a   : > { %v179_v12 = vrot.slane %v178_v10, 1  ;;  %v161_v13 = vrot.slane %v160_v11, 1  ;;  %604 = vrot.lane.b32.xlu1 %v1411_v3, %s1341_s3  ;;  %602 = vrot.lane.b32.xlu0 %v1382_v1, %s1341_s3 }
  0x8c   : > { %v181_v14 = vsel %vm180_vm3, %v178_v10, %v179_v12  ;;  %v163_v15 = vsel %vm162_vm4, %v160_v11, %v161_v13  ;;  %v196_v16 = vpop.permute.xlu1 %195  ;;  %v187_v17 = vpop.permute.xlu0 %186  ;;  %vm388_vm3 = vcmask 834560   ;;  %vm401_vm4 = vcmask 826368  }
  0x8d   : > { %184 = vst.msk [vmem:[#allocation2 + $0x4] ss:$8 sm:$0xf] %vm1384_vm0, %v181_v14  ;;  %185 = vst.msk [vmem:[#allocation2 + $0x4] ss:$8 sm:$0xf0] %vm1384_vm0, %v181_v14 }
  0x8e   : > { %166 = vst.msk [vmem:[#allocation2 + $0x2] ss:$8 sm:$0xf] %vm1384_vm0, %v163_v15  ;;  %167 = vst.msk [vmem:[#allocation2 + $0x2] ss:$8 sm:$0xf0] %vm1384_vm0, %v163_v15  ;;  %617 = vrot.lane.b32.xlu1 %v1411_v3, %s1342_s4  ;;  %615 = vrot.lane.b32.xlu0 %v1382_v1, %s1342_s4 }
  0x8f   : > { %v197_v18 = vrot.slane %v196_v16, 1  ;;  %v188_v19 = vrot.slane %v187_v17, 1 }
  0x90   : > { %v214_v22 = vpop.permute.xlu1 %213  ;;  %v205_v23 = vpop.permute.xlu0 %204 }
  0x91   : > { %v199_v20 = vsel %vm198_vm5, %v196_v16, %v197_v18  ;;  %v190_v21 = vsel %vm189_vm6, %v187_v17, %v188_v19  ;;  %v215_v24 = vrot.slane %v214_v22, 1  ;;  %v206_v25 = vrot.slane %v205_v23, 1 }
  0x92   : > { %202 = vst.msk [vmem:[#allocation2 + $0x6] ss:$8 sm:$0xf] %vm1384_vm0, %v199_v20  ;;  %203 = vst.msk [vmem:[#allocation2 + $0x6] ss:$8 sm:$0xf0] %vm1384_vm0, %v199_v20  ;;  %630 = vrot.lane.b32.xlu1 %v1411_v3, %s1343_s5  ;;  %628 = vrot.lane.b32.xlu0 %v1382_v1, %s1343_s5 }
  0x93   : > { %193 = vst.msk [vmem:[#allocation2 + $0x5] ss:$8 sm:$0xf] %vm1384_vm0, %v190_v21  ;;  %194 = vst.msk [vmem:[#allocation2 + $0x5] ss:$8 sm:$0xf0] %vm1384_vm0, %v190_v21  ;;  %v217_v26 = vsel %vm216_vm7, %v214_v22, %v215_v24  ;;  %v208_v27 = vsel %vm207_vm8, %v205_v23, %v206_v25 }
  0x94   : > { %220 = vst.msk [vmem:[#allocation2 + $0x40] ss:$8 sm:$0xf] %vm1384_vm0, %v217_v26  ;;  %221 = vst.msk [vmem:[#allocation2 + $0x40] ss:$8 sm:$0xf0] %vm1384_vm0, %v217_v26  ;;  %v232_v28 = vpop.permute.xlu1 %231  ;;  %v223_v29 = vpop.permute.xlu0 %222 }
  0x95   : > { %211 = vst.msk [vmem:[#allocation2 + $0x7] ss:$8 sm:$0xf] %vm1384_vm0, %v208_v27  ;;  %212 = vst.msk [vmem:[#allocation2 + $0x7] ss:$8 sm:$0xf0] %vm1384_vm0, %v208_v27 }
  0x96   : > { %v233_v30 = vrot.slane %v232_v28, 1  ;;  %v224_v31 = vrot.slane %v223_v29, 1  ;;  %643 = vrot.lane.b32.xlu1 %v1411_v3, %s1344_s6  ;;  %641 = vrot.lane.b32.xlu0 %v1382_v1, %s1344_s6  ;;  %vm414_vm5 = vcmask 818176   ;;  %vm427_vm6 = vcmask 809984  }
  0x97   : > { %vm440_vm7 = vcmask 801792   ;;  %vm288_vm8 = vcmask 916480  }
  0x98   : > { %v235_v32 = vsel %vm234_vm9, %v232_v28, %v233_v30  ;;  %v226_v33 = vsel %vm225_vm10, %v223_v29, %v224_v31  ;;  %v250_v34 = vpop.permute.xlu1 %249  ;;  %v241_v35 = vpop.permute.xlu0 %240  ;;  %vm453_vm9 = vcmask 793600   ;;  %vm306_vm10 = vcmask 900096  }
  0x99   : > { %238 = vst.msk [vmem:[#allocation2 + $0x42] ss:$8 sm:$0xf] %vm1384_vm0, %v235_v32  ;;  %239 = vst.msk [vmem:[#allocation2 + $0x42] ss:$8 sm:$0xf0] %vm1384_vm0, %v235_v32 }
  0x9a   : > { %229 = vst.msk [vmem:[#allocation2 + $0x41] ss:$8 sm:$0xf] %vm1384_vm0, %v226_v33  ;;  %230 = vst.msk [vmem:[#allocation2 + $0x41] ss:$8 sm:$0xf0] %vm1384_vm0, %v226_v33  ;;  %656 = vrot.lane.b32.xlu1 %v1411_v3, %s1345_s7  ;;  %654 = vrot.lane.b32.xlu0 %v1382_v1, %s1345_s7 }
  0x9b   : > { %v251_v36 = vrot.slane %v250_v34, 1  ;;  %v242_v37 = vrot.slane %v241_v35, 1 }
  0x9c   : > { %v268_v40 = vpop.permute.xlu1 %267  ;;  %v259_v41 = vpop.permute.xlu0 %258  ;;  %v708_v61 = vld [vmem:[#allocation2 + $0x8] sm:$0xff]  ;;  %v710_v62 = vld [vmem:[#allocation2 + $0x18] sm:$0xff]  ;;  %v707_v63 = vld [vmem:[#allocation2] sm:$0xff] }
  0x9d   : > { %v253_v38 = vsel %vm252_vm11, %v250_v34, %v251_v36  ;;  %v244_v39 = vsel %vm243_vm12, %v241_v35, %v242_v37  ;;  %v269_v42 = vrot.slane %v268_v40, 1  ;;  %v260_v43 = vrot.slane %v259_v41, 1  ;;  %v709_v11 = vld [vmem:[#allocation2 + $0x10] sm:$0xff] }
  0x9e   : > { %256 = vst.msk [vmem:[#allocation2 + $0x44] ss:$8 sm:$0xf] %vm1384_vm0, %v253_v38  ;;  %257 = vst.msk [vmem:[#allocation2 + $0x44] ss:$8 sm:$0xf0] %vm1384_vm0, %v253_v38  ;;  %669 = vrot.lane.b32.xlu1 %v1411_v3, %s1346_s8  ;;  %667 = vrot.lane.b32.xlu0 %v1382_v1, %s1346_s8 }
  0x9f   : > { %247 = vst.msk [vmem:[#allocation2 + $0x43] ss:$8 sm:$0xf] %vm1384_vm0, %v244_v39  ;;  %248 = vst.msk [vmem:[#allocation2 + $0x43] ss:$8 sm:$0xf0] %vm1384_vm0, %v244_v39  ;;  %v271_v44 = vsel %vm270_vm13, %v268_v40, %v269_v42  ;;  %v262_v45 = vsel %vm261_vm14, %v259_v41, %v260_v43 }
  0xa0   : > { %274 = vst.msk [vmem:[#allocation2 + $0x46] ss:$8 sm:$0xf] %vm1384_vm0, %v271_v44  ;;  %275 = vst.msk [vmem:[#allocation2 + $0x46] ss:$8 sm:$0xf0] %vm1384_vm0, %v271_v44  ;;  %v368_v46 = vpop.permute.xlu1 %367  ;;  %v277_v47 = vpop.permute.xlu0 %276 }
  0xa1   : > { %265 = vst.msk [vmem:[#allocation2 + $0x45] ss:$8 sm:$0xf] %vm1384_vm0, %v262_v45  ;;  %266 = vst.msk [vmem:[#allocation2 + $0x45] ss:$8 sm:$0xf0] %vm1384_vm0, %v262_v45 }
  0xa2   : > { %v278_v48 = vrot.slane %v277_v47, 1  ;;  %682 = vrot.lane.b32.xlu1 %v1411_v3, %s1347_s11  ;;  %680 = vrot.lane.b32.xlu0 %v1382_v1, %s1347_s11  ;;  %v371_v52 = vrot.slane %v368_v46, 1  ;;  %vm297_vm11 = vcmask 908288   ;;  %vm324_vm12 = vcmask 883712  }
  0xa3   : > { %vm315_vm13 = vcmask 891904   ;;  %vm342_vm14 = vcmask 867328  }
  0xa4   : > { %v280_v49 = vsel %vm279_vm15, %v277_v47, %v278_v48  ;;  %v382_v50 = vpop.permute.xlu1 %381  ;;  %v370_v51 = vpop.permute.xlu0 %369  ;;  %vm333_vm15 = vcmask 875520  }
  0xa5   : > { %283 = vst.msk [vmem:[#allocation2 + $0x47] ss:$8 sm:$0xf] %vm1384_vm0, %v280_v49  ;;  %284 = vst.msk [vmem:[#allocation2 + $0x47] ss:$8 sm:$0xf0] %vm1384_vm0, %v280_v49 }
  0xa6   : > { %v372_v53 = vrot.slane %v370_v51, 1  ;;  %695 = vrot.lane.b32.xlu1 %v1411_v3, %s1348_s12  ;;  %693 = vrot.lane.b32.xlu0 %v1382_v1, %s1348_s12  ;;  %v385_v59 = vrot.slane %v382_v50, 1 }
  0xa8   : > { %v374_v54 = vsel %vm373_vm1, %v371_v52, %v372_v53  ;;  %v395_v57 = vpop.permute.xlu1 %394  ;;  %v384_v58 = vpop.permute.xlu0 %383 }
  0xa9   : > { %v376_v56 = vsel %vm375_vm2, %v368_v46, %v374_v54  ;;  %v386_v60 = vrot.slane %v384_v58, 1  ;;  %v398_v13 = vrot.slane %v395_v57, 1  ;;  %vm360_vm2 = vcmask 850944  }
  0xaa   : > { %379 = vst.msk [vmem:[#allocation2 + $0xc1] ss:$8 sm:$0xf] %vm1384_vm0, %v376_v56  ;;  %380 = vst.msk [vmem:[#allocation2 + $0xc1] ss:$8 sm:$0xf0] %vm1384_vm0, %v376_v56 }
  0xab   : > { %v387_v0 = vsel %vm373_vm1, %v385_v59, %v386_v60 }
  0xac   : > { %v716_v1 = vld [vmem:[#allocation2 + $0x48] sm:$0xff]  ;;  %v718_v3 = vld [vmem:[#allocation2 + $0x58] sm:$0xff]  ;;  %v715_v4 = vld [vmem:[#allocation2 + $0x40] sm:$0xff]  ;;  %v389_v5 = vsel %vm388_vm3, %v382_v50, %v387_v0  ;;  %v408_v6 = vpop.permute.xlu1 %407  ;;  %v397_v7 = vpop.permute.xlu0 %396  ;;  %vm351_vm3 = vcmask 859136  }
  0xad   : > { %v1183_v8 = vpack.c.bf16 %v716_v1, %v708_v61  ;;  %v1195_v9 = vpack.c.bf16 %v718_v3, %v710_v62  ;;  %v1185_v10 = vpack.c.bf16 %v715_v4, %v707_v63  ;;  %v717_v12 = vld [vmem:[#allocation2 + $0x50] sm:$0xff]  ;;  %392 = vst.msk [vmem:[#allocation2 + $0xc2] ss:$8 sm:$0xf] %vm1384_vm0, %v389_v5  ;;  %v399_v14 = vrot.slane %v397_v7, 1 }
  0xae   : > { %393 = vst.msk [vmem:[#allocation2 + $0xc2] ss:$8 sm:$0xf0] %vm1384_vm0, %v389_v5  ;;  %v1197_v15 = vpack.c.bf16 %v717_v12, %v709_v11  ;;  %v411_v20 = vrot.slane %v408_v6, 1 }
  0xaf   : > { %1184 = vmatprep.subr.bf16.mxu0 %v1183_v8  ;;  %1196 = vmatprep.subr.bf16.mxu1 %v1195_v9  ;;  %v400_v16 = vsel %vm373_vm1, %v398_v13, %v399_v14 }
  0xb0   : > { %1186 = vmatpush1.bf16.msra.mxu0 %v1185_v10  ;;  %1198 = vmatpush1.bf16.msra.mxu1 %v1197_v15  ;;  %v402_v17 = vsel %vm401_vm4, %v395_v57, %v400_v16  ;;  %v421_v18 = vpop.permute.xlu1 %420  ;;  %v410_v19 = vpop.permute.xlu0 %409  ;;  %vm466_vm4 = vcmask 785408  }
  0xb1   : > { %405 = vst.msk [vmem:[#allocation2 + $0xc3] ss:$8 sm:$0xf] %vm1384_vm0, %v402_v17  ;;  %406 = vst.msk [vmem:[#allocation2 + $0xc3] ss:$8 sm:$0xf0] %vm1384_vm0, %v402_v17 }
  0xb2   : > { %v412_v21 = vrot.slane %v410_v19, 1  ;;  %v424_v26 = vrot.slane %v421_v18, 1 }
  0xb4   : > { %v413_v22 = vsel %vm373_vm1, %v411_v20, %v412_v21  ;;  %v434_v24 = vpop.permute.xlu1 %433  ;;  %v423_v25 = vpop.permute.xlu0 %422 }
  0xb5   : > { %v415_v23 = vsel %vm414_vm5, %v408_v6, %v413_v22  ;;  %v425_v27 = vrot.slane %v423_v25, 1  ;;  %v437_v32 = vrot.slane %v434_v24, 1  ;;  %vm479_vm5 = vcmask 777216  }
  0xb6   : > { %418 = vst.msk [vmem:[#allocation2 + $0xc4] ss:$8 sm:$0xf] %vm1384_vm0, %v415_v23  ;;  %419 = vst.msk [vmem:[#allocation2 + $0xc4] ss:$8 sm:$0xf0] %vm1384_vm0, %v415_v23 }
  0xb7   : > { %v426_v28 = vsel %vm373_vm1, %v424_v26, %v425_v27 }
  0xb8   : > { %v428_v29 = vsel %vm427_vm6, %v421_v18, %v426_v28  ;;  %v447_v30 = vpop.permute.xlu1 %446  ;;  %v436_v31 = vpop.permute.xlu0 %435  ;;  %vm492_vm6 = vcmask 769024  }
  0xb9   : > { %431 = vst.msk [vmem:[#allocation2 + $0xc5] ss:$8 sm:$0xf] %vm1384_vm0, %v428_v29  ;;  %432 = vst.msk [vmem:[#allocation2 + $0xc5] ss:$8 sm:$0xf0] %vm1384_vm0, %v428_v29 }
  0xba   : > { %v438_v33 = vrot.slane %v436_v31, 1  ;;  %v450_v38 = vrot.slane %v447_v30, 1 }
  0xbc   : > { %v439_v34 = vsel %vm373_vm1, %v437_v32, %v438_v33  ;;  %v286_v36 = vpop.permute.xlu1 %285  ;;  %v449_v37 = vpop.permute.xlu0 %448 }
  0xbd   : > { %v441_v35 = vsel %vm440_vm7, %v434_v24, %v439_v34  ;;  %v287_v39 = vrot.slane %v286_v36, 1  ;;  %v451_v40 = vrot.slane %v449_v37, 1  ;;  %vm505_vm7 = vcmask 760832  }
  0xbe   : > { %444 = vst.msk [vmem:[#allocation2 + $0xc6] ss:$8 sm:$0xf] %vm1384_vm0, %v441_v35  ;;  %445 = vst.msk [vmem:[#allocation2 + $0xc6] ss:$8 sm:$0xf0] %vm1384_vm0, %v441_v35 }
  0xbf   : > { %v289_v41 = vsel %vm288_vm8, %v286_v36, %v287_v39  ;;  %v452_v42 = vsel %vm373_vm1, %v450_v38, %v451_v40  ;;  %vm518_vm8 = vcmask 752640  }
  0xc0   : > { %292 = vst.msk [vmem:[#allocation2 + $0x80] ss:$8 sm:$0xf] %vm1384_vm0, %v289_v41  ;;  %293 = vst.msk [vmem:[#allocation2 + $0x80] ss:$8 sm:$0xf0] %vm1384_vm0, %v289_v41  ;;  %v454_v43 = vsel %vm453_vm9, %v447_v30, %v452_v42  ;;  %v304_v44 = vpop.permute.xlu1 %303  ;;  %v295_v45 = vpop.permute.xlu0 %294 }
  0xc1   : > { %457 = vst.msk [vmem:[#allocation2 + $0xc7] ss:$8 sm:$0xf] %vm1384_vm0, %v454_v43  ;;  %458 = vst.msk [vmem:[#allocation2 + $0xc7] ss:$8 sm:$0xf0] %vm1384_vm0, %v454_v43 }
  0xc2   : > { %v305_v46 = vrot.slane %v304_v44, 1  ;;  %v296_v47 = vrot.slane %v295_v45, 1  ;;  %vm531_vm9 = vcmask 744448  }
  0xc4   : > { %v307_v48 = vsel %vm306_vm10, %v304_v44, %v305_v46  ;;  %v298_v49 = vsel %vm297_vm11, %v295_v45, %v296_v47  ;;  %v322_v50 = vpop.permute.xlu1 %321  ;;  %v313_v51 = vpop.permute.xlu0 %312  ;;  %vm544_vm10 = vcmask 736256   ;;  %vm557_vm11 = vcmask 728064  }
  0xc5   : > { %310 = vst.msk [vmem:[#allocation2 + $0x82] ss:$8 sm:$0xf] %vm1384_vm0, %v307_v48  ;;  %311 = vst.msk [vmem:[#allocation2 + $0x82] ss:$8 sm:$0xf0] %vm1384_vm0, %v307_v48 }
  0xc6   : > { %301 = vst.msk [vmem:[#allocation2 + $0x81] ss:$8 sm:$0xf] %vm1384_vm0, %v298_v49  ;;  %302 = vst.msk [vmem:[#allocation2 + $0x81] ss:$8 sm:$0xf0] %vm1384_vm0, %v298_v49 }
  0xc7   : > { %v323_v52 = vrot.slane %v322_v50, 1  ;;  %v314_v53 = vrot.slane %v313_v51, 1 }
  0xc8   : > { %v340_v57 = vpop.permute.xlu1 %339  ;;  %v331_v58 = vpop.permute.xlu0 %330 }
  0xc9   : > { %v325_v54 = vsel %vm324_vm12, %v322_v50, %v323_v52  ;;  %v316_v56 = vsel %vm315_vm13, %v313_v51, %v314_v53  ;;  %v341_v59 = vrot.slane %v340_v57, 1  ;;  %v332_v60 = vrot.slane %v331_v58, 1 }
  0xca   : > { %328 = vst.msk [vmem:[#allocation2 + $0x84] ss:$8 sm:$0xf] %vm1384_vm0, %v325_v54  ;;  %329 = vst.msk [vmem:[#allocation2 + $0x84] ss:$8 sm:$0xf0] %vm1384_vm0, %v325_v54 }
  0xcb   : > { %319 = vst.msk [vmem:[#allocation2 + $0x83] ss:$8 sm:$0xf] %vm1384_vm0, %v316_v56  ;;  %320 = vst.msk [vmem:[#allocation2 + $0x83] ss:$8 sm:$0xf0] %vm1384_vm0, %v316_v56  ;;  %v343_v61 = vsel %vm342_vm14, %v340_v57, %v341_v59  ;;  %v334_v62 = vsel %vm333_vm15, %v331_v58, %v332_v60 }
  0xcc   : > { %346 = vst.msk [vmem:[#allocation2 + $0x86] ss:$8 sm:$0xf] %vm1384_vm0, %v343_v61  ;;  %347 = vst.msk [vmem:[#allocation2 + $0x86] ss:$8 sm:$0xf0] %vm1384_vm0, %v343_v61  ;;  %v358_v63 = vpop.permute.xlu1 %357  ;;  %v349_v0 = vpop.permute.xlu0 %348 }
  0xcd   : > { %337 = vst.msk [vmem:[#allocation2 + $0x85] ss:$8 sm:$0xf] %vm1384_vm0, %v334_v62  ;;  %338 = vst.msk [vmem:[#allocation2 + $0x85] ss:$8 sm:$0xf0] %vm1384_vm0, %v334_v62 }
  0xce   : > { %v359_v1 = vrot.slane %v358_v63, 1  ;;  %v350_v3 = vrot.slane %v349_v0, 1  ;;  %vm570_vm12 = vcmask 719872   ;;  %vm583_vm13 = vcmask 711680  }
  0xcf   : > { %vm596_vm14 = vcmask 703488   ;;  %vm609_vm15 = vcmask 695296  }
  0xd0   : > { %v361_v4 = vsel %vm360_vm2, %v358_v63, %v359_v1  ;;  %v352_v5 = vsel %vm351_vm3, %v349_v0, %v350_v3  ;;  %v462_v6 = vpop.permute.xlu1 %461  ;;  %v460_v7 = vpop.permute.xlu0 %459  ;;  %vm622_vm2 = vcmask 687104   ;;  %vm635_vm3 = vcmask 678912  }
  0xd1   : > { %364 = vst.msk [vmem:[#allocation2 + $0xc0] ss:$8 sm:$0xf] %vm1384_vm0, %v361_v4  ;;  %365 = vst.msk [vmem:[#allocation2 + $0xc0] ss:$8 sm:$0xf0] %vm1384_vm0, %v361_v4 }
  0xd2   : > { %355 = vst.msk [vmem:[#allocation2 + $0x87] ss:$8 sm:$0xf] %vm1384_vm0, %v352_v5  ;;  %356 = vst.msk [vmem:[#allocation2 + $0x87] ss:$8 sm:$0xf0] %vm1384_vm0, %v352_v5 }
  0xd3   : > { %v464_v8 = vrot.slane %v462_v6, 1  ;;  %v463_v9 = vrot.slane %v460_v7, 1 }
  0xd4   : > { %v475_v12 = vpop.permute.xlu1 %474  ;;  %v473_v13 = vpop.permute.xlu0 %472 }
  0xd5   : > { %v465_v10 = vsel %vm373_vm1, %v463_v9, %v464_v8  ;;  %v477_v14 = vrot.slane %v475_v12, 1  ;;  %v476_v15 = vrot.slane %v473_v13, 1 }
  0xd6   : > { %v467_v11 = vsel %vm466_vm4, %v460_v7, %v465_v10  ;;  %vm648_vm4 = vcmask 670720  }
  0xd7   : > { %470 = vst.msk [vmem:[#allocation2 + $0x100] ss:$8 sm:$0xf] %vm1384_vm0, %v467_v11  ;;  %471 = vst.msk [vmem:[#allocation2 + $0x100] ss:$8 sm:$0xf0] %vm1384_vm0, %v467_v11  ;;  %v478_v16 = vsel %vm373_vm1, %v476_v15, %v477_v14 }
  0xd8   : > { %v732_v18 = vld [vmem:[#allocation2 + $0xc8] sm:$0xff]  ;;  %v480_v20 = vsel %vm479_vm5, %v473_v13, %v478_v16  ;;  %v488_v21 = vpop.permute.xlu1 %487  ;;  %v486_v22 = vpop.permute.xlu0 %485  ;;  %v734_v24 = vld [vmem:[#allocation2 + $0xd8] sm:$0xff]  ;;  %v731_v26 = vld [vmem:[#allocation2 + $0xc0] sm:$0xff]  ;;  %vm661_vm5 = vcmask 662528  }
  0xd9   : > { %v724_v17 = vld [vmem:[#allocation2 + $0x88] sm:$0xff]  ;;  %v726_v19 = vld [vmem:[#allocation2 + $0x98] sm:$0xff]  ;;  %v723_v25 = vld [vmem:[#allocation2 + $0x80] sm:$0xff]  ;;  %483 = vst.msk [vmem:[#allocation2 + $0x101] ss:$8 sm:$0xf] %vm1384_vm0, %v480_v20 }
  0xda   : > { %v1187_v23 = vpack.c.bf16 %v732_v18, %v724_v17  ;;  %484 = vst.msk [vmem:[#allocation2 + $0x101] ss:$8 sm:$0xf0] %vm1384_vm0, %v480_v20  ;;  %v490_v27 = vrot.slane %v488_v21, 1  ;;  %v489_v28 = vrot.slane %v486_v22, 1  ;;  %v1199_v29 = vpack.c.bf16 %v734_v24, %v726_v19  ;;  %v725_v31 = vld [vmem:[#allocation2 + $0x90] sm:$0xff] }
  0xdb   : > { %v1189_v30 = vpack.c.bf16 %v731_v26, %v723_v25  ;;  %v733_v32 = vld [vmem:[#allocation2 + $0xd0] sm:$0xff] }
  0xdc   : > { %1188 = vmatprep.subr.bf16.mxu0 %v1187_v23  ;;  %v1201_v33 = vpack.c.bf16 %v733_v32, %v725_v31  ;;  %v491_v34 = vsel %vm373_vm1, %v489_v28, %v490_v27  ;;  %1200 = vmatprep.subr.bf16.mxu1 %v1199_v29  ;;  %v501_v36 = vpop.permute.xlu1 %500  ;;  %v499_v37 = vpop.permute.xlu0 %498 }
  0xdd   : > { %1190 = vmatpush1.bf16.msra.mxu0 %v1189_v30  ;;  %v493_v35 = vsel %vm492_vm6, %v486_v22, %v491_v34  ;;  %v503_v38 = vrot.slane %v501_v36, 1  ;;  %v502_v39 = vrot.slane %v499_v37, 1  ;;  %vm674_vm6 = vcmask 654336  }
  0xde   : > { %1202 = vmatpush1.bf16.msra.mxu1 %v1201_v33  ;;  %496 = vst.msk [vmem:[#allocation2 + $0x102] ss:$8 sm:$0xf] %vm1384_vm0, %v493_v35  ;;  %497 = vst.msk [vmem:[#allocation2 + $0x102] ss:$8 sm:$0xf0] %vm1384_vm0, %v493_v35 }
  0xdf   : > { %v504_v40 = vsel %vm373_vm1, %v502_v39, %v503_v38 }
  0xe0   : > { %v506_v41 = vsel %vm505_vm7, %v499_v37, %v504_v40  ;;  %v514_v42 = vpop.permute.xlu1 %513  ;;  %v512_v43 = vpop.permute.xlu0 %511  ;;  %vm687_vm7 = vcmask 646144  }
  0xe1   : > { %509 = vst.msk [vmem:[#allocation2 + $0x103] ss:$8 sm:$0xf] %vm1384_vm0, %v506_v41  ;;  %510 = vst.msk [vmem:[#allocation2 + $0x103] ss:$8 sm:$0xf0] %vm1384_vm0, %v506_v41 }
  0xe2   : > { %v516_v44 = vrot.slane %v514_v42, 1  ;;  %v515_v45 = vrot.slane %v512_v43, 1 }
  0xe4   : > { %v517_v46 = vsel %vm373_vm1, %v515_v45, %v516_v44  ;;  %v527_v48 = vpop.permute.xlu1 %526  ;;  %v525_v49 = vpop.permute.xlu0 %524 }
  0xe5   : > { %v519_v47 = vsel %vm518_vm8, %v512_v43, %v517_v46  ;;  %v529_v50 = vrot.slane %v527_v48, 1  ;;  %v528_v51 = vrot.slane %v525_v49, 1  ;;  %vm700_vm8 = vcmask 637952  }
  0xe6   : > { %522 = vst.msk [vmem:[#allocation2 + $0x104] ss:$8 sm:$0xf] %vm1384_vm0, %v519_v47  ;;  %523 = vst.msk [vmem:[#allocation2 + $0x104] ss:$8 sm:$0xf0] %vm1384_vm0, %v519_v47 }
  0xe7   : > { %v530_v52 = vsel %vm373_vm1, %v528_v51, %v529_v50 }
  0xe8   : > { %v532_v53 = vsel %vm531_vm9, %v525_v49, %v530_v52  ;;  %v540_v54 = vpop.permute.xlu1 %539  ;;  %v538_v56 = vpop.permute.xlu0 %537  ;;  %vm767_vm9 = vcmask 1042432  }
  0xe9   : > { %535 = vst.msk [vmem:[#allocation2 + $0x105] ss:$8 sm:$0xf] %vm1384_vm0, %v532_v53  ;;  %536 = vst.msk [vmem:[#allocation2 + $0x105] ss:$8 sm:$0xf0] %vm1384_vm0, %v532_v53 }
  0xea   : > { %v542_v57 = vrot.slane %v540_v54, 1  ;;  %v541_v58 = vrot.slane %v538_v56, 1 }
  0xec   : > { %v543_v59 = vsel %vm373_vm1, %v541_v58, %v542_v57  ;;  %v553_v61 = vpop.permute.xlu1 %552  ;;  %v551_v62 = vpop.permute.xlu0 %550 }
  0xed   : > { %v545_v60 = vsel %vm544_vm10, %v538_v56, %v543_v59  ;;  %v555_v63 = vrot.slane %v553_v61, 1  ;;  %v554_v0 = vrot.slane %v551_v62, 1 }
  0xee   : > { %548 = vst.msk [vmem:[#allocation2 + $0x106] ss:$8 sm:$0xf] %vm1384_vm0, %v545_v60  ;;  %549 = vst.msk [vmem:[#allocation2 + $0x106] ss:$8 sm:$0xf0] %vm1384_vm0, %v545_v60 }
  0xef   : > { %v556_v1 = vsel %vm373_vm1, %v554_v0, %v555_v63 }
  0xf0   : > { %v558_v3 = vsel %vm557_vm11, %v551_v62, %v556_v1  ;;  %v566_v4 = vpop.permute.xlu1 %565  ;;  %v564_v5 = vpop.permute.xlu0 %563 }
  0xf1   : > { %561 = vst.msk [vmem:[#allocation2 + $0x107] ss:$8 sm:$0xf] %vm1384_vm0, %v558_v3  ;;  %562 = vst.msk [vmem:[#allocation2 + $0x107] ss:$8 sm:$0xf0] %vm1384_vm0, %v558_v3 }
  0xf2   : > { %v568_v6 = vrot.slane %v566_v4, 1  ;;  %v567_v7 = vrot.slane %v564_v5, 1 }
  0xf4   : > { %v569_v8 = vsel %vm373_vm1, %v567_v7, %v568_v6  ;;  %v579_v10 = vpop.permute.xlu1 %578  ;;  %v577_v11 = vpop.permute.xlu0 %576 }
  0xf5   : > { %v571_v9 = vsel %vm570_vm12, %v564_v5, %v569_v8  ;;  %v581_v12 = vrot.slane %v579_v10, 1  ;;  %v580_v13 = vrot.slane %v577_v11, 1 }
  0xf6   : > { %574 = vst.msk [vmem:[#allocation2 + $0x140] ss:$8 sm:$0xf] %vm1384_vm0, %v571_v9  ;;  %575 = vst.msk [vmem:[#allocation2 + $0x140] ss:$8 sm:$0xf0] %vm1384_vm0, %v571_v9 }
  0xf7   : > { %v582_v14 = vsel %vm373_vm1, %v580_v13, %v581_v12 }
  0xf8   : > { %v584_v15 = vsel %vm583_vm13, %v577_v11, %v582_v14  ;;  %v592_v16 = vpop.permute.xlu1 %591  ;;  %v590_v17 = vpop.permute.xlu0 %589  ;;  %v740_v0 = vld [vmem:[#allocation2 + $0x108] sm:$0xff]  ;;  %v742_v1 = vld [vmem:[#allocation2 + $0x118] sm:$0xff]  ;;  %v739_v13 = vld [vmem:[#allocation2 + $0x100] sm:$0xff] }
  0xf9   : > { %587 = vst.msk [vmem:[#allocation2 + $0x141] ss:$8 sm:$0xf] %vm1384_vm0, %v584_v15  ;;  %588 = vst.msk [vmem:[#allocation2 + $0x141] ss:$8 sm:$0xf0] %vm1384_vm0, %v584_v15 }
  0xfa   : > { %v594_v18 = vrot.slane %v592_v16, 1  ;;  %v593_v19 = vrot.slane %v590_v17, 1  ;;  %v741_v14 = vld [vmem:[#allocation2 + $0x110] sm:$0xff] }
  0xfc   : > { %v595_v20 = vsel %vm373_vm1, %v593_v19, %v594_v18  ;;  %v605_v22 = vpop.permute.xlu1 %604  ;;  %v603_v23 = vpop.permute.xlu0 %602 }
  0xfd   : > { %v597_v21 = vsel %vm596_vm14, %v590_v17, %v595_v20  ;;  %v607_v24 = vrot.slane %v605_v22, 1  ;;  %v606_v25 = vrot.slane %v603_v23, 1  ;;  %v1706_v20 = vld [vmem:[%s1735_s1] sm:$0x7]  ;;  %v722_v22 = vld [vmem:[#allocation2 + $0x78] sm:$0xff] }
  0xfe   : > { %600 = vst.msk [vmem:[#allocation2 + $0x142] ss:$8 sm:$0xf] %vm1384_vm0, %v597_v21  ;;  %601 = vst.msk [vmem:[#allocation2 + $0x142] ss:$8 sm:$0xf0] %vm1384_vm0, %v597_v21 }
  0xff   : > { %v608_v26 = vsel %vm373_vm1, %v606_v25, %v607_v24  ;;  %v720_v21 = vld [vmem:[#allocation2 + $0x68] sm:$0xff]  ;;  %v714_v25 = vld [vmem:[#allocation2 + $0x38] sm:$0xff] }
 0x100   : > { %v610_v27 = vsel %vm609_vm15, %v603_v23, %v608_v26  ;;  %v618_v28 = vpop.permute.xlu1 %617  ;;  %v616_v29 = vpop.permute.xlu0 %615  ;;  %v719_v23 = vld [vmem:[#allocation2 + $0x60] sm:$0xff]  ;;  %v712_v24 = vld [vmem:[#allocation2 + $0x28] sm:$0xff]  ;;  %v721_v26 = vld [vmem:[#allocation2 + $0x70] sm:$0xff] }
 0x101   : > { %613 = vst.msk [vmem:[#allocation2 + $0x143] ss:$8 sm:$0xf] %vm1384_vm0, %v610_v27  ;;  %614 = vst.msk [vmem:[#allocation2 + $0x143] ss:$8 sm:$0xf0] %vm1384_vm0, %v610_v27 }
 0x102   : > { %v620_v30 = vrot.slane %v618_v28, 1  ;;  %v619_v31 = vrot.slane %v616_v29, 1  ;;  %v728_v27 = vld [vmem:[#allocation2 + $0xa8] sm:$0xff] }
 0x103   : > { %v736_v28 = vld [vmem:[#allocation2 + $0xe8] sm:$0xff] }
 0x104   : > { %v621_v32 = vsel %vm373_vm1, %v619_v31, %v620_v30  ;;  %v631_v34 = vpop.permute.xlu1 %630  ;;  %v629_v35 = vpop.permute.xlu0 %628 }
 0x105   : > { %v623_v33 = vsel %vm622_vm2, %v616_v29, %v621_v32  ;;  %v633_v36 = vrot.slane %v631_v34, 1  ;;  %v632_v37 = vrot.slane %v629_v35, 1  ;;  %v730_v32 = vld [vmem:[#allocation2 + $0xb8] sm:$0xff]  ;;  %v1207_v34 = vpack.c.bf16 %v720_v21, %v712_v24 }
 0x106   : > { %626 = vst.msk [vmem:[#allocation2 + $0x144] ss:$8 sm:$0xf] %vm1384_vm0, %v623_v33  ;;  %627 = vst.msk [vmem:[#allocation2 + $0x144] ss:$8 sm:$0xf0] %vm1384_vm0, %v623_v33 }
 0x107   : > { %v634_v38 = vsel %vm373_vm1, %v632_v37, %v633_v36  ;;  %v738_v33 = vld [vmem:[#allocation2 + $0xf8] sm:$0xff]  ;;  %v711_v36 = vld [vmem:[#allocation2 + $0x20] sm:$0xff]  ;;  %v713_v37 = vld [vmem:[#allocation2 + $0x30] sm:$0xff] }
 0x108   : > { %v636_v39 = vsel %vm635_vm3, %v629_v35, %v634_v38  ;;  %v644_v40 = vpop.permute.xlu1 %643  ;;  %v642_v41 = vpop.permute.xlu0 %641  ;;  %v1219_v35 = vpack.c.bf16 %v722_v22, %v714_v25  ;;  %v1209_v38 = vpack.c.bf16 %v719_v23, %v711_v36 }
 0x109   : > { %639 = vst.msk [vmem:[#allocation2 + $0x145] ss:$8 sm:$0xf] %vm1384_vm0, %v636_v39  ;;  %640 = vst.msk [vmem:[#allocation2 + $0x145] ss:$8 sm:$0xf0] %vm1384_vm0, %v636_v39  ;;  %v1221_v39 = vpack.c.bf16 %v721_v26, %v713_v37 }
 0x10a   : > { %v646_v42 = vrot.slane %v644_v40, 1  ;;  %v645_v43 = vrot.slane %v642_v41, 1  ;;  %v727_v40 = vld [vmem:[#allocation2 + $0xa0] sm:$0xff] }
 0x10c   : > { %v647_v44 = vsel %vm373_vm1, %v645_v43, %v646_v42  ;;  %v657_v46 = vpop.permute.xlu1 %656  ;;  %v655_v47 = vpop.permute.xlu0 %654  ;;  %v1223_v42 = vpack.c.bf16 %v738_v33, %v730_v32  ;;  %v735_v43 = vld [vmem:[#allocation2 + $0xe0] sm:$0xff] }
 0x10d   : > { %v649_v45 = vsel %vm648_vm4, %v642_v41, %v647_v44  ;;  %v659_v48 = vrot.slane %v657_v46, 1  ;;  %v658_v49 = vrot.slane %v655_v47, 1  ;;  %v1211_v41 = vpack.c.bf16 %v736_v28, %v728_v27  ;;  %v729_v44 = vld [vmem:[#allocation2 + $0xb0] sm:$0xff] }
 0x10e   : > { %652 = vst.msk [vmem:[#allocation2 + $0x146] ss:$8 sm:$0xf] %vm1384_vm0, %v649_v45  ;;  %653 = vst.msk [vmem:[#allocation2 + $0x146] ss:$8 sm:$0xf0] %vm1384_vm0, %v649_v45 }
 0x10f   : > { %v660_v50 = vsel %vm373_vm1, %v658_v49, %v659_v48  ;;  %v737_v45 = vld [vmem:[#allocation2 + $0xf0] sm:$0xff]  ;;  %v1213_v48 = vpack.c.bf16 %v735_v43, %v727_v40 }
 0x110   : > { %v662_v51 = vsel %vm661_vm5, %v655_v47, %v660_v50  ;;  %v670_v52 = vpop.permute.xlu1 %669  ;;  %v668_v53 = vpop.permute.xlu0 %667  ;;  %v1225_v49 = vpack.c.bf16 %v737_v45, %v729_v44  ;;  %v744_v50 = vld [vmem:[#allocation2 + $0x128] sm:$0xff] }
 0x111   : > { %665 = vst.msk [vmem:[#allocation2 + $0x147] ss:$8 sm:$0xf] %vm1384_vm0, %v662_v51  ;;  %666 = vst.msk [vmem:[#allocation2 + $0x147] ss:$8 sm:$0xf0] %vm1384_vm0, %v662_v51 }
 0x112   : > { %v672_v54 = vrot.slane %v670_v52, 1  ;;  %v671_v56 = vrot.slane %v668_v53, 1  ;;  %v746_v51 = vld [vmem:[#allocation2 + $0x138] sm:$0xff] }
 0x114   : > { %v673_v57 = vsel %vm373_vm1, %v671_v56, %v672_v54  ;;  %v683_v59 = vpop.permute.xlu1 %682  ;;  %v681_v60 = vpop.permute.xlu0 %680 }
 0x115   : > { %v675_v58 = vsel %vm674_vm6, %v668_v53, %v673_v57  ;;  %v685_v61 = vrot.slane %v683_v59, 1  ;;  %v684_v62 = vrot.slane %v681_v60, 1  ;;  %v743_v57 = vld [vmem:[#allocation2 + $0x120] sm:$0xff] }
 0x116   : > { %678 = vst.msk [vmem:[#allocation2 + $0x180] ss:$8 sm:$0xf] %vm1384_vm0, %v675_v58  ;;  %679 = vst.msk [vmem:[#allocation2 + $0x180] ss:$8 sm:$0xf0] %vm1384_vm0, %v675_v58 }
 0x117   : > { %v686_v63 = vsel %vm373_vm1, %v684_v62, %v685_v61  ;;  %v745_v58 = vld [vmem:[#allocation2 + $0x130] sm:$0xff] }
 0x118   : > { %v688_v3 = vsel %vm687_vm7, %v681_v60, %v686_v63  ;;  %v696_v4 = vpop.permute.xlu1 %695  ;;  %v694_v5 = vpop.permute.xlu0 %693  ;;  %v748_v6 = vld [vmem:[#allocation2 + $0x148] sm:$0xff]  ;;  %v750_v7 = vld [vmem:[#allocation2 + $0x158] sm:$0xff]  ;;  %v747_v8 = vld [vmem:[#allocation2 + $0x140] sm:$0xff] }
 0x119   : > { %691 = vst.msk [vmem:[#allocation2 + $0x181] ss:$8 sm:$0xf] %vm1384_vm0, %v688_v3  ;;  %692 = vst.msk [vmem:[#allocation2 + $0x181] ss:$8 sm:$0xf0] %vm1384_vm0, %v688_v3  ;;  %v1191_v11 = vpack.c.bf16 %v748_v6, %v740_v0  ;;  %v1203_v12 = vpack.c.bf16 %v750_v7, %v742_v1  ;;  %v1193_v16 = vpack.c.bf16 %v747_v8, %v739_v13 }
 0x11a   : > { %v698_v9 = vrot.slane %v696_v4, 1  ;;  %v697_v10 = vrot.slane %v694_v5, 1  ;;  %v749_v15 = vld [vmem:[#allocation2 + $0x150] sm:$0xff]  ;;  %v752_v46 = vld [vmem:[#allocation2 + $0x168] sm:$0xff]  ;;  %v754_v47 = vld [vmem:[#allocation2 + $0x178] sm:$0xff] }
 0x11b   : > { %v1205_v17 = vpack.c.bf16 %v749_v15, %v741_v14  ;;  %1192 = vmatprep.subr.bf16.mxu0 %v1191_v11  ;;  %1204 = vmatprep.subr.bf16.mxu1 %v1203_v12  ;;  %v1215_v52 = vpack.c.bf16 %v752_v46, %v744_v50  ;;  %v1227_v53 = vpack.c.bf16 %v754_v47, %v746_v51  ;;  %v751_v54 = vld [vmem:[#allocation2 + $0x160] sm:$0xff]  ;;  %v753_v56 = vld [vmem:[#allocation2 + $0x170] sm:$0xff] }
 0x11c   : > { %v699_v18 = vsel %vm373_vm1, %v697_v10, %v698_v9  ;;  %1194 = vmatpush1.bf16.msra.mxu0 %v1193_v16  ;;  %vm763_vm1 = vcmask 416768   ;;  %v1217_v59 = vpack.c.bf16 %v751_v54, %v743_v57  ;;  %v1229_v60 = vpack.c.bf16 %v753_v56, %v745_v58 }
 0x11d   : > { %v701_v19 = vsel %vm700_vm8, %v694_v5, %v699_v18  ;;  %1206 = vmatpush1.bf16.msra.mxu1 %v1205_v17 }
 0x11e   : > { %704 = vst.msk [vmem:[#allocation2 + $0x182] ss:$8 sm:$0xf] %vm1384_vm0, %v701_v19  ;;  %705 = vst.msk [vmem:[#allocation2 + $0x182] ss:$8 sm:$0xf0] %vm1384_vm0, %v701_v19 }
 0x11f   : > { %vm1103_vm0 = vcmask 849924  }
 0x120   : > { %vm1104_vm10 = vmor %vm1103_vm0, %vm767_vm9 }
 0x125   : > { %v756_v29 = vld [vmem:[#allocation2 + $0x188] sm:$0x7]  ;;  %v758_v30 = vld [vmem:[#allocation2 + $0x198] sm:$0x7]  ;;  %v755_v31 = vld [vmem:[#allocation2 + $0x180] sm:$0x7] }
 0x126   : > { %1168 = vmatprep.subr.msk.mxu0 %vm767_vm9, %v756_v29  ;;  %1171 = vmatprep.subr.msk.mxu1 %vm767_vm9, %v758_v30  ;;  %v757_v2 = vld [vmem:[#allocation2 + $0x190] sm:$0x7]  ;;  %v760_v61 = vld [vmem:[#allocation2 + $0x1a8] sm:$0x7]  ;;  %v762_v62 = vld [vmem:[#allocation2 + $0x1b8] sm:$0x7] }
 0x127   : > { %1169 = vmatpush1.msk.msra.mxu0 %vm767_vm9, %v755_v31  ;;  %1172 = vmatpush1.msk.msra.mxu1 %vm767_vm9, %v757_v2  ;;  %v761_v63 = vld [vmem:[#allocation2 + $0x1b0] sm:$0x7] }
 0x128   : > { %1170 = vmatmul.mubr.msk.f32.vlgmr.msra.gmra.mrb[0].mxu0 %vm763_vm1, %v1706_v20  ;;  %1173 = vmatmul.mubr.msk.f32.vlgmr.msra.gmra.mrb[0].mxu1 %vm763_vm1, %v1706_v20 }
 0x129   : > { %1208 = vmatprep.subr.bf16.mxu0 %v1207_v34  ;;  %1220 = vmatprep.subr.bf16.mxu1 %v1219_v35 }
 0x12a   : > { %1210 = vmatpush1.bf16.msra.mxu0 %v1209_v38  ;;  %1222 = vmatpush1.bf16.msra.mxu1 %v1221_v39 }
 0x12b   : > { %1212 = vmatprep.subr.bf16.mxu0 %v1211_v41  ;;  %1224 = vmatprep.subr.bf16.mxu1 %v1223_v42 }
 0x12c   : > { %998 = vmatprep.mubr.f32.mxu0 %v1349_v55  ;;  %1069 = vmatprep.mubr.f32.mxu1 %v1349_v55  ;;  %v759_v55 = vld [vmem:[#allocation2 + $0x1a0] sm:$0x7] }
 0x12e   : > { %1214 = vmatpush1.bf16.msra.mxu0 %v1213_v48  ;;  %1226 = vmatpush1.bf16.msra.mxu1 %v1225_v49 }
 0x12f   : > { %1216 = vmatprep.subr.bf16.mxu0 %v1215_v52  ;;  %1228 = vmatprep.subr.bf16.mxu1 %v1227_v53 }
 0x132   : > { %1218 = vmatpush1.bf16.msra.mxu0 %v1217_v59  ;;  %1230 = vmatpush1.bf16.msra.mxu1 %v1229_v60 }
 0x133   : > { %1174 = vmatprep.subr.msk.mxu0 %vm767_vm9, %v760_v61  ;;  %1177 = vmatprep.subr.msk.mxu1 %vm767_vm9, %v762_v62 }
 0x136   : > { %1175 = vmatpush1.msk.msra.mxu0 %vm767_vm9, %v759_v55  ;;  %1178 = vmatpush1.msk.msra.mxu1 %vm767_vm9, %v761_v63 }
 0x137   : > { %1176 = vmatmul.mubr.msk.f32.vlgmr.msra.gmra.mrb[2].mxu0 %vm763_vm1, %v1706_v20  ;;  %1179 = vmatmul.mubr.msk.f32.vlgmr.msra.gmra.mrb[2].mxu1 %vm763_vm1, %v1706_v20 }
 0x1fb   : > { %v858_v0 = vpop.f32.mrb[0].mxu0  ;;  %v929_v1 = vpop.f32.mrb[0].mxu1 }
 0x1fc   : > { %v1076_v3 = vmax.f32 %v858_v0, 0.0  ;;  %v1078_v4 = vmax.f32 %v929_v1, 0.0  ;;  %v860_v5 = vpop.f32.mrb[1].mxu0  ;;  %v931_v6 = vpop.f32.mrb[1].mxu1 }
 0x1fd   : > { %v1077_v7 = vmax.f32 %v860_v5, 0.0  ;;  %v1079_v8 = vmax.f32 %v931_v6, 0.0 }
 0x1ff   : > { %v1092_v9 = vcombine.low %v1076_v3, %v1077_v7  ;;  %v1093_v10 = vcombine.low %v1078_v4, %v1079_v8 }
 0x201   : > { %1100 = vst [vmem:[%s140_s18] sm:$0x77] %v1092_v9  ;;  %1101 = vst [vmem:[%s140_s18 + $0x8] sm:$0x77] %v1093_v10 }
 0x20a   : > { %v1000_v11 = vpop.f32.mrb[2].mxu0  ;;  %v1071_v12 = vpop.f32.mrb[2].mxu1 }
 0x20b   : > { %v1080_v13 = vmax.f32 %v1000_v11, 0.0  ;;  %v1082_v14 = vmax.f32 %v1071_v12, 0.0  ;;  %v1002_v15 = vpop.f32.mrb[3].mxu0  ;;  %v1073_v16 = vpop.f32.mrb[3].mxu1 }
 0x20c   : > { %v1081_v17 = vmax.f32 %v1002_v15, 0.0  ;;  %v1083_v18 = vmax.f32 %v1073_v16, 0.0 }
 0x20e   : > { %v1094_v19 = vcombine.low %v1080_v13, %v1081_v17  ;;  %v1095_v20 = vcombine.low %v1082_v14, %v1083_v18 }
 0x210   : > { %1102 = vst [vmem:[%s140_s18 + $0x10] sm:$0x77] %v1094_v19  ;;  %1105 = vst.msk [vmem:[%s140_s18 + $0x18] sm:$0x77] %vm1104_vm10, %v1095_v20 }
 0x211 PF: > { %s12_s9 = sadd.s32 1, %s1297_s9  }
 0x212   : > { %p9_p4 = scmp.ge.s32.totalorder %s12_s9, 4  }
 0x214   :  { %11 = sbr.rel (!%p9_p4) target bundleno = 1 (0x1), region = 108 }

// kernel: _init_active.5
= control target key start
LH: loop header
LB: loop body
LE: loop exit
PB: predicated region body
PF: predicated region fallthrough
CT: control target
= control target key end

     0   :  { %s1344_s9 = smov 0   ;;  %s1712_s0 = inlined_call_operand.vmem [shape: f32[2,1,1050], index: 0, kind: input, shape index: {}]   ;;  %s1713_s1 = inlined_call_operand.vmem [shape: f32[7,51], index: 1, kind: input, shape index: {}]   ;;  %s1714_s2 = inlined_call_operand.vmem [shape: f32[2,7,1000], index: 2, kind: output, shape index: {}]  }
   0x1 LB: > { %s1140_s10 = sadd.s32 4294967295, %s1276_s9   ;;  %p1144_p0 = scmp.ge.s32.totalorder %s1276_s9, 1  ;;  %s1276_s9 = sphi %s1344_s9, %s12_s9  }
   0x2   : > { %p111_p1 = scmp.lt.s32.totalorder %s1276_s9, 3 }
   0x4   : > { %p112_p2 = pnand %p1144_p0, %p111_p1 }
   0x5   : > { %p132_p3 = scmp.lt.s32.totalorder (!%p112_p2), %s1140_s10, 1  ;;  %v143_v0 = vlaneseq (!%p112_p2)  ;;  %s1278_s15 = smov (!%p112_p2), 125   ;;  %vm171_vm1 = vcmask (!%p112_p2), 1022976   ;;  %vm153_vm2 = vcmask (!%p112_p2), 1039360   ;;  %vm180_vm3 = vcmask (!%p112_p2), 1014784  }
   0x6   : > { %115 = sbr.rel (%p112_p2) target bundleno = 525 (0x20d), region = 28  ;;  %s1279_s16 = smov (!%p112_p2), 127   ;;  %vm162_vm4 = vcmask (!%p112_p2), 1031168   ;;  %vm198_vm5 = vcmask (!%p112_p2), 998400   ;;  %vm189_vm6 = vcmask (!%p112_p2), 1006592   ;;  %vm216_vm7 = vcmask (!%p112_p2), 982016  }
   0x7   : > { %vm1363_vm0 = vcmp.lt.s32.totalorder (!%p112_p2), %v143_v0, 1000  ;;  %s1280_s17 = smov (!%p112_p2), 124   ;;  %s1281_s18 = smov (!%p112_p2), 126   ;;  %vm207_vm8 = vcmask (!%p112_p2), 990208   ;;  %vm234_vm9 = vcmask (!%p112_p2), 965632   ;;  %vm225_vm10 = vcmask (!%p112_p2), 973824  }
   0x8   : > { %s1282_s19 = smov (!%p112_p2), 122   ;;  %s1283_s20 = smov (!%p112_p2), 123   ;;  %vm252_vm11 = vcmask (!%p112_p2), 949248   ;;  %vm243_vm12 = vcmask (!%p112_p2), 957440   ;;  %vm270_vm13 = vcmask (!%p112_p2), 932864   ;;  %vm261_vm14 = vcmask (!%p112_p2), 941056  }
   0x9   : > { %s1284_s21 = smov (!%p112_p2), 120   ;;  %s1285_s22 = smov (!%p112_p2), 121   ;;  %vm279_vm15 = vcmask (!%p112_p2), 924672   ;;  %v1328_v55 = vmov (!%p112_p2), 0.0  }
   0xa   : > { %s1286_s23 = smov (!%p112_p2), 118   ;;  %s1287_s24 = smov (!%p112_p2), 119   ;;  %856 = vmatprep.mubr.f32.mxu0 (!%p112_p2), %v1328_v55  ;;  %927 = vmatprep.mubr.f32.mxu1 (!%p112_p2), %v1328_v55 }
   0xb   : > { %s1288_s25 = smov (!%p112_p2), 116   ;;  %s1289_s26 = smov (!%p112_p2), 117  }
   0xc   : > { %s1290_s27 = smov (!%p112_p2), 114   ;;  %s1291_s28 = smov (!%p112_p2), 115  }
   0xd   : > { %s1718_s10 = smov (!%p132_p3, %s1140_s10), 1  ;;  %s1292_s29 = smov 103  }
   0xe   : > { %s1210_s11 = smul.u32 9, %s1718_s10  ;;  %s1293_s30 = smov 113  }
   0xf   : > { %s1294_s3 = smov 102   ;;  %s1295_s4 = smov 101  }
  0x10   : > { %s1358_s14 = scalar_lea.vmem %s1712_s0, %s1210_s11  ;;  %s1296_s5 = smov 100  }
  0x11   : > { %v1361_v1 = vld [vmem:[%s1358_s14] sm:$0xff]  ;;  %v1390_v3 = vld [vmem:[%s1358_s14 + $0x8] sm:$0x1]  ;;  %s1297_s6 = smov 99   ;;  %s1298_s7 = smov 98  }
  0x12   : > { %168 = vrot.lane.b32.xlu1 %v1361_v1, %s1278_s15  ;;  %150 = vrot.lane.b32.xlu0 %v1361_v1, %s1279_s16  ;;  %147 = vst.msk [vmem:[#allocation2] ss:$8 sm:$0xf] %vm1363_vm0, %v1361_v1  ;;  %148 = vst.msk [vmem:[#allocation2] ss:$8 sm:$0xf0] %vm1363_vm0, %v1361_v1 }
  0x13   : > { %s1299_s8 = smov 97   ;;  %s1300_s11 = smov 112  }
  0x14   : > { %s1301_s12 = smov 110   ;;  %s1302_s13 = smov 111  }
  0x15   : > { %s1303_s14 = smov 108   ;;  %s1304_s15 = smov 109  }
  0x16   : > { %177 = vrot.lane.b32.xlu1 %v1361_v1, %s1280_s17  ;;  %159 = vrot.lane.b32.xlu0 %v1361_v1, %s1281_s18  ;;  %s1305_s16 = smov 106   ;;  %s1306_s17 = smov 107  }
  0x17   : > { %s1307_s18 = smov 104  }
  0x1a   : > { %195 = vrot.lane.b32.xlu1 %v1361_v1, %s1282_s19  ;;  %186 = vrot.lane.b32.xlu0 %v1361_v1, %s1283_s20  ;;  %s1308_s19 = smov 105   ;;  %s1309_s20 = smov 96  }
  0x1e   : > { %213 = vrot.lane.b32.xlu1 %v1361_v1, %s1284_s21  ;;  %204 = vrot.lane.b32.xlu0 %v1361_v1, %s1285_s22  ;;  %s1310_s21 = smov 95   ;;  %s1311_s22 = smov 94  }
  0x22   : > { %231 = vrot.lane.b32.xlu1 %v1361_v1, %s1286_s23  ;;  %222 = vrot.lane.b32.xlu0 %v1361_v1, %s1287_s24  ;;  %s1312_s23 = smov 93   ;;  %s1313_s24 = smov 92  }
  0x26   : > { %249 = vrot.lane.b32.xlu1 %v1361_v1, %s1288_s25  ;;  %240 = vrot.lane.b32.xlu0 %v1361_v1, %s1289_s26  ;;  %s1314_s25 = smov 91   ;;  %s1315_s26 = smov 90  }
  0x2a   : > { %267 = vrot.lane.b32.xlu1 %v1361_v1, %s1290_s27  ;;  %258 = vrot.lane.b32.xlu0 %v1361_v1, %s1291_s28  ;;  %s1316_s27 = smov 89   ;;  %s1317_s28 = smov 88  }
  0x2e   : > { %367 = vrot.lane.b32.xlu1 %v1361_v1, %s1292_s29  ;;  %276 = vrot.lane.b32.xlu0 %v1361_v1, %s1293_s30  ;;  %s1319_s30 = smov 86  }
  0x32   : > { %381 = vrot.lane.b32.xlu1 %v1361_v1, %s1294_s3  ;;  %369 = vrot.lane.b32.xlu0 %v1390_v3, %s1292_s29  ;;  %s1318_s29 = smov 87  }
  0x36   : > { %394 = vrot.lane.b32.xlu1 %v1361_v1, %s1295_s4  ;;  %383 = vrot.lane.b32.xlu0 %v1390_v3, %s1294_s3  ;;  %s1320_s3 = smov 85  }
  0x3a   : > { %407 = vrot.lane.b32.xlu1 %v1361_v1, %s1296_s5  ;;  %396 = vrot.lane.b32.xlu0 %v1390_v3, %s1295_s4  ;;  %s1321_s4 = smov 84  }
  0x3e   : > { %420 = vrot.lane.b32.xlu1 %v1361_v1, %s1297_s6  ;;  %409 = vrot.lane.b32.xlu0 %v1390_v3, %s1296_s5  ;;  %s1322_s5 = smov 83  }
  0x42   : > { %433 = vrot.lane.b32.xlu1 %v1361_v1, %s1298_s7  ;;  %422 = vrot.lane.b32.xlu0 %v1390_v3, %s1297_s6  ;;  %s1323_s6 = smov 82  }
  0x46   : > { %446 = vrot.lane.b32.xlu1 %v1361_v1, %s1299_s8  ;;  %435 = vrot.lane.b32.xlu0 %v1390_v3, %s1298_s7  ;;  %s1324_s7 = smov 81  }
  0x4a   : > { %285 = vrot.lane.b32.xlu1 %v1361_v1, %s1300_s11  ;;  %448 = vrot.lane.b32.xlu0 %v1390_v3, %s1299_s8  ;;  %s1325_s8 = smov 80   ;;  %s1326_s11 = smov 79  }
  0x4e   : > { %303 = vrot.lane.b32.xlu1 %v1361_v1, %s1301_s12  ;;  %294 = vrot.lane.b32.xlu0 %v1361_v1, %s1302_s13  ;;  %s1327_s12 = smov 78  }
  0x52   : > { %321 = vrot.lane.b32.xlu1 %v1361_v1, %s1303_s14  ;;  %312 = vrot.lane.b32.xlu0 %v1361_v1, %s1304_s15  ;;  %s1161_s15 = sshll.u32 %s1718_s10, 6 }
  0x56   : > { %339 = vrot.lane.b32.xlu1 %v1361_v1, %s1305_s16  ;;  %330 = vrot.lane.b32.xlu0 %v1361_v1, %s1306_s17 }
  0x5a   : > { %357 = vrot.lane.b32.xlu1 %v1361_v1, %s1307_s18  ;;  %348 = vrot.lane.b32.xlu0 %v1361_v1, %s1308_s19  ;;  %s140_s18 = scalar_lea.vmem %s1714_s2, %s1161_s15 }
  0x5e   : > { %461 = vrot.lane.b32.xlu1 %v1390_v3, %s1309_s20  ;;  %459 = vrot.lane.b32.xlu0 %v1361_v1, %s1309_s20 }
  0x62   : > { %474 = vrot.lane.b32.xlu1 %v1390_v3, %s1310_s21  ;;  %472 = vrot.lane.b32.xlu0 %v1361_v1, %s1310_s21 }
  0x66   : > { %487 = vrot.lane.b32.xlu1 %v1390_v3, %s1311_s22  ;;  %485 = vrot.lane.b32.xlu0 %v1361_v1, %s1311_s22 }
  0x6a   : > { %500 = vrot.lane.b32.xlu1 %v1390_v3, %s1312_s23  ;;  %498 = vrot.lane.b32.xlu0 %v1361_v1, %s1312_s23 }
  0x6e   : > { %513 = vrot.lane.b32.xlu1 %v1390_v3, %s1313_s24  ;;  %511 = vrot.lane.b32.xlu0 %v1361_v1, %s1313_s24 }
  0x72   : > { %526 = vrot.lane.b32.xlu1 %v1390_v3, %s1314_s25  ;;  %524 = vrot.lane.b32.xlu0 %v1361_v1, %s1314_s25 }
  0x76   : > { %539 = vrot.lane.b32.xlu1 %v1390_v3, %s1315_s26  ;;  %537 = vrot.lane.b32.xlu0 %v1361_v1, %s1315_s26 }
  0x7a   : > { %552 = vrot.lane.b32.xlu1 %v1390_v3, %s1316_s27  ;;  %550 = vrot.lane.b32.xlu0 %v1361_v1, %s1316_s27 }
  0x7e   : > { %565 = vrot.lane.b32.xlu1 %v1390_v3, %s1317_s28  ;;  %563 = vrot.lane.b32.xlu0 %v1361_v1, %s1317_s28 }
  0x82   : > { %578 = vrot.lane.b32.xlu1 %v1390_v3, %s1318_s29  ;;  %576 = vrot.lane.b32.xlu0 %v1361_v1, %s1318_s29 }
  0x84   : > { %v169_v4 = vpop.permute.xlu1 %168  ;;  %v151_v5 = vpop.permute.xlu0 %150 }
  0x85   : > { %v170_v6 = vrot.slane %v169_v4, 1  ;;  %v152_v7 = vrot.slane %v151_v5, 1 }
  0x86   : > { %591 = vrot.lane.b32.xlu1 %v1390_v3, %s1319_s30  ;;  %589 = vrot.lane.b32.xlu0 %v1361_v1, %s1319_s30 }
  0x87   : > { %v172_v8 = vsel %vm171_vm1, %v169_v4, %v170_v6  ;;  %v154_v9 = vsel %vm153_vm2, %v151_v5, %v152_v7  ;;  %vm373_vm1 = vcmask 1046528   ;;  %vm375_vm2 = vcmask 842752  }
  0x88   : > { %175 = vst.msk [vmem:[#allocation2 + $0x3] ss:$8 sm:$0xf] %vm1363_vm0, %v172_v8  ;;  %176 = vst.msk [vmem:[#allocation2 + $0x3] ss:$8 sm:$0xf0] %vm1363_vm0, %v172_v8  ;;  %v178_v10 = vpop.permute.xlu1 %177  ;;  %v160_v11 = vpop.permute.xlu0 %159 }
  0x89   : > { %157 = vst.msk [vmem:[#allocation2 + $0x1] ss:$8 sm:$0xf] %vm1363_vm0, %v154_v9  ;;  %158 = vst.msk [vmem:[#allocation2 + $0x1] ss:$8 sm:$0xf0] %vm1363_vm0, %v154_v9 }
  0x8a   : > { %v179_v12 = vrot.slane %v178_v10, 1  ;;  %v161_v13 = vrot.slane %v160_v11, 1  ;;  %604 = vrot.lane.b32.xlu1 %v1390_v3, %s1320_s3  ;;  %602 = vrot.lane.b32.xlu0 %v1361_v1, %s1320_s3 }
  0x8c   : > { %v181_v14 = vsel %vm180_vm3, %v178_v10, %v179_v12  ;;  %v163_v15 = vsel %vm162_vm4, %v160_v11, %v161_v13  ;;  %v196_v16 = vpop.permute.xlu1 %195  ;;  %v187_v17 = vpop.permute.xlu0 %186  ;;  %vm388_vm3 = vcmask 834560   ;;  %vm401_vm4 = vcmask 826368  }
  0x8d   : > { %184 = vst.msk [vmem:[#allocation2 + $0x4] ss:$8 sm:$0xf] %vm1363_vm0, %v181_v14  ;;  %185 = vst.msk [vmem:[#allocation2 + $0x4] ss:$8 sm:$0xf0] %vm1363_vm0, %v181_v14 }
  0x8e   : > { %166 = vst.msk [vmem:[#allocation2 + $0x2] ss:$8 sm:$0xf] %vm1363_vm0, %v163_v15  ;;  %167 = vst.msk [vmem:[#allocation2 + $0x2] ss:$8 sm:$0xf0] %vm1363_vm0, %v163_v15  ;;  %617 = vrot.lane.b32.xlu1 %v1390_v3, %s1321_s4  ;;  %615 = vrot.lane.b32.xlu0 %v1361_v1, %s1321_s4 }
  0x8f   : > { %v197_v18 = vrot.slane %v196_v16, 1  ;;  %v188_v19 = vrot.slane %v187_v17, 1 }
  0x90   : > { %v214_v22 = vpop.permute.xlu1 %213  ;;  %v205_v23 = vpop.permute.xlu0 %204 }
  0x91   : > { %v199_v20 = vsel %vm198_vm5, %v196_v16, %v197_v18  ;;  %v190_v21 = vsel %vm189_vm6, %v187_v17, %v188_v19  ;;  %v215_v24 = vrot.slane %v214_v22, 1  ;;  %v206_v25 = vrot.slane %v205_v23, 1 }
  0x92   : > { %202 = vst.msk [vmem:[#allocation2 + $0x6] ss:$8 sm:$0xf] %vm1363_vm0, %v199_v20  ;;  %203 = vst.msk [vmem:[#allocation2 + $0x6] ss:$8 sm:$0xf0] %vm1363_vm0, %v199_v20  ;;  %630 = vrot.lane.b32.xlu1 %v1390_v3, %s1322_s5  ;;  %628 = vrot.lane.b32.xlu0 %v1361_v1, %s1322_s5 }
  0x93   : > { %193 = vst.msk [vmem:[#allocation2 + $0x5] ss:$8 sm:$0xf] %vm1363_vm0, %v190_v21  ;;  %194 = vst.msk [vmem:[#allocation2 + $0x5] ss:$8 sm:$0xf0] %vm1363_vm0, %v190_v21  ;;  %v217_v26 = vsel %vm216_vm7, %v214_v22, %v215_v24  ;;  %v208_v27 = vsel %vm207_vm8, %v205_v23, %v206_v25 }
  0x94   : > { %220 = vst.msk [vmem:[#allocation2 + $0x40] ss:$8 sm:$0xf] %vm1363_vm0, %v217_v26  ;;  %221 = vst.msk [vmem:[#allocation2 + $0x40] ss:$8 sm:$0xf0] %vm1363_vm0, %v217_v26  ;;  %v232_v28 = vpop.permute.xlu1 %231  ;;  %v223_v29 = vpop.permute.xlu0 %222 }
  0x95   : > { %211 = vst.msk [vmem:[#allocation2 + $0x7] ss:$8 sm:$0xf] %vm1363_vm0, %v208_v27  ;;  %212 = vst.msk [vmem:[#allocation2 + $0x7] ss:$8 sm:$0xf0] %vm1363_vm0, %v208_v27 }
  0x96   : > { %v233_v30 = vrot.slane %v232_v28, 1  ;;  %v224_v31 = vrot.slane %v223_v29, 1  ;;  %643 = vrot.lane.b32.xlu1 %v1390_v3, %s1323_s6  ;;  %641 = vrot.lane.b32.xlu0 %v1361_v1, %s1323_s6  ;;  %vm414_vm5 = vcmask 818176   ;;  %vm427_vm6 = vcmask 809984  }
  0x97   : > { %vm440_vm7 = vcmask 801792   ;;  %vm288_vm8 = vcmask 916480  }
  0x98   : > { %v235_v32 = vsel %vm234_vm9, %v232_v28, %v233_v30  ;;  %v226_v33 = vsel %vm225_vm10, %v223_v29, %v224_v31  ;;  %v250_v34 = vpop.permute.xlu1 %249  ;;  %v241_v35 = vpop.permute.xlu0 %240  ;;  %vm453_vm9 = vcmask 793600   ;;  %vm306_vm10 = vcmask 900096  }
  0x99   : > { %238 = vst.msk [vmem:[#allocation2 + $0x42] ss:$8 sm:$0xf] %vm1363_vm0, %v235_v32  ;;  %239 = vst.msk [vmem:[#allocation2 + $0x42] ss:$8 sm:$0xf0] %vm1363_vm0, %v235_v32 }
  0x9a   : > { %229 = vst.msk [vmem:[#allocation2 + $0x41] ss:$8 sm:$0xf] %vm1363_vm0, %v226_v33  ;;  %230 = vst.msk [vmem:[#allocation2 + $0x41] ss:$8 sm:$0xf0] %vm1363_vm0, %v226_v33  ;;  %656 = vrot.lane.b32.xlu1 %v1390_v3, %s1324_s7  ;;  %654 = vrot.lane.b32.xlu0 %v1361_v1, %s1324_s7 }
  0x9b   : > { %v251_v36 = vrot.slane %v250_v34, 1  ;;  %v242_v37 = vrot.slane %v241_v35, 1 }
  0x9c   : > { %v268_v40 = vpop.permute.xlu1 %267  ;;  %v259_v41 = vpop.permute.xlu0 %258  ;;  %v708_v61 = vld [vmem:[#allocation2 + $0x8] sm:$0xff]  ;;  %v710_v62 = vld [vmem:[#allocation2 + $0x18] sm:$0xff]  ;;  %v707_v63 = vld [vmem:[#allocation2] sm:$0xff] }
  0x9d   : > { %v253_v38 = vsel %vm252_vm11, %v250_v34, %v251_v36  ;;  %v244_v39 = vsel %vm243_vm12, %v241_v35, %v242_v37  ;;  %v269_v42 = vrot.slane %v268_v40, 1  ;;  %v260_v43 = vrot.slane %v259_v41, 1  ;;  %v709_v11 = vld [vmem:[#allocation2 + $0x10] sm:$0xff] }
  0x9e   : > { %256 = vst.msk [vmem:[#allocation2 + $0x44] ss:$8 sm:$0xf] %vm1363_vm0, %v253_v38  ;;  %257 = vst.msk [vmem:[#allocation2 + $0x44] ss:$8 sm:$0xf0] %vm1363_vm0, %v253_v38  ;;  %669 = vrot.lane.b32.xlu1 %v1390_v3, %s1325_s8  ;;  %667 = vrot.lane.b32.xlu0 %v1361_v1, %s1325_s8 }
  0x9f   : > { %247 = vst.msk [vmem:[#allocation2 + $0x43] ss:$8 sm:$0xf] %vm1363_vm0, %v244_v39  ;;  %248 = vst.msk [vmem:[#allocation2 + $0x43] ss:$8 sm:$0xf0] %vm1363_vm0, %v244_v39  ;;  %v271_v44 = vsel %vm270_vm13, %v268_v40, %v269_v42  ;;  %v262_v45 = vsel %vm261_vm14, %v259_v41, %v260_v43 }
  0xa0   : > { %274 = vst.msk [vmem:[#allocation2 + $0x46] ss:$8 sm:$0xf] %vm1363_vm0, %v271_v44  ;;  %275 = vst.msk [vmem:[#allocation2 + $0x46] ss:$8 sm:$0xf0] %vm1363_vm0, %v271_v44  ;;  %v368_v46 = vpop.permute.xlu1 %367  ;;  %v277_v47 = vpop.permute.xlu0 %276 }
  0xa1   : > { %265 = vst.msk [vmem:[#allocation2 + $0x45] ss:$8 sm:$0xf] %vm1363_vm0, %v262_v45  ;;  %266 = vst.msk [vmem:[#allocation2 + $0x45] ss:$8 sm:$0xf0] %vm1363_vm0, %v262_v45 }
  0xa2   : > { %v278_v48 = vrot.slane %v277_v47, 1  ;;  %682 = vrot.lane.b32.xlu1 %v1390_v3, %s1326_s11  ;;  %680 = vrot.lane.b32.xlu0 %v1361_v1, %s1326_s11  ;;  %v371_v52 = vrot.slane %v368_v46, 1  ;;  %vm297_vm11 = vcmask 908288   ;;  %vm324_vm12 = vcmask 883712  }
  0xa3   : > { %vm315_vm13 = vcmask 891904   ;;  %vm342_vm14 = vcmask 867328  }
  0xa4   : > { %v280_v49 = vsel %vm279_vm15, %v277_v47, %v278_v48  ;;  %v382_v50 = vpop.permute.xlu1 %381  ;;  %v370_v51 = vpop.permute.xlu0 %369  ;;  %vm333_vm15 = vcmask 875520  }
  0xa5   : > { %283 = vst.msk [vmem:[#allocation2 + $0x47] ss:$8 sm:$0xf] %vm1363_vm0, %v280_v49  ;;  %284 = vst.msk [vmem:[#allocation2 + $0x47] ss:$8 sm:$0xf0] %vm1363_vm0, %v280_v49 }
  0xa6   : > { %v372_v53 = vrot.slane %v370_v51, 1  ;;  %695 = vrot.lane.b32.xlu1 %v1390_v3, %s1327_s12  ;;  %693 = vrot.lane.b32.xlu0 %v1361_v1, %s1327_s12  ;;  %v385_v59 = vrot.slane %v382_v50, 1 }
  0xa8   : > { %v374_v54 = vsel %vm373_vm1, %v371_v52, %v372_v53  ;;  %v395_v57 = vpop.permute.xlu1 %394  ;;  %v384_v58 = vpop.permute.xlu0 %383 }
  0xa9   : > { %v376_v56 = vsel %vm375_vm2, %v368_v46, %v374_v54  ;;  %v386_v60 = vrot.slane %v384_v58, 1  ;;  %v398_v13 = vrot.slane %v395_v57, 1  ;;  %vm360_vm2 = vcmask 850944  }
  0xaa   : > { %379 = vst.msk [vmem:[#allocation2 + $0xc1] ss:$8 sm:$0xf] %vm1363_vm0, %v376_v56  ;;  %380 = vst.msk [vmem:[#allocation2 + $0xc1] ss:$8 sm:$0xf0] %vm1363_vm0, %v376_v56 }
  0xab   : > { %v387_v0 = vsel %vm373_vm1, %v385_v59, %v386_v60 }
  0xac   : > { %v716_v1 = vld [vmem:[#allocation2 + $0x48] sm:$0xff]  ;;  %v718_v3 = vld [vmem:[#allocation2 + $0x58] sm:$0xff]  ;;  %v715_v4 = vld [vmem:[#allocation2 + $0x40] sm:$0xff]  ;;  %v389_v5 = vsel %vm388_vm3, %v382_v50, %v387_v0  ;;  %v408_v6 = vpop.permute.xlu1 %407  ;;  %v397_v7 = vpop.permute.xlu0 %396  ;;  %vm351_vm3 = vcmask 859136  }
  0xad   : > { %v1162_v8 = vpack.c.bf16 %v716_v1, %v708_v61  ;;  %v1174_v9 = vpack.c.bf16 %v718_v3, %v710_v62  ;;  %v1164_v10 = vpack.c.bf16 %v715_v4, %v707_v63  ;;  %v717_v12 = vld [vmem:[#allocation2 + $0x50] sm:$0xff]  ;;  %392 = vst.msk [vmem:[#allocation2 + $0xc2] ss:$8 sm:$0xf] %vm1363_vm0, %v389_v5  ;;  %v399_v14 = vrot.slane %v397_v7, 1 }
  0xae   : > { %393 = vst.msk [vmem:[#allocation2 + $0xc2] ss:$8 sm:$0xf0] %vm1363_vm0, %v389_v5  ;;  %v1176_v15 = vpack.c.bf16 %v717_v12, %v709_v11  ;;  %v411_v20 = vrot.slane %v408_v6, 1 }
  0xaf   : > { %1163 = vmatprep.subr.bf16.mxu0 %v1162_v8  ;;  %1175 = vmatprep.subr.bf16.mxu1 %v1174_v9  ;;  %v400_v16 = vsel %vm373_vm1, %v398_v13, %v399_v14 }
  0xb0   : > { %1165 = vmatpush1.bf16.msra.mxu0 %v1164_v10  ;;  %1177 = vmatpush1.bf16.msra.mxu1 %v1176_v15  ;;  %v402_v17 = vsel %vm401_vm4, %v395_v57, %v400_v16  ;;  %v421_v18 = vpop.permute.xlu1 %420  ;;  %v410_v19 = vpop.permute.xlu0 %409  ;;  %vm466_vm4 = vcmask 785408  }
  0xb1   : > { %405 = vst.msk [vmem:[#allocation2 + $0xc3] ss:$8 sm:$0xf] %vm1363_vm0, %v402_v17  ;;  %406 = vst.msk [vmem:[#allocation2 + $0xc3] ss:$8 sm:$0xf0] %vm1363_vm0, %v402_v17 }
  0xb2   : > { %v412_v21 = vrot.slane %v410_v19, 1  ;;  %v424_v26 = vrot.slane %v421_v18, 1 }
  0xb4   : > { %v413_v22 = vsel %vm373_vm1, %v411_v20, %v412_v21  ;;  %v434_v24 = vpop.permute.xlu1 %433  ;;  %v423_v25 = vpop.permute.xlu0 %422 }
  0xb5   : > { %v415_v23 = vsel %vm414_vm5, %v408_v6, %v413_v22  ;;  %v425_v27 = vrot.slane %v423_v25, 1  ;;  %v437_v32 = vrot.slane %v434_v24, 1  ;;  %vm479_vm5 = vcmask 777216  }
  0xb6   : > { %418 = vst.msk [vmem:[#allocation2 + $0xc4] ss:$8 sm:$0xf] %vm1363_vm0, %v415_v23  ;;  %419 = vst.msk [vmem:[#allocation2 + $0xc4] ss:$8 sm:$0xf0] %vm1363_vm0, %v415_v23 }
  0xb7   : > { %v426_v28 = vsel %vm373_vm1, %v424_v26, %v425_v27 }
  0xb8   : > { %v428_v29 = vsel %vm427_vm6, %v421_v18, %v426_v28  ;;  %v447_v30 = vpop.permute.xlu1 %446  ;;  %v436_v31 = vpop.permute.xlu0 %435  ;;  %vm492_vm6 = vcmask 769024  }
  0xb9   : > { %431 = vst.msk [vmem:[#allocation2 + $0xc5] ss:$8 sm:$0xf] %vm1363_vm0, %v428_v29  ;;  %432 = vst.msk [vmem:[#allocation2 + $0xc5] ss:$8 sm:$0xf0] %vm1363_vm0, %v428_v29 }
  0xba   : > { %v438_v33 = vrot.slane %v436_v31, 1  ;;  %v450_v38 = vrot.slane %v447_v30, 1 }
  0xbc   : > { %v439_v34 = vsel %vm373_vm1, %v437_v32, %v438_v33  ;;  %v286_v36 = vpop.permute.xlu1 %285  ;;  %v449_v37 = vpop.permute.xlu0 %448 }
  0xbd   : > { %v441_v35 = vsel %vm440_vm7, %v434_v24, %v439_v34  ;;  %v287_v39 = vrot.slane %v286_v36, 1  ;;  %v451_v40 = vrot.slane %v449_v37, 1  ;;  %vm505_vm7 = vcmask 760832  }
  0xbe   : > { %444 = vst.msk [vmem:[#allocation2 + $0xc6] ss:$8 sm:$0xf] %vm1363_vm0, %v441_v35  ;;  %445 = vst.msk [vmem:[#allocation2 + $0xc6] ss:$8 sm:$0xf0] %vm1363_vm0, %v441_v35 }
  0xbf   : > { %v289_v41 = vsel %vm288_vm8, %v286_v36, %v287_v39  ;;  %v452_v42 = vsel %vm373_vm1, %v450_v38, %v451_v40  ;;  %vm518_vm8 = vcmask 752640  }
  0xc0   : > { %292 = vst.msk [vmem:[#allocation2 + $0x80] ss:$8 sm:$0xf] %vm1363_vm0, %v289_v41  ;;  %293 = vst.msk [vmem:[#allocation2 + $0x80] ss:$8 sm:$0xf0] %vm1363_vm0, %v289_v41  ;;  %v454_v43 = vsel %vm453_vm9, %v447_v30, %v452_v42  ;;  %v304_v44 = vpop.permute.xlu1 %303  ;;  %v295_v45 = vpop.permute.xlu0 %294 }
  0xc1   : > { %457 = vst.msk [vmem:[#allocation2 + $0xc7] ss:$8 sm:$0xf] %vm1363_vm0, %v454_v43  ;;  %458 = vst.msk [vmem:[#allocation2 + $0xc7] ss:$8 sm:$0xf0] %vm1363_vm0, %v454_v43 }
  0xc2   : > { %v305_v46 = vrot.slane %v304_v44, 1  ;;  %v296_v47 = vrot.slane %v295_v45, 1  ;;  %vm531_vm9 = vcmask 744448  }
  0xc4   : > { %v307_v48 = vsel %vm306_vm10, %v304_v44, %v305_v46  ;;  %v298_v49 = vsel %vm297_vm11, %v295_v45, %v296_v47  ;;  %v322_v50 = vpop.permute.xlu1 %321  ;;  %v313_v51 = vpop.permute.xlu0 %312  ;;  %vm544_vm10 = vcmask 736256   ;;  %vm557_vm11 = vcmask 728064  }
  0xc5   : > { %310 = vst.msk [vmem:[#allocation2 + $0x82] ss:$8 sm:$0xf] %vm1363_vm0, %v307_v48  ;;  %311 = vst.msk [vmem:[#allocation2 + $0x82] ss:$8 sm:$0xf0] %vm1363_vm0, %v307_v48 }
  0xc6   : > { %301 = vst.msk [vmem:[#allocation2 + $0x81] ss:$8 sm:$0xf] %vm1363_vm0, %v298_v49  ;;  %302 = vst.msk [vmem:[#allocation2 + $0x81] ss:$8 sm:$0xf0] %vm1363_vm0, %v298_v49 }
  0xc7   : > { %v323_v52 = vrot.slane %v322_v50, 1  ;;  %v314_v53 = vrot.slane %v313_v51, 1 }
  0xc8   : > { %v340_v57 = vpop.permute.xlu1 %339  ;;  %v331_v58 = vpop.permute.xlu0 %330 }
  0xc9   : > { %v325_v54 = vsel %vm324_vm12, %v322_v50, %v323_v52  ;;  %v316_v56 = vsel %vm315_vm13, %v313_v51, %v314_v53  ;;  %v341_v59 = vrot.slane %v340_v57, 1  ;;  %v332_v60 = vrot.slane %v331_v58, 1 }
  0xca   : > { %328 = vst.msk [vmem:[#allocation2 + $0x84] ss:$8 sm:$0xf] %vm1363_vm0, %v325_v54  ;;  %329 = vst.msk [vmem:[#allocation2 + $0x84] ss:$8 sm:$0xf0] %vm1363_vm0, %v325_v54 }
  0xcb   : > { %319 = vst.msk [vmem:[#allocation2 + $0x83] ss:$8 sm:$0xf] %vm1363_vm0, %v316_v56  ;;  %320 = vst.msk [vmem:[#allocation2 + $0x83] ss:$8 sm:$0xf0] %vm1363_vm0, %v316_v56  ;;  %v343_v61 = vsel %vm342_vm14, %v340_v57, %v341_v59  ;;  %v334_v62 = vsel %vm333_vm15, %v331_v58, %v332_v60 }
  0xcc   : > { %346 = vst.msk [vmem:[#allocation2 + $0x86] ss:$8 sm:$0xf] %vm1363_vm0, %v343_v61  ;;  %347 = vst.msk [vmem:[#allocation2 + $0x86] ss:$8 sm:$0xf0] %vm1363_vm0, %v343_v61  ;;  %v358_v63 = vpop.permute.xlu1 %357  ;;  %v349_v0 = vpop.permute.xlu0 %348 }
  0xcd   : > { %337 = vst.msk [vmem:[#allocation2 + $0x85] ss:$8 sm:$0xf] %vm1363_vm0, %v334_v62  ;;  %338 = vst.msk [vmem:[#allocation2 + $0x85] ss:$8 sm:$0xf0] %vm1363_vm0, %v334_v62 }
  0xce   : > { %v359_v1 = vrot.slane %v358_v63, 1  ;;  %v350_v3 = vrot.slane %v349_v0, 1  ;;  %vm570_vm12 = vcmask 719872   ;;  %vm583_vm13 = vcmask 711680  }
  0xcf   : > { %vm596_vm14 = vcmask 703488   ;;  %vm609_vm15 = vcmask 695296  }
  0xd0   : > { %v361_v4 = vsel %vm360_vm2, %v358_v63, %v359_v1  ;;  %v352_v5 = vsel %vm351_vm3, %v349_v0, %v350_v3  ;;  %v462_v6 = vpop.permute.xlu1 %461  ;;  %v460_v7 = vpop.permute.xlu0 %459  ;;  %vm622_vm2 = vcmask 687104   ;;  %vm635_vm3 = vcmask 678912  }
  0xd1   : > { %364 = vst.msk [vmem:[#allocation2 + $0xc0] ss:$8 sm:$0xf] %vm1363_vm0, %v361_v4  ;;  %365 = vst.msk [vmem:[#allocation2 + $0xc0] ss:$8 sm:$0xf0] %vm1363_vm0, %v361_v4 }
  0xd2   : > { %355 = vst.msk [vmem:[#allocation2 + $0x87] ss:$8 sm:$0xf] %vm1363_vm0, %v352_v5  ;;  %356 = vst.msk [vmem:[#allocation2 + $0x87] ss:$8 sm:$0xf0] %vm1363_vm0, %v352_v5 }
  0xd3   : > { %v464_v8 = vrot.slane %v462_v6, 1  ;;  %v463_v9 = vrot.slane %v460_v7, 1 }
  0xd4   : > { %v475_v12 = vpop.permute.xlu1 %474  ;;  %v473_v13 = vpop.permute.xlu0 %472 }
  0xd5   : > { %v465_v10 = vsel %vm373_vm1, %v463_v9, %v464_v8  ;;  %v477_v14 = vrot.slane %v475_v12, 1  ;;  %v476_v15 = vrot.slane %v473_v13, 1 }
  0xd6   : > { %v467_v11 = vsel %vm466_vm4, %v460_v7, %v465_v10  ;;  %vm648_vm4 = vcmask 670720  }
  0xd7   : > { %470 = vst.msk [vmem:[#allocation2 + $0x100] ss:$8 sm:$0xf] %vm1363_vm0, %v467_v11  ;;  %471 = vst.msk [vmem:[#allocation2 + $0x100] ss:$8 sm:$0xf0] %vm1363_vm0, %v467_v11  ;;  %v478_v16 = vsel %vm373_vm1, %v476_v15, %v477_v14 }
  0xd8   : > { %v732_v18 = vld [vmem:[#allocation2 + $0xc8] sm:$0xff]  ;;  %v480_v20 = vsel %vm479_vm5, %v473_v13, %v478_v16  ;;  %v488_v21 = vpop.permute.xlu1 %487  ;;  %v486_v22 = vpop.permute.xlu0 %485  ;;  %v734_v24 = vld [vmem:[#allocation2 + $0xd8] sm:$0xff]  ;;  %v731_v26 = vld [vmem:[#allocation2 + $0xc0] sm:$0xff]  ;;  %vm661_vm5 = vcmask 662528  }
  0xd9   : > { %v724_v17 = vld [vmem:[#allocation2 + $0x88] sm:$0xff]  ;;  %v726_v19 = vld [vmem:[#allocation2 + $0x98] sm:$0xff]  ;;  %v723_v25 = vld [vmem:[#allocation2 + $0x80] sm:$0xff]  ;;  %483 = vst.msk [vmem:[#allocation2 + $0x101] ss:$8 sm:$0xf] %vm1363_vm0, %v480_v20 }
  0xda   : > { %v1166_v23 = vpack.c.bf16 %v732_v18, %v724_v17  ;;  %484 = vst.msk [vmem:[#allocation2 + $0x101] ss:$8 sm:$0xf0] %vm1363_vm0, %v480_v20  ;;  %v490_v27 = vrot.slane %v488_v21, 1  ;;  %v489_v28 = vrot.slane %v486_v22, 1  ;;  %v1178_v29 = vpack.c.bf16 %v734_v24, %v726_v19  ;;  %v725_v31 = vld [vmem:[#allocation2 + $0x90] sm:$0xff] }
  0xdb   : > { %v1168_v30 = vpack.c.bf16 %v731_v26, %v723_v25  ;;  %v733_v32 = vld [vmem:[#allocation2 + $0xd0] sm:$0xff] }
  0xdc   : > { %1167 = vmatprep.subr.bf16.mxu0 %v1166_v23  ;;  %v1180_v33 = vpack.c.bf16 %v733_v32, %v725_v31  ;;  %v491_v34 = vsel %vm373_vm1, %v489_v28, %v490_v27  ;;  %1179 = vmatprep.subr.bf16.mxu1 %v1178_v29  ;;  %v501_v36 = vpop.permute.xlu1 %500  ;;  %v499_v37 = vpop.permute.xlu0 %498 }
  0xdd   : > { %1169 = vmatpush1.bf16.msra.mxu0 %v1168_v30  ;;  %v493_v35 = vsel %vm492_vm6, %v486_v22, %v491_v34  ;;  %v503_v38 = vrot.slane %v501_v36, 1  ;;  %v502_v39 = vrot.slane %v499_v37, 1  ;;  %vm674_vm6 = vcmask 654336  }
  0xde   : > { %1181 = vmatpush1.bf16.msra.mxu1 %v1180_v33  ;;  %496 = vst.msk [vmem:[#allocation2 + $0x102] ss:$8 sm:$0xf] %vm1363_vm0, %v493_v35  ;;  %497 = vst.msk [vmem:[#allocation2 + $0x102] ss:$8 sm:$0xf0] %vm1363_vm0, %v493_v35 }
  0xdf   : > { %v504_v40 = vsel %vm373_vm1, %v502_v39, %v503_v38 }
  0xe0   : > { %v506_v41 = vsel %vm505_vm7, %v499_v37, %v504_v40  ;;  %v514_v42 = vpop.permute.xlu1 %513  ;;  %v512_v43 = vpop.permute.xlu0 %511  ;;  %vm687_vm7 = vcmask 646144  }
  0xe1   : > { %509 = vst.msk [vmem:[#allocation2 + $0x103] ss:$8 sm:$0xf] %vm1363_vm0, %v506_v41  ;;  %510 = vst.msk [vmem:[#allocation2 + $0x103] ss:$8 sm:$0xf0] %vm1363_vm0, %v506_v41 }
  0xe2   : > { %v516_v44 = vrot.slane %v514_v42, 1  ;;  %v515_v45 = vrot.slane %v512_v43, 1 }
  0xe4   : > { %v517_v46 = vsel %vm373_vm1, %v515_v45, %v516_v44  ;;  %v527_v48 = vpop.permute.xlu1 %526  ;;  %v525_v49 = vpop.permute.xlu0 %524 }
  0xe5   : > { %v519_v47 = vsel %vm518_vm8, %v512_v43, %v517_v46  ;;  %v529_v50 = vrot.slane %v527_v48, 1  ;;  %v528_v51 = vrot.slane %v525_v49, 1  ;;  %vm700_vm8 = vcmask 637952  }
  0xe6   : > { %522 = vst.msk [vmem:[#allocation2 + $0x104] ss:$8 sm:$0xf] %vm1363_vm0, %v519_v47  ;;  %523 = vst.msk [vmem:[#allocation2 + $0x104] ss:$8 sm:$0xf0] %vm1363_vm0, %v519_v47 }
  0xe7   : > { %v530_v52 = vsel %vm373_vm1, %v528_v51, %v529_v50 }
  0xe8   : > { %v532_v53 = vsel %vm531_vm9, %v525_v49, %v530_v52  ;;  %v540_v54 = vpop.permute.xlu1 %539  ;;  %v538_v56 = vpop.permute.xlu0 %537  ;;  %vm767_vm9 = vcmask 1042432  }
  0xe9   : > { %535 = vst.msk [vmem:[#allocation2 + $0x105] ss:$8 sm:$0xf] %vm1363_vm0, %v532_v53  ;;  %536 = vst.msk [vmem:[#allocation2 + $0x105] ss:$8 sm:$0xf0] %vm1363_vm0, %v532_v53 }
  0xea   : > { %v542_v57 = vrot.slane %v540_v54, 1  ;;  %v541_v58 = vrot.slane %v538_v56, 1 }
  0xec   : > { %v543_v59 = vsel %vm373_vm1, %v541_v58, %v542_v57  ;;  %v553_v61 = vpop.permute.xlu1 %552  ;;  %v551_v62 = vpop.permute.xlu0 %550 }
  0xed   : > { %v545_v60 = vsel %vm544_vm10, %v538_v56, %v543_v59  ;;  %v555_v63 = vrot.slane %v553_v61, 1  ;;  %v554_v0 = vrot.slane %v551_v62, 1 }
  0xee   : > { %548 = vst.msk [vmem:[#allocation2 + $0x106] ss:$8 sm:$0xf] %vm1363_vm0, %v545_v60  ;;  %549 = vst.msk [vmem:[#allocation2 + $0x106] ss:$8 sm:$0xf0] %vm1363_vm0, %v545_v60 }
  0xef   : > { %v556_v1 = vsel %vm373_vm1, %v554_v0, %v555_v63 }
  0xf0   : > { %v558_v3 = vsel %vm557_vm11, %v551_v62, %v556_v1  ;;  %v566_v4 = vpop.permute.xlu1 %565  ;;  %v564_v5 = vpop.permute.xlu0 %563 }
  0xf1   : > { %561 = vst.msk [vmem:[#allocation2 + $0x107] ss:$8 sm:$0xf] %vm1363_vm0, %v558_v3  ;;  %562 = vst.msk [vmem:[#allocation2 + $0x107] ss:$8 sm:$0xf0] %vm1363_vm0, %v558_v3 }
  0xf2   : > { %v568_v6 = vrot.slane %v566_v4, 1  ;;  %v567_v7 = vrot.slane %v564_v5, 1 }
  0xf4   : > { %v569_v8 = vsel %vm373_vm1, %v567_v7, %v568_v6  ;;  %v579_v10 = vpop.permute.xlu1 %578  ;;  %v577_v11 = vpop.permute.xlu0 %576 }
  0xf5   : > { %v571_v9 = vsel %vm570_vm12, %v564_v5, %v569_v8  ;;  %v581_v12 = vrot.slane %v579_v10, 1  ;;  %v580_v13 = vrot.slane %v577_v11, 1 }
  0xf6   : > { %574 = vst.msk [vmem:[#allocation2 + $0x140] ss:$8 sm:$0xf] %vm1363_vm0, %v571_v9  ;;  %575 = vst.msk [vmem:[#allocation2 + $0x140] ss:$8 sm:$0xf0] %vm1363_vm0, %v571_v9 }
  0xf7   : > { %v582_v14 = vsel %vm373_vm1, %v580_v13, %v581_v12 }
  0xf8   : > { %v584_v15 = vsel %vm583_vm13, %v577_v11, %v582_v14  ;;  %v592_v16 = vpop.permute.xlu1 %591  ;;  %v590_v17 = vpop.permute.xlu0 %589  ;;  %v740_v0 = vld [vmem:[#allocation2 + $0x108] sm:$0xff]  ;;  %v742_v1 = vld [vmem:[#allocation2 + $0x118] sm:$0xff]  ;;  %v739_v13 = vld [vmem:[#allocation2 + $0x100] sm:$0xff] }
  0xf9   : > { %587 = vst.msk [vmem:[#allocation2 + $0x141] ss:$8 sm:$0xf] %vm1363_vm0, %v584_v15  ;;  %588 = vst.msk [vmem:[#allocation2 + $0x141] ss:$8 sm:$0xf0] %vm1363_vm0, %v584_v15 }
  0xfa   : > { %v594_v18 = vrot.slane %v592_v16, 1  ;;  %v593_v19 = vrot.slane %v590_v17, 1  ;;  %v741_v14 = vld [vmem:[#allocation2 + $0x110] sm:$0xff] }
  0xfc   : > { %v595_v20 = vsel %vm373_vm1, %v593_v19, %v594_v18  ;;  %v605_v22 = vpop.permute.xlu1 %604  ;;  %v603_v23 = vpop.permute.xlu0 %602 }
  0xfd   : > { %v597_v21 = vsel %vm596_vm14, %v590_v17, %v595_v20  ;;  %v607_v24 = vrot.slane %v605_v22, 1  ;;  %v606_v25 = vrot.slane %v603_v23, 1  ;;  %v1685_v20 = vld [vmem:[%s1713_s1] sm:$0x7f]  ;;  %v722_v22 = vld [vmem:[#allocation2 + $0x78] sm:$0xff] }
  0xfe   : > { %600 = vst.msk [vmem:[#allocation2 + $0x142] ss:$8 sm:$0xf] %vm1363_vm0, %v597_v21  ;;  %601 = vst.msk [vmem:[#allocation2 + $0x142] ss:$8 sm:$0xf0] %vm1363_vm0, %v597_v21 }
  0xff   : > { %v608_v26 = vsel %vm373_vm1, %v606_v25, %v607_v24  ;;  %v720_v21 = vld [vmem:[#allocation2 + $0x68] sm:$0xff]  ;;  %v714_v25 = vld [vmem:[#allocation2 + $0x38] sm:$0xff] }
 0x100   : > { %v610_v27 = vsel %vm609_vm15, %v603_v23, %v608_v26  ;;  %v618_v28 = vpop.permute.xlu1 %617  ;;  %v616_v29 = vpop.permute.xlu0 %615  ;;  %v719_v23 = vld [vmem:[#allocation2 + $0x60] sm:$0xff]  ;;  %v712_v24 = vld [vmem:[#allocation2 + $0x28] sm:$0xff]  ;;  %v721_v26 = vld [vmem:[#allocation2 + $0x70] sm:$0xff] }
 0x101   : > { %613 = vst.msk [vmem:[#allocation2 + $0x143] ss:$8 sm:$0xf] %vm1363_vm0, %v610_v27  ;;  %614 = vst.msk [vmem:[#allocation2 + $0x143] ss:$8 sm:$0xf0] %vm1363_vm0, %v610_v27 }
 0x102   : > { %v620_v30 = vrot.slane %v618_v28, 1  ;;  %v619_v31 = vrot.slane %v616_v29, 1  ;;  %v728_v27 = vld [vmem:[#allocation2 + $0xa8] sm:$0xff] }
 0x103   : > { %v736_v28 = vld [vmem:[#allocation2 + $0xe8] sm:$0xff] }
 0x104   : > { %v621_v32 = vsel %vm373_vm1, %v619_v31, %v620_v30  ;;  %v631_v34 = vpop.permute.xlu1 %630  ;;  %v629_v35 = vpop.permute.xlu0 %628 }
 0x105   : > { %v623_v33 = vsel %vm622_vm2, %v616_v29, %v621_v32  ;;  %v633_v36 = vrot.slane %v631_v34, 1  ;;  %v632_v37 = vrot.slane %v629_v35, 1  ;;  %v730_v32 = vld [vmem:[#allocation2 + $0xb8] sm:$0xff]  ;;  %v1186_v34 = vpack.c.bf16 %v720_v21, %v712_v24 }
 0x106   : > { %626 = vst.msk [vmem:[#allocation2 + $0x144] ss:$8 sm:$0xf] %vm1363_vm0, %v623_v33  ;;  %627 = vst.msk [vmem:[#allocation2 + $0x144] ss:$8 sm:$0xf0] %vm1363_vm0, %v623_v33 }
 0x107   : > { %v634_v38 = vsel %vm373_vm1, %v632_v37, %v633_v36  ;;  %v738_v33 = vld [vmem:[#allocation2 + $0xf8] sm:$0xff]  ;;  %v711_v36 = vld [vmem:[#allocation2 + $0x20] sm:$0xff]  ;;  %v713_v37 = vld [vmem:[#allocation2 + $0x30] sm:$0xff] }
 0x108   : > { %v636_v39 = vsel %vm635_vm3, %v629_v35, %v634_v38  ;;  %v644_v40 = vpop.permute.xlu1 %643  ;;  %v642_v41 = vpop.permute.xlu0 %641  ;;  %v1198_v35 = vpack.c.bf16 %v722_v22, %v714_v25  ;;  %v1188_v38 = vpack.c.bf16 %v719_v23, %v711_v36 }
 0x109   : > { %639 = vst.msk [vmem:[#allocation2 + $0x145] ss:$8 sm:$0xf] %vm1363_vm0, %v636_v39  ;;  %640 = vst.msk [vmem:[#allocation2 + $0x145] ss:$8 sm:$0xf0] %vm1363_vm0, %v636_v39  ;;  %v1200_v39 = vpack.c.bf16 %v721_v26, %v713_v37 }
 0x10a   : > { %v646_v42 = vrot.slane %v644_v40, 1  ;;  %v645_v43 = vrot.slane %v642_v41, 1  ;;  %v727_v40 = vld [vmem:[#allocation2 + $0xa0] sm:$0xff] }
 0x10c   : > { %v647_v44 = vsel %vm373_vm1, %v645_v43, %v646_v42  ;;  %v657_v46 = vpop.permute.xlu1 %656  ;;  %v655_v47 = vpop.permute.xlu0 %654  ;;  %v1202_v42 = vpack.c.bf16 %v738_v33, %v730_v32  ;;  %v735_v43 = vld [vmem:[#allocation2 + $0xe0] sm:$0xff] }
 0x10d   : > { %v649_v45 = vsel %vm648_vm4, %v642_v41, %v647_v44  ;;  %v659_v48 = vrot.slane %v657_v46, 1  ;;  %v658_v49 = vrot.slane %v655_v47, 1  ;;  %v1190_v41 = vpack.c.bf16 %v736_v28, %v728_v27  ;;  %v729_v44 = vld [vmem:[#allocation2 + $0xb0] sm:$0xff] }
 0x10e   : > { %652 = vst.msk [vmem:[#allocation2 + $0x146] ss:$8 sm:$0xf] %vm1363_vm0, %v649_v45  ;;  %653 = vst.msk [vmem:[#allocation2 + $0x146] ss:$8 sm:$0xf0] %vm1363_vm0, %v649_v45 }
 0x10f   : > { %v660_v50 = vsel %vm373_vm1, %v658_v49, %v659_v48  ;;  %v737_v45 = vld [vmem:[#allocation2 + $0xf0] sm:$0xff]  ;;  %v1192_v48 = vpack.c.bf16 %v735_v43, %v727_v40 }
 0x110   : > { %v662_v51 = vsel %vm661_vm5, %v655_v47, %v660_v50  ;;  %v670_v52 = vpop.permute.xlu1 %669  ;;  %v668_v53 = vpop.permute.xlu0 %667  ;;  %v1204_v49 = vpack.c.bf16 %v737_v45, %v729_v44  ;;  %v744_v50 = vld [vmem:[#allocation2 + $0x128] sm:$0xff] }
 0x111   : > { %665 = vst.msk [vmem:[#allocation2 + $0x147] ss:$8 sm:$0xf] %vm1363_vm0, %v662_v51  ;;  %666 = vst.msk [vmem:[#allocation2 + $0x147] ss:$8 sm:$0xf0] %vm1363_vm0, %v662_v51 }
 0x112   : > { %v672_v54 = vrot.slane %v670_v52, 1  ;;  %v671_v56 = vrot.slane %v668_v53, 1  ;;  %v746_v51 = vld [vmem:[#allocation2 + $0x138] sm:$0xff] }
 0x114   : > { %v673_v57 = vsel %vm373_vm1, %v671_v56, %v672_v54  ;;  %v683_v59 = vpop.permute.xlu1 %682  ;;  %v681_v60 = vpop.permute.xlu0 %680 }
 0x115   : > { %v675_v58 = vsel %vm674_vm6, %v668_v53, %v673_v57  ;;  %v685_v61 = vrot.slane %v683_v59, 1  ;;  %v684_v62 = vrot.slane %v681_v60, 1  ;;  %v743_v57 = vld [vmem:[#allocation2 + $0x120] sm:$0xff] }
 0x116   : > { %678 = vst.msk [vmem:[#allocation2 + $0x180] ss:$8 sm:$0xf] %vm1363_vm0, %v675_v58  ;;  %679 = vst.msk [vmem:[#allocation2 + $0x180] ss:$8 sm:$0xf0] %vm1363_vm0, %v675_v58 }
 0x117   : > { %v686_v63 = vsel %vm373_vm1, %v684_v62, %v685_v61  ;;  %v745_v58 = vld [vmem:[#allocation2 + $0x130] sm:$0xff] }
 0x118   : > { %v688_v3 = vsel %vm687_vm7, %v681_v60, %v686_v63  ;;  %v696_v4 = vpop.permute.xlu1 %695  ;;  %v694_v5 = vpop.permute.xlu0 %693  ;;  %v748_v6 = vld [vmem:[#allocation2 + $0x148] sm:$0xff]  ;;  %v750_v7 = vld [vmem:[#allocation2 + $0x158] sm:$0xff]  ;;  %v747_v8 = vld [vmem:[#allocation2 + $0x140] sm:$0xff] }
 0x119   : > { %691 = vst.msk [vmem:[#allocation2 + $0x181] ss:$8 sm:$0xf] %vm1363_vm0, %v688_v3  ;;  %692 = vst.msk [vmem:[#allocation2 + $0x181] ss:$8 sm:$0xf0] %vm1363_vm0, %v688_v3  ;;  %v1170_v11 = vpack.c.bf16 %v748_v6, %v740_v0  ;;  %v1182_v12 = vpack.c.bf16 %v750_v7, %v742_v1  ;;  %v1172_v16 = vpack.c.bf16 %v747_v8, %v739_v13 }
 0x11a   : > { %v698_v9 = vrot.slane %v696_v4, 1  ;;  %v697_v10 = vrot.slane %v694_v5, 1  ;;  %v749_v15 = vld [vmem:[#allocation2 + $0x150] sm:$0xff]  ;;  %v752_v46 = vld [vmem:[#allocation2 + $0x168] sm:$0xff]  ;;  %v754_v47 = vld [vmem:[#allocation2 + $0x178] sm:$0xff] }
 0x11b   : > { %v1184_v17 = vpack.c.bf16 %v749_v15, %v741_v14  ;;  %1171 = vmatprep.subr.bf16.mxu0 %v1170_v11  ;;  %1183 = vmatprep.subr.bf16.mxu1 %v1182_v12  ;;  %v1194_v52 = vpack.c.bf16 %v752_v46, %v744_v50  ;;  %v1206_v53 = vpack.c.bf16 %v754_v47, %v746_v51  ;;  %v751_v54 = vld [vmem:[#allocation2 + $0x160] sm:$0xff]  ;;  %v753_v56 = vld [vmem:[#allocation2 + $0x170] sm:$0xff] }
 0x11c   : > { %v699_v18 = vsel %vm373_vm1, %v697_v10, %v698_v9  ;;  %1173 = vmatpush1.bf16.msra.mxu0 %v1172_v16  ;;  %vm763_vm1 = vcmask 416768   ;;  %v1196_v59 = vpack.c.bf16 %v751_v54, %v743_v57  ;;  %v1208_v60 = vpack.c.bf16 %v753_v56, %v745_v58 }
 0x11d   : > { %v701_v19 = vsel %vm700_vm8, %v694_v5, %v699_v18  ;;  %1185 = vmatpush1.bf16.msra.mxu1 %v1184_v17 }
 0x11e   : > { %704 = vst.msk [vmem:[#allocation2 + $0x182] ss:$8 sm:$0xf] %vm1363_vm0, %v701_v19  ;;  %705 = vst.msk [vmem:[#allocation2 + $0x182] ss:$8 sm:$0xf0] %vm1363_vm0, %v701_v19 }
 0x11f   : > { %vm1083_vm0 = vcmask 849920  }
 0x125   : > { %v756_v29 = vld [vmem:[#allocation2 + $0x188] sm:$0x7]  ;;  %v758_v30 = vld [vmem:[#allocation2 + $0x198] sm:$0x7]  ;;  %v755_v31 = vld [vmem:[#allocation2 + $0x180] sm:$0x7] }
 0x126   : > { %1147 = vmatprep.subr.msk.mxu0 %vm767_vm9, %v756_v29  ;;  %1150 = vmatprep.subr.msk.mxu1 %vm767_vm9, %v758_v30  ;;  %v757_v2 = vld [vmem:[#allocation2 + $0x190] sm:$0x7]  ;;  %v760_v61 = vld [vmem:[#allocation2 + $0x1a8] sm:$0x7]  ;;  %v762_v62 = vld [vmem:[#allocation2 + $0x1b8] sm:$0x7] }
 0x127   : > { %1148 = vmatpush1.msk.msra.mxu0 %vm767_vm9, %v755_v31  ;;  %1151 = vmatpush1.msk.msra.mxu1 %vm767_vm9, %v757_v2  ;;  %v761_v63 = vld [vmem:[#allocation2 + $0x1b0] sm:$0x7] }
 0x128   : > { %1149 = vmatmul.mubr.msk.f32.vlgmr.msra.gmra.mrb[0].mxu0 %vm763_vm1, %v1685_v20  ;;  %1152 = vmatmul.mubr.msk.f32.vlgmr.msra.gmra.mrb[0].mxu1 %vm763_vm1, %v1685_v20 }
 0x129   : > { %1187 = vmatprep.subr.bf16.mxu0 %v1186_v34  ;;  %1199 = vmatprep.subr.bf16.mxu1 %v1198_v35 }
 0x12a   : > { %1189 = vmatpush1.bf16.msra.mxu0 %v1188_v38  ;;  %1201 = vmatpush1.bf16.msra.mxu1 %v1200_v39 }
 0x12b   : > { %1191 = vmatprep.subr.bf16.mxu0 %v1190_v41  ;;  %1203 = vmatprep.subr.bf16.mxu1 %v1202_v42 }
 0x12c   : > { %998 = vmatprep.mubr.f32.mxu0 %v1328_v55  ;;  %1069 = vmatprep.mubr.f32.mxu1 %v1328_v55  ;;  %v759_v55 = vld [vmem:[#allocation2 + $0x1a0] sm:$0x7] }
 0x12e   : > { %1193 = vmatpush1.bf16.msra.mxu0 %v1192_v48  ;;  %1205 = vmatpush1.bf16.msra.mxu1 %v1204_v49 }
 0x12f   : > { %1195 = vmatprep.subr.bf16.mxu0 %v1194_v52  ;;  %1207 = vmatprep.subr.bf16.mxu1 %v1206_v53 }
 0x132   : > { %1197 = vmatpush1.bf16.msra.mxu0 %v1196_v59  ;;  %1209 = vmatpush1.bf16.msra.mxu1 %v1208_v60 }
 0x133   : > { %1153 = vmatprep.subr.msk.mxu0 %vm767_vm9, %v760_v61  ;;  %1156 = vmatprep.subr.msk.mxu1 %vm767_vm9, %v762_v62 }
 0x136   : > { %1154 = vmatpush1.msk.msra.mxu0 %vm767_vm9, %v759_v55  ;;  %1157 = vmatpush1.msk.msra.mxu1 %vm767_vm9, %v761_v63 }
 0x137   : > { %1155 = vmatmul.mubr.msk.f32.vlgmr.msra.gmra.mrb[2].mxu0 %vm763_vm1, %v1685_v20  ;;  %1158 = vmatmul.mubr.msk.f32.vlgmr.msra.gmra.mrb[2].mxu1 %vm763_vm1, %v1685_v20 }
 0x1fb   : > { %v858_v0 = vpop.f32.mrb[0].mxu0  ;;  %v929_v1 = vpop.f32.mrb[0].mxu1 }
 0x1fc   : > { %1076 = vst [vmem:[%s140_s18] sm:$0x7f] %v858_v0  ;;  %1078 = vst [vmem:[%s140_s18 + $0x10] sm:$0x7f] %v929_v1  ;;  %v860_v3 = vpop.f32.mrb[1].mxu0  ;;  %v931_v4 = vpop.f32.mrb[1].mxu1 }
 0x1fd   : > { %1077 = vst [vmem:[%s140_s18 + $0x8] sm:$0x7f] %v860_v3  ;;  %1079 = vst [vmem:[%s140_s18 + $0x18] sm:$0x7f] %v931_v4 }
 0x20a   : > { %v1000_v5 = vpop.f32.mrb[2].mxu0  ;;  %v1071_v6 = vpop.f32.mrb[2].mxu1 }
 0x20b   : > { %1080 = vst [vmem:[%s140_s18 + $0x20] sm:$0x7f] %v1000_v5  ;;  %1082 = vst [vmem:[%s140_s18 + $0x30] sm:$0x7f] %v1071_v6  ;;  %v1002_v7 = vpop.f32.mrb[3].mxu0  ;;  %v1073_v8 = vpop.f32.mrb[3].mxu1 }
 0x20c   : > { %1081 = vst [vmem:[%s140_s18 + $0x28] sm:$0x7f] %v1002_v7  ;;  %1084 = vst.msk [vmem:[%s140_s18 + $0x38] sm:$0x7f] %vm1083_vm0, %v1073_v8 }
 0x20d PF: > { %s12_s9 = sadd.s32 1, %s1276_s9  }
 0x20e   : > { %p9_p4 = scmp.ge.s32.totalorder %s12_s9, 4  }
 0x210   :  { %11 = sbr.rel (!%p9_p4) target bundleno = 1 (0x1), region = 108 }

// kernel: squeeze.3
= control target key start
LH: loop header
LB: loop body
LE: loop exit
PB: predicated region body
PF: predicated region fallthrough
CT: control target
= control target key end

     0   :  { %vm7_vm0 = vcmask 15360   ;;  %s39_s0 = inlined_call_operand.vmem [shape: f32[4], index: 0, kind: input, shape index: {}]   ;;  %s40_s1 = inlined_call_operand.vmem [shape: f32[2,2], index: 1, kind: output, shape index: {}]  }
   0x1   :  { %v4_v0 = vld [vmem:[%s39_s0] sm:$0x1]  ;;  %s22_s0 = smov 126  }
   0x2   :  { %5 = vst [vmem:[#allocation1] sm:$0x1] %v4_v0 }
   0x9   :  { %v9_v1 = vld [vmem:[#allocation1] sm:$0x1]  }
   0xa   :  { %v6_v2 = vld [vmem:[#allocation1] sm:$0x1]   ;;  %10 = vrot.lane.b32.xlu0 %v9_v1, %s22_s0 }
   0xb   :  { %8 = vst.msk [vmem:[#allocation0] sm:$0x1] %vm7_vm0, %v6_v2  }
  0x7c   :  { %v11_v3 = vpop.permute.xlu0 %10  }
  0x7d   :  { %14 = vst.msk [vmem:[#allocation0 + $0x1] sm:$0x1] %vm7_vm0, %v11_v3  }
  0x84   :  { %v18_v4 = vld [vmem:[#allocation0] sm:$0x3] }
  0x85   :  { %20 = vst [vmem:[%s40_s1] sm:$0x3] %v18_v4 }

// kernel: _init_active.9
= control target key start
LH: loop header
LB: loop body
LE: loop exit
PB: predicated region body
PF: predicated region fallthrough
CT: control target
= control target key end

     0   :  { %s1476_s11 = smov 126   ;;  %s1477_s12 = smov 127   ;;  %vm22_vm0 = vcmask 850944   ;;  %vm80_vm1 = vcmask 1014784   ;;  %vm122_vm2 = vcmask 1047632   ;;  %vm106_vm3 = vcmask 80896   ;;  %s2943_s1 = inlined_call_operand.vmem [shape: f32[1,21], index: 1, kind: input, shape index: {}]   ;;  %s2944_s0 = inlined_call_operand.vmem [shape: f32[8,1000], index: 0, kind: input, shape index: {}]   ;;  %s2945_s2 = inlined_call_operand.vmem [shape: f32[8,1], index: 2, kind: output, shape index: {}]  }
   0x1   :  { %v140_v0 = vld [vmem:[%s2943_s1] sm:$0x1]  ;;  %s1478_s13 = smov 124   ;;  %s1479_s14 = smov 125   ;;  %v1526_v1 = vld [vmem:[%s2944_s0 + $0x38] sm:$0xff]  ;;  %v12_v3 = vld [vmem:[%s2944_s0 + $0x8] sm:$0xff] }
   0x2   :  { %221 = vrot.lane.b32.xlu0 %v140_v0, %s1476_s11  ;;  %160 = vrot.lane.b32.xlu1 %v140_v0, %s1477_s12  ;;  %1394 = vpush %v140_v0  ;;  %s1480_s15 = smov 123   ;;  %s1481_s16 = smov 121   ;;  %v11_v2 = vld [vmem:[%s2944_s0] sm:$0xff]  ;;  %v13_v4 = vld [vmem:[%s2944_s0 + $0x10] sm:$0xff]  ;;  %v23_v9 = vsel %vm22_vm0, %v1526_v1, -inf  ;;  %vm130_vm4 = vcmask 932864  }
   0x3   :  { %s1482_s1 = smov 119   ;;  %v1540_v5 = vld [vmem:[%s2944_s0 + $0x18] sm:$0xff]  ;;  %v1545_v6 = vld [vmem:[%s2944_s0 + $0x20] sm:$0xff]  ;;  %v1550_v7 = vld [vmem:[%s2944_s0 + $0x28] sm:$0xff]  ;;  %s1483_s5 = smov 117   ;;  %vm197_vm5 = vcmask 1039360  }
   0x4   :  { %v1555_v8 = vld [vmem:[%s2944_s0 + $0x30] sm:$0xff]  ;;  %v19_v10 = vmax.f32 %v11_v2, %v1545_v6  ;;  %v20_v11 = vmax.f32 %v12_v3, %v1550_v7  ;;  %v24_v13 = vmax.f32 %v1540_v5, %v23_v9  ;;  %s1484_s6 = smov 115   ;;  %s1485_s0 = smov 113   ;;  %vm258_vm6 = vcmask 1031168  }
   0x5   :  { %v21_v12 = vmax.f32 %v13_v4, %v1555_v8  ;;  %s1486_s7 = smov 111   ;;  %s1487_s8 = smov 109   ;;  %vm319_vm7 = vcmask 1022976   ;;  %vm501_vm8 = vcmask 998400   ;;  %vm562_vm9 = vcmask 990208  }
   0x6   :  { %343 = vrot.lane.b32.xlu0 %v140_v0, %s1478_s13  ;;  %282 = vrot.lane.b32.xlu1 %v140_v0, %s1479_s14  ;;  %v25_v14 = vmax.f32 %v19_v10, %v20_v11  ;;  %s1488_s9 = smov 122   ;;  %s1489_s10 = smov 120   ;;  %vm440_vm10 = vcmask 1006592   ;;  %vm623_vm11 = vcmask 982016   ;;  %vm684_vm12 = vcmask 973824  }
   0x7   :  { %v26_v15 = vmax.f32 %v21_v12, %v24_v13  ;;  %s1490_s17 = smov 118   ;;  %s1491_s18 = smov 116   ;;  %vm745_vm13 = vcmask 965632   ;;  %vm806_vm14 = vcmask 957440   ;;  %vm867_vm15 = vcmask 949248  }
   0x8   :  { %s1492_s19 = smov 114   ;;  %s1493_s20 = smov 112  }
   0x9   :  { %v27_v16 = vmax.f32 %v25_v14, %v26_v15  ;;  %s1494_s21 = smov 110   ;;  %s1495_s22 = smov 108  }
   0xa   :  { %403 = vrot.lane.b32.xlu1 %v140_v0, %s1480_s15  ;;  %s1497_s23 = smov 10  }
   0xe   :  { %525 = vrot.lane.b32.xlu1 %v140_v0, %s1481_s16 }
  0x12   :  { %647 = vrot.lane.b32.xlu1 %v140_v0, %s1482_s1 }
  0x16   :  { %769 = vrot.lane.b32.xlu1 %v140_v0, %s1483_s5 }
  0x1a   :  { %891 = vrot.lane.b32.xlu1 %v140_v0, %s1484_s6 }
  0x1e   :  { %1012 = vrot.lane.b32.xlu1 %v140_v0, %s1485_s0 }
  0x22   :  { %1134 = vrot.lane.b32.xlu1 %v140_v0, %s1486_s7 }
  0x25   :  { %28 = vmax.xlane.f32.xlu0 %v27_v16 }
  0x26   :  { %1256 = vrot.lane.b32.xlu1 %v140_v0, %s1487_s8 }
  0x33   :  { %s1583_s24 = spop %1394 }
  0x3b   :  { %464 = vrot.lane.b32.xlu0 %v140_v0, %s1488_s9 }
  0x3f   :  { %586 = vrot.lane.b32.xlu0 %v140_v0, %s1489_s10 }
  0x43   :  { %708 = vrot.lane.b32.xlu0 %v140_v0, %s1490_s17 }
  0x47   :  { %830 = vrot.lane.b32.xlu0 %v140_v0, %s1491_s18 }
  0x4b   :  { %952 = vrot.lane.b32.xlu0 %v140_v0, %s1492_s19 }
  0x4f   :  { %1073 = vrot.lane.b32.xlu0 %v140_v0, %s1493_s20 }
  0x53   :  { %1195 = vrot.lane.b32.xlu0 %v140_v0, %s1494_s21 }
  0x57   :  { %1317 = vrot.lane.b32.xlu0 %v140_v0, %s1495_s22 }
  0x74   :  { %v222_v17 = vpop.permute.xlu0 %221  ;;  %v161_v18 = vpop.permute.xlu1 %160 }
  0x75   :  { %1396 = vpush %v161_v18 }
  0x76   :  { %1398 = vpush %v222_v17 }
  0x78   :  { %v344_v19 = vpop.permute.xlu0 %343  ;;  %v283_v20 = vpop.permute.xlu1 %282 }
  0x79   :  { %1400 = vpush %v283_v20 }
  0x7a   :  { %1402 = vpush %v344_v19 }
  0x7c   :  { %v404_v21 = vpop.permute.xlu1 %403 }
  0x7d   :  { %1404 = vpush %v404_v21 }
  0x80   :  { %v526_v22 = vpop.permute.xlu1 %525 }
  0x84   :  { %v648_v23 = vpop.permute.xlu1 %647 }
  0x88   :  { %v770_v31 = vpop.permute.xlu1 %769 }
  0x8c   :  { %v892_v41 = vpop.permute.xlu1 %891 }
  0x90   :  { %v1013_v47 = vpop.permute.xlu1 %1012 }
  0x94   :  { %v1135_v56 = vpop.permute.xlu1 %1134 }
  0xa6   :  { %s1397_s25 = spop %1396 }
  0xa7   :  { %s1399_s26 = spop %1398  ;;  %v1587_v18 = vstv %s1397_s25 }
  0xaa   :  { %s1401_s27 = spop %1400 }
  0xab   :  { %s1403_s28 = spop %1402  ;;  %v1589_v21 = vstv %s1401_s27 }
  0xae   :  { %s1585_s29 = spop %1404 }
  0xb2   :  { %v29_v24 = vpop.xlane.xlu0 %28 }
  0xb3   :  { %v30_v25 = vsub.f32 %v11_v2, %v29_v24  ;;  %v31_v26 = vsub.f32 %v12_v3, %v29_v24  ;;  %v32_v27 = vsub.f32 %v13_v4, %v29_v24  ;;  %v33_v28 = vsub.f32 %v1540_v5, %v29_v24 }
  0xb4   :  { %v34_v32 = vsub.f32 %v1545_v6, %v29_v24  ;;  %v35_v35 = vsub.f32 %v1550_v7, %v29_v24  ;;  %v37_v37 = vsub.f32 %v1526_v1, %v29_v24  ;;  %v36_v38 = vsub.f32 %v1555_v8, %v29_v24  ;;  %v1257_v1 = vpop.permute.xlu1 %1256 }
  0xb5   :  { %v38_v29 = vmul.f32 1.442695, %v30_v25  ;;  %v40_v30 = vmul.f32 1.442695, %v31_v26  ;;  %v42_v33 = vmul.f32 1.442695, %v32_v27  ;;  %v1599_v25 = vstv %s1399_s26 }
  0xb6   :  { %v465_v34 = vpop.permute.xlu0 %464  ;;  %v44_v36 = vmul.f32 1.442695, %v33_v28  ;;  %v46_v39 = vmul.f32 1.442695, %v34_v32  ;;  %v48_v42 = vmul.f32 1.442695, %v35_v35  ;;  %v1601_v26 = vstv %s1403_s28 }
  0xb7   :  { %1458 = vpow2.f32 %v38_v29  ;;  %1406 = vpush %v465_v34  ;;  %v52_v43 = vmul.f32 1.442695, %v37_v37  ;;  %v50_v44 = vmul.f32 1.442695, %v36_v38  ;;  %v1496_v7 = vmov 0.0  }
  0xb8   :  { %1460 = vpow2.f32 %v40_v30  ;;  %1408 = vpush %v526_v22  ;;  %73 = vst [vmem:[#allocation2] sm:$0xff] %v1496_v7 }
  0xb9   :  { %1462 = vpow2.f32 %v42_v33  ;;  %81 = vst.msk [vmem:[#allocation2 + $0x38] sm:$0xff] %vm80_vm1, %v1496_v7 }
  0xba   :  { %v587_v40 = vpop.permute.xlu0 %586  ;;  %1464 = vpow2.f32 %v44_v36 }
  0xbb   :  { %1410 = vpush %v587_v40  ;;  %1466 = vpow2.f32 %v46_v39 }
  0xbc   :  { %1412 = vpush %v648_v23  ;;  %1468 = vpow2.f32 %v48_v42 }
  0xbd   :  { %1470 = vpow2.f32 %v52_v43 }
  0xbe   :  { %v709_v45 = vpop.permute.xlu0 %708  ;;  %1472 = vpow2.f32 %v50_v44 }
  0xbf   :  { %1414 = vpush %v709_v45  ;;  %v1654_v45 = vstv %s1585_s29 }
  0xc0   :  { %1416 = vpush %v770_v31 }
  0xc1   :  { %v1459_v46 = vpop.eup %1458 }
  0xc2   :  { %v1461_v48 = vpop.eup %1460  ;;  %v831_v49 = vpop.permute.xlu0 %830 }
  0xc3   :  { %v54_v50 = vadd.f32 %v1461_v48, %v1459_v46  ;;  %1418 = vpush %v831_v49  ;;  %v1463_v51 = vpop.eup %1462 }
  0xc4   :  { %1420 = vpush %v892_v41  ;;  %v1465_v53 = vpop.eup %1464 }
  0xc5   :  { %v55_v52 = vadd.f32 %v1463_v51, %v54_v50  ;;  %v1467_v57 = vpop.eup %1466 }
  0xc6   :  { %v953_v54 = vpop.permute.xlu0 %952  ;;  %v1469_v59 = vpop.eup %1468 }
  0xc7   :  { %v56_v55 = vadd.f32 %v1465_v53, %v55_v52  ;;  %1422 = vpush %v953_v54  ;;  %v1471_v61 = vpop.eup %1470 }
  0xc8   :  { %1424 = vpush %v1013_v47  ;;  %v1473_v63 = vpop.eup %1472  ;;  %v60_v2 = vsel %vm22_vm0, %v1471_v61, 0.0 }
  0xc9   :  { %v57_v58 = vadd.f32 %v1467_v57, %v56_v55 }
  0xca   :  { %v1074_v60 = vpop.permute.xlu0 %1073 }
  0xcb   :  { %v58_v62 = vadd.f32 %v1469_v59, %v57_v58  ;;  %1426 = vpush %v1074_v60 }
  0xcc   :  { %1428 = vpush %v1135_v56 }
  0xcd   :  { %v59_v0 = vadd.f32 %v1473_v63, %v58_v62 }
  0xce   :  { %v1196_v3 = vpop.permute.xlu0 %1195 }
  0xcf   :  { %v61_v4 = vadd.f32 %v60_v2, %v59_v0  ;;  %1430 = vpush %v1196_v3 }
  0xd0   :  { %1432 = vpush %v1257_v1 }
  0xd1   :  { %62 = vadd.xlane.f32.xlu0 %v61_v4 }
  0xd2   :  { %v1318_v5 = vpop.permute.xlu0 %1317 }
  0xd3   :  { %1434 = vpush %v1318_v5 }
  0xe8   :  { %s1407_s30 = spop %1406 }
  0xe9   :  { %s1409_s3 = spop %1408  ;;  %v1603_v27 = vstv %s1407_s30 }
  0xea   :  { %v1591_v22 = vstv %s1409_s3 }
  0xec   :  { %s1411_s4 = spop %1410 }
  0xed   :  { %v1605_v28 = vstv %s1411_s4 }
 0x15e   :  { %v63_v6 = vpop.xlane.xlu0 %62 }
 0x15f   :  { %1474 = vrcp.f32 %v63_v6 }
 0x169   :  { %v1475_v8 = vpop.eup %1474 }
 0x16a   :  { %v67_v9 = vmul.f32 %v1475_v8, %v1463_v51  ;;  %v65_v10 = vmul.f32 %v1475_v8, %v1459_v46  ;;  %v66_v11 = vmul.f32 %v1475_v8, %v1461_v48  ;;  %v68_v12 = vmul.f32 %v1475_v8, %v1465_v53 }
 0x16b   :  { %v69_v13 = vmul.f32 %v1475_v8, %v1467_v57  ;;  %v70_v14 = vmul.f32 %v1475_v8, %v1469_v59  ;;  %v71_v15 = vmul.f32 %v1475_v8, %v1473_v63  ;;  %v72_v16 = vmul.f32 %v1475_v8, %v1471_v61 }
 0x16c   :  { %94 = vrot.lane.b32.xlu0 %v67_v9, %s1497_s23  ;;  %90 = vrot.lane.b32.xlu1 %v65_v10, %s1497_s23 }
 0x170   :  { %92 = vrot.lane.b32.xlu1 %v66_v11, %s1497_s23 }
 0x174   :  { %96 = vrot.lane.b32.xlu1 %v68_v12, %s1497_s23 }
 0x178   :  { %98 = vrot.lane.b32.xlu1 %v69_v13, %s1497_s23 }
 0x17c   :  { %100 = vrot.lane.b32.xlu1 %v70_v14, %s1497_s23 }
 0x180   :  { %102 = vrot.lane.b32.xlu1 %v71_v15, %s1497_s23 }
 0x184   :  { %104 = vrot.lane.b32.xlu1 %v72_v16, %s1497_s23  ;;  %s1413_s23 = spop %1412 }
 0x185   :  { %s1415_s25 = spop %1414  ;;  %v1656_v46 = vstv %s1413_s23 }
 0x186   :  { %s1417_s26 = spop %1416  ;;  %v1658_v47 = vstv %s1415_s25 }
 0x187   :  { %s1419_s27 = spop %1418  ;;  %v1660_v48 = vstv %s1417_s26 }
 0x188   :  { %v1662_v49 = vstv %s1419_s27  ;;  %s1421_s28 = spop %1420 }
 0x189   :  { %v1713_v1 = vstv %s1421_s28  ;;  %s1423_s29 = spop %1422 }
 0x18a   :  { %v1760_v14 = vstv %s1423_s29  ;;  %s1425_s30 = spop %1424 }
 0x18b   :  { %s1427_s3 = spop %1426 }
 0x18c   :  { %s1429_s4 = spop %1428 }
 0x18d   :  { %s1431_s23 = spop %1430 }
 0x18e   :  { %s1433_s25 = spop %1432 }
 0x18f   :  { %s1435_s26 = spop %1434 }
 0x1de   :  { %v91_v17 = vpop.permute.xlu1 %90  ;;  %v95_v19 = vpop.permute.xlu0 %94 }
 0x1df   :  { %123 = vst.msk [vmem:[#allocation2] sm:$0xff] %vm122_vm2, %v91_v17  ;;  %vm1049_vm2 = vcmask 924672  }
 0x1e2   :  { %v93_v20 = vpop.permute.xlu1 %92 }
 0x1e3   :  { %v1594_v23 = vsel %vm106_vm3, %v91_v17, %v93_v20  ;;  %v1597_v24 = vsel %vm106_vm3, %v93_v20, %v95_v19 }
 0x1e4   :  { %v1609_v29 = vmul.f32 %v1587_v18, %v1594_v23  ;;  %v1613_v30 = vmul.f32 %v1603_v27, %v1594_v23  ;;  %v1617_v31 = vmul.f32 %v1599_v25, %v1597_v24  ;;  %v1623_v34 = vmul.f32 %v1589_v21, %v1594_v23 }
 0x1e5   :  { %v1627_v35 = vmul.f32 %v1591_v22, %v1594_v23  ;;  %v1631_v36 = vmul.f32 %v1601_v26, %v1597_v24  ;;  %v1635_v37 = vmul.f32 %v1605_v28, %v1594_v23  ;;  %v167_v62 = vmul.f32 %v1587_v18, %v1597_v24 }
 0x1e6   :  { %v1619_v32 = vld [vmem:[#allocation2] sm:$0xff]  ;;  %v97_v33 = vpop.permute.xlu1 %96  ;;  %v1735_v7 = vmul.f32 %v1654_v45, %v1594_v23  ;;  %v1743_v9 = vmul.f32 %v1656_v46, %v1594_v23  ;;  %v1778_v20 = vmul.f32 %v1603_v27, %v1597_v24 }
 0x1e7   :  { %v1638_v38 = vsel %vm106_vm3, %v95_v19, %v97_v33  ;;  %v226_v39 = vmul.f32 %v1599_v25, %v1619_v32  ;;  %v165_v40 = vmul.f32 %v1587_v18, %v1619_v32  ;;  %v348_v43 = vmul.f32 %v1601_v26, %v1619_v32 }
 0x1e8   :  { %v287_v44 = vmul.f32 %v1589_v21, %v1619_v32  ;;  %v469_v50 = vmul.f32 %v1603_v27, %v1619_v32  ;;  %v408_v51 = vmul.f32 %v1654_v45, %v1619_v32  ;;  %v1672_v53 = vmul.f32 %v1587_v18, %v1638_v38  ;;  %2952 = vst [vmem:[#allocation6_spill] sm:$0xff] %v1778_v20 }
 0x1e9   :  { %242 = vrot.lane.b32.xlu1 %v226_v39, %s1476_s11  ;;  %181 = vrot.lane.b32.xlu0 %v165_v40, %s1477_s12  ;;  %v1680_v55 = vmul.f32 %v1603_v27, %v1638_v38  ;;  %v1691_v58 = vmul.f32 %v1589_v21, %v1638_v38  ;;  %v1695_v59 = vmul.f32 %v1591_v22, %v1638_v38  ;;  %v1942_v20 = vstv %s1429_s4 }
 0x1ea   :  { %v99_v41 = vpop.permute.xlu1 %98  ;;  %v530_v61 = vmul.f32 %v1591_v22, %v1619_v32  ;;  %v1727_v4 = vmul.f32 %v1605_v28, %v1638_v38  ;;  %v1739_v8 = vmul.f32 %v1654_v45, %v1638_v38  ;;  %v1754_v12 = vmul.f32 %v1656_v46, %v1638_v38 }
 0x1eb   :  { %v1647_v42 = vsel %vm106_vm3, %v97_v33, %v99_v41  ;;  %v591_v15 = vmul.f32 %v1605_v28, %v1619_v32  ;;  %v1786_v40 = vmul.f32 %v1658_v47, %v1594_v23 }
 0x1ec   :  { %v1676_v54 = vmul.f32 %v1654_v45, %v1647_v42  ;;  %v1684_v56 = vmul.f32 %v1599_v25, %v1647_v42  ;;  %v1699_v60 = vmul.f32 %v1601_v26, %v1647_v42  ;;  %2950 = vst [vmem:[#allocation4_spill] sm:$0xff] %v1754_v12  ;;  %v169_v16 = vmul.f32 %v1587_v18, %v1647_v42 }
 0x1ed   :  { %364 = vrot.lane.b32.xlu1 %v348_v43, %s1478_s13  ;;  %303 = vrot.lane.b32.xlu0 %v287_v44, %s1479_s14  ;;  %v1782_v33 = vmul.f32 %v1603_v27, %v1647_v42  ;;  %2954 = vst [vmem:[#allocation8_spill] sm:$0xff] %v1786_v40  ;;  %v1794_v43 = vmul.f32 %v1658_v47, %v1638_v38 }
 0x1ee   :  { %v101_v52 = vpop.permute.xlu1 %100  ;;  %v1798_v44 = vmul.f32 %v1591_v22, %v1597_v24 }
 0x1ef   :  { %v1687_v57 = vsel %vm106_vm3, %v99_v41, %v101_v52  ;;  %2953 = vst [vmem:[#allocation7_spill] sm:$0xff] %v1782_v33  ;;  %2956 = vst [vmem:[#allocation10_spill] sm:$0xff] %v1794_v43  ;;  %v1884_v43 = vstv %s1427_s3 }
 0x1f0   :  { %v1707_v63 = vmul.f32 %v1587_v18, %v1687_v57  ;;  %v1711_v0 = vmul.f32 %v1603_v27, %v1687_v57  ;;  %v1719_v2 = vmul.f32 %v1589_v21, %v1687_v57  ;;  %v1723_v3 = vmul.f32 %v1591_v22, %v1687_v57  ;;  %2957 = vst [vmem:[#allocation11_spill] sm:$0xff] %v1798_v44 }
 0x1f1   :  { %485 = vrot.lane.b32.xlu1 %v469_v50, %s1488_s9  ;;  %424 = vrot.lane.b32.xlu0 %v408_v51, %s1480_s15  ;;  %v1731_v6 = vmul.f32 %v1605_v28, %v1687_v57  ;;  %v1750_v11 = vmul.f32 %v1654_v45, %v1687_v57  ;;  %v1758_v13 = vmul.f32 %v1656_v46, %v1687_v57 }
 0x1f2   :  { %v103_v5 = vpop.permute.xlu1 %102  ;;  %v1803_v51 = vmul.f32 %v1658_v47, %v1687_v57  ;;  %v1882_v44 = vmul.f32 %v1658_v47, %v1597_v24  ;;  %v1912_v40 = vmul.f32 %v1713_v1, %v1687_v57  ;;  %v231_v33 = vmul.f32 %v1599_v25, %v1687_v57 }
 0x1f3   :  { %v1746_v10 = vsel %vm106_vm3, %v101_v52, %v103_v5  ;;  %2949 = vst [vmem:[#allocation3_spill] sm:$0xff] %v1750_v11  ;;  %2951 = vst [vmem:[#allocation5_spill] sm:$0xff] %v1758_v13  ;;  %v1807_v52 = vmul.f32 %v1591_v22, %v1647_v42 }
 0x1f4   :  { %v1768_v17 = vmul.f32 %v1599_v25, %v1746_v10  ;;  %v1774_v19 = vmul.f32 %v1601_v26, %v1746_v10  ;;  %v1790_v41 = vmul.f32 %v1603_v27, %v1746_v10  ;;  %2958 = vst [vmem:[#allocation12_spill] sm:$0xff] %v1803_v51  ;;  %v1878_v51 = vmul.f32 %v1589_v21, %v1597_v24 }
 0x1f5   :  { %546 = vrot.lane.b32.xlu1 %v530_v61, %s1481_s16  ;;  %185 = vrot.lane.b32.xlu0 %v167_v62, %s1477_s12  ;;  %2959 = vst [vmem:[#allocation13_spill] sm:$0xff] %v1807_v52  ;;  %v1811_v61 = vmul.f32 %v1591_v22, %v1746_v10  ;;  %v1816_v62 = vmul.f32 %v1660_v48, %v1594_v23  ;;  %2973 = vst [vmem:[#allocation27_spill] sm:$0xff] %v1882_v44 }
 0x1f6   :  { %v105_v39 = vpop.permute.xlu1 %104  ;;  %2955 = vst [vmem:[#allocation9_spill] sm:$0xff] %v1790_v41  ;;  %v1828_v52 = vmul.f32 %v1605_v28, %v1647_v42  ;;  %v1896_v41 = vmul.f32 %v1713_v1, %v1594_v23  ;;  %v1900_v44 = vmul.f32 %v1658_v47, %v1746_v10  ;;  %2979 = vst [vmem:[#allocation33_spill] sm:$0xff] %v1912_v40 }
 0x1f7   :  { %v113_v50 = vsel %vm106_vm3, %v103_v5, %v105_v39  ;;  %2960 = vst [vmem:[#allocation14_spill] sm:$0xff] %v1811_v61  ;;  %2961 = vst [vmem:[#allocation15_spill] sm:$0xff] %v1816_v62  ;;  %v1820_v5 = vmul.f32 %v1605_v28, %v1597_v24  ;;  %v1824_v39 = vmul.f32 %v1660_v48, %v1638_v38  ;;  %v1830_v61 = vstv %s1425_s30 }
 0x1f8   :  { %131 = vst.msk [vmem:[#allocation2 + $0x38] sm:$0xff] %vm130_vm4, %v113_v50  ;;  %2964 = vst [vmem:[#allocation18_spill] sm:$0xff] %v1828_v52  ;;  %v1836_v50 = vmul.f32 %v1660_v48, %v1687_v57  ;;  %v227_v52 = vmul.f32 %v1599_v25, %v1594_v23  ;;  %v1866_v62 = vmul.f32 %v1656_v46, %v1746_v10  ;;  %vm1110_vm3 = vcmask 916480  }
 0x1f9   :  { %2962 = vst [vmem:[#allocation16_spill] sm:$0xff] %v1820_v5  ;;  %2963 = vst [vmem:[#allocation17_spill] sm:$0xff] %v1824_v39  ;;  %607 = vrot.lane.b32.xlu1 %v591_v15, %s1489_s10  ;;  %189 = vrot.lane.b32.xlu0 %v169_v16, %s1477_s12  ;;  %v1840_v5 = vmul.f32 %v1605_v28, %v1746_v10  ;;  %v1844_v39 = vmul.f32 %v1656_v46, %v1597_v24 }
 0x1fa   :  { %2965 = vst [vmem:[#allocation19_spill] sm:$0xff] %v1836_v50  ;;  %v1850_v15 = vmul.f32 %v1662_v49, %v1594_v23  ;;  %v1854_v16 = vmul.f32 %v1656_v46, %v1647_v42  ;;  %v1858_v50 = vmul.f32 %v1662_v49, %v1638_v38  ;;  %2971 = vst [vmem:[#allocation25_spill] sm:$0xff] %v1866_v62 }
 0x1fb   :  { %2966 = vst [vmem:[#allocation20_spill] sm:$0xff] %v1840_v5  ;;  %2967 = vst [vmem:[#allocation21_spill] sm:$0xff] %v1844_v39  ;;  %v652_v5 = vmul.f32 %v1656_v46, %v1619_v32  ;;  %v171_v39 = vmul.f32 %v1587_v18, %v1746_v10  ;;  %v1892_v62 = vmul.f32 %v1658_v47, %v1647_v42 }
 0x1fc   :  { %2968 = vst [vmem:[#allocation22_spill] sm:$0xff] %v1850_v15  ;;  %2969 = vst [vmem:[#allocation23_spill] sm:$0xff] %v1854_v16  ;;  %v1870_v15 = vmul.f32 %v1662_v49, %v1687_v57  ;;  %v713_v16 = vmul.f32 %v1658_v47, %v1619_v32  ;;  %v835_v40 = vmul.f32 %v1662_v49, %v1619_v32 }
 0x1fd   :  { %2970 = vst [vmem:[#allocation24_spill] sm:$0xff] %v1858_v50  ;;  %v774_v50 = vmul.f32 %v1660_v48, %v1619_v32  ;;  %668 = vrot.lane.b32.xlu1 %v652_v5, %s1482_s1  ;;  %193 = vrot.lane.b32.xlu0 %v171_v39, %s1477_s12  ;;  %2974 = vst [vmem:[#allocation28_spill] sm:$0xff] %v1892_v62  ;;  %v1904_v5 = vmul.f32 %v1713_v1, %v1638_v38 }
 0x1fe   :  { %2972 = vst [vmem:[#allocation26_spill] sm:$0xff] %v1870_v15  ;;  %v229_v15 = vmul.f32 %v1599_v25, %v1638_v38  ;;  %2975 = vst [vmem:[#allocation29_spill] sm:$0xff] %v1896_v41  ;;  %v1908_v39 = vmul.f32 %v1660_v48, %v1597_v24  ;;  %v1918_v41 = vmul.f32 %v1660_v48, %v1647_v42 }
 0x1ff   :  { %2976 = vst [vmem:[#allocation30_spill] sm:$0xff] %v1900_v44  ;;  %2977 = vst [vmem:[#allocation31_spill] sm:$0xff] %v1904_v5  ;;  %v1914_v62 = vld [vmem:[#allocation2 + $0x38] sm:$0xff]  ;;  %v1922_v44 = vmul.f32 %v1660_v48, %v1746_v10  ;;  %v1926_v5 = vmul.f32 %v1760_v14, %v1594_v23 }
 0x200   :  { %2978 = vst [vmem:[#allocation32_spill] sm:$0xff] %v1908_v39  ;;  %2980 = vst [vmem:[#allocation34_spill] sm:$0xff] %v1918_v41  ;;  %v1930_v39 = vmul.f32 %v1662_v49, %v1597_v24  ;;  %v896_v41 = vmul.f32 %v1713_v1, %v1619_v32  ;;  %v1956_v13 = vmul.f32 %v1605_v28, %v1914_v62 }
 0x201   :  { %2981 = vst [vmem:[#allocation35_spill] sm:$0xff] %v1922_v44  ;;  %2982 = vst [vmem:[#allocation36_spill] sm:$0xff] %v1926_v5  ;;  %v1940_v44 = vmul.f32 %v1760_v14, %v1619_v32  ;;  %729 = vrot.lane.b32.xlu1 %v713_v16, %s1490_s17  ;;  %244 = vrot.lane.b32.xlu0 %v227_v52, %s1476_s11  ;;  %v1952_v5 = vmul.f32 %v1591_v22, %v1914_v62 }
 0x202   :  { %2983 = vst [vmem:[#allocation37_spill] sm:$0xff] %v1930_v39  ;;  %v1948_v39 = vmul.f32 %v1589_v21, %v1914_v62  ;;  %v1960_v12 = vmul.f32 %v1654_v45, %v1914_v62  ;;  %v1964_v52 = vmul.f32 %v1656_v46, %v1914_v62  ;;  %v1968_v16 = vmul.f32 %v1658_v47, %v1914_v62 }
 0x203   :  { %v1972_v22 = vmul.f32 %v1660_v48, %v1914_v62  ;;  %v233_v28 = vmul.f32 %v1599_v25, %v1914_v62  ;;  %v1978_v11 = vmul.f32 %v1662_v49, %v1914_v62  ;;  %v1986_v46 = vmul.f32 %v1760_v14, %v1638_v38 }
 0x204   :  { %2984 = vst [vmem:[#allocation38_spill] sm:$0xff] %v1960_v12  ;;  %v1982_v12 = vmul.f32 %v1713_v1, %v1914_v62  ;;  %v1990_v47 = vmul.f32 %v1662_v49, %v1647_v42  ;;  %v1994_v48 = vmul.f32 %v1760_v14, %v1687_v57  ;;  %v1998_v25 = vmul.f32 %v1662_v49, %v1746_v10 }
 0x205   :  { %2985 = vst [vmem:[#allocation39_spill] sm:$0xff] %v1978_v11  ;;  %v2002_v11 = vmul.f32 %v1760_v14, %v1914_v62  ;;  %790 = vrot.lane.b32.xlu1 %v774_v50, %s1483_s5  ;;  %248 = vrot.lane.b32.xlu0 %v229_v15, %s1476_s11  ;;  %v2018_v49 = vmul.f32 %v1713_v1, %v1647_v42 }
 0x206   :  { %2986 = vst [vmem:[#allocation40_spill] sm:$0xff] %v1982_v12  ;;  %2987 = vst [vmem:[#allocation41_spill] sm:$0xff] %v1990_v47  ;;  %v2004_v12 = vstv %s1431_s23  ;;  %v2010_v47 = vmul.f32 %v1713_v1, %v1597_v24  ;;  %v2026_v50 = vmul.f32 %v1713_v1, %v1746_v10  ;;  %v2030_v15 = vmul.f32 %v1830_v61, %v1687_v57 }
 0x207   :  { %2988 = vst [vmem:[#allocation42_spill] sm:$0xff] %v1994_v48  ;;  %2989 = vst [vmem:[#allocation43_spill] sm:$0xff] %v2002_v11  ;;  %v2014_v48 = vmul.f32 %v1830_v61, %v1594_v23  ;;  %v2022_v11 = vmul.f32 %v1830_v61, %v1638_v38  ;;  %v2046_v1 = vmul.f32 %v1884_v43, %v1594_v23 }
 0x208   :  { %2990 = vst [vmem:[#allocation44_spill] sm:$0xff] %v2010_v47  ;;  %2992 = vst [vmem:[#allocation46_spill] sm:$0xff] %v2018_v49  ;;  %v2034_v47 = vmul.f32 %v1760_v14, %v1597_v24  ;;  %v2042_v49 = vmul.f32 %v1760_v14, %v1647_v42 }
 0x209   :  { %2991 = vst [vmem:[#allocation45_spill] sm:$0xff] %v2014_v48  ;;  %2993 = vst [vmem:[#allocation47_spill] sm:$0xff] %v2026_v50  ;;  %v2038_v48 = vmul.f32 %v1830_v61, %v1914_v62  ;;  %v2050_v50 = vmul.f32 %v1760_v14, %v1746_v10  ;;  %851 = vrot.lane.b32.xlu1 %v835_v40, %s1491_s18  ;;  %252 = vrot.lane.b32.xlu0 %v231_v33, %s1476_s11 }
 0x20a   :  { %2994 = vst [vmem:[#allocation48_spill] sm:$0xff] %v2030_v15  ;;  %2995 = vst [vmem:[#allocation49_spill] sm:$0xff] %v2034_v47  ;;  %v2054_v47 = vmul.f32 %v1884_v43, %v1638_v38  ;;  %v1260_v15 = vstv %s1433_s25  ;;  %v2072_v14 = vmul.f32 %v1884_v43, %v1914_v62  ;;  %v2088_v33 = vmul.f32 %v1942_v20, %v1638_v38 }
 0x20b   :  { %2996 = vst [vmem:[#allocation50_spill] sm:$0xff] %v2038_v48  ;;  %2997 = vst [vmem:[#allocation51_spill] sm:$0xff] %v2042_v49  ;;  %v2058_v48 = vmul.f32 %v1830_v61, %v1597_v24  ;;  %v2062_v49 = vmul.f32 %v1884_v43, %v1687_v57  ;;  %v2092_v40 = vmul.f32 %v1884_v43, %v1647_v42 }
 0x20c   :  { %2998 = vst [vmem:[#allocation52_spill] sm:$0xff] %v2046_v1  ;;  %v2066_v1 = vmul.f32 %v1830_v61, %v1647_v42  ;;  %3002 = vst [vmem:[#allocation56_spill] sm:$0xff] %v2072_v14  ;;  %v2104_v14 = vmul.f32 %v1942_v20, %v1914_v62 }
 0x20d   :  { %2999 = vst [vmem:[#allocation53_spill] sm:$0xff] %v2058_v48  ;;  %3000 = vst [vmem:[#allocation54_spill] sm:$0xff] %v2062_v49  ;;  %v2076_v48 = vmul.f32 %v1830_v61, %v1746_v10  ;;  %v2080_v49 = vmul.f32 %v1942_v20, %v1594_v23  ;;  %912 = vrot.lane.b32.xlu1 %v896_v41, %s1484_s6  ;;  %256 = vrot.lane.b32.xlu0 %v233_v28, %s1476_s11 }
 0x20e   :  { %3001 = vst [vmem:[#allocation55_spill] sm:$0xff] %v2066_v1  ;;  %v2084_v1 = vmul.f32 %v1884_v43, %v1597_v24  ;;  %3006 = vst [vmem:[#allocation60_spill] sm:$0xff] %v2088_v33  ;;  %v2112_v33 = vmul.f32 %v2004_v12, %v1594_v23  ;;  %v2149_v41 = vmul.f32 %v2004_v12, %v1746_v10 }
 0x20f   :  { %3003 = vst [vmem:[#allocation57_spill] sm:$0xff] %v2076_v48  ;;  %3004 = vst [vmem:[#allocation58_spill] sm:$0xff] %v2080_v49  ;;  %v2096_v48 = vmul.f32 %v1942_v20, %v1687_v57  ;;  %v2100_v49 = vmul.f32 %v1884_v43, %v1746_v10  ;;  %v2152_v28 = vmul.f32 %v1260_v15, %v1638_v38 }
 0x210   :  { %3005 = vst [vmem:[#allocation59_spill] sm:$0xff] %v2084_v1  ;;  %3007 = vst [vmem:[#allocation61_spill] sm:$0xff] %v2092_v40  ;;  %v2108_v1 = vmul.f32 %v1942_v20, %v1597_v24  ;;  %v2116_v40 = vmul.f32 %v1942_v20, %v1647_v42 }
 0x211   :  { %3008 = vst [vmem:[#allocation62_spill] sm:$0xff] %v2096_v48  ;;  %3009 = vst [vmem:[#allocation63_spill] sm:$0xff] %v2100_v49  ;;  %v2120_v48 = vmul.f32 %v2004_v12, %v1638_v38  ;;  %v2124_v49 = vmul.f32 %v1942_v20, %v1746_v10  ;;  %973 = vrot.lane.b32.xlu1 %v1940_v44, %s1492_s19  ;;  %307 = vrot.lane.b32.xlu0 %v1878_v51, %s1479_s14 }
 0x212   :  { %3010 = vst [vmem:[#allocation64_spill] sm:$0xff] %v2104_v14  ;;  %3011 = vst [vmem:[#allocation65_spill] sm:$0xff] %v2108_v1  ;;  %v2128_v14 = vmul.f32 %v2004_v12, %v1687_v57  ;;  %v1321_v1 = vstv %s1435_s26  ;;  %v1078_v44 = vmul.f32 %v1884_v43, %v1619_v32  ;;  %v293_v51 = vmul.f32 %v1589_v21, %v1746_v10 }
 0x213   :  { %3012 = vst [vmem:[#allocation66_spill] sm:$0xff] %v2112_v33  ;;  %3013 = vst [vmem:[#allocation67_spill] sm:$0xff] %v2116_v40  ;;  %v2134_v40 = vmul.f32 %v2004_v12, %v1597_v24  ;;  %v2145_v33 = vmul.f32 %v1260_v15, %v1594_v23  ;;  %v1200_v43 = vmul.f32 %v2004_v12, %v1619_v32 }
 0x214   :  { %3014 = vst [vmem:[#allocation68_spill] sm:$0xff] %v2120_v48  ;;  %3015 = vst [vmem:[#allocation69_spill] sm:$0xff] %v2124_v49  ;;  %v2138_v48 = vmul.f32 %v2004_v12, %v1914_v62  ;;  %v2142_v49 = vmul.f32 %v2004_v12, %v1647_v42  ;;  %v355_v12 = vmul.f32 %v1601_v26, %v1914_v62 }
 0x215   :  { %3016 = vst [vmem:[#allocation70_spill] sm:$0xff] %v2128_v14  ;;  %3017 = vst [vmem:[#allocation71_spill] sm:$0xff] %v2134_v40  ;;  %v2155_v40 = vmul.f32 %v1260_v15, %v1597_v24  ;;  %v2158_v14 = vmul.f32 %v1260_v15, %v1687_v57 }
 0x216   :  { %3018 = vst [vmem:[#allocation72_spill] sm:$0xff] %v2138_v48  ;;  %3019 = vst [vmem:[#allocation73_spill] sm:$0xff] %v2142_v49  ;;  %v2161_v48 = vmul.f32 %v1260_v15, %v1647_v42  ;;  %v2164_v49 = vmul.f32 %v1260_v15, %v1914_v62 }
 0x217   :  { %3020 = vst [vmem:[#allocation74_spill] sm:$0xff] %v2145_v33  ;;  %3021 = vst [vmem:[#allocation75_spill] sm:$0xff] %v2149_v41  ;;  %v2167_v33 = vmul.f32 %v1260_v15, %v1746_v10  ;;  %v2170_v41 = vmul.f32 %v1321_v1, %v1594_v23 }
 0x218   :  { %3022 = vst [vmem:[#allocation76_spill] sm:$0xff] %v2152_v28  ;;  %3023 = vst [vmem:[#allocation77_spill] sm:$0xff] %v2155_v40  ;;  %v2173_v28 = vmul.f32 %v1321_v1, %v1597_v24  ;;  %v2176_v40 = vmul.f32 %v1321_v1, %v1638_v38 }
 0x219   :  { %3024 = vst [vmem:[#allocation78_spill] sm:$0xff] %v2158_v14  ;;  %3025 = vst [vmem:[#allocation79_spill] sm:$0xff] %v2161_v48  ;;  %v2179_v14 = vmul.f32 %v1321_v1, %v1647_v42  ;;  %v142_v48 = vstv %s1583_s24 }
 0x21a   :  { %3026 = vst [vmem:[#allocation80_spill] sm:$0xff] %v2164_v49  ;;  %3027 = vst [vmem:[#allocation81_spill] sm:$0xff] %v2167_v33  ;;  %v2186_v33 = vmul.f32 %v1321_v1, %v1687_v57 }
 0x21b   :  { %3028 = vst [vmem:[#allocation82_spill] sm:$0xff] %v2170_v41  ;;  %3029 = vst [vmem:[#allocation83_spill] sm:$0xff] %v2173_v28  ;;  %v2189_v41 = vmul.f32 %v1321_v1, %v1746_v10  ;;  %v2192_v28 = vmul.f32 %v1321_v1, %v1914_v62 }
 0x21c   :  { %3030 = vst [vmem:[#allocation84_spill] sm:$0xff] %v2176_v40  ;;  %3031 = vst [vmem:[#allocation85_spill] sm:$0xff] %v2179_v14  ;;  %v1017_v40 = vmul.f32 %v1830_v61, %v1619_v32  ;;  %v291_v14 = vmul.f32 %v1589_v21, %v1647_v42  ;;  %v1139_v61 = vmul.f32 %v1942_v20, %v1619_v32 }
 0x21d   :  { %3032 = vst [vmem:[#allocation86_spill] sm:$0xff] %v2186_v33  ;;  %3033 = vst [vmem:[#allocation87_spill] sm:$0xff] %v2189_v41  ;;  %v351_v21 = vmul.f32 %v1601_v26, %v1638_v38  ;;  %v353_v20 = vmul.f32 %v1601_v26, %v1687_v57 }
 0x21e   :  { %3034 = vst [vmem:[#allocation88_spill] sm:$0xff] %v2192_v28  ;;  %1033 = vrot.lane.b32.xlu1 %v1017_v40, %s1485_s0  ;;  %311 = vrot.lane.b32.xlu0 %v291_v14, %s1479_s14  ;;  %v349_v28 = vmul.f32 %v1601_v26, %v1594_v23  ;;  %v1261_v14 = vmul.f32 %v1260_v15, %v1619_v32 }
 0x21f   :  { %v1322_v40 = vmul.f32 %v1321_v1, %v1619_v32  ;;  %v414_v26 = vmul.f32 %v1654_v45, %v1746_v10  ;;  %v172_v15 = vmul.f32 %v1587_v18, %v1914_v62  ;;  %v476_v18 = vmul.f32 %v1603_v27, %v1914_v62 }
 0x222   :  { %1094 = vrot.lane.b32.xlu1 %v1078_v44, %s1493_s20  ;;  %315 = vrot.lane.b32.xlu0 %v293_v51, %s1479_s14  ;;  %v3051_v51 = vld [vmem:[#allocation13_spill] sm:$0xff] }
 0x226   :  { %1155 = vrot.lane.b32.xlu1 %v1139_v61, %s1486_s7  ;;  %366 = vrot.lane.b32.xlu0 %v349_v28, %s1478_s13  ;;  %v410_v28 = vmul.f32 %v1654_v45, %v1597_v24 }
 0x22a   :  { %1216 = vrot.lane.b32.xlu1 %v1200_v43, %s1494_s21  ;;  %370 = vrot.lane.b32.xlu0 %v351_v21, %s1478_s13  ;;  %v3053_v21 = vld [vmem:[#allocation14_spill] sm:$0xff] }
 0x22e   :  { %1277 = vrot.lane.b32.xlu1 %v1261_v14, %s1487_s8  ;;  %374 = vrot.lane.b32.xlu0 %v353_v20, %s1478_s13  ;;  %v3054_v14 = vld [vmem:[#allocation15_spill] sm:$0xff] }
 0x232   :  { %1338 = vrot.lane.b32.xlu1 %v1322_v40, %s1495_s22  ;;  %378 = vrot.lane.b32.xlu0 %v355_v12, %s1478_s13  ;;  %v3056_v12 = vld [vmem:[#allocation16_spill] sm:$0xff] }
 0x236   :  { %183 = vrot.lane.b32.xlu1 %v1609_v29, %s1477_s12  ;;  %428 = vrot.lane.b32.xlu0 %v410_v28, %s1480_s15  ;;  %v3057_v28 = vld [vmem:[#allocation17_spill] sm:$0xff] }
 0x23a   :  { %187 = vrot.lane.b32.xlu1 %v1672_v53, %s1477_s12  ;;  %432 = vrot.lane.b32.xlu0 %v1676_v54, %s1480_s15  ;;  %v3035_v54 = vld [vmem:[#allocation3_spill] sm:$0xff] }
 0x23e   :  { %191 = vrot.lane.b32.xlu1 %v1707_v63, %s1477_s12  ;;  %436 = vrot.lane.b32.xlu0 %v414_v26, %s1480_s15 }
 0x242   :  { %195 = vrot.lane.b32.xlu1 %v172_v15, %s1477_s12  ;;  %487 = vrot.lane.b32.xlu0 %v1613_v30, %s1488_s9  ;;  %v3059_v15 = vld [vmem:[#allocation18_spill] sm:$0xff] }
 0x246   :  { %246 = vrot.lane.b32.xlu1 %v1617_v31, %s1476_s11  ;;  %491 = vrot.lane.b32.xlu0 %v1680_v55, %s1488_s9  ;;  %v3036_v55 = vld [vmem:[#allocation4_spill] sm:$0xff] }
 0x24a   :  { %250 = vrot.lane.b32.xlu1 %v1684_v56, %s1476_s11  ;;  %495 = vrot.lane.b32.xlu0 %v1711_v0, %s1488_s9 }
 0x24e   :  { %254 = vrot.lane.b32.xlu1 %v1768_v17, %s1476_s11  ;;  %499 = vrot.lane.b32.xlu0 %v476_v18, %s1488_s9  ;;  %v3046_v17 = vld [vmem:[#allocation10_spill] sm:$0xff]  ;;  %v3060_v18 = vld [vmem:[#allocation19_spill] sm:$0xff] }
 0x252   :  { %305 = vrot.lane.b32.xlu1 %v1623_v34, %s1479_s14  ;;  %548 = vrot.lane.b32.xlu0 %v1627_v35, %s1481_s16 }
 0x256   :  { %309 = vrot.lane.b32.xlu1 %v1691_v58, %s1479_s14  ;;  %552 = vrot.lane.b32.xlu0 %v1695_v59, %s1481_s16  ;;  %v3037_v59 = vld [vmem:[#allocation38_spill] sm:$0xff] }
 0x25a   :  { %313 = vrot.lane.b32.xlu1 %v1719_v2, %s1479_s14  ;;  %556 = vrot.lane.b32.xlu0 %v1723_v3, %s1481_s16  ;;  %v3040_v2 = vld [vmem:[#allocation6_spill] sm:$0xff] }
 0x25b   :  { %v2280_v27 = vpop.permute.xlu0 %181  ;;  %v2282_v29 = vpop.permute.xlu1 %242 }
 0x25e   :  { %317 = vrot.lane.b32.xlu1 %v1948_v39, %s1479_s14  ;;  %560 = vrot.lane.b32.xlu0 %v1952_v5, %s1481_s16  ;;  %v3048_v39 = vld [vmem:[#allocation11_spill] sm:$0xff] }
 0x25f   :  { %v2288_v30 = vpop.permute.xlu0 %303  ;;  %v2290_v31 = vpop.permute.xlu1 %364 }
 0x262   :  { %368 = vrot.lane.b32.xlu1 %v1631_v36, %s1478_s13  ;;  %609 = vrot.lane.b32.xlu0 %v1635_v37, %s1489_s10 }
 0x263   :  { %v2296_v34 = vpop.permute.xlu0 %424  ;;  %v2298_v35 = vpop.permute.xlu1 %485 }
 0x266   :  { %372 = vrot.lane.b32.xlu1 %v1699_v60, %s1478_s13  ;;  %613 = vrot.lane.b32.xlu0 %v1727_v4, %s1489_s10  ;;  %v3038_v60 = vld [vmem:[#allocation5_spill] sm:$0xff] }
 0x267   :  { %v2304_v36 = vpop.permute.xlu0 %185  ;;  %v2306_v37 = vpop.permute.xlu1 %546 }
 0x26a   :  { %376 = vrot.lane.b32.xlu1 %v1774_v19, %s1478_s13  ;;  %617 = vrot.lane.b32.xlu0 %v1731_v6, %s1489_s10  ;;  %v3042_v6 = vld [vmem:[#allocation7_spill] sm:$0xff] }
 0x26b   :  { %v2312_v45 = vpop.permute.xlu0 %189  ;;  %v2314_v53 = vpop.permute.xlu1 %607 }
 0x26e   :  { %426 = vrot.lane.b32.xlu1 %v1735_v7, %s1480_s15  ;;  %621 = vrot.lane.b32.xlu0 %v1956_v13, %s1489_s10  ;;  %v3043_v7 = vld [vmem:[#allocation8_spill] sm:$0xff]  ;;  %v3045_v13 = vld [vmem:[#allocation9_spill] sm:$0xff] }
 0x26f   :  { %v2320_v56 = vpop.permute.xlu1 %668  ;;  %v2322_v58 = vpop.permute.xlu0 %193 }
 0x272   :  { %430 = vrot.lane.b32.xlu1 %v1739_v8, %s1480_s15  ;;  %670 = vrot.lane.b32.xlu0 %v1743_v9, %s1482_s1 }
 0x273   :  { %v2328_v63 = vpop.permute.xlu1 %729  ;;  %v2330_v0 = vpop.permute.xlu0 %244 }
 0x274   :  { %3039 = vst [vmem:[#allocation3_spill] sm:$0xff] %v2328_v63 }
 0x276   :  { %434 = vrot.lane.b32.xlu1 %v3035_v54, %s1480_s15  ;;  %674 = vrot.lane.b32.xlu0 %v3036_v55, %s1482_s1 }
 0x277   :  { %v2336_v3 = vpop.permute.xlu1 %790  ;;  %v2338_v4 = vpop.permute.xlu0 %248 }
 0x278   :  { %3041 = vst [vmem:[#allocation4_spill] sm:$0xff] %v2336_v3 }
 0x27a   :  { %438 = vrot.lane.b32.xlu1 %v3037_v59, %s1480_s15  ;;  %678 = vrot.lane.b32.xlu0 %v3038_v60, %s1482_s1  ;;  %v3062_v59 = vld [vmem:[#allocation20_spill] sm:$0xff] }
 0x27b   :  { %v2344_v8 = vpop.permute.xlu1 %851  ;;  %v2346_v9 = vpop.permute.xlu0 %252 }
 0x27c   :  { %3044 = vst [vmem:[#allocation38_spill] sm:$0xff] %v2344_v8 }
 0x27e   :  { %489 = vrot.lane.b32.xlu1 %v3040_v2, %s1488_s9  ;;  %682 = vrot.lane.b32.xlu0 %v1964_v52, %s1482_s1  ;;  %v3049_v52 = vld [vmem:[#allocation12_spill] sm:$0xff] }
 0x27f   :  { %v2352_v19 = vpop.permute.xlu1 %912  ;;  %v2354_v5 = vpop.permute.xlu0 %256 }
 0x280   :  { %3047 = vst [vmem:[#allocation5_spill] sm:$0xff] %v2352_v19 }
 0x282   :  { %493 = vrot.lane.b32.xlu1 %v3042_v6, %s1488_s9  ;;  %731 = vrot.lane.b32.xlu0 %v3043_v7, %s1490_s17  ;;  %v3064_v6 = vld [vmem:[#allocation21_spill] sm:$0xff]  ;;  %v3065_v7 = vld [vmem:[#allocation22_spill] sm:$0xff] }
 0x283   :  { %v2360_v1 = vpop.permute.xlu1 %973  ;;  %v2362_v44 = vpop.permute.xlu0 %307 }
 0x284   :  { %3050 = vst [vmem:[#allocation6_spill] sm:$0xff] %v2360_v1 }
 0x286   :  { %497 = vrot.lane.b32.xlu1 %v3045_v13, %s1488_s9  ;;  %735 = vrot.lane.b32.xlu0 %v3046_v17, %s1490_s17 }
 0x28a   :  { %550 = vrot.lane.b32.xlu1 %v3048_v39, %s1481_s16  ;;  %739 = vrot.lane.b32.xlu0 %v3049_v52, %s1490_s17  ;;  %v3067_v39 = vld [vmem:[#allocation23_spill] sm:$0xff]  ;;  %v3068_v52 = vld [vmem:[#allocation24_spill] sm:$0xff] }
 0x28e   :  { %554 = vrot.lane.b32.xlu1 %v3051_v51, %s1481_s16  ;;  %743 = vrot.lane.b32.xlu0 %v1968_v16, %s1490_s17 }
 0x290   :  { %v2368_v61 = vpop.permute.xlu1 %1033  ;;  %v2370_v43 = vpop.permute.xlu0 %311 }
 0x291   :  { %3052 = vst [vmem:[#allocation7_spill] sm:$0xff] %v2368_v61  ;;  %v3082_v61 = vld [vmem:[#allocation35_spill] sm:$0xff] }
 0x292   :  { %558 = vrot.lane.b32.xlu1 %v3053_v21, %s1481_s16  ;;  %792 = vrot.lane.b32.xlu0 %v3054_v14, %s1483_s5  ;;  %v3069_v21 = vld [vmem:[#allocation25_spill] sm:$0xff]  ;;  %v3070_v14 = vld [vmem:[#allocation26_spill] sm:$0xff] }
 0x294   :  { %v2376_v20 = vpop.permute.xlu1 %1094  ;;  %v2378_v40 = vpop.permute.xlu0 %315 }
 0x295   :  { %3055 = vst [vmem:[#allocation8_spill] sm:$0xff] %v2376_v20 }
 0x296   :  { %611 = vrot.lane.b32.xlu1 %v3056_v12, %s1489_s10  ;;  %796 = vrot.lane.b32.xlu0 %v3057_v28, %s1483_s5 }
 0x298   :  { %v2384_v16 = vpop.permute.xlu1 %1155  ;;  %v2386_v26 = vpop.permute.xlu0 %366 }
 0x299   :  { %3058 = vst [vmem:[#allocation9_spill] sm:$0xff] %v2384_v16  ;;  %v3080_v16 = vld [vmem:[#allocation34_spill] sm:$0xff] }
 0x29a   :  { %615 = vrot.lane.b32.xlu1 %v3059_v15, %s1489_s10  ;;  %800 = vrot.lane.b32.xlu0 %v3060_v18, %s1483_s5  ;;  %v3071_v15 = vld [vmem:[#allocation27_spill] sm:$0xff] }
 0x29b   :  { %v3072_v18 = vld [vmem:[#allocation39_spill] sm:$0xff] }
 0x29c   :  { %v2392_v54 = vpop.permute.xlu1 %1216  ;;  %v2394_v55 = vpop.permute.xlu0 %370 }
 0x29d   :  { %3061 = vst [vmem:[#allocation10_spill] sm:$0xff] %v2392_v54 }
 0x29e   :  { %619 = vrot.lane.b32.xlu1 %v3062_v59, %s1489_s10  ;;  %804 = vrot.lane.b32.xlu0 %v1972_v22, %s1483_s5 }
 0x2a0   :  { %v2400_v60 = vpop.permute.xlu1 %1277  ;;  %v2402_v2 = vpop.permute.xlu0 %374 }
 0x2a1   :  { %3063 = vst [vmem:[#allocation11_spill] sm:$0xff] %v2400_v60  ;;  %v3077_v60 = vld [vmem:[#allocation32_spill] sm:$0xff] }
 0x2a2   :  { %672 = vrot.lane.b32.xlu1 %v3064_v6, %s1482_s1  ;;  %853 = vrot.lane.b32.xlu0 %v3065_v7, %s1491_s18  ;;  %v3073_v7 = vld [vmem:[#allocation28_spill] sm:$0xff] }
 0x2a4   :  { %v2408_v13 = vpop.permute.xlu1 %1338  ;;  %v2410_v17 = vpop.permute.xlu0 %378 }
 0x2a5   :  { %3066 = vst [vmem:[#allocation12_spill] sm:$0xff] %v2408_v13 }
 0x2a6   :  { %676 = vrot.lane.b32.xlu1 %v3067_v39, %s1482_s1  ;;  %857 = vrot.lane.b32.xlu0 %v3068_v52, %s1491_s18  ;;  %v3074_v39 = vld [vmem:[#allocation29_spill] sm:$0xff] }
 0x2a8   :  { %v2416_v22 = vpop.permute.xlu1 %183  ;;  %v2418_v51 = vpop.permute.xlu0 %428 }
 0x2a9   :  { %v198_v8 = vsel %vm197_vm5, %v2280_v27, %v2416_v22  ;;  %v149_v27 = vmul.f32 %v142_v48, %v1746_v10 }
 0x2aa   :  { %680 = vrot.lane.b32.xlu1 %v3069_v21, %s1482_s1  ;;  %861 = vrot.lane.b32.xlu0 %v3070_v14, %s1491_s18  ;;  %v3075_v14 = vld [vmem:[#allocation30_spill] sm:$0xff] }
 0x2ac   :  { %v2424_v12 = vpop.permute.xlu1 %187  ;;  %v2426_v28 = vpop.permute.xlu0 %432 }
 0x2ae   :  { %733 = vrot.lane.b32.xlu1 %v3071_v15, %s1490_s17  ;;  %865 = vrot.lane.b32.xlu0 %v3072_v18, %s1491_s18  ;;  %v3076_v15 = vld [vmem:[#allocation31_spill] sm:$0xff] }
 0x2b0   :  { %v2432_v59 = vpop.permute.xlu1 %191  ;;  %v2434_v6 = vpop.permute.xlu0 %436 }
 0x2b2   :  { %737 = vrot.lane.b32.xlu1 %v3073_v7, %s1490_s17  ;;  %914 = vrot.lane.b32.xlu0 %v3074_v39, %s1484_s6  ;;  %v3078_v7 = vld [vmem:[#allocation33_spill] sm:$0xff] }
 0x2b4   :  { %v2440_v52 = vpop.permute.xlu1 %195  ;;  %v2442_v21 = vpop.permute.xlu0 %487 }
 0x2b6   :  { %741 = vrot.lane.b32.xlu1 %v3075_v14, %s1490_s17  ;;  %918 = vrot.lane.b32.xlu0 %v3076_v15, %s1484_s6  ;;  %v3081_v14 = vld [vmem:[#allocation40_spill] sm:$0xff] }
 0x2b8   :  { %v2448_v18 = vpop.permute.xlu1 %246  ;;  %v2450_v13 = vpop.permute.xlu0 %491 }
 0x2ba   :  { %794 = vrot.lane.b32.xlu1 %v3077_v60, %s1483_s5  ;;  %922 = vrot.lane.b32.xlu0 %v3078_v7, %s1484_s6  ;;  %v3083_v60 = vld [vmem:[#allocation36_spill] sm:$0xff] }
 0x2bc   :  { %v2456_v39 = vpop.permute.xlu1 %250  ;;  %v2458_v54 = vpop.permute.xlu0 %495 }
 0x2bd   :  { %3079 = vst [vmem:[#allocation13_spill] sm:$0xff] %v2458_v54  ;;  %v3092_v54 = vld [vmem:[#allocation46_spill] sm:$0xff] }
 0x2be   :  { %798 = vrot.lane.b32.xlu1 %v3080_v16, %s1483_s5  ;;  %926 = vrot.lane.b32.xlu0 %v3081_v14, %s1484_s6  ;;  %v3084_v16 = vld [vmem:[#allocation37_spill] sm:$0xff] }
 0x2c0   :  { %v2464_v15 = vpop.permute.xlu1 %254  ;;  %v2466_v20 = vpop.permute.xlu0 %499 }
 0x2c2   :  { %802 = vrot.lane.b32.xlu1 %v3082_v61, %s1483_s5  ;;  %975 = vrot.lane.b32.xlu0 %v3083_v60, %s1492_s19  ;;  %v3086_v61 = vld [vmem:[#allocation41_spill] sm:$0xff]  ;;  %v3087_v60 = vld [vmem:[#allocation42_spill] sm:$0xff] }
 0x2c4   :  { %v2472_v7 = vpop.permute.xlu1 %305  ;;  %v2474_v1 = vpop.permute.xlu0 %548 }
 0x2c6   :  { %855 = vrot.lane.b32.xlu1 %v3084_v16, %s1491_s18  ;;  %979 = vrot.lane.b32.xlu0 %v1986_v46, %s1492_s19  ;;  %v3089_v16 = vld [vmem:[#allocation43_spill] sm:$0xff] }
 0x2c8   :  { %v2480_v14 = vpop.permute.xlu1 %309  ;;  %v2482_v41 = vpop.permute.xlu0 %552 }
 0x2c9   :  { %3085 = vst [vmem:[#allocation14_spill] sm:$0xff] %v2482_v41  ;;  %v145_v41 = vmul.f32 %v142_v48, %v1597_v24  ;;  %v259_v24 = vsel %vm258_vm6, %v2282_v29, %v2330_v0 }
 0x2ca   :  { %859 = vrot.lane.b32.xlu1 %v3086_v61, %s1491_s18  ;;  %983 = vrot.lane.b32.xlu0 %v3087_v60, %s1492_s19  ;;  %v3090_v61 = vld [vmem:[#allocation44_spill] sm:$0xff]  ;;  %v3091_v60 = vld [vmem:[#allocation45_spill] sm:$0xff] }
 0x2cc   :  { %v2488_v33 = vpop.permute.xlu1 %313  ;;  %v2490_v19 = vpop.permute.xlu0 %556 }
 0x2cd   :  { %3088 = vst [vmem:[#allocation15_spill] sm:$0xff] %v2490_v19  ;;  %v144_v19 = vmul.f32 %v142_v48, %v1594_v23  ;;  %v150_v23 = vmul.f32 %v142_v48, %v1914_v62  ;;  %v380_v62 = vsel %vm80_vm1, %v2290_v31, %v2386_v26  ;;  %v3093_v31 = vld [vmem:[#allocation47_spill] sm:$0xff] }
 0x2ce   :  { %863 = vrot.lane.b32.xlu1 %v1998_v25, %s1491_s18  ;;  %987 = vrot.lane.b32.xlu0 %v3089_v16, %s1492_s19  ;;  %v143_v25 = vmul.f32 %v142_v48, %v1619_v32  ;;  %v148_v32 = vmul.f32 %v142_v48, %v1687_v57  ;;  %v201_v57 = vsel %vm197_vm5, %v2424_v12, %v2312_v45 }
 0x2cf   :  { %v220_v29 = vadd.f32 %v2440_v52, %v150_v23 }
 0x2d0   :  { %v2496_v46 = vpop.permute.xlu1 %317  ;;  %v2498_v49 = vpop.permute.xlu0 %560  ;;  %v213_v63 = vadd.f32 %v198_v8, %v143_v25  ;;  %v203_v8 = vsel %vm197_vm5, %v2432_v59, %v2322_v58 }
 0x2d2   :  { %916 = vrot.lane.b32.xlu1 %v3090_v61, %s1484_s6  ;;  %1035 = vrot.lane.b32.xlu0 %v3091_v60, %s1485_s0  ;;  %v146_v61 = vmul.f32 %v142_v48, %v1638_v38  ;;  %v147_v60 = vmul.f32 %v142_v48, %v1647_v42  ;;  %v199_v38 = vsel %vm197_vm5, %v2416_v22, %v2304_v36 }
 0x2d3   :  { %v200_v42 = vsel %vm197_vm5, %v2304_v36, %v2424_v12  ;;  %v202_v48 = vsel %vm197_vm5, %v2312_v45, %v2432_v59  ;;  %v320_v36 = vsel %vm319_vm7, %v2288_v30, %v2472_v7  ;;  %v274_v22 = vadd.f32 %v259_v24, %v213_v63  ;;  %v3094_v45 = vld [vmem:[#allocation48_spill] sm:$0xff] }
 0x2d4   :  { %v2509_v3 = vpop.permute.xlu1 %368  ;;  %v2511_v16 = vpop.permute.xlu0 %609  ;;  %v214_v12 = vadd.f32 %v199_v38, %v144_v19  ;;  %v215_v25 = vadd.f32 %v200_v42, %v145_v41  ;;  %v216_v23 = vadd.f32 %v201_v57, %v146_v61  ;;  %v261_v30 = vsel %vm258_vm6, %v2448_v18, %v2338_v4  ;;  %v3095_v42 = vld [vmem:[#allocation49_spill] sm:$0xff] }
 0x2d5   :  { %v217_v59 = vadd.f32 %v202_v48, %v147_v60  ;;  %v263_v63 = vsel %vm258_vm6, %v2456_v39, %v2346_v9  ;;  %v218_v41 = vadd.f32 %v203_v8, %v148_v32  ;;  %v502_v61 = vsel %vm501_vm8, %v2298_v35, %v2442_v21  ;;  %v3096_v32 = vld [vmem:[#allocation50_spill] sm:$0xff] }
 0x2d6   :  { %920 = vrot.lane.b32.xlu1 %v3092_v54, %s1484_s6  ;;  %1039 = vrot.lane.b32.xlu0 %v2022_v11, %s1485_s0  ;;  %v204_v54 = vsel %vm197_vm5, %v2322_v58, %v2440_v52  ;;  %v262_v58 = vsel %vm258_vm6, %v2338_v4, %v2456_v39  ;;  %v335_v52 = vadd.f32 %v320_v36, %v274_v22  ;;  %vm1232_vm5 = vcmask 900096  }
 0x2d7   :  { %v219_v19 = vadd.f32 %v204_v54, %v149_v27  ;;  %v281_v60 = vadd.f32 %v2354_v5, %v220_v29  ;;  %v260_v4 = vsel %vm258_vm6, %v2330_v0, %v2448_v18  ;;  %v276_v38 = vadd.f32 %v261_v30, %v215_v25 }
 0x2d8   :  { %v2536_v10 = vpop.permute.xlu1 %372  ;;  %v2538_v11 = vpop.permute.xlu0 %613  ;;  %v264_v39 = vsel %vm258_vm6, %v2346_v9, %v2464_v15  ;;  %v277_v27 = vadd.f32 %v262_v58, %v216_v23  ;;  %v278_v35 = vadd.f32 %v263_v63, %v217_v59  ;;  %v322_v57 = vsel %vm319_vm7, %v2362_v44, %v2480_v14 }
 0x2d9   :  { %v323_v0 = vsel %vm319_vm7, %v2480_v14, %v2370_v43  ;;  %v265_v9 = vsel %vm258_vm6, %v2464_v15, %v2354_v5  ;;  %v324_v18 = vsel %vm319_vm7, %v2370_v43, %v2488_v33  ;;  %v325_v48 = vsel %vm319_vm7, %v2488_v33, %v2378_v40 }
 0x2da   :  { %924 = vrot.lane.b32.xlu1 %v3093_v31, %s1484_s6  ;;  %1043 = vrot.lane.b32.xlu0 %v3094_v45, %s1485_s0  ;;  %v395_v29 = vadd.f32 %v380_v62, %v335_v52  ;;  %v279_v54 = vadd.f32 %v264_v39, %v218_v41  ;;  %v382_v14 = vsel %vm80_vm1, %v2509_v3, %v2394_v55  ;;  %v3097_v62 = vld [vmem:[#allocation51_spill] sm:$0xff]  ;;  %v3098_v45 = vld [vmem:[#allocation52_spill] sm:$0xff]  ;;  %vm1293_vm6 = vcmask 891904  }
 0x2db   :  { %v383_v5 = vsel %vm80_vm1, %v2394_v55, %v2536_v10  ;;  %v337_v15 = vadd.f32 %v322_v57, %v276_v38  ;;  %v338_v22 = vadd.f32 %v323_v0, %v277_v27  ;;  %v280_v25 = vadd.f32 %v265_v9, %v219_v19 }
 0x2dc   :  { %v2569_v24 = vpop.permute.xlu1 %376  ;;  %v2571_v31 = vpop.permute.xlu0 %617  ;;  %v563_v23 = vsel %vm562_vm9, %v2306_v37, %v2474_v1  ;;  %v339_v30 = vadd.f32 %v324_v18, %v278_v35  ;;  %v340_v55 = vadd.f32 %v325_v48, %v279_v54  ;;  %v384_v19 = vsel %vm80_vm1, %v2536_v10, %v2402_v2  ;;  %v3100_v48 = vld [vmem:[#allocation54_spill] sm:$0xff] }
 0x2dd   :  { %v397_v59 = vadd.f32 %v382_v14, %v337_v15  ;;  %v398_v58 = vadd.f32 %v383_v5, %v338_v22  ;;  %v385_v37 = vsel %vm80_vm1, %v2402_v2, %v2569_v24  ;;  %v275_v10 = vadd.f32 %v260_v4, %v214_v12  ;;  %v3099_v4 = vld [vmem:[#allocation53_spill] sm:$0xff] }
 0x2de   :  { %977 = vrot.lane.b32.xlu1 %v3095_v42, %s1492_s19  ;;  %1047 = vrot.lane.b32.xlu0 %v3096_v32, %s1485_s0  ;;  %v321_v2 = vsel %vm319_vm7, %v2472_v7, %v2362_v44  ;;  %v342_v32 = vadd.f32 %v2496_v46, %v281_v60  ;;  %v624_v27 = vsel %vm623_vm11, %v2314_v53, %v2511_v16 }
 0x2df   :  { %v399_v57 = vadd.f32 %v384_v19, %v339_v30  ;;  %v400_v0 = vadd.f32 %v385_v37, %v340_v55  ;;  %v3103_v55 = vld [vmem:[#allocation57_spill] sm:$0xff] }
 0x2e0   :  { %v427_v36 = vpop.permute.xlu1 %426  ;;  %v2602_v8 = vpop.permute.xlu0 %621  ;;  %v3105_v19 = vld [vmem:[#allocation13_spill] sm:$0xff] }
 0x2e1   :  { %v441_v43 = vsel %vm440_vm10, %v2296_v34, %v427_v36  ;;  %v326_v34 = vsel %vm319_vm7, %v2378_v40, %v2496_v46  ;;  %v442_v5 = vsel %vm440_vm10, %v427_v36, %v2418_v51  ;;  %vm1354_vm7 = vcmask 883712  }
 0x2e2   :  { %v456_v33 = vadd.f32 %v441_v43, %v395_v29  ;;  %981 = vrot.lane.b32.xlu1 %v3097_v62, %s1492_s19  ;;  %1096 = vrot.lane.b32.xlu0 %v3098_v45, %s1493_s20  ;;  %v341_v35 = vadd.f32 %v326_v34, %v280_v25  ;;  %v336_v29 = vadd.f32 %v321_v2, %v275_v10  ;;  %v3101_v62 = vld [vmem:[#allocation55_spill] sm:$0xff]  ;;  %v3104_v34 = vld [vmem:[#allocation58_spill] sm:$0xff] }
 0x2e3   :  { %v3107_v2 = vld [vmem:[#allocation59_spill] sm:$0xff] }
 0x2e4   :  { %v517_v63 = vadd.f32 %v502_v61, %v456_v33  ;;  %v431_v52 = vpop.permute.xlu1 %430  ;;  %v2622_v41 = vpop.permute.xlu0 %670 }
 0x2e5   :  { %v443_v38 = vsel %vm440_vm10, %v2418_v51, %v431_v52  ;;  %v444_v40 = vsel %vm440_vm10, %v431_v52, %v2426_v28  ;;  %v685_v44 = vsel %vm684_vm12, %v2320_v56, %v2622_v41  ;;  %v402_v56 = vadd.f32 %v2410_v17, %v342_v32  ;;  %v3108_v32 = vld [vmem:[#allocation60_spill] sm:$0xff] }
 0x2e6   :  { %v458_v39 = vadd.f32 %v443_v38, %v397_v59  ;;  %v459_v42 = vadd.f32 %v444_v40, %v398_v58  ;;  %v578_v61 = vadd.f32 %v563_v23, %v517_v63  ;;  %985 = vrot.lane.b32.xlu1 %v2050_v50, %s1492_s19  ;;  %1100 = vrot.lane.b32.xlu0 %v2054_v47, %s1493_s20  ;;  %v3106_v38 = vld [vmem:[#allocation3_spill] sm:$0xff] }
 0x2e7   :  { %v386_v47 = vsel %vm80_vm1, %v2569_v24, %v2410_v17  ;;  %v381_v24 = vsel %vm80_vm1, %v2386_v26, %v2509_v3  ;;  %v3102_v3 = vld [vmem:[#allocation56_spill] sm:$0xff]  ;;  %vm928_vm1 = vcmask 941056  }
 0x2e8   :  { %v639_v9 = vadd.f32 %v624_v27, %v578_v61  ;;  %v435_v18 = vpop.permute.xlu1 %434  ;;  %v2645_v50 = vpop.permute.xlu0 %674  ;;  %v396_v22 = vadd.f32 %v381_v24, %v336_v29  ;;  %v3114_v29 = vld [vmem:[#allocation15_spill] sm:$0xff] }
 0x2e9   :  { %v445_v7 = vsel %vm440_vm10, %v2426_v28, %v435_v18  ;;  %v446_v53 = vsel %vm440_vm10, %v435_v18, %v2434_v6  ;;  %v401_v28 = vadd.f32 %v386_v47, %v341_v35  ;;  %v3110_v18 = vld [vmem:[#allocation62_spill] sm:$0xff] }
 0x2ea   :  { %v700_v46 = vadd.f32 %v685_v44, %v639_v9  ;;  %v460_v12 = vadd.f32 %v445_v7, %v399_v57  ;;  %v461_v60 = vadd.f32 %v446_v53, %v400_v0  ;;  %1037 = vrot.lane.b32.xlu1 %v3099_v4, %s1485_s0  ;;  %1104 = vrot.lane.b32.xlu0 %v3100_v48, %s1493_s20  ;;  %v3111_v53 = vld [vmem:[#allocation14_spill] sm:$0xff] }
 0x2eb   :  { %v457_v17 = vadd.f32 %v442_v5, %v396_v22 }
 0x2ec   :  { %v439_v54 = vpop.permute.xlu1 %438  ;;  %v2665_v14 = vpop.permute.xlu0 %678 }
 0x2ed   :  { %v447_v43 = vsel %vm440_vm10, %v2434_v6, %v439_v54  ;;  %v463_v15 = vadd.f32 %v439_v54, %v402_v56 }
 0x2ee   :  { %v462_v33 = vadd.f32 %v447_v43, %v401_v28  ;;  %1041 = vrot.lane.b32.xlu1 %v3101_v62, %s1485_s0  ;;  %1108 = vrot.lane.b32.xlu0 %v3102_v3, %s1493_s20  ;;  %v3115_v43 = vld [vmem:[#allocation65_spill] sm:$0xff] }
 0x2ef   :  { %v524_v26 = vadd.f32 %v2466_v20, %v463_v15  ;;  %v3116_v15 = vld [vmem:[#allocation66_spill] sm:$0xff] }
 0x2f0   :  { %v490_v45 = vpop.permute.xlu1 %489  ;;  %v2676_v25 = vpop.permute.xlu0 %682 }
 0x2f1   :  { %v503_v51 = vsel %vm501_vm8, %v2442_v21, %v490_v45  ;;  %v504_v6 = vsel %vm501_vm8, %v490_v45, %v2450_v13  ;;  %v585_v36 = vadd.f32 %v2498_v49, %v524_v26  ;;  %v3117_v26 = vld [vmem:[#allocation4_spill] sm:$0xff] }
 0x2f2   :  { %v518_v23 = vadd.f32 %v503_v51, %v457_v17  ;;  %v519_v30 = vadd.f32 %v504_v6, %v458_v39  ;;  %1045 = vrot.lane.b32.xlu1 %v3103_v55, %s1485_s0  ;;  %1157 = vrot.lane.b32.xlu0 %v3104_v34, %s1486_s7 }
 0x2f3   :  { %v646_v59 = vadd.f32 %v2602_v8, %v585_v36  ;;  %v3118_v36 = vld [vmem:[#allocation67_spill] sm:$0xff] }
 0x2f4   :  { %v494_v58 = vpop.permute.xlu1 %493  ;;  %v2688_v63 = vpop.permute.xlu0 %731 }
 0x2f5   :  { %v707_v21 = vadd.f32 %v2676_v25, %v646_v59  ;;  %v505_v52 = vsel %vm501_vm8, %v2450_v13, %v494_v58  ;;  %v506_v37 = vsel %vm501_vm8, %v494_v58, %v3105_v19  ;;  %v746_v40 = vsel %vm745_vm13, %v3106_v38, %v2688_v63 }
 0x2f6   :  { %v520_v39 = vadd.f32 %v505_v52, %v459_v42  ;;  %v521_v61 = vadd.f32 %v506_v37, %v460_v12  ;;  %v761_v10 = vadd.f32 %v746_v40, %v700_v46  ;;  %1098 = vrot.lane.b32.xlu1 %v3107_v2, %s1493_s20  ;;  %1161 = vrot.lane.b32.xlu0 %v3108_v32, %s1486_s7  ;;  %v3109_v42 = vld [vmem:[#allocation61_spill] sm:$0xff]  ;;  %v3121_v52 = vld [vmem:[#allocation70_spill] sm:$0xff] }
 0x2f8   :  { %v498_v27 = vpop.permute.xlu1 %497  ;;  %v2702_v35 = vpop.permute.xlu0 %735 }
 0x2f9   :  { %v507_v13 = vsel %vm501_vm8, %v3105_v19, %v498_v27  ;;  %v508_v57 = vsel %vm501_vm8, %v498_v27, %v2466_v20  ;;  %v3112_v20 = vld [vmem:[#allocation63_spill] sm:$0xff]  ;;  %vm1388_vm8 = vcmask 7168  }
 0x2fa   :  { %v522_v0 = vadd.f32 %v507_v13, %v461_v60  ;;  %v523_v9 = vadd.f32 %v508_v57, %v462_v33  ;;  %1102 = vrot.lane.b32.xlu1 %v3109_v42, %s1493_s20  ;;  %1165 = vrot.lane.b32.xlu0 %v3110_v18, %s1486_s7  ;;  %v3113_v60 = vld [vmem:[#allocation64_spill] sm:$0xff]  ;;  %v3125_v42 = vld [vmem:[#allocation74_spill] sm:$0xff] }
 0x2fc   :  { %v551_v47 = vpop.permute.xlu1 %550  ;;  %v2712_v44 = vpop.permute.xlu0 %739 }
 0x2fd   :  { %v564_v7 = vsel %vm562_vm9, %v2474_v1, %v551_v47  ;;  %v565_v46 = vsel %vm562_vm9, %v551_v47, %v3111_v53 }
 0x2fe   :  { %v579_v12 = vadd.f32 %v564_v7, %v518_v23  ;;  %v580_v4 = vadd.f32 %v565_v46, %v519_v30  ;;  %1106 = vrot.lane.b32.xlu1 %v3112_v20, %s1493_s20  ;;  %1169 = vrot.lane.b32.xlu0 %v3113_v60, %s1486_s7  ;;  %v3119_v23 = vld [vmem:[#allocation68_spill] sm:$0xff]  ;;  %v3126_v7 = vld [vmem:[#allocation38_spill] sm:$0xff]  ;;  %v3127_v20 = vld [vmem:[#allocation75_spill] sm:$0xff] }
 0x2ff   :  { %v3128_v60 = vld [vmem:[#allocation76_spill] sm:$0xff] }
 0x300   :  { %v555_v48 = vpop.permute.xlu1 %554  ;;  %v2722_v24 = vpop.permute.xlu0 %743 }
 0x301   :  { %v566_v56 = vsel %vm562_vm9, %v3111_v53, %v555_v48  ;;  %v567_v1 = vsel %vm562_vm9, %v555_v48, %v3114_v29  ;;  %v768_v28 = vadd.f32 %v2722_v24, %v707_v21  ;;  %v3120_v21 = vld [vmem:[#allocation69_spill] sm:$0xff] }
 0x302   :  { %v581_v54 = vadd.f32 %v566_v56, %v520_v39  ;;  %v582_v5 = vadd.f32 %v567_v1, %v521_v61  ;;  %1159 = vrot.lane.b32.xlu1 %v3115_v43, %s1486_s7  ;;  %1218 = vrot.lane.b32.xlu0 %v3116_v15, %s1494_s21  ;;  %v3122_v61 = vld [vmem:[#allocation71_spill] sm:$0xff] }
 0x304   :  { %v559_v22 = vpop.permute.xlu1 %558  ;;  %v2733_v33 = vpop.permute.xlu0 %792 }
 0x305   :  { %v568_v62 = vsel %vm562_vm9, %v3114_v29, %v559_v22  ;;  %v569_v3 = vsel %vm562_vm9, %v559_v22, %v2498_v49  ;;  %v807_v17 = vsel %vm806_vm14, %v3117_v26, %v2733_v33  ;;  %v3131_v26 = vld [vmem:[#allocation79_spill] sm:$0xff] }
 0x306   :  { %v583_v45 = vadd.f32 %v568_v62, %v522_v0  ;;  %v584_v51 = vadd.f32 %v569_v3, %v523_v9  ;;  %v822_v6 = vadd.f32 %v807_v17, %v761_v10  ;;  %1163 = vrot.lane.b32.xlu1 %v3118_v36, %s1486_s7  ;;  %1222 = vrot.lane.b32.xlu0 %v3119_v23, %s1494_s21  ;;  %v3123_v10 = vld [vmem:[#allocation72_spill] sm:$0xff]  ;;  %v3124_v9 = vld [vmem:[#allocation73_spill] sm:$0xff] }
 0x307   :  { %v3132_v17 = vld [vmem:[#allocation80_spill] sm:$0xff] }
 0x308   :  { %v612_v30 = vpop.permute.xlu1 %611  ;;  %v2746_v55 = vpop.permute.xlu0 %796 }
 0x309   :  { %v625_v34 = vsel %vm623_vm11, %v2511_v16, %v612_v30  ;;  %v626_v49 = vsel %vm623_vm11, %v612_v30, %v2538_v11  ;;  %v3133_v30 = vld [vmem:[#allocation81_spill] sm:$0xff] }
 0x30a   :  { %v640_v59 = vadd.f32 %v625_v34, %v579_v12  ;;  %v641_v58 = vadd.f32 %v626_v49, %v580_v4  ;;  %1167 = vrot.lane.b32.xlu1 %v3120_v21, %s1486_s7  ;;  %1226 = vrot.lane.b32.xlu0 %v3121_v52, %s1494_s21  ;;  %v3134_v34 = vld [vmem:[#allocation82_spill] sm:$0xff]  ;;  %v3135_v21 = vld [vmem:[#allocation5_spill] sm:$0xff] }
 0x30c   :  { %v616_v19 = vpop.permute.xlu1 %615  ;;  %v2756_v37 = vpop.permute.xlu0 %800 }
 0x30d   :  { %v627_v38 = vsel %vm623_vm11, %v2538_v11, %v616_v19  ;;  %v628_v16 = vsel %vm623_vm11, %v616_v19, %v2571_v31 }
 0x30e   :  { %v642_v40 = vadd.f32 %v627_v38, %v581_v54  ;;  %v643_v39 = vadd.f32 %v628_v16, %v582_v5  ;;  %1220 = vrot.lane.b32.xlu1 %v3122_v61, %s1494_s21  ;;  %1230 = vrot.lane.b32.xlu0 %v3123_v10, %s1494_s21  ;;  %v3129_v54 = vld [vmem:[#allocation77_spill] sm:$0xff]  ;;  %v3130_v5 = vld [vmem:[#allocation78_spill] sm:$0xff] }
 0x310   :  { %v620_v2 = vpop.permute.xlu1 %619  ;;  %v2766_v32 = vpop.permute.xlu0 %804 }
 0x311   :  { %v629_v27 = vsel %vm623_vm11, %v2571_v31, %v620_v2  ;;  %v630_v11 = vsel %vm623_vm11, %v620_v2, %v2602_v8  ;;  %v829_v13 = vadd.f32 %v2766_v32, %v768_v28 }
 0x312   :  { %v644_v57 = vadd.f32 %v629_v27, %v583_v45  ;;  %v645_v0 = vadd.f32 %v630_v11, %v584_v51  ;;  %1224 = vrot.lane.b32.xlu1 %v3124_v9, %s1494_s21  ;;  %1279 = vrot.lane.b32.xlu0 %v3125_v42, %s1487_s8 }
 0x314   :  { %v673_v18 = vpop.permute.xlu1 %672  ;;  %v2777_v47 = vpop.permute.xlu0 %853 }
 0x315   :  { %v686_v31 = vsel %vm684_vm12, %v2622_v41, %v673_v18  ;;  %v687_v8 = vsel %vm684_vm12, %v673_v18, %v2645_v50  ;;  %v868_v53 = vsel %vm867_vm15, %v3126_v7, %v2777_v47 }
 0x316   :  { %v701_v46 = vadd.f32 %v686_v31, %v640_v59  ;;  %v702_v12 = vadd.f32 %v687_v8, %v641_v58  ;;  %v883_v4 = vadd.f32 %v868_v53, %v822_v6  ;;  %1228 = vrot.lane.b32.xlu1 %v3127_v20, %s1494_s21  ;;  %1283 = vrot.lane.b32.xlu0 %v3128_v60, %s1487_s8  ;;  %v3141_v8 = vld [vmem:[#allocation88_spill] sm:$0xff] }
 0x318   :  { %v677_v48 = vpop.permute.xlu1 %676  ;;  %v2790_v56 = vpop.permute.xlu0 %857 }
 0x319   :  { %v688_v41 = vsel %vm684_vm12, %v2645_v50, %v677_v48  ;;  %v689_v29 = vsel %vm684_vm12, %v677_v48, %v2665_v14 }
 0x31a   :  { %v703_v1 = vadd.f32 %v688_v41, %v642_v40  ;;  %v704_v28 = vadd.f32 %v689_v29, %v643_v39  ;;  %1281 = vrot.lane.b32.xlu1 %v3129_v54, %s1487_s8  ;;  %1287 = vrot.lane.b32.xlu0 %v3130_v5, %s1487_s8  ;;  %v3136_v40 = vld [vmem:[#allocation83_spill] sm:$0xff]  ;;  %v3137_v39 = vld [vmem:[#allocation84_spill] sm:$0xff] }
 0x31c   :  { %v681_v43 = vpop.permute.xlu1 %680  ;;  %v2800_v15 = vpop.permute.xlu0 %861 }
 0x31d   :  { %v690_v22 = vsel %vm684_vm12, %v2665_v14, %v681_v43  ;;  %v691_v50 = vsel %vm684_vm12, %v681_v43, %v2676_v25 }
 0x31e   :  { %v705_v62 = vadd.f32 %v690_v22, %v644_v57  ;;  %v706_v3 = vadd.f32 %v691_v50, %v645_v0  ;;  %1285 = vrot.lane.b32.xlu1 %v3131_v26, %s1487_s8  ;;  %1291 = vrot.lane.b32.xlu0 %v3132_v17, %s1487_s8  ;;  %v3139_v57 = vld [vmem:[#allocation86_spill] sm:$0xff] }
 0x320   :  { %v734_v45 = vpop.permute.xlu1 %733  ;;  %v2810_v51 = vpop.permute.xlu0 %865 }
 0x321   :  { %v747_v6 = vsel %vm745_vm13, %v2688_v63, %v734_v45  ;;  %v748_v14 = vsel %vm745_vm13, %v734_v45, %v2702_v35  ;;  %v890_v36 = vadd.f32 %v2810_v51, %v829_v13  ;;  %v3138_v13 = vld [vmem:[#allocation85_spill] sm:$0xff] }
 0x322   :  { %v762_v25 = vadd.f32 %v747_v6, %v701_v46  ;;  %v763_v23 = vadd.f32 %v748_v14, %v702_v12  ;;  %1289 = vrot.lane.b32.xlu1 %v3133_v30, %s1487_s8  ;;  %1340 = vrot.lane.b32.xlu0 %v3134_v34, %s1495_s22 }
 0x324   :  { %v738_v49 = vpop.permute.xlu1 %737  ;;  %v2821_v59 = vpop.permute.xlu0 %914 }
 0x325   :  { %v749_v63 = vsel %vm745_vm13, %v2702_v35, %v738_v49  ;;  %v750_v58 = vsel %vm745_vm13, %v738_v49, %v2712_v44  ;;  %v929_v52 = vsel %vm928_vm1, %v3135_v21, %v2821_v59 }
 0x326   :  { %v764_v19 = vadd.f32 %v749_v63, %v703_v1  ;;  %v765_v38 = vadd.f32 %v750_v58, %v704_v28  ;;  %v944_v16 = vadd.f32 %v929_v52, %v883_v4  ;;  %1342 = vrot.lane.b32.xlu1 %v3136_v40, %s1495_s22  ;;  %1344 = vrot.lane.b32.xlu0 %v3137_v39, %s1495_s22  ;;  %v3142_v1 = vld [vmem:[#allocation6_spill] sm:$0xff]  ;;  %v3143_v52 = vld [vmem:[#allocation7_spill] sm:$0xff] }
 0x328   :  { %v742_v61 = vpop.permute.xlu1 %741  ;;  %v919_v10 = vpop.permute.xlu0 %918 }
 0x329   :  { %v751_v35 = vsel %vm745_vm13, %v2712_v44, %v742_v61  ;;  %v752_v2 = vsel %vm745_vm13, %v742_v61, %v2722_v24  ;;  %v3140_v24 = vld [vmem:[#allocation87_spill] sm:$0xff] }
 0x32a   :  { %v766_v27 = vadd.f32 %v751_v35, %v705_v62  ;;  %v767_v11 = vadd.f32 %v752_v2, %v706_v3  ;;  %1346 = vrot.lane.b32.xlu1 %v3138_v13, %s1495_s22  ;;  %1348 = vrot.lane.b32.xlu0 %v3139_v57, %s1495_s22 }
 0x32c   :  { %v795_v0 = vpop.permute.xlu1 %794  ;;  %v923_v9 = vpop.permute.xlu0 %922 }
 0x32d   :  { %v808_v42 = vsel %vm806_vm14, %v2733_v33, %v795_v0  ;;  %v809_v18 = vsel %vm806_vm14, %v795_v0, %v2746_v55 }
 0x32e   :  { %v823_v44 = vadd.f32 %v808_v42, %v762_v25  ;;  %v824_v31 = vadd.f32 %v809_v18, %v763_v23  ;;  %1350 = vrot.lane.b32.xlu1 %v3140_v24, %s1495_s22  ;;  %1352 = vrot.lane.b32.xlu0 %v3141_v8, %s1495_s22 }
 0x330   :  { %v799_v7 = vpop.permute.xlu1 %798  ;;  %v927_v53 = vpop.permute.xlu0 %926 }
 0x331   :  { %v810_v46 = vsel %vm806_vm14, %v2746_v55, %v799_v7  ;;  %v811_v12 = vsel %vm806_vm14, %v799_v7, %v2756_v37  ;;  %v951_v33 = vadd.f32 %v927_v53, %v890_v36 }
 0x332   :  { %v825_v4 = vadd.f32 %v810_v46, %v764_v19  ;;  %v826_v20 = vadd.f32 %v811_v12, %v765_v38 }
 0x334   :  { %v803_v60 = vpop.permute.xlu1 %802  ;;  %v976_v48 = vpop.permute.xlu0 %975 }
 0x335   :  { %v812_v41 = vsel %vm806_vm14, %v2756_v37, %v803_v60  ;;  %v813_v29 = vsel %vm806_vm14, %v803_v60, %v2766_v32  ;;  %v989_v28 = vsel %vm130_vm4, %v3142_v1, %v976_v48 }
 0x336   :  { %v827_v54 = vadd.f32 %v812_v41, %v766_v27  ;;  %v828_v5 = vadd.f32 %v813_v29, %v767_v11  ;;  %v1004_v55 = vadd.f32 %v989_v28, %v944_v16 }
 0x338   :  { %v856_v43 = vpop.permute.xlu1 %855  ;;  %v980_v22 = vpop.permute.xlu0 %979 }
 0x339   :  { %v869_v50 = vsel %vm867_vm15, %v2777_v47, %v856_v43  ;;  %v870_v62 = vsel %vm867_vm15, %v856_v43, %v2790_v56 }
 0x33a   :  { %v884_v3 = vadd.f32 %v869_v50, %v823_v44  ;;  %v885_v26 = vadd.f32 %v870_v62, %v824_v31 }
 0x33c   :  { %v860_v37 = vpop.permute.xlu1 %859  ;;  %v984_v17 = vpop.permute.xlu0 %983 }
 0x33d   :  { %v871_v32 = vsel %vm867_vm15, %v2790_v56, %v860_v37  ;;  %v872_v45 = vsel %vm867_vm15, %v860_v37, %v2800_v15 }
 0x33e   :  { %v886_v6 = vadd.f32 %v871_v32, %v825_v4  ;;  %v887_v14 = vadd.f32 %v872_v45, %v826_v20 }
 0x340   :  { %v864_v36 = vpop.permute.xlu1 %863  ;;  %v988_v25 = vpop.permute.xlu0 %987 }
 0x341   :  { %v873_v47 = vsel %vm867_vm15, %v2800_v15, %v864_v36  ;;  %v874_v23 = vsel %vm867_vm15, %v864_v36, %v2810_v51  ;;  %v1011_v30 = vadd.f32 %v988_v25, %v951_v33 }
 0x342   :  { %v888_v34 = vadd.f32 %v873_v47, %v827_v54  ;;  %v889_v49 = vadd.f32 %v874_v23, %v828_v5 }
 0x344   :  { %v917_v63 = vpop.permute.xlu1 %916  ;;  %v1036_v58 = vpop.permute.xlu0 %1035 }
 0x345   :  { %v930_v56 = vsel %vm928_vm1, %v2821_v59, %v917_v63  ;;  %v931_v21 = vsel %vm928_vm1, %v917_v63, %v919_v10  ;;  %v1050_v19 = vsel %vm1049_vm2, %v3143_v52, %v1036_v58 }
 0x346   :  { %v945_v38 = vadd.f32 %v930_v56, %v884_v3  ;;  %v946_v16 = vadd.f32 %v931_v21, %v885_v26  ;;  %v1065_v15 = vadd.f32 %v1050_v19, %v1004_v55 }
 0x348   :  { %v921_v40 = vpop.permute.xlu1 %920  ;;  %v1040_v39 = vpop.permute.xlu0 %1039 }
 0x349   :  { %v932_v51 = vsel %vm928_vm1, %v919_v10, %v921_v40  ;;  %v933_v61 = vsel %vm928_vm1, %v921_v40, %v923_v9 }
 0x34a   :  { %v947_v35 = vadd.f32 %v932_v51, %v886_v6  ;;  %v948_v2 = vadd.f32 %v933_v61, %v887_v14 }
 0x34c   :  { %v925_v27 = vpop.permute.xlu1 %924  ;;  %v1044_v11 = vpop.permute.xlu0 %1043 }
 0x34d   :  { %v934_v59 = vsel %vm928_vm1, %v923_v9, %v925_v27  ;;  %v935_v13 = vsel %vm928_vm1, %v925_v27, %v927_v53  ;;  %v3144_v53 = vld [vmem:[#allocation8_spill] sm:$0xff] }
 0x34e   :  { %v949_v57 = vadd.f32 %v934_v59, %v888_v34  ;;  %v950_v0 = vadd.f32 %v935_v13, %v889_v49 }
 0x350   :  { %v978_v42 = vpop.permute.xlu1 %977  ;;  %v1048_v18 = vpop.permute.xlu0 %1047 }
 0x351   :  { %v990_v44 = vsel %vm130_vm4, %v976_v48, %v978_v42  ;;  %v991_v31 = vsel %vm130_vm4, %v978_v42, %v980_v22  ;;  %v2883_v24 = vadd.f32 %v1048_v18, %v1011_v30 }
 0x352   :  { %v1005_v10 = vadd.f32 %v990_v44, %v945_v38  ;;  %v1006_v8 = vadd.f32 %v991_v31, %v946_v16 }
 0x354   :  { %v982_v7 = vpop.permute.xlu1 %981  ;;  %v1097_v46 = vpop.permute.xlu0 %1096 }
 0x355   :  { %v992_v12 = vsel %vm130_vm4, %v980_v22, %v982_v7  ;;  %v993_v9 = vsel %vm130_vm4, %v982_v7, %v984_v17  ;;  %v1111_v33 = vsel %vm1110_vm3, %v3144_v53, %v1097_v46 }
 0x356   :  { %v1007_v4 = vadd.f32 %v992_v12, %v947_v35  ;;  %v1008_v20 = vadd.f32 %v993_v9, %v948_v2  ;;  %v2889_v60 = vadd.f32 %v1111_v33, %v1065_v15 }
 0x358   :  { %v986_v48 = vpop.permute.xlu1 %985  ;;  %v1101_v41 = vpop.permute.xlu0 %1100 }
 0x359   :  { %v994_v29 = vsel %vm130_vm4, %v984_v17, %v986_v48  ;;  %v995_v1 = vsel %vm130_vm4, %v986_v48, %v988_v25  ;;  %vm1171_vm4 = vcmask 908288  }
 0x35a   :  { %v1009_v28 = vadd.f32 %v994_v29, %v949_v57  ;;  %v1010_v54 = vadd.f32 %v995_v1, %v950_v0 }
 0x35c   :  { %v1038_v5 = vpop.permute.xlu1 %1037  ;;  %v1105_v55 = vpop.permute.xlu0 %1104 }
 0x35d   :  { %v1051_v43 = vsel %vm1049_vm2, %v1036_v58, %v1038_v5  ;;  %v1052_v22 = vsel %vm1049_vm2, %v1038_v5, %v1040_v39 }
 0x35e   :  { %v1066_v50 = vadd.f32 %v1051_v43, %v1005_v10  ;;  %v1067_v62 = vadd.f32 %v1052_v22, %v1006_v8  ;;  %v3145_v10 = vld [vmem:[#allocation9_spill] sm:$0xff] }
 0x360   :  { %v1042_v3 = vpop.permute.xlu1 %1041  ;;  %v1109_v26 = vpop.permute.xlu0 %1108 }
 0x361   :  { %v1053_v37 = vsel %vm1049_vm2, %v1040_v39, %v1042_v3  ;;  %v1054_v32 = vsel %vm1049_vm2, %v1042_v3, %v1044_v11 }
 0x362   :  { %v1068_v45 = vadd.f32 %v1053_v37, %v1007_v4  ;;  %v1069_v17 = vadd.f32 %v1054_v32, %v1008_v20  ;;  %v3146_v4 = vld [vmem:[#allocation10_spill] sm:$0xff] }
 0x364   :  { %v1046_v6 = vpop.permute.xlu1 %1045  ;;  %v1158_v14 = vpop.permute.xlu0 %1157 }
 0x365   :  { %v1055_v36 = vsel %vm1049_vm2, %v1044_v11, %v1046_v6  ;;  %v1056_v25 = vsel %vm1049_vm2, %v1046_v6, %v1048_v18  ;;  %v1172_v8 = vsel %vm1171_vm4, %v3145_v10, %v1158_v14 }
 0x366   :  { %v1070_v47 = vadd.f32 %v1055_v36, %v1009_v28  ;;  %v1071_v23 = vadd.f32 %v1056_v25, %v1010_v54  ;;  %v1187_v48 = vadd.f32 %v1172_v8, %v2889_v60 }
 0x368   :  { %v1099_v30 = vpop.permute.xlu1 %1098  ;;  %v1162_v34 = vpop.permute.xlu0 %1161 }
 0x369   :  { %v1112_v49 = vsel %vm1110_vm3, %v1097_v46, %v1099_v30  ;;  %v1113_v63 = vsel %vm1110_vm3, %v1099_v30, %v1101_v41  ;;  %v1133_v46 = vadd.f32 %v1109_v26, %v2883_v24 }
 0x36a   :  { %v1127_v58 = vadd.f32 %v1112_v49, %v1066_v50  ;;  %v1128_v56 = vadd.f32 %v1113_v63, %v1067_v62 }
 0x36c   :  { %v1103_v21 = vpop.permute.xlu1 %1102  ;;  %v1166_v52 = vpop.permute.xlu0 %1165 }
 0x36d   :  { %v1114_v19 = vsel %vm1110_vm3, %v1101_v41, %v1103_v21  ;;  %v1115_v7 = vsel %vm1110_vm3, %v1103_v21, %v1105_v55 }
 0x36e   :  { %v1129_v38 = vadd.f32 %v1114_v19, %v1068_v45  ;;  %v1130_v41 = vadd.f32 %v1115_v7, %v1069_v17 }
 0x370   :  { %v1107_v16 = vpop.permute.xlu1 %1106  ;;  %v1170_v15 = vpop.permute.xlu0 %1169 }
 0x371   :  { %v1116_v12 = vsel %vm1110_vm3, %v1105_v55, %v1107_v16  ;;  %v1117_v9 = vsel %vm1110_vm3, %v1107_v16, %v1109_v26  ;;  %v1194_v29 = vadd.f32 %v1170_v15, %v1133_v46  ;;  %v3148_v16 = vld [vmem:[#allocation12_spill] sm:$0xff] }
 0x372   :  { %v1131_v54 = vadd.f32 %v1116_v12, %v1070_v47  ;;  %v1132_v5 = vadd.f32 %v1117_v9, %v1071_v23 }
 0x374   :  { %v1160_v40 = vpop.permute.xlu1 %1159  ;;  %v1219_v39 = vpop.permute.xlu0 %1218 }
 0x375   :  { %v1173_v53 = vsel %vm1171_vm4, %v1158_v14, %v1160_v40  ;;  %v1174_v33 = vsel %vm1171_vm4, %v1160_v40, %v1162_v34  ;;  %v1233_v20 = vsel %vm1232_vm5, %v3146_v4, %v1219_v39  ;;  %v3147_v14 = vld [vmem:[#allocation11_spill] sm:$0xff] }
 0x376   :  { %v1188_v22 = vadd.f32 %v1173_v53, %v1127_v58  ;;  %v1189_v50 = vadd.f32 %v1174_v33, %v1128_v56  ;;  %v1248_v62 = vadd.f32 %v1233_v20, %v1187_v48 }
 0x378   :  { %v1164_v51 = vpop.permute.xlu1 %1163  ;;  %v1223_v61 = vpop.permute.xlu0 %1222 }
 0x379   :  { %v1175_v1 = vsel %vm1171_vm4, %v1162_v34, %v1164_v51  ;;  %v1176_v55 = vsel %vm1171_vm4, %v1164_v51, %v1166_v52 }
 0x37a   :  { %v1190_v26 = vadd.f32 %v1175_v1, %v1129_v38  ;;  %v1191_v45 = vadd.f32 %v1176_v55, %v1130_v41 }
 0x37c   :  { %v1168_v35 = vpop.permute.xlu1 %1167  ;;  %v1227_v2 = vpop.permute.xlu0 %1226 }
 0x37d   :  { %v1177_v43 = vsel %vm1171_vm4, %v1166_v52, %v1168_v35  ;;  %v1178_v3 = vsel %vm1171_vm4, %v1168_v35, %v1170_v15 }
 0x37e   :  { %v1192_v17 = vadd.f32 %v1177_v43, %v1131_v54  ;;  %v1193_v23 = vadd.f32 %v1178_v3, %v1132_v5 }
 0x380   :  { %v1221_v27 = vpop.permute.xlu1 %1220  ;;  %v1231_v11 = vpop.permute.xlu0 %1230 }
 0x381   :  { %v1234_v60 = vsel %vm1232_vm5, %v1219_v39, %v1221_v27  ;;  %v1235_v37 = vsel %vm1232_vm5, %v1221_v27, %v1223_v61  ;;  %v1255_v56 = vadd.f32 %v1231_v11, %v1194_v29 }
 0x382   :  { %v1249_v63 = vadd.f32 %v1234_v60, %v1188_v22  ;;  %v1250_v58 = vadd.f32 %v1235_v37, %v1189_v50 }
 0x384   :  { %v1225_v59 = vpop.permute.xlu1 %1224  ;;  %v1280_v13 = vpop.permute.xlu0 %1279 }
 0x385   :  { %v1237_v32 = vsel %vm1232_vm5, %v1225_v59, %v1227_v2  ;;  %v1236_v6 = vsel %vm1232_vm5, %v1223_v61, %v1225_v59  ;;  %v1294_v36 = vsel %vm1293_vm6, %v3147_v14, %v1280_v13 }
 0x386   :  { %v1252_v21 = vadd.f32 %v1237_v32, %v1191_v45  ;;  %v1251_v52 = vadd.f32 %v1236_v6, %v1190_v26  ;;  %v1309_v19 = vadd.f32 %v1294_v36, %v1248_v62 }
 0x388   :  { %v1229_v57 = vpop.permute.xlu1 %1228  ;;  %v1284_v0 = vpop.permute.xlu0 %1283 }
 0x389   :  { %v1238_v30 = vsel %vm1232_vm5, %v1227_v2, %v1229_v57  ;;  %v1239_v34 = vsel %vm1232_vm5, %v1229_v57, %v1231_v11 }
 0x38a   :  { %v1253_v40 = vadd.f32 %v1238_v30, %v1192_v17  ;;  %v1254_v39 = vadd.f32 %v1239_v34, %v1193_v23 }
 0x38c   :  { %v1282_v42 = vpop.permute.xlu1 %1281  ;;  %v1288_v18 = vpop.permute.xlu0 %1287 }
 0x38d   :  { %v1295_v38 = vsel %vm1293_vm6, %v1280_v13, %v1282_v42  ;;  %v1296_v51 = vsel %vm1293_vm6, %v1282_v42, %v1284_v0 }
 0x38e   :  { %v1310_v10 = vadd.f32 %v1295_v38, %v1249_v63  ;;  %v1311_v46 = vadd.f32 %v1296_v51, %v1250_v58 }
 0x390   :  { %v1286_v44 = vpop.permute.xlu1 %1285  ;;  %v1292_v31 = vpop.permute.xlu0 %1291 }
 0x391   :  { %v1298_v49 = vsel %vm1293_vm6, %v1286_v44, %v1288_v18  ;;  %v1297_v27 = vsel %vm1293_vm6, %v1284_v0, %v1286_v44  ;;  %v1316_v12 = vadd.f32 %v1292_v31, %v1255_v56 }
 0x392   :  { %v1313_v61 = vadd.f32 %v1298_v49, %v1252_v21  ;;  %v1312_v53 = vadd.f32 %v1297_v27, %v1251_v52 }
 0x394   :  { %v1290_v24 = vpop.permute.xlu1 %1289  ;;  %v1341_v28 = vpop.permute.xlu0 %1340 }
 0x395   :  { %v1355_v15 = vsel %vm1354_vm7, %v3148_v16, %v1341_v28  ;;  %v1299_v59 = vsel %vm1293_vm6, %v1288_v18, %v1290_v24  ;;  %v1300_v11 = vsel %vm1293_vm6, %v1290_v24, %v1292_v31 }
 0x396   :  { %v1370_v13 = vadd.f32 %v1355_v15, %v1309_v19  ;;  %v1314_v33 = vadd.f32 %v1299_v59, %v1253_v40  ;;  %v1315_v0 = vadd.f32 %v1300_v11, %v1254_v39 }
 0x398   :  { %v1343_v25 = vpop.permute.xlu1 %1342  ;;  %v1345_v47 = vpop.permute.xlu0 %1344 }
 0x399   :  { %v1356_v8 = vsel %vm1354_vm7, %v1341_v28, %v1343_v25  ;;  %v1357_v42 = vsel %vm1354_vm7, %v1343_v25, %v1345_v47 }
 0x39a   :  { %v1371_v20 = vadd.f32 %v1356_v8, %v1310_v10  ;;  %v1372_v1 = vadd.f32 %v1357_v42, %v1311_v46 }
 0x39c   :  { %v1347_v35 = vpop.permute.xlu1 %1346  ;;  %v1349_v2 = vpop.permute.xlu0 %1348 }
 0x39d   :  { %v1359_v57 = vsel %vm1354_vm7, %v1347_v35, %v1349_v2  ;;  %v1358_v9 = vsel %vm1354_vm7, %v1345_v47, %v1347_v35 }
 0x39e   :  { %v1374_v7 = vadd.f32 %v1359_v57, %v1313_v61  ;;  %v1373_v24 = vadd.f32 %v1358_v9, %v1312_v53 }
 0x3a0   :  { %v1378_v44 = vmax.f32 %v1370_v13, %v1374_v7  ;;  %v1351_v18 = vpop.permute.xlu1 %1350  ;;  %v1353_v4 = vpop.permute.xlu0 %1352 }
 0x3a1   :  { %v1360_v48 = vsel %vm1354_vm7, %v1349_v2, %v1351_v18  ;;  %v1361_v41 = vsel %vm1354_vm7, %v1351_v18, %v1353_v4  ;;  %v1377_v29 = vadd.f32 %v1353_v4, %v1316_v12 }
 0x3a2   :  { %v1375_v28 = vadd.f32 %v1360_v48, %v1314_v33  ;;  %v1376_v31 = vadd.f32 %v1361_v41, %v1315_v0 }
 0x3a3   :  { %v1381_v54 = vsel %vm22_vm0, %v1377_v29, -inf }
 0x3a4   :  { %v1379_v5 = vmax.f32 %v1371_v20, %v1375_v28  ;;  %v1380_v55 = vmax.f32 %v1372_v1, %v1376_v31  ;;  %v1382_v43 = vmax.f32 %v1373_v24, %v1381_v54 }
 0x3a6   :  { %v1384_v22 = vmax.f32 %v1380_v55, %v1382_v43  ;;  %v1383_v50 = vmax.f32 %v1378_v44, %v1379_v5 }
 0x3a8   :  { %v1385_v62 = vmax.f32 %v1383_v50, %v1384_v22 }
 0x3aa   :  { %1386 = vmax.xlane.f32.xlu1 %v1385_v62 }
 0x437   :  { %v1387_v3 = vpop.xlane.xlu1 %1386 }
 0x438   :  { %1389 = vst.msk [vmem:[%s2945_s2] sm:$0xff] %vm1388_vm8, %v1387_v3 }

// kernel: _init_active.8
= control target key start
LH: loop header
LB: loop body
LE: loop exit
PB: predicated region body
PF: predicated region fallthrough
CT: control target
= control target key end

     0   :  { %s2901_s9 = smov 0   ;;  %s4568_s0 = inlined_call_operand.vmem [shape: f32[2,9,1020], index: 0, kind: input, shape index: {}]   ;;  %s4569_s1 = inlined_call_operand.vmem [shape: f32[2,189], index: 1, kind: input, shape index: {}]   ;;  %s4570_s2 = inlined_call_operand.vmem [shape: f32[2,2,1000], index: 2, kind: output, shape index: {}]  }
   0x1 LB: > { %s2590_s10 = sadd.s32 4294967295, %s2862_s9   ;;  %p2594_p0 = scmp.ge.s32.totalorder %s2862_s9, 1  ;;  %s2862_s9 = sphi %s2901_s9, %s12_s9  }
   0x2   : > { %p112_p1 = scmp.lt.s32.totalorder %s2862_s9, 3 }
   0x4   : > { %p113_p2 = pnand %p2594_p0, %p112_p1 }
   0x6   : > { %116 = sbr.rel (%p113_p2) target bundleno = 1010 (0x3f2), region = 28 }
   0xd   : > { %p134_p3 = scmp.lt.s32.totalorder %s2590_s10, 1  ;;  %s2864_s15 = smov 127   ;;  %vm194_vm0 = vcmask 1040384   ;;  %vm4693_vm1 = vcmask 850944   ;;  %vm4692_vm2 = vcmask 843776   ;;  %vm4681_vm3 = vcmask 1041408  }
   0xe   : > { %s2865_s16 = smov 126   ;;  %s2866_s17 = smov 125   ;;  %vm406_vm4 = vcmask 1042432   ;;  %vm512_vm5 = vcmask 1043456   ;;  %vm251_vm6 = vcmask 1039360   ;;  %vm4691_vm7 = vcmask 850945  }
   0xf   : > { %s4928_s10 = smov (!%p134_p3, %s2590_s10), 1  ;;  %s2867_s18 = smov 124   ;;  %vm618_vm8 = vcmask 1044480   ;;  %vm298_vm9 = vcmask 844800   ;;  %vm357_vm10 = vcmask 1031168   ;;  %vm395_vm11 = vcmask 850946  }
  0x10   : > { %s2614_s11 = sshll.u32 %s4928_s10, 7  ;;  %s2868_s19 = smov 123   ;;  %vm724_vm12 = vcmask 1045504   ;;  %vm404_vm13 = vcmask 845824   ;;  %vm463_vm14 = vcmask 1022976   ;;  %vm501_vm15 = vcmask 850947  }
  0x11   : > { %s2915_s14 = scalar_lea.vmem %s4568_s0, %s2614_s11  ;;  %s2869_s20 = smov 122  }
  0x12   : > { %v2918_v0 = vld [vmem:[%s2915_s14 + $0x10] sm:$0xff]  ;;  %v2921_v1 = vld [vmem:[%s2915_s14] sm:$0xff]  ;;  %v2924_v2 = vld [vmem:[%s2915_s14 + $0x18] sm:$0xff]  ;;  %s2870_s21 = smov 121   ;;  %s2871_s22 = smov 120  }
  0x13   : > { %v2927_v3 = vrot.slane %v2918_v0, 7  ;;  %162 = vst [vmem:[#allocation2 + $0x10] sm:$0xff] %v2918_v0  ;;  %v2931_v4 = vrot.slane %v2921_v1, 7  ;;  %160 = vst [vmem:[#allocation2] sm:$0xff] %v2921_v1  ;;  %v2936_v5 = vld [vmem:[%s2915_s14 + $0x8] sm:$0xff]  ;;  %v2942_v7 = vld [vmem:[%s2915_s14 + $0x20] sm:$0xff] }
  0x14   : > { %163 = vst [vmem:[#allocation2 + $0x18] sm:$0xff] %v2924_v2  ;;  %v2939_v6 = vld [vmem:[%s2915_s14 + $0x28] sm:$0xff]  ;;  %161 = vst [vmem:[#allocation2 + $0x8] sm:$0xff] %v2936_v5  ;;  %v2948_v8 = vld [vmem:[%s2915_s14 + $0x30] sm:$0xff]  ;;  %v2955_v9 = vrot.slane %v2924_v2, 7  ;;  %v2958_v10 = vrot.slane %v2936_v5, 7 }
  0x15   : > { %165 = vst [vmem:[#allocation2 + $0x28] sm:$0xff] %v2939_v6  ;;  %164 = vst [vmem:[#allocation2 + $0x20] sm:$0xff] %v2942_v7  ;;  %223 = vrot.lane.b32.xlu1 %v2927_v3, %s2864_s15  ;;  %219 = vrot.lane.b32.xlu0 %v2931_v4, %s2864_s15  ;;  %v2962_v11 = vld [vmem:[%s2915_s14 + $0x48] sm:$0x1]  ;;  %v2965_v12 = vld [vmem:[%s2915_s14 + $0x40] sm:$0x1] }
  0x16   : > { %166 = vst [vmem:[#allocation2 + $0x30] sm:$0xff] %v2948_v8  ;;  %170 = vst [vmem:[#allocation2 + $0x48] sm:$0x1] %v2962_v11  ;;  %v2970_v13 = vld [vmem:[%s2915_s14 + $0x58] sm:$0x1]  ;;  %v2993_v18 = vrot.slane %v2939_v6, 7 }
  0x17   : > { %169 = vst [vmem:[#allocation2 + $0x40] sm:$0x1] %v2965_v12  ;;  %v2973_v14 = vld [vmem:[%s2915_s14 + $0x50] sm:$0x1]  ;;  %172 = vst [vmem:[#allocation2 + $0x58] sm:$0x1] %v2970_v13 }
  0x18   : > { %171 = vst [vmem:[#allocation2 + $0x50] sm:$0x1] %v2973_v14  ;;  %v2978_v15 = vld [vmem:[%s2915_s14 + $0x68] sm:$0x1]  ;;  %v2981_v16 = vld [vmem:[%s2915_s14 + $0x60] sm:$0x1] }
  0x19   : > { %4704 = vst [vmem:[#allocation3_spill] sm:$0xff] %v2978_v15  ;;  %174 = vst [vmem:[#allocation2 + $0x68] sm:$0x1] %v2978_v15  ;;  %v2986_v17 = vld [vmem:[%s2915_s14 + $0x70] sm:$0x1]  ;;  %225 = vrot.lane.b32.xlu1 %v2955_v9, %s2864_s15  ;;  %221 = vrot.lane.b32.xlu0 %v2958_v10, %s2864_s15  ;;  %v2996_v19 = vrot.slane %v2942_v7, 7 }
  0x1a   : > { %173 = vst [vmem:[#allocation2 + $0x60] sm:$0x1] %v2981_v16  ;;  %4705 = vst [vmem:[#allocation4_spill] sm:$0xff] %v2986_v17  ;;  %v3000_v20 = vld [vmem:[%s2915_s14 + $0x38] sm:$0xff]  ;;  %v3010_v22 = vrot.slane %v2948_v8, 7  ;;  %v205_v23 = vrot.slane %v2962_v11, 7 }
  0x1b   : > { %4706 = vst [vmem:[#allocation5_spill] sm:$0xff] %v2993_v18  ;;  %175 = vst [vmem:[#allocation2 + $0x70] sm:$0x1] %v2986_v17  ;;  %v3007_v21 = vrot.slane %v3000_v20, 7  ;;  %v203_v24 = vrot.slane %v2965_v12, 7  ;;  %v209_v27 = vrot.slane %v2970_v13, 7 }
  0x1c   : > { %4707 = vst [vmem:[#allocation6_spill] sm:$0xff] %v3000_v20  ;;  %4709 = vst [vmem:[#allocation8_spill] sm:$0xff] %v3010_v22  ;;  %v3020_v25 = vsel %vm194_vm0, %v2958_v10, %v205_v23  ;;  %v207_v28 = vrot.slane %v2973_v14, 7  ;;  %v213_v31 = vrot.slane %v2978_v15, 7  ;;  %v211_v32 = vrot.slane %v2981_v16, 7  ;;  %s2872_s23 = smov 119  }
  0x1d   : > { %229 = vrot.lane.b32.xlu1 %v2993_v18, %s2864_s15  ;;  %227 = vrot.lane.b32.xlu0 %v2996_v19, %s2864_s15  ;;  %4708 = vst [vmem:[#allocation7_spill] sm:$0xff] %v3007_v21  ;;  %v3024_v26 = vsel %vm194_vm0, %v2931_v4, %v203_v24  ;;  %v3034_v29 = vsel %vm194_vm0, %v2955_v9, %v209_v27  ;;  %v3043_v33 = vld [vmem:[%s2915_s14 + $0x78] sm:$0x1]  ;;  %v215_v37 = vrot.slane %v2986_v17, 7  ;;  %v3076_v40 = vrot.slane %v2936_v5, 6  ;;  %s2873_s24 = smov 118  }
  0x1e   : > { %v3038_v30 = vsel %vm194_vm0, %v2927_v3, %v207_v28  ;;  %4710 = vst [vmem:[#allocation9_spill] sm:$0xff] %v3043_v33  ;;  %v3051_v34 = vsel %vm194_vm0, %v2993_v18, %v213_v31  ;;  %v3055_v35 = vsel %vm194_vm0, %v2996_v19, %v211_v32  ;;  %v217_v36 = vrot.slane %v3043_v33, 7  ;;  %168 = vst.msk [vmem:[#allocation2 + $0x38] sm:$0xff] %vm4693_vm1, %v3000_v20  ;;  %s2874_s25 = smov 117   ;;  %s2875_s26 = smov 116  }
  0x1f   : > { %4711 = vst [vmem:[#allocation10_spill] sm:$0xff] %v3051_v34  ;;  %v3069_v39 = vsel %vm194_vm0, %v3010_v22, %v215_v37  ;;  %v3079_v41 = vrot.slane %v2921_v1, 6  ;;  %v3086_v42 = vrot.slane %v2924_v2, 6  ;;  %v3089_v43 = vrot.slane %v2918_v0, 6  ;;  %177 = vst.msk [vmem:[#allocation2 + $0x78] sm:$0x1] %vm4692_vm2, %v3043_v33 }
  0x20   : > { %v3065_v38 = vsel %vm194_vm0, %v3007_v21, %v217_v36  ;;  %4713 = vst [vmem:[#allocation12_spill] sm:$0xff] %v3069_v39  ;;  %v3100_v44 = vrot.slane %v2939_v6, 6  ;;  %v3103_v45 = vrot.slane %v2942_v7, 6  ;;  %v3110_v46 = vrot.slane %v3000_v20, 6  ;;  %s2876_s27 = smov 115   ;;  %s2877_s28 = smov 114  }
  0x21   : > { %233 = vrot.lane.b32.xlu1 %v3007_v21, %s2864_s15  ;;  %231 = vrot.lane.b32.xlu0 %v3010_v22, %s2864_s15  ;;  %4712 = vst [vmem:[#allocation11_spill] sm:$0xff] %v3065_v38  ;;  %v3113_v47 = vrot.slane %v2948_v8, 6  ;;  %v311_v48 = vrot.slane %v2962_v11, 6  ;;  %v309_v49 = vrot.slane %v2965_v12, 6  ;;  %v315_v52 = vrot.slane %v2970_v13, 6  ;;  %s2878_s29 = smov 113  }
  0x22   : > { %4714 = vst [vmem:[#allocation13_spill] sm:$0xff] %v3100_v44  ;;  %4715 = vst [vmem:[#allocation14_spill] sm:$0xff] %v3110_v46  ;;  %v313_v53 = vrot.slane %v2973_v14, 6  ;;  %v319_v56 = vrot.slane %v2978_v15, 6  ;;  %v317_v57 = vrot.slane %v2981_v16, 6  ;;  %v323_v60 = vrot.slane %v3043_v33, 6 }
  0x23   : > { %4716 = vst [vmem:[#allocation15_spill] sm:$0xff] %v3113_v47  ;;  %v3123_v50 = vsel %vm4681_vm3, %v3076_v40, %v311_v48  ;;  %v3127_v51 = vsel %vm4681_vm3, %v3079_v41, %v309_v49  ;;  %v3137_v54 = vsel %vm4681_vm3, %v3086_v42, %v315_v52  ;;  %v321_v61 = vrot.slane %v2986_v17, 6  ;;  %s2879_s30 = smov 112   ;;  %s2880_s3 = smov 111  }
  0x24   : > { %4717 = vst [vmem:[#allocation16_spill] sm:$0xff] %v3127_v51  ;;  %v3141_v55 = vsel %vm4681_vm3, %v3089_v43, %v313_v53  ;;  %v3151_v58 = vsel %vm4681_vm3, %v3100_v44, %v319_v56  ;;  %v3155_v59 = vsel %vm4681_vm3, %v3103_v45, %v317_v57  ;;  %v3165_v62 = vsel %vm4681_vm3, %v3110_v46, %v323_v60  ;;  %s2881_s4 = smov 110   ;;  %s2882_s5 = smov 109  }
  0x25   : > { %237 = vrot.lane.b32.xlu1 %v3020_v25, %s2864_s15  ;;  %235 = vrot.lane.b32.xlu0 %v3024_v26, %s2864_s15  ;;  %4718 = vst [vmem:[#allocation17_spill] sm:$0xff] %v3151_v58  ;;  %4719 = vst [vmem:[#allocation18_spill] sm:$0xff] %v3165_v62  ;;  %v3169_v63 = vsel %vm4681_vm3, %v3113_v47, %v321_v61  ;;  %v3176_v23 = vrot.slane %v2936_v5, 5  ;;  %v3179_v24 = vrot.slane %v2921_v1, 5  ;;  %v3186_v27 = vrot.slane %v2924_v2, 5  ;;  %s2883_s6 = smov 108  }
  0x26   : > { %4720 = vst [vmem:[#allocation19_spill] sm:$0xff] %v3169_v63  ;;  %v3189_v28 = vrot.slane %v2918_v0, 5  ;;  %v3196_v31 = vrot.slane %v2939_v6, 5  ;;  %v3199_v32 = vrot.slane %v2942_v7, 5  ;;  %v3206_v36 = vrot.slane %v3000_v20, 5  ;;  %s2615_s13 = sshll.u32 %s4928_s10, 4 }
  0x27   : > { %4721 = vst [vmem:[#allocation20_spill] sm:$0xff] %v3179_v24  ;;  %v3209_v37 = vrot.slane %v2948_v8, 5  ;;  %v417_v48 = vrot.slane %v2962_v11, 5  ;;  %v415_v49 = vrot.slane %v2965_v12, 5  ;;  %v421_v56 = vrot.slane %v2970_v13, 5 }
  0x28   : > { %4722 = vst [vmem:[#allocation21_spill] sm:$0xff] %v3196_v31  ;;  %4723 = vst [vmem:[#allocation22_spill] sm:$0xff] %v3206_v36  ;;  %v419_v57 = vrot.slane %v2973_v14, 5  ;;  %vm830_vm0 = vcmask 1046528   ;;  %vm4694_vm3 = vcmask 849920  }
  0x29   : > { %241 = vrot.lane.b32.xlu1 %v3034_v29, %s2864_s15  ;;  %239 = vrot.lane.b32.xlu0 %v3038_v30, %s2864_s15  ;;  %4724 = vst [vmem:[#allocation23_spill] sm:$0xff] %v3209_v37  ;;  %v3219_v52 = vsel %vm406_vm4, %v3176_v23, %v417_v48  ;;  %v3223_v53 = vsel %vm406_vm4, %v3179_v24, %v415_v49  ;;  %v425_v48 = vrot.slane %v2978_v15, 5  ;;  %v423_v49 = vrot.slane %v2981_v16, 5 }
  0x2a   : > { %4725 = vst [vmem:[#allocation24_spill] sm:$0xff] %v3219_v52  ;;  %4726 = vst [vmem:[#allocation25_spill] sm:$0xff] %v3223_v53  ;;  %v3233_v60 = vsel %vm406_vm4, %v3186_v27, %v421_v56  ;;  %v3237_v61 = vsel %vm406_vm4, %v3189_v28, %v419_v57  ;;  %v429_v57 = vrot.slane %v3043_v33, 5 }
  0x2b   : > { %4727 = vst [vmem:[#allocation26_spill] sm:$0xff] %v3233_v60  ;;  %4728 = vst [vmem:[#allocation27_spill] sm:$0xff] %v3237_v61  ;;  %v3251_v56 = vsel %vm406_vm4, %v3199_v32, %v423_v49  ;;  %v3272_v49 = vrot.slane %v2936_v5, 4 }
  0x2c   : > { %4730 = vst [vmem:[#allocation29_spill] sm:$0xff] %v3251_v56 }
  0x2d   : > { %245 = vrot.lane.b32.xlu1 %v3051_v34, %s2864_s15  ;;  %243 = vrot.lane.b32.xlu0 %v3055_v35, %s2864_s15  ;;  %4733 = vst [vmem:[#allocation32_spill] sm:$0xff] %v3272_v49 }
  0x31   : > { %249 = vrot.lane.b32.xlu1 %v3065_v38, %s2864_s15  ;;  %247 = vrot.lane.b32.xlu0 %v3069_v39, %s2864_s15  ;;  %v527_v39 = vrot.slane %v2970_v13, 4 }
  0x35   : > { %327 = vrot.lane.b32.xlu1 %v3076_v40, %s2865_s16  ;;  %325 = vrot.lane.b32.xlu0 %v3079_v41, %s2865_s16 }
  0x39   : > { %331 = vrot.lane.b32.xlu1 %v3086_v42, %s2865_s16  ;;  %329 = vrot.lane.b32.xlu0 %v3089_v43, %s2865_s16 }
  0x3d   : > { %335 = vrot.lane.b32.xlu1 %v3100_v44, %s2865_s16  ;;  %333 = vrot.lane.b32.xlu0 %v3103_v45, %s2865_s16  ;;  %v525_v44 = vrot.slane %v2973_v14, 4 }
  0x41   : > { %339 = vrot.lane.b32.xlu1 %v3110_v46, %s2865_s16  ;;  %337 = vrot.lane.b32.xlu0 %v3113_v47, %s2865_s16  ;;  %v3261_v46 = vsel %vm406_vm4, %v3206_v36, %v429_v57  ;;  %v3285_v57 = vrot.slane %v2918_v0, 4 }
  0x42   : > { %4731 = vst [vmem:[#allocation30_spill] sm:$0xff] %v3261_v46 }
  0x43   : > { %4736 = vst [vmem:[#allocation35_spill] sm:$0xff] %v3285_v57 }
  0x45   : > { %343 = vrot.lane.b32.xlu1 %v3123_v50, %s2865_s16  ;;  %341 = vrot.lane.b32.xlu0 %v3127_v51, %s2865_s16 }
  0x49   : > { %347 = vrot.lane.b32.xlu1 %v3137_v54, %s2865_s16  ;;  %345 = vrot.lane.b32.xlu0 %v3141_v55, %s2865_s16 }
  0x4d   : > { %351 = vrot.lane.b32.xlu1 %v3151_v58, %s2865_s16  ;;  %349 = vrot.lane.b32.xlu0 %v3155_v59, %s2865_s16  ;;  %v521_v58 = vrot.slane %v2965_v12, 4 }
  0x51   : > { %355 = vrot.lane.b32.xlu1 %v3165_v62, %s2865_s16  ;;  %353 = vrot.lane.b32.xlu0 %v3169_v63, %s2865_s16  ;;  %v3247_v62 = vsel %vm406_vm4, %v3196_v31, %v425_v48  ;;  %v427_v63 = vrot.slane %v2986_v17, 5  ;;  %s143_s16 = scalar_lea.vmem %s4570_s2, %s2615_s13 }
  0x52   : > { %4729 = vst [vmem:[#allocation28_spill] sm:$0xff] %v3247_v62 }
  0x53   : > { %v3265_v48 = vsel %vm406_vm4, %v3209_v37, %v427_v63  ;;  %v3282_v63 = vrot.slane %v2924_v2, 4  ;;  %vm510_vm4 = vcmask 846848  }
  0x54   : > { %4732 = vst [vmem:[#allocation31_spill] sm:$0xff] %v3265_v48 }
  0x55   : > { %433 = vrot.lane.b32.xlu1 %v3176_v23, %s2866_s17  ;;  %431 = vrot.lane.b32.xlu0 %v3179_v24, %s2866_s17  ;;  %4735 = vst [vmem:[#allocation34_spill] sm:$0xff] %v3282_v63  ;;  %v3329_v34 = vsel %vm512_vm5, %v3282_v63, %v527_v39 }
  0x56   : > { %4743 = vst [vmem:[#allocation42_spill] sm:$0xff] %v3329_v34 }
  0x59   : > { %437 = vrot.lane.b32.xlu1 %v3186_v27, %s2866_s17  ;;  %435 = vrot.lane.b32.xlu0 %v3189_v28, %s2866_s17 }
  0x5d   : > { %441 = vrot.lane.b32.xlu1 %v3196_v31, %s2866_s17  ;;  %439 = vrot.lane.b32.xlu0 %v3199_v32, %s2866_s17  ;;  %v523_v31 = vrot.slane %v2962_v11, 4 }
  0x5f   : > { %v3315_v47 = vsel %vm512_vm5, %v3272_v49, %v523_v31  ;;  %v3333_v31 = vsel %vm512_vm5, %v3285_v57, %v525_v44 }
  0x60   : > { %4741 = vst [vmem:[#allocation40_spill] sm:$0xff] %v3315_v47  ;;  %4744 = vst [vmem:[#allocation43_spill] sm:$0xff] %v3333_v31 }
  0x61   : > { %445 = vrot.lane.b32.xlu1 %v3206_v36, %s2866_s17  ;;  %443 = vrot.lane.b32.xlu0 %v3209_v37, %s2866_s17  ;;  %v3292_v36 = vrot.slane %v2939_v6, 4  ;;  %v3305_v37 = vrot.slane %v2948_v8, 4 }
  0x63   : > { %4737 = vst [vmem:[#allocation36_spill] sm:$0xff] %v3292_v36  ;;  %4740 = vst [vmem:[#allocation39_spill] sm:$0xff] %v3305_v37 }
  0x65   : > { %449 = vrot.lane.b32.xlu1 %v3219_v52, %s2866_s17  ;;  %447 = vrot.lane.b32.xlu0 %v3223_v53, %s2866_s17  ;;  %v529_v53 = vrot.slane %v2981_v16, 4 }
  0x69   : > { %453 = vrot.lane.b32.xlu1 %v3233_v60, %s2866_s17  ;;  %451 = vrot.lane.b32.xlu0 %v3237_v61, %s2866_s17 }
  0x6d   : > { %457 = vrot.lane.b32.xlu1 %v3247_v62, %s2866_s17  ;;  %455 = vrot.lane.b32.xlu0 %v3251_v56, %s2866_s17  ;;  %v3275_v62 = vrot.slane %v2921_v1, 4 }
  0x6f   : > { %4734 = vst [vmem:[#allocation33_spill] sm:$0xff] %v3275_v62  ;;  %v3319_v38 = vsel %vm512_vm5, %v3275_v62, %v521_v58  ;;  %v531_v58 = vrot.slane %v2978_v15, 4 }
  0x70   : > { %4742 = vst [vmem:[#allocation41_spill] sm:$0xff] %v3319_v38 }
  0x71   : > { %461 = vrot.lane.b32.xlu1 %v3261_v46, %s2866_s17  ;;  %459 = vrot.lane.b32.xlu0 %v3265_v48, %s2866_s17  ;;  %v3295_v46 = vrot.slane %v2942_v7, 4  ;;  %v3302_v48 = vrot.slane %v3000_v20, 4  ;;  %v3343_v39 = vsel %vm512_vm5, %v3292_v36, %v531_v58 }
  0x72   : > { %4745 = vst [vmem:[#allocation44_spill] sm:$0xff] %v3343_v39 }
  0x73   : > { %4738 = vst [vmem:[#allocation37_spill] sm:$0xff] %v3295_v46  ;;  %4739 = vst [vmem:[#allocation38_spill] sm:$0xff] %v3302_v48  ;;  %v3347_v44 = vsel %vm512_vm5, %v3295_v46, %v529_v53 }
  0x74   : > { %4746 = vst [vmem:[#allocation45_spill] sm:$0xff] %v3347_v44 }
  0x75   : > { %539 = vrot.lane.b32.xlu1 %v3272_v49, %s2867_s18  ;;  %537 = vrot.lane.b32.xlu0 %v3275_v62, %s2867_s18 }
  0x79   : > { %543 = vrot.lane.b32.xlu1 %v3282_v63, %s2867_s18  ;;  %541 = vrot.lane.b32.xlu0 %v3285_v57, %s2867_s18 }
  0x7d   : > { %547 = vrot.lane.b32.xlu1 %v3292_v36, %s2867_s18  ;;  %545 = vrot.lane.b32.xlu0 %v3295_v46, %s2867_s18 }
  0x81   : > { %551 = vrot.lane.b32.xlu1 %v3302_v48, %s2867_s18  ;;  %549 = vrot.lane.b32.xlu0 %v3305_v37, %s2867_s18 }
  0x85   : > { %555 = vrot.lane.b32.xlu1 %v3315_v47, %s2867_s18  ;;  %553 = vrot.lane.b32.xlu0 %v3319_v38, %s2867_s18  ;;  %v535_v38 = vrot.slane %v3043_v33, 4  ;;  %v533_v47 = vrot.slane %v2986_v17, 4 }
  0x87   : > { %v224_v62 = vpop.permute.xlu1 %223  ;;  %v220_v51 = vpop.permute.xlu0 %219  ;;  %v3360_v53 = vsel %vm512_vm5, %v3302_v48, %v535_v38  ;;  %v3364_v58 = vsel %vm512_vm5, %v3305_v37, %v533_v47  ;;  %v3373_v38 = vrot.slane %v2936_v5, 3  ;;  %v3376_v47 = vrot.slane %v2921_v1, 3 }
  0x88   : > { %4747 = vst [vmem:[#allocation46_spill] sm:$0xff] %v3360_v53  ;;  %4748 = vst [vmem:[#allocation47_spill] sm:$0xff] %v3364_v58  ;;  %vm569_vm5 = vcmask 1014784  }
  0x89   : > { %559 = vrot.lane.b32.xlu1 %v3329_v34, %s2867_s18  ;;  %557 = vrot.lane.b32.xlu0 %v3333_v31, %s2867_s18  ;;  %4749 = vst [vmem:[#allocation48_spill] sm:$0xff] %v3373_v38  ;;  %4750 = vst [vmem:[#allocation49_spill] sm:$0xff] %v3376_v47 }
  0x8b   : > { %v226_v24 = vpop.permute.xlu1 %225  ;;  %v222_v63 = vpop.permute.xlu0 %221 }
  0x8c   : > { %v254_v34 = vsel %vm251_vm6, %v224_v62, %v226_v24  ;;  %v252_v49 = vsel %vm251_vm6, %v220_v51, %v222_v63  ;;  %v253_v31 = vsel %vm251_vm6, %v222_v63, %v224_v62 }
  0x8d   : > { %284 = vst [vmem:[#allocation2 + $0x50] sm:$0xfe] %v254_v34  ;;  %282 = vst [vmem:[#allocation2 + $0x40] sm:$0xfe] %v252_v49  ;;  %563 = vrot.lane.b32.xlu1 %v3343_v39, %s2867_s18  ;;  %561 = vrot.lane.b32.xlu0 %v3347_v44, %s2867_s18 }
  0x8e   : > { %283 = vst [vmem:[#allocation2 + $0x48] sm:$0xfe] %v253_v31 }
  0x8f   : > { %v230_v51 = vpop.permute.xlu1 %229  ;;  %v228_v36 = vpop.permute.xlu0 %227 }
  0x90   : > { %v255_v34 = vsel %vm251_vm6, %v226_v24, %v228_v36  ;;  %v256_v62 = vsel %vm251_vm6, %v228_v36, %v230_v51 }
  0x91   : > { %285 = vst [vmem:[#allocation2 + $0x58] sm:$0xfe] %v255_v34  ;;  %286 = vst [vmem:[#allocation2 + $0x60] sm:$0xfe] %v256_v62  ;;  %567 = vrot.lane.b32.xlu1 %v3360_v53, %s2867_s18  ;;  %565 = vrot.lane.b32.xlu0 %v3364_v58, %s2867_s18  ;;  %v3388_v58 = vrot.slane %v2924_v2, 3 }
  0x93   : > { %v234_v49 = vpop.permute.xlu1 %233  ;;  %v232_v63 = vpop.permute.xlu0 %231  ;;  %4751 = vst [vmem:[#allocation50_spill] sm:$0xff] %v3388_v58 }
  0x94   : > { %290 = vst.msk [vmem:[#allocation2 + $0x78] sm:$0xfe] %vm4691_vm7, %v234_v49  ;;  %v257_v24 = vsel %vm251_vm6, %v230_v51, %v232_v63  ;;  %v258_v36 = vsel %vm251_vm6, %v232_v63, %v234_v49  ;;  %v1971_v34 = vld [vmem:[#allocation2 + $0x40] sm:$0xff]  ;;  %v3391_v51 = vrot.slane %v2918_v0, 3 }
  0x95   : > { %v1972_v31 = vld [vmem:[#allocation2 + $0x48] sm:$0xff]  ;;  %287 = vst [vmem:[#allocation2 + $0x68] sm:$0xfe] %v257_v24  ;;  %288 = vst [vmem:[#allocation2 + $0x70] sm:$0xfe] %v258_v36  ;;  %645 = vrot.lane.b32.xlu1 %v3373_v38, %s2868_s19  ;;  %643 = vrot.lane.b32.xlu0 %v3376_v47, %s2868_s19  ;;  %v2618_v53 = vpack.c.bf16 %v1971_v34, %v2921_v1  ;;  %v1973_v24 = vld [vmem:[#allocation2 + $0x50] sm:$0xff] }
  0x96   : > { %v2616_v62 = vpack.c.bf16 %v1972_v31, %v2936_v5  ;;  %4752 = vst [vmem:[#allocation51_spill] sm:$0xff] %v3391_v51  ;;  %v3400_v34 = vrot.slane %v2939_v6, 3  ;;  %v2668_v39 = vpack.c.bf16 %v1973_v24, %v2918_v0  ;;  %v3416_v24 = vrot.slane %v2948_v8, 3 }
  0x97   : > { %v238_v49 = vpop.permute.xlu1 %237  ;;  %v236_v63 = vpop.permute.xlu0 %235 }
  0x98   : > { %2617 = vmatprep.subr.bf16.mxu0 %v2616_v62  ;;  %v259_v36 = vsel %vm251_vm6, %v236_v63, %v238_v49  ;;  %v1974_v48 = vld [vmem:[#allocation2 + $0x58] sm:$0xff]  ;;  %4753 = vst [vmem:[#allocation52_spill] sm:$0xff] %v3400_v34  ;;  %v3403_v62 = vrot.slane %v2942_v7, 3  ;;  %4756 = vst [vmem:[#allocation55_spill] sm:$0xff] %v3416_v24 }
  0x99   : > { %2619 = vmatpush1.bf16.msra.mxu0 %v2618_v53  ;;  %291 = vst [vmem:[#allocation2 + $0x80] sm:$0x3] %v259_v36  ;;  %649 = vrot.lane.b32.xlu1 %v3388_v58, %s2868_s19  ;;  %v2666_v31 = vpack.c.bf16 %v1974_v48, %v2924_v2  ;;  %v3413_v48 = vrot.slane %v3000_v20, 3 }
  0x9a   : > { %647 = vrot.lane.b32.xlu0 %v3391_v51, %s2868_s19  ;;  %4754 = vst [vmem:[#allocation53_spill] sm:$0xff] %v3403_v62 }
  0x9b   : > { %v242_v63 = vpop.permute.xlu1 %241  ;;  %2667 = vmatprep.subr.bf16.mxu1 %v2666_v31  ;;  %v240_v53 = vpop.permute.xlu0 %239  ;;  %4755 = vst [vmem:[#allocation54_spill] sm:$0xff] %v3413_v48  ;;  %v629_v31 = vrot.slane %v2962_v11, 3 }
  0x9c   : > { %v260_v36 = vsel %vm251_vm6, %v238_v49, %v240_v53  ;;  %v261_v37 = vsel %vm251_vm6, %v240_v53, %v242_v63  ;;  %2669 = vmatpush1.bf16.msra.mxu1 %v2668_v39  ;;  %v627_v49 = vrot.slane %v2965_v12, 3 }
  0x9d   : > { %292 = vst [vmem:[#allocation2 + $0x88] sm:$0x3] %v260_v36  ;;  %293 = vst [vmem:[#allocation2 + $0x90] sm:$0x3] %v261_v37  ;;  %653 = vrot.lane.b32.xlu1 %v3400_v34, %s2868_s19  ;;  %v3428_v44 = vsel %vm618_vm8, %v3373_v38, %v629_v31 }
  0x9e   : > { %651 = vrot.lane.b32.xlu0 %v3403_v62, %s2868_s19  ;;  %4757 = vst [vmem:[#allocation56_spill] sm:$0xff] %v3428_v44  ;;  %v3432_v46 = vsel %vm618_vm8, %v3376_v47, %v627_v49  ;;  %v639_v47 = vrot.slane %v2986_v17, 3 }
  0x9f   : > { %v246_v53 = vpop.permute.xlu1 %245  ;;  %v244_v39 = vpop.permute.xlu0 %243  ;;  %4758 = vst [vmem:[#allocation57_spill] sm:$0xff] %v3432_v46 }
  0xa0   : > { %v262_v37 = vsel %vm251_vm6, %v242_v63, %v244_v39  ;;  %v263_v36 = vsel %vm251_vm6, %v244_v39, %v246_v53  ;;  %v633_v63 = vrot.slane %v2970_v13, 3  ;;  %v631_v39 = vrot.slane %v2973_v14, 3 }
  0xa1   : > { %294 = vst [vmem:[#allocation2 + $0x98] sm:$0x3] %v262_v37  ;;  %295 = vst [vmem:[#allocation2 + $0xa0] sm:$0x3] %v263_v36  ;;  %657 = vrot.lane.b32.xlu1 %v3413_v48, %s2868_s19 }
  0xa2   : > { %655 = vrot.lane.b32.xlu0 %v3416_v24, %s2868_s19  ;;  %v3445_v31 = vsel %vm618_vm8, %v3388_v58, %v633_v63  ;;  %v3449_v49 = vsel %vm618_vm8, %v3391_v51, %v631_v39 }
  0xa3   : > { %v250_v37 = vpop.permute.xlu1 %249  ;;  %v248_v36 = vpop.permute.xlu0 %247  ;;  %4759 = vst [vmem:[#allocation58_spill] sm:$0xff] %v3445_v31  ;;  %4760 = vst [vmem:[#allocation59_spill] sm:$0xff] %v3449_v49 }
  0xa4   : > { %299 = vst.msk [vmem:[#allocation2 + $0xb8] sm:$0x3] %vm298_vm9, %v250_v37  ;;  %v264_v57 = vsel %vm251_vm6, %v246_v53, %v248_v36  ;;  %v265_v60 = vsel %vm251_vm6, %v248_v36, %v250_v37  ;;  %v637_v53 = vrot.slane %v2978_v15, 3  ;;  %vm607_vm6 = vcmask 850948  }
  0xa5   : > { %296 = vst [vmem:[#allocation2 + $0xa8] sm:$0x3] %v264_v57  ;;  %297 = vst [vmem:[#allocation2 + $0xb0] sm:$0x3] %v265_v60  ;;  %661 = vrot.lane.b32.xlu1 %v3428_v44, %s2868_s19  ;;  %v635_v57 = vrot.slane %v2981_v16, 3 }
  0xa6   : > { %659 = vrot.lane.b32.xlu0 %v3432_v46, %s2868_s19  ;;  %v3460_v63 = vsel %vm618_vm8, %v3400_v34, %v637_v53  ;;  %v641_v46 = vrot.slane %v3043_v33, 3 }
  0xa7   : > { %v328_v60 = vpop.permute.xlu1 %327  ;;  %v326_v37 = vpop.permute.xlu0 %325  ;;  %4761 = vst [vmem:[#allocation60_spill] sm:$0xff] %v3460_v63  ;;  %v3464_v39 = vsel %vm618_vm8, %v3403_v62, %v635_v57  ;;  %v3480_v57 = vsel %vm618_vm8, %v3416_v24, %v639_v47  ;;  %v3492_v47 = vrot.slane %v2921_v1, 2 }
  0xa8   : > { %v358_v36 = vsel %vm357_vm10, %v326_v37, %v328_v60  ;;  %4762 = vst [vmem:[#allocation61_spill] sm:$0xff] %v3464_v39  ;;  %v3476_v53 = vsel %vm618_vm8, %v3413_v48, %v641_v46  ;;  %4764 = vst [vmem:[#allocation63_spill] sm:$0xff] %v3480_v57  ;;  %v3489_v46 = vrot.slane %v2936_v5, 2 }
  0xa9   : > { %388 = vst [vmem:[#allocation2 + $0x80] sm:$0xfc] %v358_v36  ;;  %665 = vrot.lane.b32.xlu1 %v3445_v31, %s2868_s19  ;;  %4763 = vst [vmem:[#allocation62_spill] sm:$0xff] %v3476_v53 }
  0xaa   : > { %663 = vrot.lane.b32.xlu0 %v3449_v49, %s2868_s19  ;;  %4765 = vst [vmem:[#allocation64_spill] sm:$0xff] %v3492_v47 }
  0xab   : > { %v332_v37 = vpop.permute.xlu1 %331  ;;  %v330_v36 = vpop.permute.xlu0 %329 }
  0xac   : > { %v359_v44 = vsel %vm357_vm10, %v328_v60, %v330_v36  ;;  %v360_v31 = vsel %vm357_vm10, %v330_v36, %v332_v37 }
  0xad   : > { %389 = vst [vmem:[#allocation2 + $0x88] sm:$0xfc] %v359_v44  ;;  %390 = vst [vmem:[#allocation2 + $0x90] sm:$0xfc] %v360_v31  ;;  %669 = vrot.lane.b32.xlu1 %v3460_v63, %s2868_s19 }
  0xae   : > { %667 = vrot.lane.b32.xlu0 %v3464_v39, %s2868_s19  ;;  %v735_v39 = vrot.slane %v2962_v11, 2 }
  0xaf   : > { %v336_v34 = vpop.permute.xlu1 %335  ;;  %v334_v60 = vpop.permute.xlu0 %333 }
  0xb0   : > { %v361_v36 = vsel %vm357_vm10, %v332_v37, %v334_v60  ;;  %v362_v44 = vsel %vm357_vm10, %v334_v60, %v336_v34  ;;  %v3540_v58 = vsel %vm724_vm12, %v3489_v46, %v735_v39 }
  0xb1   : > { %391 = vst [vmem:[#allocation2 + $0x98] sm:$0xfc] %v361_v36  ;;  %392 = vst [vmem:[#allocation2 + $0xa0] sm:$0xfc] %v362_v44  ;;  %673 = vrot.lane.b32.xlu1 %v3476_v53, %s2868_s19  ;;  %v3502_v36 = vrot.slane %v2924_v2, 2  ;;  %v3505_v44 = vrot.slane %v2918_v0, 2 }
  0xb2   : > { %671 = vrot.lane.b32.xlu0 %v3480_v57, %s2868_s19  ;;  %4769 = vst [vmem:[#allocation68_spill] sm:$0xff] %v3540_v58 }
  0xb3   : > { %v340_v31 = vpop.permute.xlu1 %339  ;;  %v338_v48 = vpop.permute.xlu0 %337 }
  0xb4   : > { %396 = vst.msk [vmem:[#allocation2 + $0xb8] sm:$0xfc] %vm395_vm11, %v340_v31  ;;  %v363_v37 = vsel %vm357_vm10, %v336_v34, %v338_v48  ;;  %v364_v60 = vsel %vm357_vm10, %v338_v48, %v340_v31  ;;  %v3513_v48 = vrot.slane %v2939_v6, 2  ;;  %v3516_v31 = vrot.slane %v2942_v7, 2 }
  0xb5   : > { %393 = vst [vmem:[#allocation2 + $0xa8] sm:$0xfc] %v363_v37  ;;  %394 = vst [vmem:[#allocation2 + $0xb0] sm:$0xfc] %v364_v60  ;;  %751 = vrot.lane.b32.xlu1 %v3489_v46, %s2869_s20 }
  0xb6   : > { %749 = vrot.lane.b32.xlu0 %v3492_v47, %s2869_s20  ;;  %4766 = vst [vmem:[#allocation65_spill] sm:$0xff] %v3513_v48 }
  0xb7   : > { %v344_v53 = vpop.permute.xlu1 %343  ;;  %v342_v57 = vpop.permute.xlu0 %341 }
  0xb8   : > { %v365_v34 = vsel %vm357_vm10, %v342_v57, %v344_v53  ;;  %v3525_v57 = vrot.slane %v3000_v20, 2 }
  0xb9   : > { %397 = vst [vmem:[#allocation2 + $0xc0] sm:$0x7] %v365_v34  ;;  %755 = vrot.lane.b32.xlu1 %v3502_v36, %s2869_s20  ;;  %v3528_v34 = vrot.slane %v2948_v8, 2 }
  0xba   : > { %753 = vrot.lane.b32.xlu0 %v3505_v44, %s2869_s20  ;;  %4767 = vst [vmem:[#allocation66_spill] sm:$0xff] %v3525_v57 }
  0xbb   : > { %v348_v37 = vpop.permute.xlu1 %347  ;;  %v346_v60 = vpop.permute.xlu0 %345  ;;  %4768 = vst [vmem:[#allocation67_spill] sm:$0xff] %v3528_v34 }
  0xbc   : > { %v366_v24 = vsel %vm357_vm10, %v344_v53, %v346_v60  ;;  %v367_v63 = vsel %vm357_vm10, %v346_v60, %v348_v37  ;;  %v733_v53 = vrot.slane %v2965_v12, 2 }
  0xbd   : > { %398 = vst [vmem:[#allocation2 + $0xc8] sm:$0x7] %v366_v24  ;;  %399 = vst [vmem:[#allocation2 + $0xd0] sm:$0x7] %v367_v63  ;;  %759 = vrot.lane.b32.xlu1 %v3513_v48, %s2869_s20 }
  0xbe   : > { %757 = vrot.lane.b32.xlu0 %v3516_v31, %s2869_s20  ;;  %v3544_v62 = vsel %vm724_vm12, %v3492_v47, %v733_v53 }
  0xbf   : > { %v352_v49 = vpop.permute.xlu1 %351  ;;  %v350_v60 = vpop.permute.xlu0 %349  ;;  %4770 = vst [vmem:[#allocation69_spill] sm:$0xff] %v3544_v62 }
  0xc0   : > { %v368_v24 = vsel %vm357_vm10, %v348_v37, %v350_v60  ;;  %v369_v63 = vsel %vm357_vm10, %v350_v60, %v352_v49  ;;  %v739_v37 = vrot.slane %v2970_v13, 2  ;;  %v737_v60 = vrot.slane %v2973_v14, 2 }
  0xc1   : > { %400 = vst [vmem:[#allocation2 + $0xd8] sm:$0x7] %v368_v24  ;;  %401 = vst [vmem:[#allocation2 + $0xe0] sm:$0x7] %v369_v63  ;;  %763 = vrot.lane.b32.xlu1 %v3525_v57, %s2869_s20 }
  0xc2   : > { %761 = vrot.lane.b32.xlu0 %v3528_v34, %s2869_s20  ;;  %v3557_v39 = vsel %vm724_vm12, %v3502_v36, %v739_v37  ;;  %v3561_v53 = vsel %vm724_vm12, %v3505_v44, %v737_v60 }
  0xc3   : > { %v356_v24 = vpop.permute.xlu1 %355  ;;  %v354_v63 = vpop.permute.xlu0 %353  ;;  %4771 = vst [vmem:[#allocation70_spill] sm:$0xff] %v3557_v39 }
  0xc4   : > { %405 = vst.msk [vmem:[#allocation2 + $0xf8] sm:$0x7] %vm404_vm13, %v356_v24  ;;  %v370_v38 = vsel %vm357_vm10, %v352_v49, %v354_v63  ;;  %v371_v51 = vsel %vm357_vm10, %v354_v63, %v356_v24  ;;  %v743_v49 = vrot.slane %v2978_v15, 2  ;;  %vm4697_vm10 = vcmask 847872  }
  0xc5   : > { %402 = vst [vmem:[#allocation2 + $0xe8] sm:$0x7] %v370_v38  ;;  %403 = vst [vmem:[#allocation2 + $0xf0] sm:$0x7] %v371_v51  ;;  %767 = vrot.lane.b32.xlu1 %v3540_v58, %s2869_s20  ;;  %v741_v38 = vrot.slane %v2981_v16, 2  ;;  %v745_v58 = vrot.slane %v2986_v17, 2 }
  0xc6   : > { %765 = vrot.lane.b32.xlu0 %v3544_v62, %s2869_s20  ;;  %v3572_v37 = vsel %vm724_vm12, %v3513_v48, %v743_v49  ;;  %v747_v62 = vrot.slane %v3043_v33, 2 }
  0xc7   : > { %v434_v51 = vpop.permute.xlu1 %433  ;;  %v432_v24 = vpop.permute.xlu0 %431  ;;  %4772 = vst [vmem:[#allocation71_spill] sm:$0xff] %v3572_v37  ;;  %v3576_v60 = vsel %vm724_vm12, %v3516_v31, %v741_v38  ;;  %v3592_v38 = vsel %vm724_vm12, %v3528_v34, %v745_v58  ;;  %v3604_v58 = vrot.slane %v2921_v1, 1  ;;  %v1982_v34 = vld [vmem:[#allocation2 + $0x98] sm:$0xff] }
  0xc8   : > { %v464_v63 = vsel %vm463_vm14, %v432_v24, %v434_v51  ;;  %4773 = vst [vmem:[#allocation72_spill] sm:$0xff] %v3576_v60  ;;  %v3588_v49 = vsel %vm724_vm12, %v3525_v57, %v747_v62  ;;  %4775 = vst [vmem:[#allocation74_spill] sm:$0xff] %v3592_v38  ;;  %v3601_v62 = vrot.slane %v2936_v5, 1  ;;  %v1979_v5 = vld [vmem:[#allocation2 + $0x80] sm:$0xff]  ;;  %vm675_vm12 = vcmask 1006592  }
  0xc9   : > { %494 = vst [vmem:[#allocation2 + $0xc0] sm:$0xf8] %v464_v63  ;;  %771 = vrot.lane.b32.xlu1 %v3557_v39, %s2869_s20  ;;  %4774 = vst [vmem:[#allocation73_spill] sm:$0xff] %v3588_v49 }
  0xca   : > { %769 = vrot.lane.b32.xlu0 %v3561_v53, %s2869_s20  ;;  %4776 = vst [vmem:[#allocation75_spill] sm:$0xff] %v3604_v58 }
  0xcb   : > { %v438_v24 = vpop.permute.xlu1 %437  ;;  %v436_v63 = vpop.permute.xlu0 %435 }
  0xcc   : > { %v465_v47 = vsel %vm463_vm14, %v434_v51, %v436_v63  ;;  %v466_v39 = vsel %vm463_vm14, %v436_v63, %v438_v24 }
  0xcd   : > { %495 = vst [vmem:[#allocation2 + $0xc8] sm:$0xf8] %v465_v47  ;;  %496 = vst [vmem:[#allocation2 + $0xd0] sm:$0xf8] %v466_v39  ;;  %775 = vrot.lane.b32.xlu1 %v3572_v37, %s2869_s20 }
  0xce   : > { %773 = vrot.lane.b32.xlu0 %v3576_v60, %s2869_s20 }
  0xcf   : > { %v442_v48 = vpop.permute.xlu1 %441  ;;  %v440_v51 = vpop.permute.xlu0 %439 }
  0xd0   : > { %v467_v63 = vsel %vm463_vm14, %v438_v24, %v440_v51  ;;  %v468_v47 = vsel %vm463_vm14, %v440_v51, %v442_v48  ;;  %v1987_v24 = vld [vmem:[#allocation2 + $0xc0] sm:$0xff] }
  0xd1   : > { %497 = vst [vmem:[#allocation2 + $0xd8] sm:$0xf8] %v467_v63  ;;  %498 = vst [vmem:[#allocation2 + $0xe0] sm:$0xf8] %v468_v47  ;;  %779 = vrot.lane.b32.xlu1 %v3588_v49, %s2869_s20  ;;  %v1980_v47 = vld [vmem:[#allocation2 + $0x88] sm:$0xff] }
  0xd2   : > { %777 = vrot.lane.b32.xlu0 %v3592_v38, %s2869_s20  ;;  %v3614_v38 = vrot.slane %v2924_v2, 1 }
  0xd3   : > { %v446_v39 = vpop.permute.xlu1 %445  ;;  %v444_v57 = vpop.permute.xlu0 %443 }
  0xd4   : > { %502 = vst.msk [vmem:[#allocation2 + $0xf8] sm:$0xf8] %vm501_vm15, %v446_v39  ;;  %v469_v51 = vsel %vm463_vm14, %v442_v48, %v444_v57  ;;  %v470_v63 = vsel %vm463_vm14, %v444_v57, %v446_v39  ;;  %v1988_v49 = vld [vmem:[#allocation2 + $0xc8] sm:$0xff]  ;;  %v3617_v48 = vrot.slane %v2918_v0, 1  ;;  %v2622_v57 = vpack.c.bf16 %v1987_v24, %v1979_v5  ;;  %v1981_v0 = vld [vmem:[#allocation2 + $0x90] sm:$0xff] }
  0xd5   : > { %499 = vst [vmem:[#allocation2 + $0xe8] sm:$0xf8] %v469_v51  ;;  %500 = vst [vmem:[#allocation2 + $0xf0] sm:$0xf8] %v470_v63  ;;  %857 = vrot.lane.b32.xlu1 %v3601_v62, %s2870_s21  ;;  %v2620_v1 = vpack.c.bf16 %v1988_v49, %v1980_v47  ;;  %v1989_v51 = vld [vmem:[#allocation2 + $0xd0] sm:$0xff]  ;;  %v3625_v49 = vrot.slane %v2939_v6, 1 }
  0xd6   : > { %855 = vrot.lane.b32.xlu0 %v3604_v58, %s2870_s21  ;;  %v3628_v24 = vrot.slane %v2942_v7, 1  ;;  %v2672_v47 = vpack.c.bf16 %v1989_v51, %v1981_v0  ;;  %v3637_v6 = vrot.slane %v3000_v20, 1  ;;  %v3640_v7 = vrot.slane %v2948_v8, 1 }
  0xd7   : > { %v450_v39 = vpop.permute.xlu1 %449  ;;  %v448_v37 = vpop.permute.xlu0 %447  ;;  %2621 = vmatprep.subr.bf16.mxu0 %v2620_v1  ;;  %4777 = vst [vmem:[#allocation76_spill] sm:$0xff] %v3625_v49 }
  0xd8   : > { %v471_v63 = vsel %vm463_vm14, %v448_v37, %v450_v39  ;;  %2623 = vmatpush1.bf16.msra.mxu0 %v2622_v57  ;;  %v1990_v60 = vld [vmem:[#allocation2 + $0xd8] sm:$0xff]  ;;  %4778 = vst [vmem:[#allocation77_spill] sm:$0xff] %v3637_v6  ;;  %4779 = vst [vmem:[#allocation78_spill] sm:$0xff] %v3640_v7 }
  0xd9   : > { %503 = vst [vmem:[#allocation2 + $0x100] sm:$0xf] %v471_v63  ;;  %861 = vrot.lane.b32.xlu1 %v3614_v38, %s2870_s21  ;;  %v2670_v2 = vpack.c.bf16 %v1990_v60, %v1982_v34  ;;  %v841_v34 = vrot.slane %v2962_v11, 1  ;;  %v839_v60 = vrot.slane %v2965_v12, 1 }
  0xda   : > { %859 = vrot.lane.b32.xlu0 %v3617_v48, %s2870_s21 }
  0xdb   : > { %v454_v37 = vpop.permute.xlu1 %453  ;;  %2671 = vmatprep.subr.bf16.mxu1 %v2670_v2  ;;  %v452_v1 = vpop.permute.xlu0 %451  ;;  %v3652_v8 = vsel %vm830_vm0, %v3601_v62, %v841_v34  ;;  %v3656_v0 = vsel %vm830_vm0, %v3604_v58, %v839_v60 }
  0xdc   : > { %v472_v5 = vsel %vm463_vm14, %v450_v39, %v452_v1  ;;  %v473_v57 = vsel %vm463_vm14, %v452_v1, %v454_v37  ;;  %2673 = vmatpush1.bf16.msra.mxu1 %v2672_v47  ;;  %4780 = vst [vmem:[#allocation79_spill] sm:$0xff] %v3656_v0  ;;  %v845_v47 = vrot.slane %v2970_v13, 1 }
  0xdd   : > { %504 = vst [vmem:[#allocation2 + $0x108] sm:$0xf] %v472_v5  ;;  %505 = vst [vmem:[#allocation2 + $0x110] sm:$0xf] %v473_v57  ;;  %865 = vrot.lane.b32.xlu1 %v3625_v49, %s2870_s21 }
  0xde   : > { %863 = vrot.lane.b32.xlu0 %v3628_v24, %s2870_s21  ;;  %v3669_v34 = vsel %vm830_vm0, %v3614_v38, %v845_v47 }
  0xdf   : > { %v458_v39 = vpop.permute.xlu1 %457  ;;  %v456_v51 = vpop.permute.xlu0 %455 }
  0xe0   : > { %v474_v63 = vsel %vm463_vm14, %v454_v37, %v456_v51  ;;  %v475_v2 = vsel %vm463_vm14, %v456_v51, %v458_v39  ;;  %v843_v37 = vrot.slane %v2973_v14, 1 }
  0xe1   : > { %506 = vst [vmem:[#allocation2 + $0x118] sm:$0xf] %v474_v63  ;;  %507 = vst [vmem:[#allocation2 + $0x120] sm:$0xf] %v475_v2  ;;  %869 = vrot.lane.b32.xlu1 %v3637_v6, %s2870_s21  ;;  %v847_v63 = vrot.slane %v2981_v16, 1 }
  0xe2   : > { %867 = vrot.lane.b32.xlu0 %v3640_v7, %s2870_s21  ;;  %v3673_v60 = vsel %vm830_vm0, %v3617_v48, %v843_v37 }
  0xe3   : > { %v462_v1 = vpop.permute.xlu1 %461  ;;  %v460_v5 = vpop.permute.xlu0 %459  ;;  %v3688_v37 = vsel %vm830_vm0, %v3628_v24, %v847_v63 }
  0xe4   : > { %511 = vst.msk [vmem:[#allocation2 + $0x138] sm:$0xf] %vm510_vm4, %v462_v1  ;;  %v476_v57 = vsel %vm463_vm14, %v458_v39, %v460_v5  ;;  %v477_v51 = vsel %vm463_vm14, %v460_v5, %v462_v1  ;;  %v849_v39 = vrot.slane %v2978_v15, 1  ;;  %vm4695_vm14 = vcmask 850949  }
  0xe5   : > { %508 = vst [vmem:[#allocation2 + $0x128] sm:$0xf] %v476_v57  ;;  %509 = vst [vmem:[#allocation2 + $0x130] sm:$0xf] %v477_v51  ;;  %873 = vrot.lane.b32.xlu1 %v3652_v8, %s2870_s21  ;;  %v853_v57 = vrot.slane %v3043_v33, 1  ;;  %v851_v51 = vrot.slane %v2986_v17, 1 }
  0xe6   : > { %871 = vrot.lane.b32.xlu0 %v3656_v0, %s2870_s21  ;;  %v3684_v47 = vsel %vm830_vm0, %v3625_v49, %v849_v39 }
  0xe7   : > { %v540_v2 = vpop.permute.xlu1 %539  ;;  %v538_v1 = vpop.permute.xlu0 %537  ;;  %4781 = vst [vmem:[#allocation80_spill] sm:$0xff] %v3684_v47  ;;  %v3700_v39 = vsel %vm830_vm0, %v3637_v6, %v853_v57  ;;  %v3704_v63 = vsel %vm830_vm0, %v3640_v7, %v851_v51  ;;  %vm4696_vm0 = vcmask 848896  }
  0xe8   : > { %v570_v5 = vsel %vm569_vm5, %v538_v1, %v540_v2  ;;  %4782 = vst [vmem:[#allocation81_spill] sm:$0xff] %v3700_v39  ;;  %4783 = vst [vmem:[#allocation82_spill] sm:$0xff] %v3704_v63 }
  0xe9   : > { %600 = vst [vmem:[#allocation2 + $0x100] sm:$0xf0] %v570_v5  ;;  %877 = vrot.lane.b32.xlu1 %v3669_v34, %s2870_s21 }
  0xea   : > { %875 = vrot.lane.b32.xlu0 %v3673_v60, %s2870_s21 }
  0xeb   : > { %v544_v1 = vpop.permute.xlu1 %543  ;;  %v542_v5 = vpop.permute.xlu0 %541 }
  0xec   : > { %v571_v0 = vsel %vm569_vm5, %v540_v2, %v542_v5  ;;  %v572_v58 = vsel %vm569_vm5, %v542_v5, %v544_v1 }
  0xed   : > { %601 = vst [vmem:[#allocation2 + $0x108] sm:$0xf0] %v571_v0  ;;  %602 = vst [vmem:[#allocation2 + $0x110] sm:$0xf0] %v572_v58  ;;  %881 = vrot.lane.b32.xlu1 %v3684_v47, %s2870_s21 }
  0xee   : > { %879 = vrot.lane.b32.xlu0 %v3688_v37, %s2870_s21 }
  0xef   : > { %v548_v49 = vpop.permute.xlu1 %547  ;;  %v546_v2 = vpop.permute.xlu0 %545 }
  0xf0   : > { %v573_v5 = vsel %vm569_vm5, %v544_v1, %v546_v2  ;;  %v574_v58 = vsel %vm569_vm5, %v546_v2, %v548_v49  ;;  %v3715_v1 = vld [vmem:[#allocation2 + $0x8] sm:$0xff]  ;;  %v3719_v2 = vld [vmem:[#allocation2] sm:$0xff] }
  0xf1   : > { %603 = vst [vmem:[#allocation2 + $0x118] sm:$0xf0] %v573_v5  ;;  %604 = vst [vmem:[#allocation2 + $0x120] sm:$0xf0] %v574_v58  ;;  %885 = vrot.lane.b32.xlu1 %v3700_v39, %s2870_s21 }
  0xf2   : > { %883 = vrot.lane.b32.xlu0 %v3704_v63, %s2870_s21  ;;  %4784 = vst [vmem:[#allocation83_spill] sm:$0xff] %v3719_v2 }
  0xf3   : > { %v552_v0 = vpop.permute.xlu1 %551  ;;  %v550_v57 = vpop.permute.xlu0 %549 }
  0xf4   : > { %608 = vst.msk [vmem:[#allocation2 + $0x138] sm:$0xf0] %vm607_vm6, %v552_v0  ;;  %v575_v51 = vsel %vm569_vm5, %v548_v49, %v550_v57  ;;  %v576_v6 = vsel %vm569_vm5, %v550_v57, %v552_v0  ;;  %v3724_v49 = vld [vmem:[#allocation2 + $0x18] sm:$0xff] }
  0xf5   : > { %605 = vst [vmem:[#allocation2 + $0x128] sm:$0xf0] %v575_v51  ;;  %606 = vst [vmem:[#allocation2 + $0x130] sm:$0xf0] %v576_v6  ;;  %937 = vrot.lane.b32.xlu1 %v3715_v1, %s2871_s22  ;;  %v3728_v6 = vld [vmem:[#allocation2 + $0x10] sm:$0xff] }
  0xf6   : > { %935 = vrot.lane.b32.xlu0 %v3719_v2, %s2871_s22  ;;  %4785 = vst [vmem:[#allocation84_spill] sm:$0xff] %v3728_v6 }
  0xf7   : > { %v556_v5 = vpop.permute.xlu1 %555  ;;  %v554_v58 = vpop.permute.xlu0 %553 }
  0xf8   : > { %v577_v39 = vsel %vm569_vm5, %v554_v58, %v556_v5  ;;  %v2850_v58 = vld [vmem:[#allocation2 + $0x28] sm:$0xff] }
  0xf9   : > { %609 = vst [vmem:[#allocation2 + $0x140] sm:$0x1f] %v577_v39  ;;  %941 = vrot.lane.b32.xlu1 %v3724_v49, %s2871_s22  ;;  %v3735_v39 = vld [vmem:[#allocation2 + $0x20] sm:$0xff] }
  0xfa   : > { %939 = vrot.lane.b32.xlu0 %v3728_v6, %s2871_s22 }
  0xfb   : > { %v560_v0 = vpop.permute.xlu1 %559  ;;  %v558_v57 = vpop.permute.xlu0 %557 }
  0xfc   : > { %v578_v51 = vsel %vm569_vm5, %v556_v5, %v558_v57  ;;  %v579_v63 = vsel %vm569_vm5, %v558_v57, %v560_v0 }
  0xfd   : > { %610 = vst [vmem:[#allocation2 + $0x148] sm:$0x1f] %v578_v51  ;;  %611 = vst [vmem:[#allocation2 + $0x150] sm:$0x1f] %v579_v63  ;;  %945 = vrot.lane.b32.xlu1 %v2850_v58, %s2871_s22  ;;  %v2852_v63 = vld [vmem:[#allocation2 + $0x30] sm:$0xff] }
  0xfe   : > { %943 = vrot.lane.b32.xlu0 %v3735_v39, %s2871_s22 }
  0xff   : > { %v564_v7 = vpop.permute.xlu1 %563  ;;  %v562_v47 = vpop.permute.xlu0 %561 }
 0x100   : > { %v580_v2 = vsel %vm569_vm5, %v560_v0, %v562_v47  ;;  %v581_v6 = vsel %vm569_vm5, %v562_v47, %v564_v7 }
 0x101   : > { %612 = vst [vmem:[#allocation2 + $0x158] sm:$0x1f] %v580_v2  ;;  %613 = vst [vmem:[#allocation2 + $0x160] sm:$0x1f] %v581_v6  ;;  %949 = vrot.lane.b32.xlu1 %v3000_v20, %s2871_s22 }
 0x102   : > { %947 = vrot.lane.b32.xlu0 %v2852_v63, %s2871_s22 }
 0x103   : > { %v568_v5 = vpop.permute.xlu1 %567  ;;  %v566_v57 = vpop.permute.xlu0 %565 }
 0x104   : > { %617 = vst.msk [vmem:[#allocation2 + $0x178] sm:$0x1f] %vm4697_vm10, %v568_v5  ;;  %v582_v51 = vsel %vm569_vm5, %v564_v7, %v566_v57  ;;  %v583_v58 = vsel %vm569_vm5, %v566_v57, %v568_v5  ;;  %vm781_vm5 = vcmask 998400   ;;  %vm4699_vm10 = vcmask 916480  }
 0x105   : > { %614 = vst [vmem:[#allocation2 + $0x168] sm:$0x1f] %v582_v51  ;;  %615 = vst [vmem:[#allocation2 + $0x170] sm:$0x1f] %v583_v58  ;;  %953 = vrot.lane.b32.xlu1 %v2962_v11, %s2871_s22 }
 0x106   : > { %951 = vrot.lane.b32.xlu0 %v2965_v12, %s2871_s22 }
 0x107   : > { %v646_v47 = vpop.permute.xlu1 %645  ;;  %v644_v2 = vpop.permute.xlu0 %643 }
 0x108   : > { %v676_v6 = vsel %vm675_vm12, %v644_v2, %v646_v47 }
 0x109   : > { %706 = vst [vmem:[#allocation2 + $0x140] sm:$0xe0] %v676_v6  ;;  %957 = vrot.lane.b32.xlu1 %v2970_v13, %s2871_s22 }
 0x10a   : > { %955 = vrot.lane.b32.xlu0 %v2973_v14, %s2871_s22 }
 0x10b   : > { %v650_v7 = vpop.permute.xlu1 %649 }
 0x10c   : > { %v648_v0 = vpop.permute.xlu0 %647 }
 0x10d   : > { %v677_v63 = vsel %vm675_vm12, %v646_v47, %v648_v0  ;;  %v678_v5 = vsel %vm675_vm12, %v648_v0, %v650_v7  ;;  %961 = vrot.lane.b32.xlu1 %v2978_v15, %s2871_s22 }
 0x10e   : > { %707 = vst [vmem:[#allocation2 + $0x148] sm:$0xe0] %v677_v63  ;;  %708 = vst [vmem:[#allocation2 + $0x150] sm:$0xe0] %v678_v5  ;;  %959 = vrot.lane.b32.xlu0 %v2981_v16, %s2871_s22  ;;  %v1996_v5 = vld [vmem:[#allocation2 + $0x108] sm:$0xff] }
 0x10f   : > { %v654_v57 = vpop.permute.xlu1 %653 }
 0x110   : > { %v652_v51 = vpop.permute.xlu0 %651  ;;  %v2003_v0 = vld [vmem:[#allocation2 + $0x140] sm:$0xff] }
 0x111   : > { %v679_v58 = vsel %vm675_vm12, %v650_v7, %v652_v51  ;;  %v680_v2 = vsel %vm675_vm12, %v652_v51, %v654_v57  ;;  %965 = vrot.lane.b32.xlu1 %v3043_v33, %s2871_s22 }
 0x112   : > { %709 = vst [vmem:[#allocation2 + $0x158] sm:$0xe0] %v679_v58  ;;  %710 = vst [vmem:[#allocation2 + $0x160] sm:$0xe0] %v680_v2  ;;  %963 = vrot.lane.b32.xlu0 %v2986_v17, %s2871_s22  ;;  %v1995_v2 = vld [vmem:[#allocation2 + $0x100] sm:$0xff] }
 0x113   : > { %v658_v47 = vpop.permute.xlu1 %657  ;;  %v2626_v20 = vpack.c.bf16 %v2003_v0, %v1995_v2 }
 0x114   : > { %v656_v6 = vpop.permute.xlu0 %655  ;;  %714 = vst.msk [vmem:[#allocation2 + $0x178] sm:$0xe0] %vm4695_vm14, %v658_v47  ;;  %vm4698_vm14 = vcmask 924672  }
 0x115   : > { %v681_v63 = vsel %vm675_vm12, %v654_v57, %v656_v6  ;;  %v682_v7 = vsel %vm675_vm12, %v656_v6, %v658_v47  ;;  %v2004_v51 = vld [vmem:[#allocation2 + $0x148] sm:$0xff]  ;;  %1016 = vrot.lane.b32.xlu1 %v2958_v10, %s2872_s23  ;;  %v2005_v57 = vld [vmem:[#allocation2 + $0x150] sm:$0xff]  ;;  %v1998_v6 = vld [vmem:[#allocation2 + $0x118] sm:$0xff] }
 0x116   : > { %711 = vst [vmem:[#allocation2 + $0x168] sm:$0xe0] %v681_v63  ;;  %712 = vst [vmem:[#allocation2 + $0x170] sm:$0xe0] %v682_v7  ;;  %1014 = vrot.lane.b32.xlu0 %v2931_v4, %s2872_s23  ;;  %v2624_v58 = vpack.c.bf16 %v2004_v51, %v1996_v5  ;;  %v1997_v5 = vld [vmem:[#allocation2 + $0x110] sm:$0xff] }
 0x117   : > { %v662_v33 = vpop.permute.xlu1 %661  ;;  %v2676_v51 = vpack.c.bf16 %v2005_v57, %v1997_v5 }
 0x118   : > { %v660_v15 = vpop.permute.xlu0 %659  ;;  %2625 = vmatprep.subr.bf16.mxu0 %v2624_v58 }
 0x119   : > { %v683_v47 = vsel %vm675_vm12, %v660_v15, %v662_v33  ;;  %2627 = vmatpush1.bf16.msra.mxu0 %v2626_v20  ;;  %v2006_v63 = vld [vmem:[#allocation2 + $0x158] sm:$0xff]  ;;  %1020 = vrot.lane.b32.xlu1 %v2955_v9, %s2872_s23 }
 0x11a   : > { %715 = vst [vmem:[#allocation2 + $0x180] sm:$0x3f] %v683_v47  ;;  %1018 = vrot.lane.b32.xlu0 %v2927_v3, %s2872_s23  ;;  %v2674_v7 = vpack.c.bf16 %v2006_v63, %v1998_v6 }
 0x11b   : > { %v666_v0 = vpop.permute.xlu1 %665 }
 0x11c   : > { %2675 = vmatprep.subr.bf16.mxu1 %v2674_v7  ;;  %v664_v2 = vpop.permute.xlu0 %663 }
 0x11d   : > { %v684_v58 = vsel %vm675_vm12, %v662_v33, %v664_v2  ;;  %v685_v15 = vsel %vm675_vm12, %v664_v2, %v666_v0  ;;  %2677 = vmatpush1.bf16.msra.mxu1 %v2676_v51  ;;  %1024 = vrot.lane.b32.xlu1 %v2993_v18, %s2872_s23 }
 0x11e   : > { %716 = vst [vmem:[#allocation2 + $0x188] sm:$0x3f] %v684_v58  ;;  %717 = vst [vmem:[#allocation2 + $0x190] sm:$0x3f] %v685_v15  ;;  %1022 = vrot.lane.b32.xlu0 %v2996_v19, %s2872_s23 }
 0x11f   : > { %v670_v20 = vpop.permute.xlu1 %669 }
 0x120   : > { %v668_v47 = vpop.permute.xlu0 %667 }
 0x121   : > { %v686_v57 = vsel %vm675_vm12, %v666_v0, %v668_v47  ;;  %v687_v6 = vsel %vm675_vm12, %v668_v47, %v670_v20  ;;  %1028 = vrot.lane.b32.xlu1 %v3007_v21, %s2872_s23 }
 0x122   : > { %718 = vst [vmem:[#allocation2 + $0x198] sm:$0x3f] %v686_v57  ;;  %719 = vst [vmem:[#allocation2 + $0x1a0] sm:$0x3f] %v687_v6  ;;  %1026 = vrot.lane.b32.xlu0 %v3010_v22, %s2872_s23 }
 0x123   : > { %v674_v33 = vpop.permute.xlu1 %673 }
 0x124   : > { %v672_v63 = vpop.permute.xlu0 %671  ;;  %723 = vst.msk [vmem:[#allocation2 + $0x1b8] sm:$0x3f] %vm4696_vm0, %v674_v33  ;;  %vm2165_vm0 = vcmask 498688  }
 0x125   : > { %v688_v7 = vsel %vm675_vm12, %v670_v20, %v672_v63  ;;  %v689_v5 = vsel %vm675_vm12, %v672_v63, %v674_v33  ;;  %1032 = vrot.lane.b32.xlu1 %v3020_v25, %s2872_s23  ;;  %vm4682_vm12 = vcmask 850950  }
 0x126   : > { %720 = vst [vmem:[#allocation2 + $0x1a8] sm:$0x3f] %v688_v7  ;;  %721 = vst [vmem:[#allocation2 + $0x1b0] sm:$0x3f] %v689_v5  ;;  %1030 = vrot.lane.b32.xlu0 %v3024_v26, %s2872_s23 }
 0x127   : > { %v752_v51 = vpop.permute.xlu1 %751 }
 0x128   : > { %v750_v0 = vpop.permute.xlu0 %749 }
 0x129   : > { %v782_v2 = vsel %vm781_vm5, %v750_v0, %v752_v51  ;;  %1036 = vrot.lane.b32.xlu1 %v3034_v29, %s2872_s23 }
 0x12a   : > { %812 = vst [vmem:[#allocation2 + $0x180] sm:$0xc0] %v782_v2  ;;  %1034 = vrot.lane.b32.xlu0 %v3038_v30, %s2872_s23 }
 0x12b   : > { %v756_v58 = vpop.permute.xlu1 %755 }
 0x12c   : > { %v754_v15 = vpop.permute.xlu0 %753 }
 0x12d   : > { %v783_v20 = vsel %vm781_vm5, %v752_v51, %v754_v15  ;;  %v784_v47 = vsel %vm781_vm5, %v754_v15, %v756_v58  ;;  %1095 = vrot.lane.b32.xlu1 %v3076_v40, %s2873_s24 }
 0x12e   : > { %813 = vst [vmem:[#allocation2 + $0x188] sm:$0xc0] %v783_v20  ;;  %814 = vst [vmem:[#allocation2 + $0x190] sm:$0xc0] %v784_v47  ;;  %1038 = vrot.lane.b32.xlu0 %v3055_v35, %s2872_s23 }
 0x12f   : > { %v760_v57 = vpop.permute.xlu1 %759 }
 0x130   : > { %v758_v6 = vpop.permute.xlu0 %757 }
 0x131   : > { %v785_v33 = vsel %vm781_vm5, %v756_v58, %v758_v6  ;;  %v786_v63 = vsel %vm781_vm5, %v758_v6, %v760_v57  ;;  %1099 = vrot.lane.b32.xlu1 %v3086_v42, %s2873_s24  ;;  %v2011_v18 = vld [vmem:[#allocation2 + $0x180] sm:$0xff] }
 0x132   : > { %815 = vst [vmem:[#allocation2 + $0x198] sm:$0xc0] %v785_v33  ;;  %816 = vst [vmem:[#allocation2 + $0x1a0] sm:$0xc0] %v786_v63  ;;  %1097 = vrot.lane.b32.xlu0 %v3089_v43, %s2873_s24 }
 0x133   : > { %v764_v7 = vpop.permute.xlu1 %763 }
 0x134   : > { %v762_v5 = vpop.permute.xlu0 %761  ;;  %820 = vst.msk [vmem:[#allocation2 + $0x1b8] sm:$0xc0] %vm4682_vm12, %v764_v7  ;;  %vm887_vm12 = vcmask 990208  }
 0x135   : > { %v787_v51 = vsel %vm781_vm5, %v760_v57, %v762_v5  ;;  %v788_v0 = vsel %vm781_vm5, %v762_v5, %v764_v7  ;;  %1093 = vrot.lane.b32.xlu1 %v3079_v41, %s2873_s24 }
 0x136   : > { %817 = vst [vmem:[#allocation2 + $0x1a8] sm:$0xc0] %v787_v51  ;;  %818 = vst [vmem:[#allocation2 + $0x1b0] sm:$0xc0] %v788_v0  ;;  %1101 = vrot.lane.b32.xlu0 %v3103_v45, %s2873_s24 }
 0x137   : > { %v768_v2 = vpop.permute.xlu1 %767 }
 0x138   : > { %v766_v58 = vpop.permute.xlu0 %765 }
 0x139   : > { %v789_v15 = vsel %vm781_vm5, %v766_v58, %v768_v2  ;;  %1113 = vrot.lane.b32.xlu1 %v3141_v55, %s2873_s24 }
 0x13a   : > { %821 = vst [vmem:[#allocation2 + $0x1c0] sm:$0x7f] %v789_v15  ;;  %1111 = vrot.lane.b32.xlu0 %v3123_v50, %s2873_s24 }
 0x13b   : > { %v772_v20 = vpop.permute.xlu1 %771 }
 0x13c   : > { %v770_v47 = vpop.permute.xlu0 %769 }
 0x13d   : > { %v790_v57 = vsel %vm781_vm5, %v768_v2, %v770_v47  ;;  %v791_v6 = vsel %vm781_vm5, %v770_v47, %v772_v20  ;;  %1117 = vrot.lane.b32.xlu1 %v3155_v59, %s2873_s24 }
 0x13e   : > { %822 = vst [vmem:[#allocation2 + $0x1c8] sm:$0x7f] %v790_v57  ;;  %823 = vst [vmem:[#allocation2 + $0x1d0] sm:$0x7f] %v791_v6  ;;  %1115 = vrot.lane.b32.xlu0 %v3137_v54, %s2873_s24 }
 0x13f   : > { %v776_v33 = vpop.permute.xlu1 %775 }
 0x140   : > { %v774_v63 = vpop.permute.xlu0 %773 }
 0x141   : > { %v792_v7 = vsel %vm781_vm5, %v772_v20, %v774_v63  ;;  %v793_v5 = vsel %vm781_vm5, %v774_v63, %v776_v33  ;;  %1176 = vrot.lane.b32.xlu1 %v3189_v28, %s2874_s25 }
 0x142   : > { %824 = vst [vmem:[#allocation2 + $0x1d8] sm:$0x7f] %v792_v7  ;;  %825 = vst [vmem:[#allocation2 + $0x1e0] sm:$0x7f] %v793_v5  ;;  %1174 = vrot.lane.b32.xlu0 %v3176_v23, %s2874_s25  ;;  %v4786_v7 = vld [vmem:[#allocation26_spill] sm:$0xff] }
 0x143   : > { %v780_v51 = vpop.permute.xlu1 %779 }
 0x144   : > { %v778_v0 = vpop.permute.xlu0 %777  ;;  %829 = vst.msk [vmem:[#allocation2 + $0x1f8] sm:$0x7f] %vm4694_vm3, %v780_v51  ;;  %vm4700_vm3 = vcmask 932864  }
 0x145   : > { %v794_v2 = vsel %vm781_vm5, %v776_v33, %v778_v0  ;;  %v795_v58 = vsel %vm781_vm5, %v778_v0, %v780_v51  ;;  %1180 = vrot.lane.b32.xlu1 %v3199_v32, %s2874_s25  ;;  %vm4688_vm5 = vcmask 850951  }
 0x146   : > { %826 = vst [vmem:[#allocation2 + $0x1e8] sm:$0x7f] %v794_v2  ;;  %827 = vst [vmem:[#allocation2 + $0x1f0] sm:$0x7f] %v795_v58  ;;  %1178 = vrot.lane.b32.xlu0 %v3186_v27, %s2874_s25  ;;  %v4787_v58 = vld [vmem:[#allocation35_spill] sm:$0xff] }
 0x147   : > { %v858_v15 = vpop.permute.xlu1 %857 }
 0x148   : > { %v856_v20 = vpop.permute.xlu0 %855 }
 0x149   : > { %v888_v47 = vsel %vm887_vm12, %v856_v20, %v858_v15  ;;  %1192 = vrot.lane.b32.xlu1 %v3237_v61, %s2874_s25 }
 0x14a   : > { %918 = vst [vmem:[#allocation2 + $0x1c0] sm:$0x80] %v888_v47  ;;  %1190 = vrot.lane.b32.xlu0 %v3219_v52, %s2874_s25 }
 0x14b   : > { %v862_v57 = vpop.permute.xlu1 %861 }
 0x14c   : > { %v860_v6 = vpop.permute.xlu0 %859 }
 0x14d   : > { %v889_v33 = vsel %vm887_vm12, %v858_v15, %v860_v6  ;;  %v890_v63 = vsel %vm887_vm12, %v860_v6, %v862_v57  ;;  %1196 = vrot.lane.b32.xlu1 %v3251_v56, %s2874_s25  ;;  %v4788_v15 = vld [vmem:[#allocation32_spill] sm:$0xff] }
 0x14e   : > { %919 = vst [vmem:[#allocation2 + $0x1c8] sm:$0x80] %v889_v33  ;;  %920 = vst [vmem:[#allocation2 + $0x1d0] sm:$0x80] %v890_v63  ;;  %1194 = vrot.lane.b32.xlu0 %v4786_v7, %s2874_s25  ;;  %v2012_v63 = vld [vmem:[#allocation2 + $0x188] sm:$0xff] }
 0x14f   : > { %v866_v5 = vpop.permute.xlu1 %865 }
 0x150   : > { %v864_v51 = vpop.permute.xlu0 %863 }
 0x151   : > { %v891_v0 = vsel %vm887_vm12, %v862_v57, %v864_v51  ;;  %v892_v2 = vsel %vm887_vm12, %v864_v51, %v866_v5  ;;  %1255 = vrot.lane.b32.xlu1 %v4787_v58, %s2875_s26  ;;  %v2019_v6 = vld [vmem:[#allocation2 + $0x1c0] sm:$0xff] }
 0x152   : > { %921 = vst [vmem:[#allocation2 + $0x1d8] sm:$0x80] %v891_v0  ;;  %922 = vst [vmem:[#allocation2 + $0x1e0] sm:$0x80] %v892_v2  ;;  %1253 = vrot.lane.b32.xlu0 %v4788_v15, %s2875_s26  ;;  %v4789_v0 = vld [vmem:[#allocation37_spill] sm:$0xff]  ;;  %v4790_v2 = vld [vmem:[#allocation34_spill] sm:$0xff]  ;;  %v2630_v22 = vpack.c.bf16 %v2019_v6, %v2011_v18 }
 0x153   : > { %v870_v20 = vpop.permute.xlu1 %869 }
 0x154   : > { %v868_v47 = vpop.permute.xlu0 %867  ;;  %926 = vst.msk [vmem:[#allocation2 + $0x1f8] sm:$0x80] %vm4688_vm5, %v870_v20  ;;  %vm967_vm5 = vcmask 982016  }
 0x155   : > { %v893_v33 = vsel %vm887_vm12, %v866_v5, %v868_v47  ;;  %v894_v57 = vsel %vm887_vm12, %v868_v47, %v870_v20  ;;  %v2020_v51 = vld [vmem:[#allocation2 + $0x1c8] sm:$0xff]  ;;  %1259 = vrot.lane.b32.xlu1 %v4789_v0, %s2875_s26  ;;  %v2021_v58 = vld [vmem:[#allocation2 + $0x1d0] sm:$0xff]  ;;  %v2014_v20 = vld [vmem:[#allocation2 + $0x198] sm:$0xff] }
 0x156   : > { %923 = vst [vmem:[#allocation2 + $0x1e8] sm:$0x80] %v893_v33  ;;  %924 = vst [vmem:[#allocation2 + $0x1f0] sm:$0x80] %v894_v57  ;;  %1257 = vrot.lane.b32.xlu0 %v4790_v2, %s2875_s26  ;;  %v2628_v21 = vpack.c.bf16 %v2020_v51, %v2012_v63  ;;  %v4791_v33 = vld [vmem:[#allocation20_spill] sm:$0xff]  ;;  %v2013_v2 = vld [vmem:[#allocation2 + $0x190] sm:$0xff] }
 0x157   : > { %v874_v17 = vpop.permute.xlu1 %873  ;;  %v4792_v57 = vld [vmem:[#allocation16_spill] sm:$0xff]  ;;  %v2680_v63 = vpack.c.bf16 %v2021_v58, %v2013_v2 }
 0x158   : > { %v872_v15 = vpop.permute.xlu0 %871  ;;  %2629 = vmatprep.subr.bf16.mxu0 %v2628_v21 }
 0x159   : > { %v895_v5 = vsel %vm887_vm12, %v872_v15, %v874_v17  ;;  %2631 = vmatpush1.bf16.msra.mxu0 %v2630_v22  ;;  %v2022_v47 = vld [vmem:[#allocation2 + $0x1d8] sm:$0xff]  ;;  %1172 = vrot.lane.b32.xlu1 %v4791_v33, %s2874_s25  ;;  %v4793_v22 = vld [vmem:[#allocation33_spill] sm:$0xff] }
 0x15a   : > { %1109 = vrot.lane.b32.xlu0 %v4792_v57, %s2873_s24  ;;  %v2678_v0 = vpack.c.bf16 %v2022_v47, %v2014_v20  ;;  %v4794_v15 = vld [vmem:[#allocation25_spill] sm:$0xff] }
 0x15b   : > { %v878_v51 = vpop.permute.xlu1 %877 }
 0x15c   : > { %2679 = vmatprep.subr.bf16.mxu1 %v2678_v0  ;;  %v876_v18 = vpop.permute.xlu0 %875  ;;  %v4795_v0 = vld [vmem:[#allocation43_spill] sm:$0xff] }
 0x15d   : > { %v896_v21 = vsel %vm887_vm12, %v874_v17, %v876_v18  ;;  %v897_v6 = vsel %vm887_vm12, %v876_v18, %v878_v51  ;;  %2681 = vmatpush1.bf16.msra.mxu1 %v2680_v63  ;;  %1251 = vrot.lane.b32.xlu1 %v4793_v22, %s2875_s26  ;;  %v4796_v17 = vld [vmem:[#allocation40_spill] sm:$0xff] }
 0x15e   : > { %1188 = vrot.lane.b32.xlu0 %v4794_v15, %s2874_s25 }
 0x15f   : > { %v882_v7 = vpop.permute.xlu1 %881 }
 0x160   : > { %v880_v56 = vpop.permute.xlu0 %879 }
 0x161   : > { %v898_v20 = vsel %vm887_vm12, %v878_v51, %v880_v56  ;;  %v899_v58 = vsel %vm887_vm12, %v880_v56, %v882_v7  ;;  %1271 = vrot.lane.b32.xlu1 %v4795_v0, %s2875_s26  ;;  %v4797_v51 = vld [vmem:[#allocation45_spill] sm:$0xff]  ;;  %v4798_v56 = vld [vmem:[#allocation42_spill] sm:$0xff] }
 0x162   : > { %931 = vst [vmem:[#allocation2 + $0x220] sm:$0xff] %v899_v58  ;;  %1269 = vrot.lane.b32.xlu0 %v4796_v17, %s2875_s26  ;;  %v4799_v17 = vld [vmem:[#allocation51_spill] sm:$0xff] }
 0x163   : > { %v886_v2 = vpop.permute.xlu1 %885 }
 0x164   : > { %v884_v47 = vpop.permute.xlu0 %883  ;;  %934 = vst.msk [vmem:[#allocation2 + $0x238] sm:$0xff] %vm4693_vm1, %v886_v2 }
 0x165   : > { %v900_v63 = vsel %vm887_vm12, %v882_v7, %v884_v47  ;;  %v901_v18 = vsel %vm887_vm12, %v884_v47, %v886_v2  ;;  %1275 = vrot.lane.b32.xlu1 %v4797_v51, %s2875_s26  ;;  %v4800_v7 = vld [vmem:[#allocation48_spill] sm:$0xff]  ;;  %v4802_v51 = vld [vmem:[#allocation50_spill] sm:$0xff]  ;;  %vm1046_vm12 = vcmask 973824  }
 0x166   : > { %932 = vst [vmem:[#allocation2 + $0x228] sm:$0xff] %v900_v63  ;;  %933 = vst [vmem:[#allocation2 + $0x230] sm:$0xff] %v901_v18  ;;  %1273 = vrot.lane.b32.xlu0 %v4798_v56, %s2875_s26  ;;  %v4801_v56 = vld [vmem:[#allocation53_spill] sm:$0xff] }
 0x167   : > { %v938_v58 = vpop.permute.xlu1 %937 }
 0x168   : > { %v936_v15 = vpop.permute.xlu0 %935 }
 0x169   : > { %v968_v22 = vsel %vm967_vm5, %v936_v15, %v938_v58  ;;  %1334 = vrot.lane.b32.xlu1 %v4799_v17, %s2876_s27 }
 0x16a   : > { %1332 = vrot.lane.b32.xlu0 %v4800_v7, %s2876_s27  ;;  %v2634_v0 = vpack.c.bf16 %v968_v22, %v895_v5 }
 0x16b   : > { %v942_v2 = vpop.permute.xlu1 %941 }
 0x16c   : > { %v940_v47 = vpop.permute.xlu0 %939 }
 0x16d   : > { %v969_v63 = vsel %vm967_vm5, %v938_v58, %v940_v47  ;;  %v970_v18 = vsel %vm967_vm5, %v940_v47, %v942_v2  ;;  %1338 = vrot.lane.b32.xlu1 %v4801_v56, %s2876_s27  ;;  %v4803_v58 = vld [vmem:[#allocation59_spill] sm:$0xff]  ;;  %v4804_v47 = vld [vmem:[#allocation56_spill] sm:$0xff] }
 0x16e   : > { %1336 = vrot.lane.b32.xlu0 %v4802_v51, %s2876_s27  ;;  %v2632_v15 = vpack.c.bf16 %v969_v63, %v896_v21  ;;  %v2684_v57 = vpack.c.bf16 %v970_v18, %v897_v6 }
 0x16f   : > { %v946_v52 = vpop.permute.xlu1 %945 }
 0x170   : > { %v944_v61 = vpop.permute.xlu0 %943  ;;  %2633 = vmatprep.subr.bf16.mxu0 %v2632_v15 }
 0x171   : > { %v971_v17 = vsel %vm967_vm5, %v942_v2, %v944_v61  ;;  %v972_v7 = vsel %vm967_vm5, %v944_v61, %v946_v52  ;;  %2635 = vmatpush1.bf16.msra.mxu0 %v2634_v0  ;;  %1350 = vrot.lane.b32.xlu1 %v4803_v58, %s2876_s27  ;;  %v4805_v61 = vld [vmem:[#allocation61_spill] sm:$0xff]  ;;  %v4806_v0 = vld [vmem:[#allocation58_spill] sm:$0xff] }
 0x172   : > { %1002 = vst [vmem:[#allocation2 + $0x260] sm:$0xff] %v972_v7  ;;  %1348 = vrot.lane.b32.xlu0 %v4804_v47, %s2876_s27  ;;  %v2682_v56 = vpack.c.bf16 %v971_v17, %v898_v20  ;;  %v4807_v7 = vld [vmem:[#allocation49_spill] sm:$0xff] }
 0x173   : > { %v950_v51 = vpop.permute.xlu1 %949  ;;  %v4808_v58 = vld [vmem:[#allocation41_spill] sm:$0xff] }
 0x174   : > { %v948_v21 = vpop.permute.xlu0 %947  ;;  %2683 = vmatprep.subr.bf16.mxu1 %v2682_v56  ;;  %1005 = vst.msk [vmem:[#allocation2 + $0x278] sm:$0xff] %vm4693_vm1, %v950_v51  ;;  %vm4703_vm1 = vcmask 941056  }
 0x175   : > { %v973_v5 = vsel %vm967_vm5, %v946_v52, %v948_v21  ;;  %v974_v22 = vsel %vm967_vm5, %v948_v21, %v950_v51  ;;  %2685 = vmatpush1.bf16.msra.mxu1 %v2684_v57  ;;  %1354 = vrot.lane.b32.xlu1 %v4805_v61, %s2876_s27  ;;  %v4809_v51 = vld [vmem:[#allocation64_spill] sm:$0xff]  ;;  %v4810_v21 = vld [vmem:[#allocation57_spill] sm:$0xff] }
 0x176   : > { %1003 = vst [vmem:[#allocation2 + $0x268] sm:$0xff] %v973_v5  ;;  %1004 = vst [vmem:[#allocation2 + $0x270] sm:$0xff] %v974_v22  ;;  %1352 = vrot.lane.b32.xlu0 %v4806_v0, %s2876_s27  ;;  %v4811_v0 = vld [vmem:[#allocation68_spill] sm:$0xff] }
 0x177   : > { %v954_v20 = vpop.permute.xlu1 %953 }
 0x178   : > { %v952_v6 = vpop.permute.xlu0 %951 }
 0x179   : > { %v975_v2 = vsel %vm967_vm5, %v952_v6, %v954_v20  ;;  %1413 = vrot.lane.b32.xlu1 %v3505_v44, %s2877_s28 }
 0x17a   : > { %1006 = vst [vmem:[#allocation2 + $0x280] sm:$0x1] %v975_v2  ;;  %1411 = vrot.lane.b32.xlu0 %v3489_v46, %s2877_s28 }
 0x17b   : > { %v958_v52 = vpop.permute.xlu1 %957 }
 0x17c   : > { %v956_v57 = vpop.permute.xlu0 %955 }
 0x17d   : > { %v976_v63 = vsel %vm967_vm5, %v954_v20, %v956_v57  ;;  %v977_v18 = vsel %vm967_vm5, %v956_v57, %v958_v52  ;;  %1417 = vrot.lane.b32.xlu1 %v3516_v31, %s2877_s28  ;;  %v4812_v57 = vld [vmem:[#allocation72_spill] sm:$0xff] }
 0x17e   : > { %1007 = vst [vmem:[#allocation2 + $0x288] sm:$0x1] %v976_v63  ;;  %1008 = vst [vmem:[#allocation2 + $0x290] sm:$0x1] %v977_v18  ;;  %1415 = vrot.lane.b32.xlu0 %v3502_v36, %s2877_s28  ;;  %v4813_v63 = vld [vmem:[#allocation70_spill] sm:$0xff] }
 0x17f   : > { %v962_v15 = vpop.permute.xlu1 %961 }
 0x180   : > { %v960_v17 = vpop.permute.xlu0 %959 }
 0x181   : > { %v978_v44 = vsel %vm967_vm5, %v958_v52, %v960_v17  ;;  %v979_v46 = vsel %vm967_vm5, %v960_v17, %v962_v15  ;;  %1330 = vrot.lane.b32.xlu1 %v4807_v7, %s2876_s27 }
 0x182   : > { %1009 = vst [vmem:[#allocation2 + $0x298] sm:$0x1] %v978_v44  ;;  %1010 = vst [vmem:[#allocation2 + $0x2a0] sm:$0x1] %v979_v46  ;;  %1267 = vrot.lane.b32.xlu0 %v4808_v58, %s2875_s26 }
 0x183   : > { %v966_v47 = vpop.permute.xlu1 %965 }
 0x184   : > { %v964_v56 = vpop.permute.xlu0 %963  ;;  %1013 = vst.msk [vmem:[#allocation2 + $0x2b8] sm:$0x1] %vm4692_vm2, %v966_v47  ;;  %vm1283_vm2 = vcmask 949248  }
 0x185   : > { %v980_v36 = vsel %vm967_vm5, %v962_v15, %v964_v56  ;;  %v981_v31 = vsel %vm967_vm5, %v964_v56, %v966_v47  ;;  %1409 = vrot.lane.b32.xlu1 %v4809_v51, %s2877_s28  ;;  %vm1125_vm5 = vcmask 965632  }
 0x186   : > { %1011 = vst [vmem:[#allocation2 + $0x2a8] sm:$0x1] %v980_v36  ;;  %1012 = vst [vmem:[#allocation2 + $0x2b0] sm:$0x1] %v981_v31  ;;  %1346 = vrot.lane.b32.xlu0 %v4810_v21, %s2876_s27 }
 0x187   : > { %v1017_v5 = vpop.permute.xlu1 %1016 }
 0x188   : > { %v1015_v22 = vpop.permute.xlu0 %1014 }
 0x189   : > { %v1047_v61 = vsel %vm1046_vm12, %v1015_v22, %v1017_v5  ;;  %1429 = vrot.lane.b32.xlu1 %v3561_v53, %s2877_s28 }
 0x18a   : > { %1077 = vst [vmem:[#allocation2 + $0x280] sm:$0xfe] %v1047_v61  ;;  %1427 = vrot.lane.b32.xlu0 %v4811_v0, %s2877_s28  ;;  %v4816_v0 = vld [vmem:[#allocation79_spill] sm:$0xff] }
 0x18b   : > { %v1021_v20 = vpop.permute.xlu1 %1020 }
 0x18c   : > { %v1019_v6 = vpop.permute.xlu0 %1018 }
 0x18d   : > { %v1048_v2 = vsel %vm1046_vm12, %v1017_v5, %v1019_v6  ;;  %v1049_v52 = vsel %vm1046_vm12, %v1019_v6, %v1021_v20  ;;  %1433 = vrot.lane.b32.xlu1 %v4812_v57, %s2877_s28  ;;  %v4815_v5 = vld [vmem:[#allocation69_spill] sm:$0xff]  ;;  %v4817_v57 = vld [vmem:[#allocation84_spill] sm:$0xff] }
 0x18e   : > { %1078 = vst [vmem:[#allocation2 + $0x288] sm:$0xfe] %v1048_v2  ;;  %1079 = vst [vmem:[#allocation2 + $0x290] sm:$0xfe] %v1049_v52  ;;  %1431 = vrot.lane.b32.xlu0 %v4813_v63, %s2877_s28 }
 0x18f   : > { %v1025_v18 = vpop.permute.xlu1 %1024 }
 0x190   : > { %v1023_v15 = vpop.permute.xlu0 %1022 }
 0x191   : > { %v1050_v53 = vsel %vm1046_vm12, %v1021_v20, %v1023_v15  ;;  %v1051_v17 = vsel %vm1046_vm12, %v1023_v15, %v1025_v18  ;;  %1492 = vrot.lane.b32.xlu1 %v3617_v48, %s2878_s29 }
 0x192   : > { %1080 = vst [vmem:[#allocation2 + $0x298] sm:$0xfe] %v1050_v53  ;;  %1081 = vst [vmem:[#allocation2 + $0x2a0] sm:$0xfe] %v1051_v17  ;;  %1490 = vrot.lane.b32.xlu0 %v3601_v62, %s2878_s29 }
 0x193   : > { %v1029_v44 = vpop.permute.xlu1 %1028 }
 0x194   : > { %v1027_v46 = vpop.permute.xlu0 %1026  ;;  %1084 = vst.msk [vmem:[#allocation2 + $0x2b8] sm:$0xfe] %vm4691_vm7, %v1029_v44  ;;  %vm1204_vm7 = vcmask 957440  }
 0x195   : > { %v1052_v7 = vsel %vm1046_vm12, %v1025_v18, %v1027_v46  ;;  %v1053_v47 = vsel %vm1046_vm12, %v1027_v46, %v1029_v44  ;;  %1496 = vrot.lane.b32.xlu1 %v3628_v24, %s2878_s29  ;;  %v2044_v15 = vld [vmem:[#allocation2 + $0x288] sm:$0xff]  ;;  %v2043_v46 = vld [vmem:[#allocation2 + $0x280] sm:$0xff] }
 0x196   : > { %1082 = vst [vmem:[#allocation2 + $0x2a8] sm:$0xfe] %v1052_v7  ;;  %1083 = vst [vmem:[#allocation2 + $0x2b0] sm:$0xfe] %v1053_v47  ;;  %1494 = vrot.lane.b32.xlu0 %v3614_v38, %s2878_s29 }
 0x197   : > { %v1033_v48 = vpop.permute.xlu1 %1032 }
 0x198   : > { %v1031_v56 = vpop.permute.xlu0 %1030 }
 0x199   : > { %v1054_v62 = vsel %vm1046_vm12, %v1031_v56, %v1033_v48  ;;  %1508 = vrot.lane.b32.xlu1 %v3673_v60, %s2878_s29  ;;  %v4814_v60 = vld [vmem:[#allocation75_spill] sm:$0xff]  ;;  %v2046_v56 = vld [vmem:[#allocation2 + $0x298] sm:$0xff] }
 0x19a   : > { %1085 = vst [vmem:[#allocation2 + $0x2c0] sm:$0x3] %v1054_v62  ;;  %1506 = vrot.lane.b32.xlu0 %v3652_v8, %s2878_s29 }
 0x19b   : > { %v1037_v36 = vpop.permute.xlu1 %1036 }
 0x19c   : > { %v1035_v31 = vpop.permute.xlu0 %1034 }
 0x19d   : > { %v1055_v51 = vsel %vm1046_vm12, %v1033_v48, %v1035_v31  ;;  %v1056_v24 = vsel %vm1046_vm12, %v1035_v31, %v1037_v36  ;;  %1512 = vrot.lane.b32.xlu1 %v3688_v37, %s2878_s29  ;;  %v2045_v31 = vld [vmem:[#allocation2 + $0x290] sm:$0xff] }
 0x19e   : > { %1086 = vst [vmem:[#allocation2 + $0x2c8] sm:$0x3] %v1055_v51  ;;  %1087 = vst [vmem:[#allocation2 + $0x2d0] sm:$0x3] %v1056_v24  ;;  %1510 = vrot.lane.b32.xlu0 %v3669_v34, %s2878_s29 }
 0x19f   : > { %v1096_v38 = vpop.permute.xlu1 %1095 }
 0x1a0   : > { %v3978_v21 = vpop.permute.xlu0 %1038 }
 0x1a1   : > { %v1057_v8 = vsel %vm1046_vm12, %v1037_v36, %v3978_v21  ;;  %1488 = vrot.lane.b32.xlu1 %v4814_v60, %s2878_s29 }
 0x1a2   : > { %1088 = vst [vmem:[#allocation2 + $0x2d8] sm:$0x3] %v1057_v8  ;;  %1425 = vrot.lane.b32.xlu0 %v4815_v5, %s2877_s28 }
 0x1a3   : > { %v1100_v22 = vpop.permute.xlu1 %1099 }
 0x1a4   : > { %v1098_v61 = vpop.permute.xlu0 %1097 }
 0x1a5   : > { %v1127_v37 = vsel %vm1125_vm5, %v1096_v38, %v1098_v61  ;;  %v1128_v34 = vsel %vm1125_vm5, %v1098_v61, %v1100_v22  ;;  %1569 = vrot.lane.b32.xlu1 %v3715_v1, %s2879_s30  ;;  %v4818_v61 = vld [vmem:[#allocation83_spill] sm:$0xff] }
 0x1a6   : > { %1157 = vst [vmem:[#allocation2 + $0x2c8] sm:$0xfc] %v1127_v37  ;;  %1158 = vst [vmem:[#allocation2 + $0x2d0] sm:$0xfc] %v1128_v34  ;;  %1504 = vrot.lane.b32.xlu0 %v4816_v0, %s2878_s29 }
 0x1a7   : > { %v1094_v20 = vpop.permute.xlu1 %1093 }
 0x1a8   : > { %v3992_v6 = vpop.permute.xlu0 %1101  ;;  %v1126_v2 = vsel %vm1125_vm5, %v1094_v20, %v1096_v38 }
 0x1a9   : > { %v1129_v52 = vsel %vm1125_vm5, %v1100_v22, %v3992_v6  ;;  %1156 = vst [vmem:[#allocation2 + $0x2c0] sm:$0xfc] %v1126_v2  ;;  %1573 = vrot.lane.b32.xlu1 %v3724_v49, %s2879_s30 }
 0x1aa   : > { %1159 = vst [vmem:[#allocation2 + $0x2d8] sm:$0xfc] %v1129_v52  ;;  %1571 = vrot.lane.b32.xlu0 %v4817_v57, %s2879_s30 }
 0x1ab   : > { %v1114_v1 = vpop.permute.xlu1 %1113 }
 0x1ac   : > { %v4001_v63 = vpop.permute.xlu0 %1111 }
 0x1ad   : > { %v1134_v18 = vsel %vm1125_vm5, %v4001_v63, %v1114_v1  ;;  %v2052_v53 = vld [vmem:[#allocation2 + $0x2c8] sm:$0xff]  ;;  %1585 = vrot.lane.b32.xlu1 %v2962_v11, %s2879_s30  ;;  %v2053_v7 = vld [vmem:[#allocation2 + $0x2d0] sm:$0xff] }
 0x1ae   : > { %1165 = vst [vmem:[#allocation2 + $0x308] sm:$0x7] %v1134_v18  ;;  %1575 = vrot.lane.b32.xlu0 %v3735_v39, %s2879_s30  ;;  %v2636_v17 = vpack.c.bf16 %v2052_v53, %v2044_v15  ;;  %v2688_v51 = vpack.c.bf16 %v2053_v7, %v2045_v31 }
 0x1af   : > { %v4009_v49 = vpop.permute.xlu1 %1117 }
 0x1b0   : > { %v1116_v44 = vpop.permute.xlu0 %1115  ;;  %2637 = vmatprep.subr.bf16.mxu0 %v2636_v17  ;;  %v2051_v36 = vld [vmem:[#allocation2 + $0x2c0] sm:$0xff] }
 0x1b1   : > { %v1135_v47 = vsel %vm1125_vm5, %v1114_v1, %v1116_v44  ;;  %v1136_v48 = vsel %vm1125_vm5, %v1116_v44, %v4009_v49  ;;  %v2054_v62 = vld [vmem:[#allocation2 + $0x2d8] sm:$0xff]  ;;  %1589 = vrot.lane.b32.xlu1 %v2970_v13, %s2879_s30  ;;  %v2638_v39 = vpack.c.bf16 %v2051_v36, %v2043_v46 }
 0x1b2   : > { %1166 = vst [vmem:[#allocation2 + $0x310] sm:$0x7] %v1135_v47  ;;  %1167 = vst [vmem:[#allocation2 + $0x318] sm:$0x7] %v1136_v48  ;;  %1587 = vrot.lane.b32.xlu0 %v2973_v14, %s2879_s30  ;;  %v2686_v11 = vpack.c.bf16 %v2054_v62, %v2046_v56 }
 0x1b3   : > { %v1177_v24 = vpop.permute.xlu1 %1176  ;;  %2639 = vmatpush1.bf16.msra.mxu0 %v2638_v39 }
 0x1b4   : > { %2687 = vmatprep.subr.bf16.mxu1 %v2686_v11  ;;  %v1175_v38 = vpop.permute.xlu0 %1174 }
 0x1b5   : > { %v1206_v8 = vsel %vm1204_vm7, %v1175_v38, %v1177_v24  ;;  %2689 = vmatpush1.bf16.msra.mxu1 %v2688_v51  ;;  %1648 = vrot.lane.b32.xlu1 %v2958_v10, %s2880_s3 }
 0x1b6   : > { %1236 = vst [vmem:[#allocation2 + $0x308] sm:$0xf8] %v1206_v8  ;;  %1591 = vrot.lane.b32.xlu0 %v2981_v16, %s2879_s30 }
 0x1b7   : > { %v4023_v13 = vpop.permute.xlu1 %1180 }
 0x1b8   : > { %v1179_v14 = vpop.permute.xlu0 %1178 }
 0x1b9   : > { %v1207_v60 = vsel %vm1204_vm7, %v1177_v24, %v1179_v14  ;;  %v1208_v5 = vsel %vm1204_vm7, %v1179_v14, %v4023_v13  ;;  %1652 = vrot.lane.b32.xlu1 %v2955_v9, %s2880_s3 }
 0x1ba   : > { %1237 = vst [vmem:[#allocation2 + $0x310] sm:$0xf8] %v1207_v60  ;;  %1238 = vst [vmem:[#allocation2 + $0x318] sm:$0xf8] %v1208_v5  ;;  %1650 = vrot.lane.b32.xlu0 %v2927_v3, %s2880_s3 }
 0x1bb   : > { %v1193_v10 = vpop.permute.xlu1 %1192 }
 0x1bc   : > { %v1191_v22 = vpop.permute.xlu0 %1190 }
 0x1bd   : > { %v1213_v16 = vsel %vm1204_vm7, %v1191_v22, %v1193_v10  ;;  %1567 = vrot.lane.b32.xlu1 %v4818_v61, %s2879_s30  ;;  %v2060_v18 = vld [vmem:[#allocation2 + $0x308] sm:$0xff] }
 0x1be   : > { %1244 = vst [vmem:[#allocation2 + $0x348] sm:$0xf] %v1213_v16  ;;  %1654 = vrot.lane.b32.xlu0 %v2996_v19, %s2880_s3  ;;  %v4820_v16 = vld [vmem:[#allocation27_spill] sm:$0xff]  ;;  %v4821_v61 = vld [vmem:[#allocation24_spill] sm:$0xff] }
 0x1bf   : > { %v4037_v37 = vpop.permute.xlu1 %1196 }
 0x1c0   : > { %v1195_v34 = vpop.permute.xlu0 %1194 }
 0x1c1   : > { %v1214_v0 = vsel %vm1204_vm7, %v1193_v10, %v1195_v34  ;;  %v1215_v9 = vsel %vm1204_vm7, %v1195_v34, %v4037_v37  ;;  %1646 = vrot.lane.b32.xlu1 %v2931_v4, %s2880_s3  ;;  %v2062_v17 = vld [vmem:[#allocation2 + $0x318] sm:$0xff]  ;;  %v2061_v7 = vld [vmem:[#allocation2 + $0x310] sm:$0xff] }
 0x1c2   : > { %1245 = vst [vmem:[#allocation2 + $0x350] sm:$0xf] %v1214_v0  ;;  %1246 = vst [vmem:[#allocation2 + $0x358] sm:$0xf] %v1215_v9  ;;  %1583 = vrot.lane.b32.xlu0 %v2965_v12, %s2879_s30 }
 0x1c3   : > { %v1256_v3 = vpop.permute.xlu1 %1255 }
 0x1c4   : > { %v1254_v20 = vpop.permute.xlu0 %1253 }
 0x1c5   : > { %v1285_v19 = vsel %vm1283_vm2, %v1254_v20, %v1256_v3  ;;  %1666 = vrot.lane.b32.xlu1 %v3038_v30, %s2880_s3 }
 0x1c6   : > { %1315 = vst [vmem:[#allocation2 + $0x348] sm:$0xf0] %v1285_v19  ;;  %1664 = vrot.lane.b32.xlu0 %v3020_v25, %s2880_s3 }
 0x1c7   : > { %v4051_v2 = vpop.permute.xlu1 %1259 }
 0x1c8   : > { %v1258_v52 = vpop.permute.xlu0 %1257 }
 0x1c9   : > { %v1286_v4 = vsel %vm1283_vm2, %v1256_v3, %v1258_v52  ;;  %v1287_v12 = vsel %vm1283_vm2, %v1258_v52, %v4051_v2  ;;  %1670 = vrot.lane.b32.xlu1 %v3055_v35, %s2880_s3  ;;  %v4822_v3 = vld [vmem:[#allocation29_spill] sm:$0xff] }
 0x1ca   : > { %1316 = vst [vmem:[#allocation2 + $0x350] sm:$0xf0] %v1286_v4  ;;  %1317 = vst [vmem:[#allocation2 + $0x358] sm:$0xf0] %v1287_v12  ;;  %1668 = vrot.lane.b32.xlu0 %v3034_v29, %s2880_s3 }
 0x1cb   : > { %v1173_v30 = vpop.permute.xlu1 %1172 }
 0x1cc   : > { %v1110_v57 = vpop.permute.xlu0 %1109  ;;  %v1205_v25 = vsel %vm1204_vm7, %v1173_v30, %v1175_v38 }
 0x1cd   : > { %v1133_v1 = vsel %vm1125_vm5, %v1110_v57, %v4001_v63  ;;  %v2068_v15 = vld [vmem:[#allocation2 + $0x348] sm:$0xff]  ;;  %1235 = vst [vmem:[#allocation2 + $0x300] sm:$0xf8] %v1205_v25  ;;  %1729 = vrot.lane.b32.xlu1 %v3089_v43, %s2881_s4  ;;  %v4824_v25 = vld [vmem:[#allocation35_spill] sm:$0xff] }
 0x1ce   : > { %1164 = vst [vmem:[#allocation2 + $0x300] sm:$0x7] %v1133_v1  ;;  %1727 = vrot.lane.b32.xlu0 %v3076_v40, %s2881_s4  ;;  %v2640_v35 = vpack.c.bf16 %v2068_v15, %v2060_v18  ;;  %v4825_v1 = vld [vmem:[#allocation32_spill] sm:$0xff] }
 0x1cf   : > { %v1252_v29 = vpop.permute.xlu1 %1251 }
 0x1d0   : > { %v1189_v53 = vpop.permute.xlu0 %1188  ;;  %2641 = vmatprep.subr.bf16.mxu0 %v2640_v35  ;;  %v1284_v44 = vsel %vm1283_vm2, %v1252_v29, %v1254_v20  ;;  %v4823_v20 = vld [vmem:[#allocation26_spill] sm:$0xff] }
 0x1d1   : > { %v1212_v63 = vsel %vm1204_vm7, %v1189_v53, %v1191_v22  ;;  %v2070_v46 = vld [vmem:[#allocation2 + $0x358] sm:$0xff]  ;;  %v2069_v47 = vld [vmem:[#allocation2 + $0x350] sm:$0xff]  ;;  %1314 = vst [vmem:[#allocation2 + $0x340] sm:$0xf0] %v1284_v44  ;;  %1733 = vrot.lane.b32.xlu1 %v3103_v45, %s2881_s4 }
 0x1d2   : > { %1243 = vst [vmem:[#allocation2 + $0x340] sm:$0xf] %v1212_v63  ;;  %1731 = vrot.lane.b32.xlu0 %v3086_v42, %s2881_s4  ;;  %v2690_v40 = vpack.c.bf16 %v2070_v46, %v2062_v17  ;;  %v2692_v43 = vpack.c.bf16 %v2069_v47, %v2061_v7  ;;  %v4826_v7 = vld [vmem:[#allocation37_spill] sm:$0xff]  ;;  %v4827_v47 = vld [vmem:[#allocation34_spill] sm:$0xff] }
 0x1d3   : > { %v1272_v48 = vpop.permute.xlu1 %1271 }
 0x1d4   : > { %2691 = vmatprep.subr.bf16.mxu1 %v2690_v40  ;;  %v4073_v56 = vpop.permute.xlu0 %1269 }
 0x1d5   : > { %v1292_v62 = vsel %vm1283_vm2, %v4073_v56, %v1272_v48  ;;  %2693 = vmatpush1.bf16.msra.mxu1 %v2692_v43  ;;  %1745 = vrot.lane.b32.xlu1 %v3141_v55, %s2881_s4  ;;  %v2059_v39 = vld [vmem:[#allocation2 + $0x300] sm:$0xff] }
 0x1d6   : > { %1323 = vst [vmem:[#allocation2 + $0x388] sm:$0x1f] %v1292_v62  ;;  %1743 = vrot.lane.b32.xlu0 %v3123_v50, %s2881_s4 }
 0x1d7   : > { %v4081_v45 = vpop.permute.xlu1 %1275 }
 0x1d8   : > { %v1274_v42 = vpop.permute.xlu0 %1273 }
 0x1d9   : > { %v1293_v36 = vsel %vm1283_vm2, %v1272_v48, %v1274_v42  ;;  %v1294_v11 = vsel %vm1283_vm2, %v1274_v42, %v4081_v45  ;;  %v2067_v31 = vld [vmem:[#allocation2 + $0x340] sm:$0xff]  ;;  %1749 = vrot.lane.b32.xlu1 %v3155_v59, %s2881_s4 }
 0x1da   : > { %1324 = vst [vmem:[#allocation2 + $0x390] sm:$0x1f] %v1293_v36  ;;  %1325 = vst [vmem:[#allocation2 + $0x398] sm:$0x1f] %v1294_v11  ;;  %1747 = vrot.lane.b32.xlu0 %v3137_v54, %s2881_s4  ;;  %v2642_v50 = vpack.c.bf16 %v2067_v31, %v2059_v39  ;;  %v4828_v42 = vld [vmem:[#allocation43_spill] sm:$0xff]  ;;  %v4829_v36 = vld [vmem:[#allocation40_spill] sm:$0xff] }
 0x1db   : > { %v1335_v55 = vpop.permute.xlu1 %1334 }
 0x1dc   : > { %v1333_v51 = vpop.permute.xlu0 %1332  ;;  %2643 = vmatpush1.bf16.msra.mxu0 %v2642_v50 }
 0x1dd   : > { %v1364_v24 = vsel %vm4703_vm1, %v1333_v51, %v1335_v55  ;;  %1808 = vrot.lane.b32.xlu1 %v3189_v28, %s2882_s5 }
 0x1de   : > { %1394 = vst [vmem:[#allocation2 + $0x388] sm:$0xe0] %v1364_v24  ;;  %1806 = vrot.lane.b32.xlu0 %v3176_v23, %s2882_s5  ;;  %v4830_v24 = vld [vmem:[#allocation45_spill] sm:$0xff] }
 0x1df   : > { %v4095_v38 = vpop.permute.xlu1 %1338 }
 0x1e0   : > { %v1337_v59 = vpop.permute.xlu0 %1336 }
 0x1e1   : > { %v1365_v54 = vsel %vm4703_vm1, %v1335_v55, %v1337_v59  ;;  %v1366_v8 = vsel %vm4703_vm1, %v1337_v59, %v4095_v38  ;;  %1812 = vrot.lane.b32.xlu1 %v3199_v32, %s2882_s5  ;;  %v4831_v59 = vld [vmem:[#allocation42_spill] sm:$0xff] }
 0x1e2   : > { %1395 = vst [vmem:[#allocation2 + $0x390] sm:$0xe0] %v1365_v54  ;;  %1396 = vst [vmem:[#allocation2 + $0x398] sm:$0xe0] %v1366_v8  ;;  %1810 = vrot.lane.b32.xlu0 %v3186_v27, %s2882_s5  ;;  %v4819_v27 = vld [vmem:[#allocation16_spill] sm:$0xff] }
 0x1e3   : > { %v1351_v28 = vpop.permute.xlu1 %1350  ;;  %v4162_v8 = vld.sshfl [vmem:[%s4569_s1] sm:$0x33 pattern:$0x76325410] }
 0x1e4   : > { %v1349_v14 = vpop.permute.xlu0 %1348 }
 0x1e5   : > { %v1371_v23 = vsel %vm4703_vm1, %v1349_v14, %v1351_v28  ;;  %1725 = vrot.lane.b32.xlu1 %v3079_v41, %s2881_s4  ;;  %v2076_v30 = vld [vmem:[#allocation2 + $0x388] sm:$0xff] }
 0x1e6   : > { %1402 = vst [vmem:[#allocation2 + $0x3c8] sm:$0x3f] %v1371_v23  ;;  %1662 = vrot.lane.b32.xlu0 %v3024_v26, %s2880_s3 }
 0x1e7   : > { %v4109_v60 = vpop.permute.xlu1 %1354 }
 0x1e8   : > { %v1353_v5 = vpop.permute.xlu0 %1352 }
 0x1e9   : > { %v1372_v10 = vsel %vm4703_vm1, %v1351_v28, %v1353_v5  ;;  %v1373_v32 = vsel %vm4703_vm1, %v1353_v5, %v4109_v60  ;;  %1804 = vrot.lane.b32.xlu1 %v4791_v33, %s2882_s5  ;;  %v2078_v29 = vld [vmem:[#allocation2 + $0x398] sm:$0xff]  ;;  %v2077_v63 = vld [vmem:[#allocation2 + $0x390] sm:$0xff]  ;;  %v4166_v28 = vcombine.high %v4162_v8, %v4162_v8 }
 0x1ea   : > { %1403 = vst [vmem:[#allocation2 + $0x3d0] sm:$0x3f] %v1372_v10  ;;  %1404 = vst [vmem:[#allocation2 + $0x3d8] sm:$0x3f] %v1373_v32  ;;  %1741 = vrot.lane.b32.xlu0 %v4819_v27, %s2881_s4  ;;  %v4832_v10 = vld [vmem:[#allocation33_spill] sm:$0xff] }
 0x1eb   : > { %v1414_v41 = vpop.permute.xlu1 %1413  ;;  %2605 = vmatprep.mubr.msk.f32.mxu1 %vm2165_vm0, %v4166_v28  ;;  %2602 = vmatprep.mubr.msk.f32.mxu0 %vm2165_vm0, %v4166_v28  ;;  %v4833_v32 = vld [vmem:[#allocation25_spill] sm:$0xff] }
 0x1ec   : > { %v1412_v22 = vpop.permute.xlu0 %1411 }
 0x1ed   : > { %v1443_v26 = vsel %vm4700_vm3, %v1412_v22, %v1414_v41  ;;  %1824 = vrot.lane.b32.xlu1 %v4820_v16, %s2882_s5  ;;  %v4834_v16 = vld [vmem:[#allocation10_spill] sm:$0xff] }
 0x1ee   : > { %1473 = vst [vmem:[#allocation2 + $0x3c8] sm:$0xc0] %v1443_v26  ;;  %1822 = vrot.lane.b32.xlu0 %v4821_v61, %s2882_s5 }
 0x1ef   : > { %v4123_v34 = vpop.permute.xlu1 %1417 }
 0x1f0   : > { %v1416_v0 = vpop.permute.xlu0 %1415 }
 0x1f1   : > { %v1444_v33 = vsel %vm4700_vm3, %v1414_v41, %v1416_v0  ;;  %v1445_v9 = vsel %vm4700_vm3, %v1416_v0, %v4123_v34  ;;  %1828 = vrot.lane.b32.xlu1 %v4822_v3, %s2882_s5  ;;  %v4835_v3 = vld [vmem:[#allocation13_spill] sm:$0xff] }
 0x1f2   : > { %1474 = vst [vmem:[#allocation2 + $0x3d0] sm:$0xc0] %v1444_v33  ;;  %1475 = vst [vmem:[#allocation2 + $0x3d8] sm:$0xc0] %v1445_v9  ;;  %1826 = vrot.lane.b32.xlu0 %v4823_v20, %s2882_s5  ;;  %v4836_v20 = vld [vmem:[#allocation12_spill] sm:$0xff] }
 0x1f3   : > { %v1331_v19 = vpop.permute.xlu1 %1330 }
 0x1f4   : > { %v1268_v52 = vpop.permute.xlu0 %1267  ;;  %v1363_v4 = vsel %vm4703_vm1, %v1331_v19, %v1333_v51 }
 0x1f5   : > { %v1291_v12 = vsel %vm1283_vm2, %v1268_v52, %v4073_v56  ;;  %v2084_v57 = vld [vmem:[#allocation2 + $0x3c8] sm:$0xff]  ;;  %1393 = vst [vmem:[#allocation2 + $0x380] sm:$0xe0] %v1363_v4  ;;  %1887 = vrot.lane.b32.xlu1 %v4824_v25, %s2883_s6  ;;  %v4837_v25 = vld [vmem:[#allocation11_spill] sm:$0xff] }
 0x1f6   : > { %1322 = vst [vmem:[#allocation2 + $0x380] sm:$0x1f] %v1291_v12  ;;  %1885 = vrot.lane.b32.xlu0 %v4825_v1, %s2883_s6  ;;  %v2644_v18 = vpack.c.bf16 %v2084_v57, %v2076_v30  ;;  %v4838_v1 = vld [vmem:[#allocation15_spill] sm:$0xff] }
 0x1f7   : > { %v1410_v15 = vpop.permute.xlu1 %1409 }
 0x1f8   : > { %v1347_v35 = vpop.permute.xlu0 %1346  ;;  %2645 = vmatprep.subr.bf16.mxu0 %v2644_v18  ;;  %v1442_v53 = vsel %vm4700_vm3, %v1410_v15, %v1412_v22 }
 0x1f9   : > { %v1370_v17 = vsel %vm4703_vm1, %v1347_v35, %v1349_v14  ;;  %v2086_v44 = vld [vmem:[#allocation2 + $0x3d8] sm:$0xff]  ;;  %v2085_v46 = vld [vmem:[#allocation2 + $0x3d0] sm:$0xff]  ;;  %1472 = vst [vmem:[#allocation2 + $0x3c0] sm:$0xc0] %v1442_v53  ;;  %1891 = vrot.lane.b32.xlu1 %v4826_v7, %s2883_s6 }
 0x1fa   : > { %1401 = vst [vmem:[#allocation2 + $0x3c0] sm:$0x3f] %v1370_v17  ;;  %1889 = vrot.lane.b32.xlu0 %v4827_v47, %s2883_s6  ;;  %v2694_v40 = vpack.c.bf16 %v2086_v44, %v2078_v29  ;;  %v2696_v43 = vpack.c.bf16 %v2085_v46, %v2077_v63  ;;  %v4839_v44 = vld [vmem:[#allocation17_spill] sm:$0xff]  ;;  %v4840_v63 = vld [vmem:[#allocation14_spill] sm:$0xff] }
 0x1fb   : > { %v1430_v48 = vpop.permute.xlu1 %1429 }
 0x1fc   : > { %2695 = vmatprep.subr.bf16.mxu1 %v2694_v40  ;;  %v1428_v56 = vpop.permute.xlu0 %1427  ;;  %v4841_v40 = vld [vmem:[#allocation21_spill] sm:$0xff] }
 0x1fd   : > { %v1450_v62 = vsel %vm4700_vm3, %v1428_v56, %v1430_v48  ;;  %2697 = vmatpush1.bf16.msra.mxu1 %v2696_v43  ;;  %1903 = vrot.lane.b32.xlu1 %v4828_v42, %s2883_s6  ;;  %v2075_v55 = vld [vmem:[#allocation2 + $0x380] sm:$0xff] }
 0x1fe   : > { %1481 = vst [vmem:[#allocation2 + $0x408] sm:$0x7f] %v1450_v62  ;;  %1901 = vrot.lane.b32.xlu0 %v4829_v36, %s2883_s6  ;;  %v4842_v43 = vld [vmem:[#allocation19_spill] sm:$0xff] }
 0x1ff   : > { %v4150_v11 = vpop.permute.xlu1 %1433 }
 0x200   : > { %v1432_v39 = vpop.permute.xlu0 %1431 }
 0x201   : > { %v1451_v31 = vsel %vm4700_vm3, %v1430_v48, %v1432_v39  ;;  %v1452_v50 = vsel %vm4700_vm3, %v1432_v39, %v4150_v11  ;;  %v2083_v51 = vld [vmem:[#allocation2 + $0x3c0] sm:$0xff]  ;;  %1907 = vrot.lane.b32.xlu1 %v4830_v24, %s2883_s6  ;;  %v4843_v39 = vld [vmem:[#allocation28_spill] sm:$0xff] }
 0x202   : > { %1482 = vst [vmem:[#allocation2 + $0x410] sm:$0x7f] %v1451_v31  ;;  %1483 = vst [vmem:[#allocation2 + $0x418] sm:$0x7f] %v1452_v50  ;;  %1905 = vrot.lane.b32.xlu0 %v4831_v59, %s2883_s6  ;;  %v2646_v54 = vpack.c.bf16 %v2083_v51, %v2075_v55  ;;  %v4844_v31 = vld [vmem:[#allocation23_spill] sm:$0xff]  ;;  %v4845_v59 = vld [vmem:[#allocation36_spill] sm:$0xff] }
 0x203   : > { %v1493_v14 = vpop.permute.xlu1 %1492 }
 0x204   : > { %v1491_v23 = vpop.permute.xlu0 %1490  ;;  %2647 = vmatpush1.bf16.msra.mxu0 %v2646_v54  ;;  %v4846_v54 = vld [vmem:[#allocation31_spill] sm:$0xff] }
 0x205   : > { %v1522_v5 = vsel %vm4698_vm14, %v1491_v23, %v1493_v14  ;;  %1883 = vrot.lane.b32.xlu1 %v4832_v10, %s2883_s6 }
 0x206   : > { %1552 = vst [vmem:[#allocation2 + $0x408] sm:$0x80] %v1522_v5  ;;  %1820 = vrot.lane.b32.xlu0 %v4833_v32, %s2882_s5  ;;  %v4847_v32 = vld [vmem:[#allocation18_spill] sm:$0xff] }
 0x207   : > { %v4177_v27 = vpop.permute.xlu1 %1496 }
 0x208   : > { %v1495_v41 = vpop.permute.xlu0 %1494 }
 0x209   : > { %v1523_v22 = vsel %vm4698_vm14, %v1493_v14, %v1495_v41  ;;  %v1524_v26 = vsel %vm4698_vm14, %v1495_v41, %v4177_v27  ;;  %1040 = vrot.lane.b32.xlu1 %v4834_v16, %s2872_s23  ;;  %v4848_v41 = vld [vmem:[#allocation39_spill] sm:$0xff] }
 0x20a   : > { %1553 = vst [vmem:[#allocation2 + $0x410] sm:$0x80] %v1523_v22  ;;  %1554 = vst [vmem:[#allocation2 + $0x418] sm:$0x80] %v1524_v26  ;;  %1899 = vrot.lane.b32.xlu0 %v4808_v58, %s2883_s6 }
 0x20b   : > { %v1509_v61 = vpop.permute.xlu1 %1508 }
 0x20c   : > { %v1507_v0 = vpop.permute.xlu0 %1506 }
 0x20d   : > { %v1529_v33 = vsel %vm4698_vm14, %v1507_v0, %v1509_v61  ;;  %v2092_v9 = vld [vmem:[#allocation2 + $0x408] sm:$0xff]  ;;  %1103 = vrot.lane.b32.xlu1 %v4835_v3, %s2873_s24 }
 0x20e   : > { %1042 = vrot.lane.b32.xlu0 %v4836_v20, %s2872_s23  ;;  %v2648_v19 = vpack.c.bf16 %v1529_v33, %v2092_v9  ;;  %v4850_v33 = vld [vmem:[#allocation22_spill] sm:$0xff] }
 0x20f   : > { %v4191_v52 = vpop.permute.xlu1 %1512 }
 0x210   : > { %v1511_v4 = vpop.permute.xlu0 %1510  ;;  %2649 = vmatprep.subr.bf16.mxu0 %v2648_v19 }
 0x211   : > { %v1530_v12 = vsel %vm4698_vm14, %v1509_v61, %v1511_v4  ;;  %v1531_v58 = vsel %vm4698_vm14, %v1511_v4, %v4191_v52  ;;  %v2094_v30 = vld [vmem:[#allocation2 + $0x418] sm:$0xff]  ;;  %v2093_v57 = vld [vmem:[#allocation2 + $0x410] sm:$0xff]  ;;  %1044 = vrot.lane.b32.xlu1 %v4837_v25, %s2872_s23 }
 0x212   : > { %1105 = vrot.lane.b32.xlu0 %v4838_v1, %s2873_s24  ;;  %v2698_v18 = vpack.c.bf16 %v1531_v58, %v2094_v30  ;;  %v2700_v15 = vpack.c.bf16 %v1530_v12, %v2093_v57  ;;  %v4851_v58 = vld [vmem:[#allocation44_spill] sm:$0xff]  ;;  %v4852_v30 = vld [vmem:[#allocation38_spill] sm:$0xff] }
 0x213   : > { %v1489_v35 = vpop.permute.xlu1 %1488 }
 0x214   : > { %v1426_v29 = vpop.permute.xlu0 %1425  ;;  %2699 = vmatprep.subr.bf16.mxu1 %v2698_v18  ;;  %v1521_v53 = vsel %vm4698_vm14, %v1489_v35, %v1491_v23 }
 0x215   : > { %v1449_v17 = vsel %vm4700_vm3, %v1426_v29, %v1428_v56  ;;  %2701 = vmatpush1.bf16.msra.mxu1 %v2700_v15  ;;  %1551 = vst [vmem:[#allocation2 + $0x400] sm:$0x80] %v1521_v53  ;;  %1119 = vrot.lane.b32.xlu1 %v4839_v44, %s2873_s24  ;;  %v4853_v29 = vld [vmem:[#allocation52_spill] sm:$0xff]  ;;  %v4854_v53 = vld [vmem:[#allocation47_spill] sm:$0xff]  ;;  %vm1836_vm3 = vcmask 891904  }
 0x216   : > { %1480 = vst [vmem:[#allocation2 + $0x400] sm:$0x7f] %v1449_v17  ;;  %1107 = vrot.lane.b32.xlu0 %v4840_v63, %s2873_s24 }
 0x217   : > { %v1570_v46 = vpop.permute.xlu1 %1569 }
 0x218   : > { %v1505_v7 = vpop.permute.xlu0 %1504 }
 0x219   : > { %v1528_v47 = vsel %vm4698_vm14, %v1505_v7, %v1507_v0  ;;  %1182 = vrot.lane.b32.xlu1 %v4841_v40, %s2874_s25  ;;  %v4849_v0 = vld [vmem:[#allocation30_spill] sm:$0xff]  ;;  %vm4702_vm14 = vcmask 908288  }
 0x21a   : > { %1121 = vrot.lane.b32.xlu0 %v4842_v43, %s2873_s24 }
 0x21b   : > { %v1574_v48 = vpop.permute.xlu1 %1573 }
 0x21c   : > { %v1572_v56 = vpop.permute.xlu0 %1571 }
 0x21d   : > { %v1601_v62 = vsel %vm4699_vm10, %v1570_v46, %v1572_v56  ;;  %v4213_v42 = vsel %vm4699_vm10, %v1572_v56, %v1574_v48  ;;  %v2091_v36 = vld [vmem:[#allocation2 + $0x400] sm:$0xff]  ;;  %1198 = vrot.lane.b32.xlu1 %v4843_v39, %s2874_s25 }
 0x21e   : > { %1184 = vrot.lane.b32.xlu0 %v4844_v31, %s2874_s25  ;;  %v2650_v50 = vpack.c.bf16 %v1528_v47, %v2091_v36  ;;  %v4856_v36 = vld [vmem:[#allocation55_spill] sm:$0xff] }
 0x21f   : > { %v1586_v55 = vpop.permute.xlu1 %1585 }
 0x220   : > { %v4219_v51 = vpop.permute.xlu0 %1575  ;;  %2651 = vmatpush1.bf16.msra.mxu0 %v2650_v50 }
 0x221   : > { %v1603_v24 = vsel %vm4699_vm10, %v1574_v48, %v4219_v51  ;;  %1261 = vrot.lane.b32.xlu1 %v4845_v59, %s2875_s26 }
 0x222   : > { %1200 = vrot.lane.b32.xlu0 %v4846_v54, %s2874_s25 }
 0x223   : > { %v1590_v14 = vpop.permute.xlu1 %1589 }
 0x224   : > { %v1588_v23 = vpop.permute.xlu0 %1587 }
 0x225   : > { %v1608_v5 = vsel %vm4699_vm10, %v1586_v55, %v1588_v23  ;;  %v1609_v10 = vsel %vm4699_vm10, %v1588_v23, %v1590_v14  ;;  %1123 = vrot.lane.b32.xlu1 %v4847_v32, %s2873_s24 }
 0x226   : > { %1639 = vst [vmem:[#allocation2 + $0x4c8] sm:$0x1] %v1608_v5  ;;  %1640 = vst [vmem:[#allocation2 + $0x4d0] sm:$0x1] %v1609_v10  ;;  %1263 = vrot.lane.b32.xlu0 %v4848_v41, %s2875_s26 }
 0x227   : > { %v1649_v22 = vpop.permute.xlu1 %1648 }
 0x228   : > { %v4233_v26 = vpop.permute.xlu0 %1591 }
 0x229   : > { %v1610_v61 = vsel %vm4699_vm10, %v1590_v14, %v4233_v26  ;;  %1202 = vrot.lane.b32.xlu1 %v4849_v0, %s2874_s25 }
 0x22a   : > { %1641 = vst [vmem:[#allocation2 + $0x4d8] sm:$0x1] %v1610_v61  ;;  %1186 = vrot.lane.b32.xlu0 %v4850_v33, %s2874_s25  ;;  %v4858_v61 = vld [vmem:[#allocation63_spill] sm:$0xff] }
 0x22b   : > { %v1653_v9 = vpop.permute.xlu1 %1652 }
 0x22c   : > { %v1651_v19 = vpop.permute.xlu0 %1650 }
 0x22d   : > { %v1680_v4 = vsel %vm4702_vm14, %v1649_v22, %v1651_v19  ;;  %v1681_v12 = vsel %vm4702_vm14, %v1651_v19, %v1653_v9  ;;  %1277 = vrot.lane.b32.xlu1 %v4851_v58, %s2875_s26 }
 0x22e   : > { %1710 = vst [vmem:[#allocation2 + $0x4c8] sm:$0xfe] %v1680_v4  ;;  %1711 = vst [vmem:[#allocation2 + $0x4d0] sm:$0xfe] %v1681_v12  ;;  %1265 = vrot.lane.b32.xlu0 %v4852_v30, %s2875_s26 }
 0x22f   : > { %v1568_v57 = vpop.permute.xlu1 %1567 }
 0x230   : > { %v4247_v18 = vpop.permute.xlu0 %1654  ;;  %v1600_v15 = vsel %vm4699_vm10, %v1568_v57, %v1570_v46  ;;  %v4855_v46 = vld [vmem:[#allocation60_spill] sm:$0xff] }
 0x231   : > { %v1682_v35 = vsel %vm4702_vm14, %v1653_v9, %v4247_v18  ;;  %1340 = vrot.lane.b32.xlu1 %v4853_v29, %s2876_s27  ;;  %v4859_v29 = vld [vmem:[#allocation46_spill] sm:$0xff] }
 0x232   : > { %1712 = vst [vmem:[#allocation2 + $0x4d8] sm:$0xfe] %v1682_v35  ;;  %1279 = vrot.lane.b32.xlu0 %v4854_v53, %s2875_s26 }
 0x233   : > { %v1647_v17 = vpop.permute.xlu1 %1646 }
 0x234   : > { %v1584_v7 = vpop.permute.xlu0 %1583  ;;  %v1679_v47 = vsel %vm4702_vm14, %v1647_v17, %v1649_v22 }
 0x235   : > { %v1607_v48 = vsel %vm4699_vm10, %v1584_v7, %v1586_v55  ;;  %v2116_v56 = vld [vmem:[#allocation2 + $0x4c8] sm:$0xff]  ;;  %1709 = vst [vmem:[#allocation2 + $0x4c0] sm:$0xfe] %v1679_v47  ;;  %1356 = vrot.lane.b32.xlu1 %v4855_v46, %s2876_s27  ;;  %v2117_v5 = vld [vmem:[#allocation2 + $0x4d0] sm:$0xff]  ;;  %vm4701_vm10 = vcmask 900096  }
 0x236   : > { %1638 = vst [vmem:[#allocation2 + $0x4c0] sm:$0x1] %v1607_v48  ;;  %1342 = vrot.lane.b32.xlu0 %v4856_v36, %s2876_s27  ;;  %v2652_v50 = vpack.c.bf16 %v2116_v56, %v1601_v62  ;;  %v4857_v55 = vld [vmem:[#allocation65_spill] sm:$0xff]  ;;  %v2704_v19 = vpack.c.bf16 %v2117_v5, %v4213_v42  ;;  %v4861_v48 = vld [vmem:[#allocation62_spill] sm:$0xff] }
 0x237   : > { %v1667_v14 = vpop.permute.xlu1 %1666  ;;  %v4862_v56 = vld [vmem:[#allocation54_spill] sm:$0xff] }
 0x238   : > { %v4262_v23 = vpop.permute.xlu0 %1664  ;;  %2653 = vmatprep.subr.bf16.mxu0 %v2652_v50  ;;  %v4864_v5 = vld [vmem:[#allocation66_spill] sm:$0xff] }
 0x239   : > { %v1687_v10 = vsel %vm4702_vm14, %v4262_v23, %v1667_v14  ;;  %v2118_v22 = vld [vmem:[#allocation2 + $0x4d8] sm:$0xff]  ;;  %1419 = vrot.lane.b32.xlu1 %v4857_v55, %s2877_s28 }
 0x23a   : > { %1718 = vst [vmem:[#allocation2 + $0x508] sm:$0x3] %v1687_v10  ;;  %1358 = vrot.lane.b32.xlu0 %v4858_v61, %s2876_s27  ;;  %v2702_v9 = vpack.c.bf16 %v2118_v22, %v1603_v24  ;;  %v4860_v24 = vld [vmem:[#allocation67_spill] sm:$0xff]  ;;  %v4865_v61 = vld [vmem:[#allocation76_spill] sm:$0xff] }
 0x23b   : > { %v4271_v62 = vpop.permute.xlu1 %1670 }
 0x23c   : > { %2703 = vmatprep.subr.bf16.mxu1 %v2702_v9  ;;  %v1669_v4 = vpop.permute.xlu0 %1668  ;;  %v4866_v9 = vld [vmem:[#allocation74_spill] sm:$0xff] }
 0x23d   : > { %v1688_v12 = vsel %vm4702_vm14, %v1667_v14, %v1669_v4  ;;  %v1689_v57 = vsel %vm4702_vm14, %v1669_v4, %v4271_v62  ;;  %2705 = vmatpush1.bf16.msra.mxu1 %v2704_v19  ;;  %v2115_v35 = vld [vmem:[#allocation2 + $0x4c0] sm:$0xff]  ;;  %1281 = vrot.lane.b32.xlu1 %v4859_v29, %s2875_s26 }
 0x23e   : > { %1719 = vst [vmem:[#allocation2 + $0x510] sm:$0x3] %v1688_v12  ;;  %1720 = vst [vmem:[#allocation2 + $0x518] sm:$0x3] %v1689_v57  ;;  %1421 = vrot.lane.b32.xlu0 %v4860_v24, %s2877_s28  ;;  %v2654_v42 = vpack.c.bf16 %v2115_v35, %v1600_v15  ;;  %v4863_v14 = vld [vmem:[#allocation71_spill] sm:$0xff]  ;;  %v4867_v35 = vld [vmem:[#allocation80_spill] sm:$0xff] }
 0x23f   : > { %v1730_v17 = vpop.permute.xlu1 %1729  ;;  %v4868_v24 = vld [vmem:[#allocation78_spill] sm:$0xff] }
 0x240   : > { %v1728_v7 = vpop.permute.xlu0 %1727  ;;  %2655 = vmatpush1.bf16.msra.mxu0 %v2654_v42 }
 0x241   : > { %v1759_v47 = vsel %vm4701_vm10, %v1728_v7, %v1730_v17  ;;  %1360 = vrot.lane.b32.xlu1 %v4861_v48, %s2876_s27  ;;  %v4869_v48 = vld [vmem:[#allocation73_spill] sm:$0xff] }
 0x242   : > { %1789 = vst [vmem:[#allocation2 + $0x508] sm:$0xfc] %v1759_v47  ;;  %1344 = vrot.lane.b32.xlu0 %v4862_v56, %s2876_s27  ;;  %v4870_v56 = vld [vmem:[#allocation82_spill] sm:$0xff] }
 0x243   : > { %v4285_v46 = vpop.permute.xlu1 %1733 }
 0x244   : > { %v1732_v36 = vpop.permute.xlu0 %1731 }
 0x245   : > { %v1760_v50 = vsel %vm4701_vm10, %v1730_v17, %v1732_v36  ;;  %v1761_v15 = vsel %vm4701_vm10, %v1732_v36, %v4285_v46  ;;  %1435 = vrot.lane.b32.xlu1 %v4863_v14, %s2877_s28 }
 0x246   : > { %1790 = vst [vmem:[#allocation2 + $0x510] sm:$0xfc] %v1760_v50  ;;  %1791 = vst [vmem:[#allocation2 + $0x518] sm:$0xfc] %v1761_v15  ;;  %1423 = vrot.lane.b32.xlu0 %v4864_v5, %s2877_s28  ;;  %v4871_v5 = vld [vmem:[#allocation81_spill] sm:$0xff] }
 0x247   : > { %v1746_v10 = vpop.permute.xlu1 %1745 }
 0x248   : > { %v1744_v22 = vpop.permute.xlu0 %1743 }
 0x249   : > { %v1766_v55 = vsel %vm4701_vm10, %v1744_v22, %v1746_v10  ;;  %1498 = vrot.lane.b32.xlu1 %v4865_v61, %s2878_s29 }
 0x24a   : > { %1797 = vst [vmem:[#allocation2 + $0x548] sm:$0x7] %v1766_v55  ;;  %1437 = vrot.lane.b32.xlu0 %v4866_v9, %s2877_s28 }
 0x24b   : > { %v4299_v19 = vpop.permute.xlu1 %1749 }
 0x24c   : > { %v1748_v4 = vpop.permute.xlu0 %1747 }
 0x24d   : > { %v1767_v12 = vsel %vm4701_vm10, %v1746_v10, %v1748_v4  ;;  %v1768_v57 = vsel %vm4701_vm10, %v1748_v4, %v4299_v19  ;;  %1514 = vrot.lane.b32.xlu1 %v4867_v35, %s2878_s29  ;;  %v4872_v10 = vld [vmem:[#allocation77_spill] sm:$0xff] }
 0x24e   : > { %1798 = vst [vmem:[#allocation2 + $0x550] sm:$0x7] %v1767_v12  ;;  %1799 = vst [vmem:[#allocation2 + $0x558] sm:$0x7] %v1768_v57  ;;  %1500 = vrot.lane.b32.xlu0 %v4868_v24, %s2878_s29  ;;  %v2124_v12 = vld [vmem:[#allocation2 + $0x508] sm:$0xff]  ;;  %v2853_v35 = vld [vmem:[#allocation2 + $0x30] sm:$0xff] }
 0x24f   : > { %v1809_v42 = vpop.permute.xlu1 %1808  ;;  %v2854_v24 = vld [vmem:[#allocation2 + $0x28] sm:$0xff] }
 0x250   : > { %v1807_v17 = vpop.permute.xlu0 %1806 }
 0x251   : > { %v1838_v47 = vsel %vm1836_vm3, %v1807_v17, %v1809_v42  ;;  %1439 = vrot.lane.b32.xlu1 %v4869_v48, %s2877_s28 }
 0x252   : > { %1868 = vst [vmem:[#allocation2 + $0x548] sm:$0xf8] %v1838_v47  ;;  %1516 = vrot.lane.b32.xlu0 %v4870_v56, %s2878_s29  ;;  %v2126_v56 = vld [vmem:[#allocation2 + $0x518] sm:$0xff] }
 0x253   : > { %v4313_v36 = vpop.permute.xlu1 %1812 }
 0x254   : > { %v1811_v50 = vpop.permute.xlu0 %1810 }
 0x255   : > { %v1839_v15 = vsel %vm1836_vm3, %v1809_v42, %v1811_v50  ;;  %v1840_v14 = vsel %vm1836_vm3, %v1811_v50, %v4313_v36  ;;  %1518 = vrot.lane.b32.xlu1 %v4871_v5, %s2878_s29  ;;  %v4873_v5 = vld [vmem:[#allocation4_spill] sm:$0xff] }
 0x256   : > { %1869 = vst [vmem:[#allocation2 + $0x550] sm:$0xf8] %v1839_v15  ;;  %1870 = vst [vmem:[#allocation2 + $0x558] sm:$0xf8] %v1840_v14  ;;  %1502 = vrot.lane.b32.xlu0 %v4872_v10, %s2878_s29  ;;  %v2125_v15 = vld [vmem:[#allocation2 + $0x510] sm:$0xff]  ;;  %v4874_v10 = vld [vmem:[#allocation3_spill] sm:$0xff] }
 0x257   : > { %v1726_v55 = vpop.permute.xlu1 %1725 }
 0x258   : > { %v1663_v61 = vpop.permute.xlu0 %1662  ;;  %v1758_v9 = vsel %vm4701_vm10, %v1726_v55, %v1728_v7 }
 0x259   : > { %v1686_v4 = vsel %vm4702_vm14, %v1663_v61, %v4262_v23  ;;  %v2132_v57 = vld [vmem:[#allocation2 + $0x548] sm:$0xff]  ;;  %1788 = vst [vmem:[#allocation2 + $0x500] sm:$0xfc] %v1758_v9  ;;  %1579 = vrot.lane.b32.xlu1 %v2853_v35, %s2879_s30  ;;  %vm2884_vm14 = vmmov 1  }
 0x25a   : > { %1717 = vst [vmem:[#allocation2 + $0x500] sm:$0x3] %v1686_v4  ;;  %1577 = vrot.lane.b32.xlu0 %v2854_v24, %s2879_s30  ;;  %v2656_v42 = vpack.c.bf16 %v2132_v57, %v2124_v12  ;;  %v4876_v12 = vld [vmem:[#allocation5_spill] sm:$0xff]  ;;  %vm4378_vm1 = vmpackc.low %vm618_vm8, %vm2884_vm14 }
 0x25b   : > { %v1805_v47 = vpop.permute.xlu1 %1804 }
 0x25c   : > { %v1742_v48 = vpop.permute.xlu0 %1741  ;;  %2657 = vmatprep.subr.bf16.mxu0 %v2656_v42  ;;  %v1837_v7 = vsel %vm1836_vm3, %v1805_v47, %v1807_v17 }
 0x25d   : > { %v1765_v50 = vsel %vm4701_vm10, %v1742_v48, %v1744_v22  ;;  %v2134_v23 = vld [vmem:[#allocation2 + $0x558] sm:$0xff]  ;;  %v2133_v14 = vld [vmem:[#allocation2 + $0x550] sm:$0xff]  ;;  %1867 = vst [vmem:[#allocation2 + $0x540] sm:$0xf8] %v1837_v7  ;;  %1595 = vrot.lane.b32.xlu1 %v4873_v5, %s2879_s30  ;;  %v4875_v22 = vld [vmem:[#allocation8_spill] sm:$0xff]  ;;  %vm1915_vm10 = vcmask 883712  }
 0x25e   : > { %1796 = vst [vmem:[#allocation2 + $0x540] sm:$0x7] %v1765_v50  ;;  %1593 = vrot.lane.b32.xlu0 %v4874_v10, %s2879_s30  ;;  %v2706_v55 = vpack.c.bf16 %v2134_v23, %v2126_v56  ;;  %v2708_v61 = vpack.c.bf16 %v2133_v14, %v2125_v15  ;;  %v4877_v56 = vld [vmem:[#allocation9_spill] sm:$0xff]  ;;  %v4878_v7 = vld [vmem:[#allocation6_spill] sm:$0xff]  ;;  %v4879_v5 = vld [vmem:[#allocation7_spill] sm:$0xff] }
 0x25f   : > { %v1825_v9 = vpop.permute.xlu1 %1824 }
 0x260   : > { %2707 = vmatprep.subr.bf16.mxu1 %v2706_v55  ;;  %v1823_v4 = vpop.permute.xlu0 %1822 }
 0x261   : > { %v1845_v17 = vsel %vm1836_vm3, %v1823_v4, %v1825_v9  ;;  %2709 = vmatpush1.bf16.msra.mxu1 %v2708_v61  ;;  %1658 = vrot.lane.b32.xlu1 %v4875_v22, %s2880_s3  ;;  %v2123_v47 = vld [vmem:[#allocation2 + $0x500] sm:$0xff] }
 0x262   : > { %1876 = vst [vmem:[#allocation2 + $0x588] sm:$0xf] %v1845_v17  ;;  %1656 = vrot.lane.b32.xlu0 %v4876_v12, %s2880_s3 }
 0x263   : > { %v4338_v57 = vpop.permute.xlu1 %1828 }
 0x264   : > { %v1827_v35 = vpop.permute.xlu0 %1826 }
 0x265   : > { %v1846_v24 = vsel %vm1836_vm3, %v1825_v9, %v1827_v35  ;;  %v1847_v42 = vsel %vm1836_vm3, %v1827_v35, %v4338_v57  ;;  %v2131_v48 = vld [vmem:[#allocation2 + $0x540] sm:$0xff]  ;;  %1597 = vrot.lane.b32.xlu1 %v4877_v56, %s2879_s30 }
 0x266   : > { %1877 = vst [vmem:[#allocation2 + $0x590] sm:$0xf] %v1846_v24  ;;  %1878 = vst [vmem:[#allocation2 + $0x598] sm:$0xf] %v1847_v42  ;;  %1581 = vrot.lane.b32.xlu0 %v4878_v7, %s2879_s30  ;;  %v2658_v50 = vpack.c.bf16 %v2131_v48, %v2123_v47 }
 0x267   : > { %v1888_v23 = vpop.permute.xlu1 %1887 }
 0x268   : > { %v1886_v15 = vpop.permute.xlu0 %1885  ;;  %2659 = vmatpush1.bf16.msra.mxu0 %v2658_v50 }
 0x269   : > { %v1917_v14 = vsel %vm1915_vm10, %v1886_v15, %v1888_v23  ;;  %1672 = vrot.lane.b32.xlu1 %v4834_v16, %s2880_s3 }
 0x26a   : > { %1947 = vst [vmem:[#allocation2 + $0x588] sm:$0xf0] %v1917_v14  ;;  %1660 = vrot.lane.b32.xlu0 %v4879_v5, %s2880_s3 }
 0x26b   : > { %v4352_v10 = vpop.permute.xlu1 %1891 }
 0x26c   : > { %v1890_v55 = vpop.permute.xlu0 %1889 }
 0x26d   : > { %v1918_v61 = vsel %vm1915_vm10, %v1888_v23, %v1890_v55  ;;  %v1919_v9 = vsel %vm1915_vm10, %v1890_v55, %v4352_v10  ;;  %1735 = vrot.lane.b32.xlu1 %v4835_v3, %s2881_s4  ;;  %v1970_v55 = vld [vmem:[#allocation2 + $0x38] sm:$0xff] }
 0x26e   : > { %1948 = vst [vmem:[#allocation2 + $0x590] sm:$0xf0] %v1918_v61  ;;  %1949 = vst [vmem:[#allocation2 + $0x598] sm:$0xf0] %v1919_v9  ;;  %1674 = vrot.lane.b32.xlu0 %v4836_v20, %s2880_s3  ;;  %v1978_v61 = vld [vmem:[#allocation2 + $0x78] sm:$0xff] }
 0x26f   : > { %v1904_v16 = vpop.permute.xlu1 %1903 }
 0x270   : > { %v1902_v17 = vpop.permute.xlu0 %1901 }
 0x271   : > { %v1924_v22 = vsel %vm1915_vm10, %v1902_v17, %v1904_v16  ;;  %1751 = vrot.lane.b32.xlu1 %v4839_v44, %s2881_s4  ;;  %v2140_v47 = vld [vmem:[#allocation2 + $0x588] sm:$0xff] }
 0x272   : > { %1955 = vst [vmem:[#allocation2 + $0x5c8] sm:$0x1f] %v1924_v22  ;;  %1737 = vrot.lane.b32.xlu0 %v4838_v1, %s2881_s4 }
 0x273   : > { %v4366_v12 = vpop.permute.xlu1 %1907 }
 0x274   : > { %v1906_v35 = vpop.permute.xlu0 %1905 }
 0x275   : > { %v1925_v24 = vsel %vm1915_vm10, %v1904_v16, %v1906_v35  ;;  %v1926_v3 = vsel %vm1915_vm10, %v1906_v35, %v4366_v12  ;;  %1814 = vrot.lane.b32.xlu1 %v4841_v40, %s2882_s5  ;;  %v2141_v14 = vld [vmem:[#allocation2 + $0x590] sm:$0xff] }
 0x276   : > { %1956 = vst [vmem:[#allocation2 + $0x5d0] sm:$0x1f] %v1925_v24  ;;  %1957 = vst [vmem:[#allocation2 + $0x5d8] sm:$0x1f] %v1926_v3  ;;  %1753 = vrot.lane.b32.xlu0 %v4842_v43, %s2881_s4  ;;  %v1969_v16 = vld [vmem:[#allocation2 + $0x30] sm:$0xff]  ;;  %v1968_v3 = vld [vmem:[#allocation2 + $0x28] sm:$0xff] }
 0x277   : > { %v1884_v20 = vpop.permute.xlu1 %1883 }
 0x278   : > { %v1821_v44 = vpop.permute.xlu0 %1820  ;;  %v1916_v1 = vsel %vm1915_vm10, %v1884_v20, %v1886_v15 }
 0x279   : > { %v1844_v42 = vsel %vm1836_vm3, %v1821_v44, %v1823_v4  ;;  %v2148_v48 = vld [vmem:[#allocation2 + $0x5c8] sm:$0x1f]  ;;  %1946 = vst [vmem:[#allocation2 + $0x580] sm:$0xf0] %v1916_v1  ;;  %1676 = vrot.lane.b32.xlu1 %v4837_v25, %s2880_s3  ;;  %v2142_v4 = vld [vmem:[#allocation2 + $0x598] sm:$0xff] }
 0x27a   : > { %1875 = vst [vmem:[#allocation2 + $0x580] sm:$0xf] %v1844_v42  ;;  %1816 = vrot.lane.b32.xlu0 %v4844_v31, %s2882_s5  ;;  %v2660_v40 = vpack.c.bf16 %v2148_v48, %v2140_v47  ;;  %v1986_v44 = vld [vmem:[#allocation2 + $0xb8] sm:$0xff]  ;;  %v1976_v1 = vld [vmem:[#allocation2 + $0x68] sm:$0xff]  ;;  %v1993_v42 = vld [vmem:[#allocation2 + $0xf0] sm:$0xff] }
 0x27b   : > { %v1041_v43 = vpop.permute.xlu1 %1040 }
 0x27c   : > { %v1900_v7 = vpop.permute.xlu0 %1899  ;;  %2662 = vmatprep.subr.msk.bf16.mxu0 %vm4378_vm1, %v2660_v40  ;;  %v1058_v50 = vsel %vm1046_vm12, %v3978_v21, %v1041_v43 }
 0x27d   : > { %v1923_v23 = vsel %vm1915_vm10, %v1900_v7, %v1902_v17  ;;  %v2150_v15 = vld [vmem:[#allocation2 + $0x5d8] sm:$0x1f]  ;;  %v2149_v5 = vld [vmem:[#allocation2 + $0x5d0] sm:$0x1f]  ;;  %1089 = vst [vmem:[#allocation2 + $0x2e0] sm:$0x3] %v1058_v50  ;;  %1755 = vrot.lane.b32.xlu1 %v4847_v32, %s2881_s4  ;;  %v2716_v50 = vpack.c.bf16 %v1976_v1, %v1968_v3 }
 0x27e   : > { %1954 = vst [vmem:[#allocation2 + $0x5c0] sm:$0x1f] %v1923_v23  ;;  %1739 = vrot.lane.b32.xlu0 %v4840_v63, %s2881_s4  ;;  %v2710_v25 = vpack.c.bf16 %v2150_v15, %v2142_v4  ;;  %v2713_v31 = vpack.c.bf16 %v2149_v5, %v2141_v14  ;;  %v1977_v17 = vld [vmem:[#allocation2 + $0x70] sm:$0xff]  ;;  %v2766_v63 = vpack.c.bf16 %v1978_v61, %v1970_v55  ;;  %v1994_v32 = vld [vmem:[#allocation2 + $0xf8] sm:$0xff]  ;;  %v1967_v15 = vld [vmem:[#allocation2 + $0x20] sm:$0xff] }
 0x27f   : > { %v1104_v9 = vpop.permute.xlu1 %1103  ;;  %v2768_v24 = vpack.c.bf16 %v1977_v17, %v1969_v16  ;;  %v2770_v48 = vpack.c.bf16 %v1994_v32, %v1986_v44  ;;  %v1985_v7 = vld [vmem:[#allocation2 + $0xb0] sm:$0xff]  ;;  %v2010_v4 = vld [vmem:[#allocation2 + $0x178] sm:$0xff]  ;;  %v1975_v14 = vld [vmem:[#allocation2 + $0x60] sm:$0xff] }
 0x280   : > { %2712 = vmatprep.subr.msk.bf16.mxu1 %vm4378_vm1, %v2710_v25  ;;  %v1043_v21 = vpop.permute.xlu0 %1042  ;;  %v1130_v22 = vsel %vm1125_vm5, %v3992_v6, %v1104_v9  ;;  %v2772_v23 = vpack.c.bf16 %v1993_v42, %v1985_v7  ;;  %v1992_v55 = vld [vmem:[#allocation2 + $0xe8] sm:$0xff]  ;;  %v2009_v61 = vld [vmem:[#allocation2 + $0x170] sm:$0xff]  ;;  %v2018_v3 = vld [vmem:[#allocation2 + $0x1b8] sm:$0xff] }
 0x281   : > { %v1059_v35 = vsel %vm1046_vm12, %v1041_v43, %v1043_v21  ;;  %2715 = vmatpush1.bf16.msk.msra.mxu1 %vm4378_vm1, %v2713_v31  ;;  %1160 = vst [vmem:[#allocation2 + $0x2e0] sm:$0xfc] %v1130_v22  ;;  %1830 = vrot.lane.b32.xlu1 %v4843_v39, %s2882_s5  ;;  %v2002_v31 = vld [vmem:[#allocation2 + $0x138] sm:$0xff]  ;;  %v1984_v16 = vld [vmem:[#allocation2 + $0xa8] sm:$0xff]  ;;  %v2001_v17 = vld [vmem:[#allocation2 + $0x130] sm:$0xff] }
 0x282   : > { %1090 = vst [vmem:[#allocation2 + $0x2e8] sm:$0x3] %v1059_v35  ;;  %1818 = vrot.lane.b32.xlu0 %v4850_v33, %s2882_s5  ;;  %2767 = vmatprep.subr.bf16.mxu1 %v2766_v63  ;;  %v2139_v33 = vld [vmem:[#allocation2 + $0x580] sm:$0xff]  ;;  %v2026_v22 = vld [vmem:[#allocation2 + $0x1f8] sm:$0xff]  ;;  %v2776_v35 = vpack.c.bf16 %v2009_v61, %v2001_v17  ;;  %v2017_v42 = vld [vmem:[#allocation2 + $0x1b0] sm:$0xff] }
 0x283   : > { %v1045_v20 = vpop.permute.xlu1 %1044  ;;  %v1991_v63 = vld [vmem:[#allocation2 + $0xe0] sm:$0xff]  ;;  %v2024_v7 = vld [vmem:[#allocation2 + $0x1e8] sm:$0xff] }
 0x284   : > { %v1106_v6 = vpop.permute.xlu0 %1105  ;;  %2328 = vmatmul.mubr.f32.vlgmr.msra.gmra.mrb[0].mxu1 %v4162_v8  ;;  %v1060_v47 = vsel %vm1046_vm12, %v1043_v21, %v1045_v20  ;;  %1092 = vst.msk [vmem:[#allocation2 + $0x2f8] sm:$0x3] %vm298_vm9, %v1045_v20  ;;  %v2718_v21 = vpack.c.bf16 %v1975_v14, %v1967_v15  ;;  %v2008_v20 = vld [vmem:[#allocation2 + $0x168] sm:$0xff]  ;;  %v1983_v44 = vld [vmem:[#allocation2 + $0xa0] sm:$0xff] }
 0x285   : > { %v1131_v39 = vsel %vm1125_vm5, %v1104_v9, %v1106_v6  ;;  %2769 = vmatpush1.bf16.msra.mxu1 %v2768_v24  ;;  %v2147_v40 = vld [vmem:[#allocation2 + $0x5c0] sm:$0x1f]  ;;  %2611 = vmatprep.mubr.msk.f32.mxu1 %vm2165_vm0, %v4166_v28  ;;  %1091 = vst [vmem:[#allocation2 + $0x2f0] sm:$0x3] %v1060_v47  ;;  %v2774_v9 = vpack.c.bf16 %v2010_v4, %v2002_v31  ;;  %v2042_v47 = vld [vmem:[#allocation2 + $0x278] sm:$0xff]  ;;  %v2041_v4 = vld [vmem:[#allocation2 + $0x270] sm:$0xff] }
 0x286   : > { %1161 = vst [vmem:[#allocation2 + $0x2e8] sm:$0xfc] %v1131_v39  ;;  %1893 = vrot.lane.b32.xlu1 %v4845_v59, %s2883_s6  ;;  %1832 = vrot.lane.b32.xlu0 %v4846_v54, %s2882_s5  ;;  %v2663_v43 = vpack.c.bf16 %v2147_v40, %v2139_v33  ;;  %v2722_v1 = vpack.c.bf16 %v1991_v63, %v1983_v44  ;;  %v2023_v61 = vld [vmem:[#allocation2 + $0x1e0] sm:$0xff] }
 0x287   : > { %2771 = vmatprep.subr.bf16.mxu1 %v2770_v48  ;;  %v1120_v5 = vpop.permute.xlu1 %1119  ;;  %v2007_v48 = vld [vmem:[#allocation2 + $0x160] sm:$0xff] }
 0x288   : > { %v1108_v25 = vpop.permute.xlu0 %1107  ;;  %2665 = vmatpush1.bf16.msk.msra.mxu0 %vm4378_vm1, %v2663_v43  ;;  %v1137_v59 = vsel %vm1125_vm5, %v4009_v49, %v1120_v5  ;;  %v2720_v49 = vpack.c.bf16 %v1992_v55, %v1984_v16  ;;  %v2034_v43 = vld [vmem:[#allocation2 + $0x238] sm:$0xff] }
 0x289   : > { %v1132_v54 = vsel %vm1125_vm5, %v1106_v6, %v1108_v25  ;;  %1163 = vst.msk [vmem:[#allocation2 + $0x2f8] sm:$0xfc] %vm395_vm11, %v1108_v25  ;;  %2717 = vmatprep.subr.bf16.mxu0 %v2716_v50  ;;  %2773 = vmatpush1.bf16.msra.mxu1 %v2772_v23  ;;  %1168 = vst [vmem:[#allocation2 + $0x320] sm:$0x7] %v1137_v59  ;;  %v2782_v50 = vpack.c.bf16 %v2042_v47, %v2034_v43  ;;  %v1999_v23 = vld [vmem:[#allocation2 + $0x120] sm:$0xff]  ;;  %v2033_v25 = vld [vmem:[#allocation2 + $0x230] sm:$0xff] }
 0x28a   : > { %1162 = vst [vmem:[#allocation2 + $0x2f0] sm:$0xfc] %v1132_v54  ;;  %1909 = vrot.lane.b32.xlu1 %v4851_v58, %s2883_s6  ;;  %1895 = vrot.lane.b32.xlu0 %v4848_v41, %s2883_s6  ;;  %v2025_v58 = vld [vmem:[#allocation2 + $0x1f0] sm:$0xff]  ;;  %v2726_v14 = vpack.c.bf16 %v2007_v48, %v1999_v23  ;;  %v2784_v31 = vpack.c.bf16 %v2041_v4, %v2033_v25  ;;  %v2050_v55 = vld [vmem:[#allocation2 + $0x2b8] sm:$0xff]  ;;  %v2047_v48 = vld [vmem:[#allocation2 + $0x2a0] sm:$0xff] }
 0x28b   : > { %2775 = vmatprep.subr.bf16.mxu1 %v2774_v9  ;;  %2257 = vmatmul.mubr.f32.vlgmr.msra.gmra.mrb[0].mxu0 %v4162_v8  ;;  %v1183_v32 = vpop.permute.xlu1 %1182  ;;  %v2778_v8 = vpack.c.bf16 %v2026_v22, %v2018_v3  ;;  %v2780_v39 = vpack.c.bf16 %v2025_v58, %v2017_v42  ;;  %v2039_v3 = vld [vmem:[#allocation2 + $0x260] sm:$0xff] }
 0x28c   : > { %v4427_v24 = vpop.permute.xlu0 %1121  ;;  %2719 = vmatpush1.bf16.msra.mxu0 %v2718_v21  ;;  %2608 = vmatprep.mubr.msk.f32.mxu0 %vm2165_vm0, %v4166_v28  ;;  %v1209_v41 = vsel %vm1204_vm7, %v4023_v13, %v1183_v32  ;;  %v2000_v28 = vld [vmem:[#allocation2 + $0x128] sm:$0xff]  ;;  %v2055_v42 = vld [vmem:[#allocation2 + $0x2e0] sm:$0xff]  ;;  %vm4885_vm0 = vcmask 932864  }
 0x28d   : > { %v1138_v6 = vsel %vm1125_vm5, %v1120_v5, %v4427_v24  ;;  %2721 = vmatprep.subr.bf16.mxu0 %v2720_v49  ;;  %2777 = vmatpush1.bf16.msra.mxu1 %v2776_v35  ;;  %1239 = vst [vmem:[#allocation2 + $0x320] sm:$0xf8] %v1209_v41  ;;  %v2724_v13 = vpack.c.bf16 %v2008_v20, %v2000_v28  ;;  %v2016_v5 = vld [vmem:[#allocation2 + $0x1a8] sm:$0xff]  ;;  %v2049_v35 = vld [vmem:[#allocation2 + $0x2b0] sm:$0xff] }
 0x28e   : > { %1169 = vst [vmem:[#allocation2 + $0x328] sm:$0x7] %v1138_v6  ;;  %1834 = vrot.lane.b32.xlu1 %v4849_v0, %s2882_s5  ;;  %1911 = vrot.lane.b32.xlu0 %v4854_v53, %s2883_s6  ;;  %v2040_v21 = vld [vmem:[#allocation2 + $0x268] sm:$0xff] }
 0x28f   : > { %2779 = vmatprep.subr.bf16.mxu1 %v2778_v8  ;;  %v1199_v33 = vpop.permute.xlu1 %1198  ;;  %v2032_v49 = vld [vmem:[#allocation2 + $0x228] sm:$0xff]  ;;  %v2031_v8 = vld [vmem:[#allocation2 + $0x220] sm:$0xff] }
 0x290   : > { %v4439_v40 = vpop.permute.xlu0 %1184  ;;  %2723 = vmatpush1.bf16.msra.mxu0 %v2722_v1  ;;  %v1216_v0 = vsel %vm1204_vm7, %v4037_v37, %v1199_v33  ;;  %v2058_v15 = vld [vmem:[#allocation2 + $0x2f8] sm:$0xff]  ;;  %v2728_v37 = vpack.c.bf16 %v2024_v7, %v2016_v5  ;;  %v2732_v63 = vpack.c.bf16 %v2040_v21, %v2032_v49  ;;  %v2056_v41 = vld [vmem:[#allocation2 + $0x2e8] sm:$0xff]  ;;  %v2734_v44 = vpack.c.bf16 %v2039_v3, %v2031_v8 }
 0x291   : > { %v1210_v53 = vsel %vm1204_vm7, %v1183_v32, %v4439_v40  ;;  %2725 = vmatprep.subr.bf16.mxu0 %v2724_v13  ;;  %2781 = vmatpush1.bf16.msra.mxu1 %v2780_v39  ;;  %1247 = vst [vmem:[#allocation2 + $0x360] sm:$0xf] %v1216_v0  ;;  %v2786_v9 = vpack.c.bf16 %v2058_v15, %v2050_v55  ;;  %v2057_v16 = vld [vmem:[#allocation2 + $0x2f0] sm:$0xff]  ;;  %v2048_v1 = vld [vmem:[#allocation2 + $0x2a8] sm:$0xff] }
 0x292   : > { %1240 = vst [vmem:[#allocation2 + $0x328] sm:$0xf8] %v1210_v53  ;;  %1913 = vrot.lane.b32.xlu1 %v4859_v29, %s2883_s6  ;;  %1897 = vrot.lane.b32.xlu0 %v4852_v30, %s2883_s6  ;;  %v2015_v30 = vld [vmem:[#allocation2 + $0x1a0] sm:$0xff]  ;;  %v2788_v32 = vpack.c.bf16 %v2057_v16, %v2049_v35  ;;  %v2736_v28 = vpack.c.bf16 %v2056_v41, %v2048_v1 }
 0x293   : > { %2783 = vmatprep.subr.bf16.mxu1 %v2782_v50  ;;  %v1262_v59 = vpop.permute.xlu1 %1261  ;;  %v2730_v22 = vpack.c.bf16 %v2023_v61, %v2015_v30 }
 0x294   : > { %v1201_v54 = vpop.permute.xlu0 %1200  ;;  %2727 = vmatpush1.bf16.msra.mxu0 %v2726_v14  ;;  %v1288_v29 = vsel %vm1283_vm2, %v4051_v2, %v1262_v59  ;;  %v2063_v15 = vld [vmem:[#allocation2 + $0x320] sm:$0xff] }
 0x295   : > { %v1217_v17 = vsel %vm1204_vm7, %v1199_v33, %v1201_v54  ;;  %2729 = vmatprep.subr.bf16.mxu0 %v2728_v37  ;;  %2785 = vmatpush1.bf16.msra.mxu1 %v2784_v31  ;;  %1318 = vst [vmem:[#allocation2 + $0x360] sm:$0xf0] %v1288_v29  ;;  %v2738_v33 = vpack.c.bf16 %v2055_v42, %v2047_v48 }
 0x296   : > { %1248 = vst [vmem:[#allocation2 + $0x368] sm:$0xf] %v1217_v17  ;;  %2787 = vmatprep.subr.bf16.mxu1 %v2786_v9 }
 0x297   : > { %v1124_v20 = vpop.permute.xlu1 %1123 }
 0x298   : > { %v1264_v58 = vpop.permute.xlu0 %1263  ;;  %2731 = vmatpush1.bf16.msra.mxu0 %v2730_v22  ;;  %v1139_v2 = vsel %vm1125_vm5, %v4427_v24, %v1124_v20  ;;  %1171 = vst.msk [vmem:[#allocation2 + $0x338] sm:$0x7] %vm404_vm13, %v1124_v20  ;;  %vm4887_vm5 = vcmask 847872  }
 0x299   : > { %v1289_v6 = vsel %vm1283_vm2, %v1262_v59, %v1264_v58  ;;  %2733 = vmatprep.subr.bf16.mxu0 %v2732_v63  ;;  %2789 = vmatpush1.bf16.msra.mxu1 %v2788_v32  ;;  %1170 = vst [vmem:[#allocation2 + $0x330] sm:$0x7] %v1139_v2  ;;  %v2064_v50 = vld [vmem:[#allocation2 + $0x328] sm:$0xff] }
 0x29a   : > { %1319 = vst [vmem:[#allocation2 + $0x368] sm:$0xf0] %v1289_v6 }
 0x29b   : > { %v1203_v47 = vpop.permute.xlu1 %1202 }
 0x29c   : > { %v1187_v13 = vpop.permute.xlu0 %1186  ;;  %2735 = vmatpush1.bf16.msra.mxu0 %v2734_v44  ;;  %v1218_v39 = vsel %vm1204_vm7, %v1201_v54, %v1203_v47  ;;  %1250 = vst.msk [vmem:[#allocation2 + $0x378] sm:$0xf] %vm510_vm4, %v1203_v47  ;;  %v2071_v4 = vld [vmem:[#allocation2 + $0x360] sm:$0xff] }
 0x29d   : > { %v1211_v24 = vsel %vm1204_vm7, %v4439_v40, %v1187_v13  ;;  %1242 = vst.msk [vmem:[#allocation2 + $0x338] sm:$0xf8] %vm501_vm15, %v1187_v13  ;;  %2737 = vmatprep.subr.bf16.mxu0 %v2736_v28  ;;  %1249 = vst [vmem:[#allocation2 + $0x370] sm:$0xf] %v1218_v39  ;;  %v2742_v14 = vpack.c.bf16 %v2071_v4, %v2063_v15  ;;  %vm4882_vm7 = vcmask 941056  }
 0x29e   : > { %1241 = vst [vmem:[#allocation2 + $0x330] sm:$0xf8] %v1211_v24  ;;  %vm4883_vm8 = vmmov %vm4882_vm7 }
 0x29f   : > { %v1278_v43 = vpop.permute.xlu1 %1277  ;;  %vm4884_vm14 = vmmov %vm4882_vm7 }
 0x2a0   : > { %v1266_v7 = vpop.permute.xlu0 %1265  ;;  %2739 = vmatpush1.bf16.msra.mxu0 %v2738_v33  ;;  %v1295_v0 = vsel %vm1283_vm2, %v4081_v45, %v1278_v43  ;;  %vm4886_vm12 = vmmov %vm4882_vm7 }
 0x2a1   : > { %v1290_v53 = vsel %vm1283_vm2, %v1264_v58, %v1266_v7  ;;  %1321 = vst.msk [vmem:[#allocation2 + $0x378] sm:$0xf0] %vm607_vm6, %v1266_v7  ;;  %v2072_v40 = vld [vmem:[#allocation2 + $0x368] sm:$0xff]  ;;  %1326 = vst [vmem:[#allocation2 + $0x3a0] sm:$0x1f] %v1295_v0 }
 0x2a2   : > { %1320 = vst [vmem:[#allocation2 + $0x370] sm:$0xf0] %v1290_v53  ;;  %v2740_v23 = vpack.c.bf16 %v2072_v40, %v2064_v50 }
 0x2a3   : > { %v1341_v5 = vpop.permute.xlu1 %1340 }
 0x2a4   : > { %v1280_v25 = vpop.permute.xlu0 %1279  ;;  %2741 = vmatprep.subr.bf16.mxu0 %v2740_v23  ;;  %v1367_v37 = vsel %vm4882_vm7, %v4095_v38, %v1341_v5  ;;  %v2066_v61 = vld [vmem:[#allocation2 + $0x338] sm:$0xff]  ;;  %vm4888_vm7 = vmmov %vm4885_vm0 }
 0x2a5   : > { %v1296_v31 = vsel %vm1283_vm2, %v1278_v43, %v1280_v25  ;;  %2743 = vmatpush1.bf16.msra.mxu0 %v2742_v14  ;;  %1397 = vst [vmem:[#allocation2 + $0x3a0] sm:$0xe0] %v1367_v37  ;;  %v2065_v16 = vld [vmem:[#allocation2 + $0x330] sm:$0xff] }
 0x2a6   : > { %1327 = vst [vmem:[#allocation2 + $0x3a8] sm:$0x1f] %v1296_v31 }
 0x2a7   : > { %v1357_v45 = vpop.permute.xlu1 %1356 }
 0x2a8   : > { %v1343_v55 = vpop.permute.xlu0 %1342  ;;  %v2074_v59 = vld [vmem:[#allocation2 + $0x378] sm:$0xff]  ;;  %v1374_v54 = vsel %vm4883_vm8, %v4109_v60, %v1357_v45 }
 0x2a9   : > { %v1368_v9 = vsel %vm4884_vm14, %v1341_v5, %v1343_v55  ;;  %v2790_v21 = vpack.c.bf16 %v2074_v59, %v2066_v61  ;;  %v2073_v29 = vld [vmem:[#allocation2 + $0x370] sm:$0xff]  ;;  %1405 = vst [vmem:[#allocation2 + $0x3e0] sm:$0x3f] %v1374_v54  ;;  %vm4889_vm14 = vcmask 848896  }
 0x2aa   : > { %1398 = vst [vmem:[#allocation2 + $0x3a8] sm:$0xe0] %v1368_v9  ;;  %v2792_v38 = vpack.c.bf16 %v2073_v29, %v2065_v16 }
 0x2ab   : > { %2791 = vmatprep.subr.bf16.mxu1 %v2790_v21  ;;  %v1420_v17 = vpop.permute.xlu1 %1419 }
 0x2ac   : > { %2793 = vmatpush1.bf16.msra.mxu1 %v2792_v38  ;;  %v1359_v30 = vpop.permute.xlu0 %1358  ;;  %v1446_v22 = vsel %vm4885_vm0, %v4123_v34, %v1420_v17  ;;  %vm4890_vm0 = vmmov %vm4883_vm8  ;;  %v2079_v47 = vld [vmem:[#allocation2 + $0x3a0] sm:$0xff] }
 0x2ad   : > { %v1375_v49 = vsel %vm4886_vm12, %v1357_v45, %v1359_v30  ;;  %1476 = vst [vmem:[#allocation2 + $0x3e0] sm:$0xc0] %v1446_v22  ;;  %vm4891_vm12 = vcmask 850949  }
 0x2ae   : > { %1406 = vst [vmem:[#allocation2 + $0x3e8] sm:$0x3f] %v1375_v49 }
 0x2af   : > { %v1282_v60 = vpop.permute.xlu1 %1281 }
 0x2b0   : > { %v1422_v35 = vpop.permute.xlu0 %1421  ;;  %v1297_v63 = vsel %vm1283_vm2, %v1280_v25, %v1282_v60  ;;  %1329 = vst.msk [vmem:[#allocation2 + $0x3b8] sm:$0x1f] %vm4887_vm5, %v1282_v60  ;;  %vm4892_vm2 = vmmov %vm4888_vm7 }
 0x2b1   : > { %v1447_v32 = vsel %vm4888_vm7, %v1420_v17, %v1422_v35  ;;  %1328 = vst [vmem:[#allocation2 + $0x3b0] sm:$0x1f] %v1297_v63  ;;  %vm4893_vm5 = vmmov %vm4892_vm2  ;;  %vm4894_vm7 = vcmask 850950   ;;  %v2080_v1 = vld [vmem:[#allocation2 + $0x3a8] sm:$0xff] }
 0x2b2   : > { %1477 = vst [vmem:[#allocation2 + $0x3e8] sm:$0xc0] %v1447_v32 }
 0x2b3   : > { %v1361_v3 = vpop.permute.xlu1 %1360 }
 0x2b4   : > { %v1345_v20 = vpop.permute.xlu0 %1344  ;;  %v1376_v58 = vsel %vm4883_vm8, %v1359_v30, %v1361_v3  ;;  %1408 = vst.msk [vmem:[#allocation2 + $0x3f8] sm:$0x3f] %vm4889_vm14, %v1361_v3  ;;  %v2087_v6 = vld [vmem:[#allocation2 + $0x3e0] sm:$0xff]  ;;  %vm4895_vm8 = vcmask 924672   ;;  %vm4896_vm14 = vmmov %vm4892_vm2 }
 0x2b5   : > { %v1369_v34 = vsel %vm4890_vm0, %v1343_v55, %v1345_v20  ;;  %1400 = vst.msk [vmem:[#allocation2 + $0x3b8] sm:$0xe0] %vm4891_vm12, %v1345_v20  ;;  %1407 = vst [vmem:[#allocation2 + $0x3f0] sm:$0x3f] %v1376_v58  ;;  %v2746_v13 = vpack.c.bf16 %v2087_v6, %v2079_v47 }
 0x2b6   : > { %1399 = vst [vmem:[#allocation2 + $0x3b0] sm:$0xe0] %v1369_v34  ;;  %vm4897_vm0 = vmmov %vm4895_vm8 }
 0x2b7   : > { %v1436_v41 = vpop.permute.xlu1 %1435  ;;  %vm4898_vm12 = vmmov %vm4897_vm0 }
 0x2b8   : > { %v1424_v2 = vpop.permute.xlu0 %1423  ;;  %v1453_v8 = vsel %vm4892_vm2, %v4150_v11, %v1436_v41 }
 0x2b9   : > { %v1448_v44 = vsel %vm4893_vm5, %v1422_v35, %v1424_v2  ;;  %1479 = vst.msk [vmem:[#allocation2 + $0x3f8] sm:$0xc0] %vm4894_vm7, %v1424_v2  ;;  %v2088_v28 = vld [vmem:[#allocation2 + $0x3e8] sm:$0xff]  ;;  %1484 = vst [vmem:[#allocation2 + $0x420] sm:$0x7f] %v1453_v8  ;;  %vm4899_vm5 = vcmask 849920  }
 0x2ba   : > { %1478 = vst [vmem:[#allocation2 + $0x3f0] sm:$0xc0] %v1448_v44  ;;  %v2744_v42 = vpack.c.bf16 %v2088_v28, %v2080_v1  ;;  %vm4900_vm7 = vmmov %vm4897_vm0 }
 0x2bb   : > { %v1499_v39 = vpop.permute.xlu1 %1498 }
 0x2bc   : > { %v1438_v24 = vpop.permute.xlu0 %1437  ;;  %2745 = vmatprep.subr.bf16.mxu0 %v2744_v42  ;;  %v1525_v48 = vsel %vm4895_vm8, %v4177_v27, %v1499_v39  ;;  %v2082_v7 = vld [vmem:[#allocation2 + $0x3b8] sm:$0xff]  ;;  %vm4901_vm8 = vmmov %vm4897_vm0 }
 0x2bd   : > { %v1454_v33 = vsel %vm4896_vm14, %v1436_v41, %v1438_v24  ;;  %2747 = vmatpush1.bf16.msra.mxu0 %v2746_v13  ;;  %1555 = vst [vmem:[#allocation2 + $0x420] sm:$0x80] %v1525_v48  ;;  %v2081_v40 = vld [vmem:[#allocation2 + $0x3b0] sm:$0xff]  ;;  %vm4902_vm14 = vcmask 850944  }
 0x2be   : > { %1485 = vst [vmem:[#allocation2 + $0x428] sm:$0x7f] %v1454_v33 }
 0x2bf   : > { %v1515_v11 = vpop.permute.xlu1 %1514 }
 0x2c0   : > { %v1501_v43 = vpop.permute.xlu0 %1500  ;;  %v2090_v4 = vld [vmem:[#allocation2 + $0x3f8] sm:$0xff]  ;;  %v1532_v0 = vsel %vm4897_vm0, %v4191_v52, %v1515_v11 }
 0x2c1   : > { %v1526_v53 = vsel %vm4898_vm12, %v1499_v39, %v1501_v43  ;;  %v2794_v50 = vpack.c.bf16 %v2090_v4, %v2082_v7  ;;  %v2089_v23 = vld [vmem:[#allocation2 + $0x3f0] sm:$0xff]  ;;  %vm4903_vm12 = vcmask 850951  }
 0x2c2   : > { %1556 = vst [vmem:[#allocation2 + $0x428] sm:$0x80] %v1526_v53  ;;  %v2796_v15 = vpack.c.bf16 %v2089_v23, %v2081_v40 }
 0x2c3   : > { %2795 = vmatprep.subr.bf16.mxu1 %v2794_v50  ;;  %v1440_v27 = vpop.permute.xlu1 %1439 }
 0x2c4   : > { %2797 = vmatpush1.bf16.msra.mxu1 %v2796_v15  ;;  %v1517_v14 = vpop.permute.xlu0 %1516  ;;  %v1455_v5 = vsel %vm4892_vm2, %v1438_v24, %v1440_v27  ;;  %1487 = vst.msk [vmem:[#allocation2 + $0x438] sm:$0x7f] %vm4899_vm5, %v1440_v27  ;;  %v2095_v31 = vld [vmem:[#allocation2 + $0x420] sm:$0xff]  ;;  %vm4904_vm2 = vcmask 916480  }
 0x2c5   : > { %v1533_v25 = vsel %vm4900_vm7, %v1515_v11, %v1517_v14  ;;  %1486 = vst [vmem:[#allocation2 + $0x430] sm:$0x7f] %v1455_v5  ;;  %v2750_v54 = vpack.c.bf16 %v1532_v0, %v2095_v31  ;;  %vm4905_vm5 = vmmov %vm4904_vm2 }
 0x2c6   : > { %vm4906_vm7 = vmmov %vm4904_vm2 }
 0x2c7   : > { %v1519_v37 = vpop.permute.xlu1 %1518 }
 0x2c8   : > { %v1503_v52 = vpop.permute.xlu0 %1502  ;;  %v1534_v45 = vsel %vm4901_vm8, %v1517_v14, %v1519_v37  ;;  %1566 = vst.msk [vmem:[#allocation2 + $0x478] sm:$0xff] %vm4902_vm14, %v1519_v37  ;;  %vm4907_vm8 = vmmov %vm4904_vm2  ;;  %vm4908_vm14 = vcmask 908288  }
 0x2c9   : > { %v1527_v55 = vsel %vm4897_vm0, %v1501_v43, %v1503_v52  ;;  %1558 = vst.msk [vmem:[#allocation2 + $0x438] sm:$0x80] %vm4903_vm12, %v1503_v52  ;;  %v2096_v61 = vld [vmem:[#allocation2 + $0x428] sm:$0xff]  ;;  %vm4909_vm0 = vmmov %vm4908_vm14 }
 0x2ca   : > { %1557 = vst [vmem:[#allocation2 + $0x430] sm:$0x80] %v1527_v55  ;;  %v2748_v59 = vpack.c.bf16 %v1533_v25, %v2096_v61  ;;  %vm4910_vm12 = vmmov %vm4904_vm2 }
 0x2cb   : > { %v1580_v9 = vpop.permute.xlu1 %1579 }
 0x2cc   : > { %v1578_v21 = vpop.permute.xlu0 %1577  ;;  %2749 = vmatprep.subr.bf16.mxu0 %v2748_v59 }
 0x2cd   : > { %v1604_v16 = vsel %vm4904_vm2, %v4219_v51, %v1578_v21  ;;  %v1605_v29 = vsel %vm4905_vm5, %v1578_v21, %v1580_v9  ;;  %2751 = vmatpush1.bf16.msra.mxu0 %v2750_v54  ;;  %vm4911_vm2 = vcmask 843776  }
 0x2cf   : > { %v1596_v38 = vpop.permute.xlu1 %1595  ;;  %v2106_v22 = vld [vmem:[#allocation2 + $0x478] sm:$0xff] }
 0x2d0   : > { %v1594_v17 = vpop.permute.xlu0 %1593  ;;  %v2098_v30 = vld [vmem:[#allocation2 + $0x438] sm:$0xff] }
 0x2d1   : > { %v1611_v49 = vsel %vm4906_vm7, %v4233_v26, %v1594_v17  ;;  %v1612_v60 = vsel %vm4907_vm8, %v1594_v17, %v1596_v38  ;;  %v2798_v35 = vpack.c.bf16 %v2106_v22, %v2098_v30  ;;  %v2097_v63 = vld [vmem:[#allocation2 + $0x430] sm:$0xff]  ;;  %vm4912_vm7 = vcmask 850944   ;;  %vm4913_vm8 = vmmov %vm4909_vm0 }
 0x2d2   : > { %1642 = vst [vmem:[#allocation2 + $0x4e0] sm:$0x1] %v1611_v49  ;;  %1643 = vst [vmem:[#allocation2 + $0x4e8] sm:$0x1] %v1612_v60  ;;  %v2800_v32 = vpack.c.bf16 %v1534_v45, %v2097_v63 }
 0x2d3   : > { %2799 = vmatprep.subr.bf16.mxu1 %v2798_v35  ;;  %v1659_v3 = vpop.permute.xlu1 %1658 }
 0x2d4   : > { %2801 = vmatpush1.bf16.msra.mxu1 %v2800_v32  ;;  %v1657_v51 = vpop.permute.xlu0 %1656 }
 0x2d5   : > { %v1683_v20 = vsel %vm4908_vm14, %v4247_v18, %v1657_v51  ;;  %v1684_v58 = vsel %vm4909_vm0, %v1657_v51, %v1659_v3  ;;  %vm4914_vm14 = vmmov %vm4909_vm0  ;;  %vm4915_vm0 = vcmask 850945  }
 0x2d6   : > { %1713 = vst [vmem:[#allocation2 + $0x4e0] sm:$0xfe] %v1683_v20  ;;  %1714 = vst [vmem:[#allocation2 + $0x4e8] sm:$0xfe] %v1684_v58 }
 0x2d7   : > { %v1598_v34 = vpop.permute.xlu1 %1597 }
 0x2d8   : > { %v1582_v26 = vpop.permute.xlu0 %1581  ;;  %v1613_v41 = vsel %vm4910_vm12, %v1596_v38, %v1598_v34  ;;  %1645 = vst.msk [vmem:[#allocation2 + $0x4f8] sm:$0x1] %vm4911_vm2, %v1598_v34  ;;  %vm4916_vm12 = vcmask 900096   ;;  %vm4917_vm2 = vmmov %vm4913_vm8 }
 0x2d9   : > { %v1606_v2 = vsel %vm4905_vm5, %v1580_v9, %v1582_v26  ;;  %1637 = vst.msk [vmem:[#allocation2 + $0x4b8] sm:$0xff] %vm4912_vm7, %v1582_v26  ;;  %1644 = vst [vmem:[#allocation2 + $0x4f0] sm:$0x1] %v1613_v41 }
 0x2da   : > { %vm4918_vm5 = vmmov %vm4916_vm12 }
 0x2db   : > { %v1673_v6 = vpop.permute.xlu1 %1672  ;;  %vm4919_vm7 = vmmov %vm4918_vm5 }
 0x2dc   : > { %v1661_v8 = vpop.permute.xlu0 %1660  ;;  %v1690_v18 = vsel %vm4913_vm8, %v4271_v62, %v1673_v6  ;;  %vm4920_vm8 = vmmov %vm4918_vm5 }
 0x2dd   : > { %v1685_v44 = vsel %vm4914_vm14, %v1659_v3, %v1661_v8  ;;  %1716 = vst.msk [vmem:[#allocation2 + $0x4f8] sm:$0xfe] %vm4915_vm0, %v1661_v8  ;;  %v2120_v1 = vld [vmem:[#allocation2 + $0x4e8] sm:$0xff]  ;;  %v2119_v28 = vld [vmem:[#allocation2 + $0x4e0] sm:$0xff]  ;;  %1721 = vst [vmem:[#allocation2 + $0x520] sm:$0x3] %v1690_v18 }
 0x2de   : > { %1715 = vst [vmem:[#allocation2 + $0x4f0] sm:$0xfe] %v1685_v44  ;;  %v2752_v42 = vpack.c.bf16 %v2120_v1, %v1605_v29  ;;  %v2754_v47 = vpack.c.bf16 %v2119_v28, %v1604_v16  ;;  %vm4921_vm14 = vmmov %vm4917_vm2 }
 0x2df   : > { %v1736_v13 = vpop.permute.xlu1 %1735  ;;  %vm4922_vm0 = vmmov %vm4918_vm5 }
 0x2e0   : > { %v1675_v39 = vpop.permute.xlu0 %1674  ;;  %2753 = vmatprep.subr.bf16.mxu0 %v2752_v42  ;;  %v1762_v24 = vsel %vm4916_vm12, %v4285_v46, %v1736_v13  ;;  %v2114_v11 = vld [vmem:[#allocation2 + $0x4b8] sm:$0xff]  ;;  %vm4923_vm12 = vmmov %vm4922_vm0 }
 0x2e1   : > { %v1691_v48 = vsel %vm4917_vm2, %v1673_v6, %v1675_v39  ;;  %2755 = vmatpush1.bf16.msra.mxu0 %v2754_v47  ;;  %1792 = vst [vmem:[#allocation2 + $0x520] sm:$0xfc] %v1762_v24 }
 0x2e2   : > { %1722 = vst [vmem:[#allocation2 + $0x528] sm:$0x3] %v1691_v48 }
 0x2e3   : > { %v1752_v62 = vpop.permute.xlu1 %1751 }
 0x2e4   : > { %v1738_v33 = vpop.permute.xlu0 %1737  ;;  %v2122_v43 = vld [vmem:[#allocation2 + $0x4f8] sm:$0xff]  ;;  %v1769_v7 = vsel %vm4918_vm5, %v4299_v19, %v1752_v62 }
 0x2e5   : > { %v1763_v4 = vsel %vm4919_vm7, %v1736_v13, %v1738_v33  ;;  %v2802_v0 = vpack.c.bf16 %v2122_v43, %v2114_v11  ;;  %v2121_v53 = vld [vmem:[#allocation2 + $0x4f0] sm:$0xff]  ;;  %1800 = vst [vmem:[#allocation2 + $0x560] sm:$0x7] %v1769_v7  ;;  %v2885_v43 = vmov 1983009808  }
 0x2e6   : > { %1793 = vst [vmem:[#allocation2 + $0x528] sm:$0xfc] %v1763_v4  ;;  %v2804_v50 = vpack.c.bf16 %v2121_v53, %v1606_v2  ;;  %v2855_v11 = vld.sshfl [vmem:[%s4569_s1] sm:$0x33 pattern:$0x76325410]  ;;  %v2495_v7 = vunpack.c.l.s4 %v2885_v43  ;;  %v2497_v4 = vlaneseq }
 0x2e7   : > { %2803 = vmatprep.subr.bf16.mxu1 %v2802_v0  ;;  %v1815_v46 = vpop.permute.xlu1 %1814 }
 0x2e8   : > { %2805 = vmatpush1.bf16.msra.mxu1 %v2804_v50  ;;  %v1754_v40 = vpop.permute.xlu0 %1753  ;;  %v1841_v23 = vsel %vm1836_vm3, %v4313_v36, %v1815_v46  ;;  %v2127_v16 = vld [vmem:[#allocation2 + $0x520] sm:$0xff] }
 0x2e9   : > { %v1770_v15 = vsel %vm4920_vm8, %v1752_v62, %v1754_v40  ;;  %1871 = vst [vmem:[#allocation2 + $0x560] sm:$0xf8] %v1841_v23  ;;  %v2498_v23 = vshrl.u32 %v2497_v4, 7 }
 0x2ea   : > { %1801 = vst [vmem:[#allocation2 + $0x568] sm:$0x7] %v1770_v15 }
 0x2eb   : > { %v1677_v27 = vpop.permute.xlu1 %1676 }
 0x2ec   : > { %v1817_v19 = vpop.permute.xlu0 %1816  ;;  %v1692_v14 = vsel %vm4921_vm14, %v1675_v39, %v1677_v27  ;;  %1724 = vst.msk [vmem:[#allocation2 + $0x538] sm:$0x3] %vm298_vm9, %v1677_v27  ;;  %vm4924_vm9 = vcmask 847872  }
 0x2ed   : > { %v1842_v5 = vsel %vm1836_vm3, %v1815_v46, %v1817_v19  ;;  %1723 = vst [vmem:[#allocation2 + $0x530] sm:$0x3] %v1692_v14  ;;  %v2128_v54 = vld [vmem:[#allocation2 + $0x528] sm:$0xff] }
 0x2ee   : > { %1872 = vst [vmem:[#allocation2 + $0x568] sm:$0xf8] %v1842_v5 }
 0x2ef   : > { %v1756_v25 = vpop.permute.xlu1 %1755 }
 0x2f0   : > { %v1740_v37 = vpop.permute.xlu0 %1739  ;;  %v1771_v52 = vsel %vm4922_vm0, %v1754_v40, %v1756_v25  ;;  %1803 = vst.msk [vmem:[#allocation2 + $0x578] sm:$0x7] %vm404_vm13, %v1756_v25  ;;  %v2135_v55 = vld [vmem:[#allocation2 + $0x560] sm:$0xff]  ;;  %v2496_v40 = vunpack.c.0.s8 %v2495_v7  ;;  %vm2531_vm13 = vcmask 1045508  }
 0x2f1   : > { %v1764_v36 = vsel %vm4923_vm12, %v1738_v33, %v1740_v37  ;;  %1795 = vst.msk [vmem:[#allocation2 + $0x538] sm:$0xfc] %vm395_vm11, %v1740_v37  ;;  %1802 = vst [vmem:[#allocation2 + $0x570] sm:$0x7] %v1771_v52  ;;  %v2758_v29 = vpack.c.bf16 %v2135_v55, %v2127_v16 }
 0x2f2   : > { %1794 = vst [vmem:[#allocation2 + $0x530] sm:$0xfc] %v1764_v36  ;;  %v2499_v56 = vsub.s32 %v2496_v40, %v2498_v23 }
 0x2f3   : > { %v1831_v31 = vpop.permute.xlu1 %1830 }
 0x2f4   : > { %v1819_v45 = vpop.permute.xlu0 %1818  ;;  %v1848_v61 = vsel %vm1836_vm3, %v4338_v57, %v1831_v31 }
 0x2f5   : > { %v1843_v59 = vsel %vm1836_vm3, %v1817_v19, %v1819_v45  ;;  %1874 = vst.msk [vmem:[#allocation2 + $0x578] sm:$0xf8] %vm501_vm15, %v1819_v45  ;;  %v2136_v9 = vld [vmem:[#allocation2 + $0x568] sm:$0xff]  ;;  %1879 = vst [vmem:[#allocation2 + $0x5a0] sm:$0xf] %v1848_v61 }
 0x2f6   : > { %1873 = vst [vmem:[#allocation2 + $0x570] sm:$0xf8] %v1843_v59  ;;  %v2756_v21 = vpack.c.bf16 %v2136_v9, %v2128_v54 }
 0x2f8   : > { %v1894_v38 = vpop.permute.xlu1 %1893  ;;  %v1833_v17 = vpop.permute.xlu0 %1832  ;;  %2757 = vmatprep.subr.bf16.mxu0 %v2756_v21  ;;  %v2130_v60 = vld [vmem:[#allocation2 + $0x538] sm:$0xff] }
 0x2f9   : > { %v1920_v30 = vsel %vm1915_vm10, %v4352_v10, %v1894_v38  ;;  %v1849_v22 = vsel %vm1836_vm3, %v1831_v31, %v1833_v17  ;;  %2759 = vmatpush1.bf16.msra.mxu0 %v2758_v29  ;;  %v2129_v51 = vld [vmem:[#allocation2 + $0x530] sm:$0xff] }
 0x2fa   : > { %1950 = vst [vmem:[#allocation2 + $0x5a0] sm:$0xf0] %v1920_v30  ;;  %1880 = vst [vmem:[#allocation2 + $0x5a8] sm:$0xf] %v1849_v22 }
 0x2fc   : > { %v1910_v57 = vpop.permute.xlu1 %1909  ;;  %v1896_v49 = vpop.permute.xlu0 %1895  ;;  %v2138_v35 = vld [vmem:[#allocation2 + $0x578] sm:$0xff] }
 0x2fd   : > { %v1927_v63 = vsel %vm1915_vm10, %v4366_v12, %v1910_v57  ;;  %v1921_v32 = vsel %vm1915_vm10, %v1894_v38, %v1896_v49  ;;  %v2806_v3 = vpack.c.bf16 %v2138_v35, %v2130_v60  ;;  %v2137_v20 = vld [vmem:[#allocation2 + $0x570] sm:$0xff] }
 0x2fe   : > { %1958 = vst [vmem:[#allocation2 + $0x5e0] sm:$0x1f] %v1927_v63  ;;  %1951 = vst [vmem:[#allocation2 + $0x5a8] sm:$0xf0] %v1921_v32  ;;  %v2808_v10 = vpack.c.bf16 %v2137_v20, %v2129_v51 }
 0x2ff   : > { %2807 = vmatprep.subr.bf16.mxu1 %v2806_v3 }
 0x300   : > { %v1835_v58 = vpop.permute.xlu1 %1834  ;;  %2809 = vmatpush1.bf16.msra.mxu1 %v2808_v10  ;;  %v1912_v34 = vpop.permute.xlu0 %1911 }
 0x301   : > { %v1850_v26 = vsel %vm1836_vm3, %v1833_v17, %v1835_v58  ;;  %1882 = vst.msk [vmem:[#allocation2 + $0x5b8] sm:$0xf] %vm510_vm4, %v1835_v58  ;;  %v1928_v41 = vsel %vm1915_vm10, %v1910_v57, %v1912_v34  ;;  %v2143_v42 = vld [vmem:[#allocation2 + $0x5a0] sm:$0xff]  ;;  %vm4925_vm3 = vcmask 1041408   ;;  %vm4926_vm4 = vcmask 850950  }
 0x302   : > { %1881 = vst [vmem:[#allocation2 + $0x5b0] sm:$0xf] %v1850_v26  ;;  %1959 = vst [vmem:[#allocation2 + $0x5e8] sm:$0x1f] %v1928_v41 }
 0x304   : > { %v1914_v12 = vpop.permute.xlu1 %1913  ;;  %v1898_v2 = vpop.permute.xlu0 %1897 }
 0x305   : > { %v1929_v6 = vsel %vm1915_vm10, %v1912_v34, %v1914_v12  ;;  %1961 = vst.msk [vmem:[#allocation2 + $0x5f8] sm:$0x1f] %vm4924_vm9, %v1914_v12  ;;  %v1922_v8 = vsel %vm1915_vm10, %v1896_v49, %v1898_v2  ;;  %v2151_v18 = vld [vmem:[#allocation2 + $0x5e0] sm:$0x1f]  ;;  %v2144_v44 = vld [vmem:[#allocation2 + $0x5a8] sm:$0xff] }
 0x306   : > { %1953 = vst.msk [vmem:[#allocation2 + $0x5b8] sm:$0xf0] %vm607_vm6, %v1898_v2  ;;  %1960 = vst [vmem:[#allocation2 + $0x5f0] sm:$0x1f] %v1929_v6  ;;  %v2763_v47 = vpack.c.bf16 %v2151_v18, %v2143_v42 }
 0x307   : > { %1952 = vst [vmem:[#allocation2 + $0x5b0] sm:$0xf0] %v1922_v8 }
 0x309   : > { %v2152_v1 = vld [vmem:[#allocation2 + $0x5e8] sm:$0x1f] }
 0x30a   : > { %v2760_v28 = vpack.c.bf16 %v2152_v1, %v2144_v44 }
 0x30c   : > { %2762 = vmatprep.subr.msk.bf16.mxu0 %vm4378_vm1, %v2760_v28  ;;  %v2154_v39 = vld [vmem:[#allocation2 + $0x5f8] sm:$0x1f] }
 0x30d   : > { %v2146_v13 = vld [vmem:[#allocation2 + $0x5b8] sm:$0xff]  ;;  %2765 = vmatpush1.bf16.msk.msra.mxu0 %vm4378_vm1, %v2763_v47  ;;  %v2153_v62 = vld [vmem:[#allocation2 + $0x5f0] sm:$0x1f] }
 0x30e   : > { %v2810_v24 = vpack.c.bf16 %v2154_v39, %v2146_v13  ;;  %v2145_v48 = vld [vmem:[#allocation2 + $0x5b0] sm:$0xff] }
 0x30f   : > { %v2813_v33 = vpack.c.bf16 %v2153_v62, %v2145_v48 }
 0x310   : > { %2812 = vmatprep.subr.msk.bf16.mxu1 %vm4378_vm1, %v2810_v24  ;;  %2399 = vmatmul.mubr.f32.vlgmr.msra.gmra.mrb[2].mxu0 %v2855_v11 }
 0x311   : > { %2815 = vmatpush1.bf16.msk.msra.mxu1 %vm4378_vm1, %v2813_v33  ;;  %vm2529_vm1 = vcmask 1043458  }
 0x312   : > { %vm2530_vm11 = vmor %vm2529_vm1, %vm4925_vm3 }
 0x313   : > { %vm2532_vm15 = vmor %vm2531_vm13, %vm2530_vm11 }
 0x314   : > { %2470 = vmatmul.mubr.f32.vlgmr.msra.gmra.mrb[2].mxu1 %v2855_v11  ;;  %vm2533_vm6 = vmor %vm4926_vm4, %vm2532_vm15 }
 0x357   : > { %v2329_v0 = vpop.f32.mrb[0].mxu1 }
 0x358   : > { %v2478_v53 = vmax.f32 %v2329_v0, 0.0  ;;  %v2331_v50 = vpop.f32.mrb[1].mxu1 }
 0x359   : > { %v2479_v46 = vmax.f32 %v2331_v50, 0.0 }
 0x35b   : > { %v2493_v15 = vcombine.low %v2478_v53, %v2479_v46 }
 0x35d   : > { %v2507_v37 = vrot.slane %v2493_v15, %v2499_v56 }
 0x35e   : > { %v2258_v27 = vpop.f32.mrb[0].mxu0 }
 0x35f   : > { %v2476_v19 = vmax.f32 %v2258_v27, 0.0  ;;  %v2260_v14 = vpop.f32.mrb[1].mxu0 }
 0x360   : > { %v2477_v5 = vmax.f32 %v2260_v14, 0.0 }
 0x362   : > { %v2492_v25 = vcombine.low %v2476_v19, %v2477_v5 }
 0x364   : > { %v2500_v52 = vrot.slane %v2492_v25, %v2499_v56 }
 0x366   : > { %v2508_v36 = vcombine.low %v2500_v52, %v2507_v37 }
 0x368   : > { %2528 = vst [vmem:[%s143_s16] sm:$0xff] %v2508_v36 }
 0x3e3   : > { %v2400_v31 = vpop.f32.mrb[2].mxu0 }
 0x3e4   : > { %v2480_v45 = vmax.f32 %v2400_v31, 0.0  ;;  %v2402_v55 = vpop.f32.mrb[3].mxu0 }
 0x3e5   : > { %v2481_v61 = vmax.f32 %v2402_v55, 0.0 }
 0x3e7   : > { %v2471_v59 = vpop.f32.mrb[2].mxu1  ;;  %v2509_v54 = vcombine.low %v2480_v45, %v2481_v61 }
 0x3e8   : > { %v2482_v9 = vmax.f32 %v2471_v59, 0.0  ;;  %v2473_v21 = vpop.f32.mrb[3].mxu1 }
 0x3e9   : > { %v2483_v16 = vmax.f32 %v2473_v21, 0.0  ;;  %v2517_v29 = vrot.slane %v2509_v54, %v2499_v56 }
 0x3eb   : > { %v2510_v38 = vcombine.low %v2482_v9, %v2483_v16 }
 0x3ed   : > { %v2524_v17 = vrot.slane %v2510_v38, %v2499_v56 }
 0x3ef   : > { %v2525_v30 = vcombine.low %v2517_v29, %v2524_v17 }
 0x3f1   : > { %2534 = vst.msk [vmem:[%s143_s16 + $0x8] sm:$0xff] %vm2533_vm6, %v2525_v30 }
 0x3f2 PF: > { %s12_s9 = sadd.s32 1, %s2862_s9  }
 0x3f3   : > { %p9_p4 = scmp.ge.s32.totalorder %s12_s9, 4  }
 0x3f5   :  { %11 = sbr.rel (!%p9_p4) target bundleno = 1 (0x1), region = 58 }

</bundles_post_ra>
